<compile_context>
chip_gen: v6e
topology: v6e:2x2x1
jax: 0.10.0
libtpu: 0.0.40
codegen_flags: <defaults>
</compile_context>

<pallas_src>
import math
from functools import partial

import numpy as np
import jax
import jax.numpy as jnp
from jax.experimental import pallas as pl
from jax.experimental.pallas import tpu as pltpu


# ----------------------------------------------------------------------------
# helpers
# ----------------------------------------------------------------------------
def _pick_tile(dim, target, align):
    """Largest `align`-aligned divisor of `dim` that is <= target (or dim)."""
    if dim <= target:
        return dim
    t = (target // align) * align
    while t >= align:
        if dim % t == 0:
            return t
        t -= align
    return dim


# ----------------------------------------------------------------------------
# Pallas kernels
# ----------------------------------------------------------------------------
def _conv_kernel(*refs, post_slope, has_skip, has_scw, scale):
    """Tiled conv-as-matmul with f32 accumulator and fused epilogue.

    refs: patches(1,tn,tk), w(tk,tc), bias(1,tc), [skip(1,tn,Csc|tc)],
          [sc_w(Csc,tc)], out(1,tn,tc), acc(tn,tc)
    grid: (batch, n_tile, cout_tile, k_tile)  -- k is the reduction axis.
    """
    it = iter(refs)
    p_ref = next(it)
    w_ref = next(it)
    b_ref = next(it)
    s_ref = next(it) if has_skip else None
    scw_ref = next(it) if has_scw else None
    o_ref = next(it)
    acc_ref = next(it)

    k = pl.program_id(3)

    @pl.when(k == 0)
    def _init():
        acc_ref[...] = jnp.zeros_like(acc_ref)

    # MXU matmul; operands stay in their storage dtype, accumulate in f32.
    acc_ref[...] += jnp.dot(p_ref[0], w_ref[...],
                            preferred_element_type=jnp.float32)

    @pl.when(k == pl.num_programs(3) - 1)
    def _epilogue():
        r = acc_ref[...] + b_ref[...].astype(jnp.float32)
        if post_slope is not None:                       # fused LeakyReLU
            r = jnp.where(r >= 0, r, post_slope * r)
        if has_skip:
            if has_scw:                                  # fused 1x1 shortcut conv
                sk = jnp.dot(s_ref[0], scw_ref[...],
                             preferred_element_type=jnp.float32)
            else:                                        # identity shortcut
                sk = s_ref[0].astype(jnp.float32)
            r = r + sk
        if scale is not None:                            # / sqrt(2)
            r = r * scale
        o_ref[0] = r.astype(o_ref.dtype)


def _pool_kernel(top_ref, bot_ref, o_ref, tmp_ref):
    """2x2 average pooling (shortcut path), no pooling matrix.

    top/bot: even/odd image rows flattened to (1, th*W, C).  Height pairs are
    a full-block add; width pairs use sublane-strided reads (stride 2).
    """
    tmp_ref[...] = top_ref[0] + bot_ref[0]               # vertical pair sum
    m = o_ref.shape[1]                                   # th * Wf output rows
    left = tmp_ref[pl.ds(0, m, 2), :]                    # even columns
    right = tmp_ref[pl.ds(1, m, 2), :]                   # odd columns
    o_ref[0] = ((left + right) * 0.25).astype(o_ref.dtype)


def _leaky_kernel(x_ref, o_ref, *, slope):
    """Elementwise LeakyReLU applied to the activation once (not to patches)."""
    v = x_ref[...]
    o_ref[...] = jnp.where(v >= 0, v, slope * v).astype(o_ref.dtype)


def _head_kernel(x_ref, wf_ref, bf_ref, wl_ref, bl_ref, o_ref):
    """Fused head: LeakyReLU -> Conv2d(dim,dim,4,1,0) -> LeakyReLU -> Linear.

    All B rows processed in one MXU call (x: (B, 16*dim) im2col rows).
    """
    x = x_ref[...]
    x = jnp.where(x >= 0, x, 0.2 * x)
    h = jnp.dot(x, wf_ref[...], preferred_element_type=jnp.float32) + bf_ref[...]
    h = jnp.where(h >= 0, h, 0.2 * h)
    s = jnp.dot(h, wl_ref[...], preferred_element_type=jnp.float32) + bl_ref[...]
    o_ref[...] = s.astype(o_ref.dtype)


# ----------------------------------------------------------------------------
# glue: im2col (plain and pool-folded), wrappers around pallas_call
# ----------------------------------------------------------------------------
def _im2col(x, K, pad):
    """x: (B,H,W,C) -> (B, Ho, Wo, K*K*C)."""
    B, H, W, C = x.shape
    if pad:
        x = jnp.pad(x, ((0, 0), (pad, pad), (pad, pad), (0, 0)))
    Ho = H + 2 * pad - K + 1
    Wo = W + 2 * pad - K + 1
    cols = [x[:, ky:ky + Ho, kx:kx + Wo, :] for ky in range(K) for kx in range(K)]
    return jnp.concatenate(cols, axis=-1), Ho, Wo


def _im2col_pooled(x, K, pad):
    """im2col rows pre-averaged over each 2x2 output window.

    Exact fold of avg_pool2d(conv(x), 2): the pooled conv output equals
    (mean of the 4 pool-mate patch rows) @ W + b.  Cuts the patch rows (and
    the conv matmul) by 4x and removes any pooling work from the conv kernel.
    """
    B, H, W, C = x.shape
    if pad:
        x = jnp.pad(x, ((0, 0), (pad, pad), (pad, pad), (0, 0)))
    Ho = H + 2 * pad - K + 1
    Wo = W + 2 * pad - K + 1
    Hf, Wf = Ho // 2, Wo // 2
    cols = []
    for ky in range(K):
        for kx in range(K):
            win = x[:, ky:ky + Ho, kx:kx + Wo, :]
            win = win.reshape(B, Hf, 2, Wf, 2, C).mean(axis=(2, 4))
            cols.append(win)
    return jnp.concatenate(cols, axis=-1), Hf, Wf


def conv_block(patches, w, b, *, post_slope=None, skip=None, sc_w=None, scale=None):
    """Tiled conv matmul with fused bias / LeakyReLU / shortcut / scale.

    patches: (B, N, KKC), w: (KKC, Cout), b: (Cout,), skip: (B, N, Csc).
    """
    B, N, KKC = patches.shape
    Cout = w.shape[1]
    tn = _pick_tile(N, 256, 8)        # output rows per tile   (sublane-aligned)
    tk = _pick_tile(KKC, 512, 128)    # contraction tile       (lane-aligned)
    tc = _pick_tile(Cout, 256, 128)   # output channels tile   (lane-aligned)
    grid = (B, N // tn, Cout // tc, KKC // tk)

    inputs = [patches, w, b.reshape(1, Cout)]
    in_specs = [pl.BlockSpec((1, tn, tk), lambda bb, n, c, k: (bb, n, k)),
                pl.BlockSpec((tk, tc), lambda bb, n, c, k: (k, c)),
                pl.BlockSpec((1, tc), lambda bb, n, c, k: (0, c))]
    has_skip = skip is not None
    has_scw = sc_w is not None
    if has_skip:
        Csc = skip.shape[-1]
        if has_scw:
            inputs += [skip, sc_w]
            in_specs += [pl.BlockSpec((1, tn, Csc), lambda bb, n, c, k: (bb, n, 0)),
                         pl.BlockSpec((Csc, tc), lambda bb, n, c, k: (0, c))]
        else:
            inputs += [skip]
            in_specs += [pl.BlockSpec((1, tn, tc), lambda bb, n, c, k: (bb, n, c))]

    kern = partial(_conv_kernel, post_slope=post_slope, has_skip=has_skip,
                   has_scw=has_scw, scale=scale)
    return pl.pallas_call(
        kern,
        out_shape=jax.ShapeDtypeStruct((B, N, Cout), patches.dtype),
        grid=grid,
        in_specs=in_specs,
        out_specs=pl.BlockSpec((1, tn, tc), lambda bb, n, c, k: (bb, n, c)),
        scratch_shapes=[pltpu.VMEM((tn, tc), jnp.float32)],
        compiler_params=pltpu.CompilerParams(
            dimension_semantics=("parallel", "parallel", "parallel", "arbitrary"),
            vmem_limit_bytes=64 * 1024 * 1024),
    )(*inputs)


def conv2d_3x3(x, w, b, *, pool=False, post_slope=None, skip=None, sc_w=None,
               scale=None):
    """3x3 stride-1 pad-1 conv (optionally fused with 2x2 avg-pool / epilogue).

    x: (B,H,W,Cin) NHWC, w: (3,3,Cin,Cout), skip: flattened (B, N_out, Csc).
    """
    B, H, W, Cin = x.shape
    K = w.shape[0]
    Cout = w.shape[-1]
    if pool:
        patches, Ho, Wo = _im2col_pooled(x, K, 1)
    else:
        patches, Ho, Wo = _im2col(x, K, 1)
    N = Ho * Wo
    KKC = K * K * Cin
    patches = patches.reshape(B, N, KKC)
    wf = w.reshape(KKC, Cout)
    y = conv_block(patches, wf, b, post_slope=post_slope, skip=skip,
                   sc_w=sc_w, scale=scale)
    return y.reshape(B, Ho, Wo, Cout)


def avg_pool2x2_flat(x):
    """F.avg_pool2d(x, 2) (shortcut path). x: (B,H,W,C) -> (B, Hf*Wf, C)."""
    B, H, W, C = x.shape
    Hf, Wf = H // 2, W // 2
    # glue layout prep: split even/odd image rows, flatten rows.
    x_top = x[:, 0::2, :, :].reshape(B, Hf * W, C)
    x_bot = x[:, 1::2, :, :].reshape(B, Hf * W, C)
    th = _pick_tile(Hf, 32, 1)
    grid = (B, Hf // th)
    return pl.pallas_call(
        _pool_kernel,
        out_shape=jax.ShapeDtypeStruct((B, Hf * Wf, C), x.dtype),
        grid=grid,
        in_specs=[pl.BlockSpec((1, th * W, C), lambda b, h: (b, h, 0)),
                  pl.BlockSpec((1, th * W, C), lambda b, h: (b, h, 0))],
        out_specs=pl.BlockSpec((1, th * Wf, C), lambda b, h: (b, h, 0)),
        scratch_shapes=[pltpu.VMEM((th * W, C), x.dtype)],
        compiler_params=pltpu.CompilerParams(
            dimension_semantics=("parallel", "parallel")),
    )(x_top, x_bot)


def leaky_relu(x, slope=0.2):
    """LeakyReLU on the activation (applied once, never on im2col patches)."""
    B, H, W, C = x.shape
    N = H * W
    tn = _pick_tile(N, 2048, 8)
    xf = x.reshape(B, N, C)
    y = pl.pallas_call(
        partial(_leaky_kernel, slope=slope),
        out_shape=jax.ShapeDtypeStruct((B, N, C), x.dtype),
        grid=(B, N // tn),
        in_specs=[pl.BlockSpec((1, tn, C), lambda b, n: (b, n, 0))],
        out_specs=pl.BlockSpec((1, tn, C), lambda b, n: (b, n, 0)),
        compiler_params=pltpu.CompilerParams(
            dimension_semantics=("parallel", "parallel")),
    )(xf)
    return y.reshape(B, H, W, C)


def head_block(pf, wf, bf, wl, bl):
    """Fused LeakyReLU -> 4x4 conv -> LeakyReLU -> Linear over all B rows."""
    B, KKC = pf.shape
    D = wf.shape[1]
    S = wl.shape[1]
    return pl.pallas_call(
        _head_kernel,
        out_shape=jax.ShapeDtypeStruct((B, S), pf.dtype),
        grid=(1,),
        in_specs=[pl.BlockSpec((B, KKC), lambda i: (0, 0)),
                  pl.BlockSpec((KKC, D), lambda i: (0, 0)),
                  pl.BlockSpec((1, D), lambda i: (0, 0)),
                  pl.BlockSpec((D, S), lambda i: (0, 0)),
                  pl.BlockSpec((1, S), lambda i: (0, 0))],
        out_specs=pl.BlockSpec((B, S), lambda i: (0, 0)),
        compiler_params=pltpu.CompilerParams(
            dimension_semantics=("arbitrary",)),
    )(pf, wf, bf.reshape(1, D), wl, bl.reshape(1, S))


# ----------------------------------------------------------------------------
# StyleEncoder forward (ResBlk: normalize=False, downsample=True)
# ----------------------------------------------------------------------------
def resblk_forward(x, p):
    # shortcut: avg-pool in Pallas; the learned 1x1 conv (if any) is fused into
    # the conv2 kernel (pool-then-1x1 == 1x1-then-pool exactly).
    xp = avg_pool2x2_flat(x)                                   # (B, Nf, Cin)
    # residual: LeakyReLU(x) once -> conv1 (pool folded) -> LeakyReLU (fused as
    # conv1 post_slope) -> conv2 (+ fused shortcut add and 1/sqrt(2) scale).
    xa = leaky_relu(x, 0.2)
    r1 = conv2d_3x3(xa, p['c1_w'], p['c1_b'], pool=True, post_slope=0.2)
    sc_w = p.get('sc_w')
    sc_wf = None if sc_w is None else sc_w.reshape(sc_w.shape[2], sc_w.shape[3])
    out = conv2d_3x3(r1, p['c2_w'], p['c2_b'], skip=xp, sc_w=sc_wf,
                     scale=1.0 / math.sqrt(2.0))
    return out


def style_encoder_forward(x_nchw, params, embed_dim):
    x = jnp.transpose(x_nchw, (0, 2, 3, 1))                    # NCHW -> NHWC
    h = conv2d_3x3(x, params['conv0_w'], params['conv0_b'])
    for blk in params['resblks']:
        h = resblk_forward(h, blk)
    # head: LeakyReLU -> Conv2d(dim,dim,4,1,0) -> LeakyReLU -> Linear (fused)
    B, Hh, Wh, C = h.shape                                     # Hh = Wh = 4
    pf, Ho, Wo = _im2col(h, 4, 0)                              # (B,1,1,16*C)
    pf = pf.reshape(B, Ho * Wo * 16 * C)
    wf = params['convf_w'].reshape(16 * C, C)
    s = head_block(pf, wf, params['convf_b'], params['lin_w'], params['lin_b'])
    out = s[:, :, None]                                        # num_domains = 1
    return jnp.broadcast_to(out, (B, s.shape[1], embed_dim))   # .expand(..., embed_dim)


def init_style_encoder_params(key, img_size, base_dim, max_conv_dim, style_dim):
    keys = iter(jax.random.split(key, 64))

    def rnd(shape, scale=0.05):
        return scale * jax.random.normal(next(keys), shape, jnp.float32)

    params = {}
    dim_in = base_dim
    params['conv0_w'] = rnd((3, 3, 3, dim_in))
    params['conv0_b'] = rnd((dim_in,))
    repeat_num = int(np.log2(img_size)) - 2
    blocks = []
    dim_out = dim_in
    for _ in range(repeat_num):
        dim_out = min(dim_in * 2, max_conv_dim)
        blk = {'c1_w': rnd((3, 3, dim_in, dim_in)), 'c1_b': rnd((dim_in,)),
               'c2_w': rnd((3, 3, dim_in, dim_out)), 'c2_b': rnd((dim_out,))}
        if dim_in != dim_out:                                  # learned_sc
            blk['sc_w'] = rnd((1, 1, dim_in, dim_out))
        blocks.append(blk)
        dim_in = dim_out
    params['resblks'] = blocks
    params['convf_w'] = rnd((4, 4, dim_out, dim_out))
    params['convf_b'] = rnd((dim_out,))
    params['lin_w'] = rnd((dim_out, style_dim))
    params['lin_b'] = rnd((style_dim,))
    return params


# ----------------------------------------------------------------------------
# pure-JAX reference (for a correctness sanity check)
# ----------------------------------------------------------------------------
def _ref_conv(x, w, b=None, pad=0):
    y = jax.lax.conv_general_dilated(
        x, w, (1, 1), [(pad, pad), (pad, pad)],
        dimension_numbers=('NHWC', 'HWIO', 'NHWC'),
        precision=jax.lax.Precision.HIGHEST)
    return y if b is None else y + b


def _ref_leaky(x):
    return jnp.where(x >= 0, x, 0.2 * x)


def _ref_pool(x):
    B, H, W, C = x.shape
    return x.reshape(B, H // 2, 2, W // 2, 2, C).mean(axis=(2, 4))


def _ref_forward(x_nchw, params, embed_dim):
    x = jnp.transpose(x_nchw, (0, 2, 3, 1))
    h = _ref_conv(x, params['conv0_w'], params['conv0_b'], pad=1)
    for p in params['resblks']:
        if 'sc_w' in p:
            sc = _ref_pool(_ref_conv(h, p['sc_w'], None, pad=0))
        else:
            sc = _ref_pool(h)
        r = _ref_conv(_ref_leaky(h), p['c1_w'], p['c1_b'], pad=1)
        r = _ref_pool(r)
        r = _ref_conv(_ref_leaky(r), p['c2_w'], p['c2_b'], pad=1)
        h = (sc + r) / math.sqrt(2.0)
    h = _ref_leaky(h)
    h = _ref_conv(h, params['convf_w'], params['convf_b'], pad=0)
    h = _ref_leaky(h)
    B = h.shape[0]
    hf = h.reshape(B, -1)
    s = jnp.dot(hf, params['lin_w'],
                precision=jax.lax.Precision.HIGHEST) + params['lin_b']
    return jnp.broadcast_to(s[:, :, None], (B, s.shape[1], embed_dim))


if __name__ == "__main__":
    jax.config.update("jax_default_matmul_precision", "highest")

    B = 2
    IMG_SIZE = 16        # small test size; real module default is 256
    BASE_DIM = 16        # stands in for 2**14 // img_size at small test scale
    MAX_CONV_DIM = 32
    STYLE_DIM = 32
    EMBED_DIM = 48

    key = jax.random.PRNGKey(0)
    kp, kx = jax.random.split(key)
    params = init_style_encoder_params(kp, IMG_SIZE, BASE_DIM, MAX_CONV_DIM, STYLE_DIM)
    x = jax.random.normal(kx, (B, 3, IMG_SIZE, IMG_SIZE), jnp.float32)   # NCHW

    fwd = jax.jit(partial(style_encoder_forward, embed_dim=EMBED_DIM))
    out = jax.block_until_ready(fwd(x, params))
    assert out.shape == (B, STYLE_DIM, EMBED_DIM), out.shape
    assert bool(jnp.all(jnp.isfinite(out)))

    ref = jax.block_until_ready(_ref_forward(x, params, EMBED_DIM))
    max_err = float(jnp.max(jnp.abs(out - ref)))
    rel_err = max_err / (float(jnp.max(jnp.abs(ref))) + 1e-12)
    assert rel_err < 2e-2, (max_err, rel_err)

    print("KERNEL_OK")
</pallas_src>

<mosaic_0001>
module attributes {stable_mosaic.version = 11 : i64} {
  func.func @_conv_kernel(%arg0: i32, %arg1: i32, %arg2: i32, %arg3: i32, %arg4: memref<1x256x27xf32, #tpu.memory_space<vmem>>, %arg5: memref<27x16xf32, #tpu.memory_space<vmem>>, %arg6: memref<1x16xf32, #tpu.memory_space<vmem>>, %arg7: memref<1x256x16xf32, #tpu.memory_space<vmem>>, %arg8: memref<256x16xf32, #tpu.memory_space<vmem>>) attributes {dimension_semantics = [#tpu.dimension_semantics<parallel>, #tpu.dimension_semantics<parallel>, #tpu.dimension_semantics<parallel>, #tpu.dimension_semantics<arbitrary>], iteration_bounds = array<i64: 2, 1, 1, 1>, scalar_prefetch = 0 : i64, scratch_operands = 1 : i64, tpu.core_type = #tpu.core_type<tc>, window_params = [{transform_indices = @transform_0, window_bounds = array<i64: 1, 256, 27>}, {transform_indices = @transform_1, window_bounds = array<i64: 27, 16>}, {transform_indices = @transform_2, window_bounds = array<i64: 1, 16>}, {transform_indices = @transform_3, window_bounds = array<i64: 1, 256, 16>}]} {
    %c0_i32 = arith.constant 0 : i32
    %0 = arith.cmpi eq, %arg3, %c0_i32 : i32
    %1 = arith.extui %0 : i1 to i32
    %c0_i32_0 = arith.constant 0 : i32
    %2 = arith.cmpi ne, %1, %c0_i32_0 : i32
    scf.if %2 {
      %cst_11 = arith.constant 0.000000e+00 : f32
      %13 = vector.broadcast %cst_11 : f32 to vector<256x16xf32>
      %c0_12 = arith.constant 0 : index
      %c0_13 = arith.constant 0 : index
      %14 = vector.load %arg8[%c0_12, %c0_13] : memref<256x16xf32, #tpu.memory_space<vmem>>, vector<256x16xf32>
      tpu.vector_store %arg8[%c0_12, %c0_13], %13 {strides = array<i32>} : memref<256x16xf32, #tpu.memory_space<vmem>>, vector<256x16xf32>,
    } else {
    }
    %c0 = arith.constant 0 : index
    %c0_1 = arith.constant 0 : index
    %3 = vector.load %arg8[%c0, %c0_1] : memref<256x16xf32, #tpu.memory_space<vmem>>, vector<256x16xf32>
    %c0_2 = arith.constant 0 : index
    %c0_3 = arith.constant 0 : index
    %c0_4 = arith.constant 0 : index
    %4 = vector.load %arg4[%c0_2, %c0_3, %c0_4] : memref<1x256x27xf32, #tpu.memory_space<vmem>>, vector<1x256x27xf32>
    %5 = vector.shape_cast %4 : vector<1x256x27xf32> to vector<256x27xf32>
    %c0_5 = arith.constant 0 : index
    %c0_6 = arith.constant 0 : index
    %6 = vector.load %arg5[%c0_5, %c0_6] : memref<27x16xf32, #tpu.memory_space<vmem>>, vector<27x16xf32>
    %cst = arith.constant dense<0.000000e+00> : vector<256x16xf32>
    %7 = tpu.matmul %5, %6, %cst {dimension_numbers = #tpu.dot_dimension_numbers<[1], [0], [0], [1], [0, 0, 1, 1], [], []>, precision = #tpu.contract_precision<fp32>} : vector<256x27xf32>, vector<27x16xf32>, vector<256x16xf32> -> vector<256x16xf32>
    %8 = arith.addf %3, %7 : vector<256x16xf32>
    %c0_7 = arith.constant 0 : index
    %c0_8 = arith.constant 0 : index
    %9 = vector.load %arg8[%c0_7, %c0_8] : memref<256x16xf32, #tpu.memory_space<vmem>>, vector<256x16xf32>
    tpu.vector_store %arg8[%c0_7, %c0_8], %8 {strides = array<i32>} : memref<256x16xf32, #tpu.memory_space<vmem>>, vector<256x16xf32>,
    %c0_i32_9 = arith.constant 0 : i32
    %10 = arith.cmpi eq, %arg3, %c0_i32_9 : i32
    %11 = arith.extui %10 : i1 to i32
    %c0_i32_10 = arith.constant 0 : i32
    %12 = arith.cmpi ne, %11, %c0_i32_10 : i32
    scf.if %12 {
      %c0_11 = arith.constant 0 : index
      %c0_12 = arith.constant 0 : index
      %13 = vector.load %arg8[%c0_11, %c0_12] : memref<256x16xf32, #tpu.memory_space<vmem>>, vector<256x16xf32>
      %c0_13 = arith.constant 0 : index
      %c0_14 = arith.constant 0 : index
      %14 = vector.load %arg6[%c0_13, %c0_14] : memref<1x16xf32, #tpu.memory_space<vmem>>, vector<1x16xf32>
      %15 = vector.broadcast %14 : vector<1x16xf32> to vector<256x16xf32>
      %16 = arith.addf %13, %15 : vector<256x16xf32>
      %c0_15 = arith.constant 0 : index
      %c0_16 = arith.constant 0 : index
      %c0_17 = arith.constant 0 : index
      %17 = vector.load %arg7[%c0_15, %c0_16, %c0_17] : memref<1x256x16xf32, #tpu.memory_space<vmem>>, vector<1x256x16xf32>
      %18 = vector.shape_cast %17 : vector<1x256x16xf32> to vector<256x16xf32>
      %19 = vector.shape_cast %16 : vector<256x16xf32> to vector<1x256x16xf32>
      tpu.vector_store %arg7[%c0_15, %c0_16, %c0_17], %19 {strides = array<i32>} : memref<1x256x16xf32, #tpu.memory_space<vmem>>, vector<1x256x16xf32>,
    } else {
    }
    return
  }
  func.func @transform_0(%arg0: i32, %arg1: i32, %arg2: i32, %arg3: i32) -> (i32, i32, i32) {
    %c0_i32 = arith.constant 0 : i32
    return %arg0, %arg1, %arg3 : i32, i32, i32
  }
  func.func @transform_1(%arg0: i32, %arg1: i32, %arg2: i32, %arg3: i32) -> (i32, i32) {
    %c0_i32 = arith.constant 0 : i32
    return %arg3, %arg2 : i32, i32
  }
  func.func @transform_2(%arg0: i32, %arg1: i32, %arg2: i32, %arg3: i32) -> (i32, i32) {
    %c0_i32 = arith.constant 0 : i32
    %c0_i32_0 = arith.constant 0 : i32
    return %c0_i32, %arg2 : i32, i32
  }
  func.func @transform_3(%arg0: i32, %arg1: i32, %arg2: i32, %arg3: i32) -> (i32, i32, i32) {
    %c0_i32 = arith.constant 0 : i32
    return %arg0, %arg1, %arg2 : i32, i32, i32
  }
}

module attributes {stable_mosaic.version = 11 : i64} {
  func.func @_leaky_kernel(%arg0: i32, %arg1: i32, %arg2: memref<1x256x16xf32, #tpu.memory_space<vmem>>, %arg3: memref<1x256x16xf32, #tpu.memory_space<vmem>>) attributes {dimension_semantics = [#tpu.dimension_semantics<parallel>, #tpu.dimension_semantics<parallel>], iteration_bounds = array<i64: 2, 1>, scalar_prefetch = 0 : i64, scratch_operands = 0 : i64, tpu.core_type = #tpu.core_type<tc>, window_params = [{transform_indices = @transform_0, window_bounds = array<i64: 1, 256, 16>}, {transform_indices = @transform_1, window_bounds = array<i64: 1, 256, 16>}]} {
    %c0 = arith.constant 0 : index
    %c0_0 = arith.constant 0 : index
    %c0_1 = arith.constant 0 : index
    %0 = vector.load %arg2[%c0, %c0_0, %c0_1] : memref<1x256x16xf32, #tpu.memory_space<vmem>>, vector<1x256x16xf32>
    %cst = arith.constant 0.000000e+00 : f32
    %1 = vector.broadcast %cst : f32 to vector<1x256x16xf32>
    %2 = arith.cmpf oge, %0, %1 : vector<1x256x16xf32>
    %cst_2 = arith.constant 2.000000e-01 : f32
    %3 = vector.broadcast %cst_2 : f32 to vector<1x256x16xf32>
    %4 = arith.mulf %3, %0 : vector<1x256x16xf32>
    %5 = arith.select %2, %0, %4 : vector<1x256x16xi1>, vector<1x256x16xf32>
    %c0_3 = arith.constant 0 : index
    %c0_4 = arith.constant 0 : index
    %c0_5 = arith.constant 0 : index
    %6 = vector.load %arg3[%c0_3, %c0_4, %c0_5] : memref<1x256x16xf32, #tpu.memory_space<vmem>>, vector<1x256x16xf32>
    tpu.vector_store %arg3[%c0_3, %c0_4, %c0_5], %5 {strides = array<i32>} : memref<1x256x16xf32, #tpu.memory_space<vmem>>, vector<1x256x16xf32>,
    return
  }
  func.func @transform_0(%arg0: i32, %arg1: i32) -> (i32, i32, i32) {
    %c0_i32 = arith.constant 0 : i32
    %c0_i32_0 = arith.constant 0 : i32
    return %arg0, %arg1, %c0_i32 : i32, i32, i32
  }
  func.func @transform_1(%arg0: i32, %arg1: i32) -> (i32, i32, i32) {
    %c0_i32 = arith.constant 0 : i32
    %c0_i32_0 = arith.constant 0 : i32
    return %arg0, %arg1, %c0_i32 : i32, i32, i32
  }
}

module attributes {stable_mosaic.version = 11 : i64} {
  func.func @_pool_kernel(%arg0: i32, %arg1: i32, %arg2: memref<1x128x16xf32, #tpu.memory_space<vmem>>, %arg3: memref<1x128x16xf32, #tpu.memory_space<vmem>>, %arg4: memref<1x64x16xf32, #tpu.memory_space<vmem>>, %arg5: memref<128x16xf32, #tpu.memory_space<vmem>>) attributes {dimension_semantics = [#tpu.dimension_semantics<parallel>, #tpu.dimension_semantics<parallel>], iteration_bounds = array<i64: 2, 1>, scalar_prefetch = 0 : i64, scratch_operands = 1 : i64, tpu.core_type = #tpu.core_type<tc>, window_params = [{transform_indices = @transform_0, window_bounds = array<i64: 1, 128, 16>}, {transform_indices = @transform_1, window_bounds = array<i64: 1, 128, 16>}, {transform_indices = @transform_2, window_bounds = array<i64: 1, 64, 16>}]} {
    %c0 = arith.constant 0 : index
    %c0_0 = arith.constant 0 : index
    %c0_1 = arith.constant 0 : index
    %0 = vector.load %arg2[%c0, %c0_0, %c0_1] : memref<1x128x16xf32, #tpu.memory_space<vmem>>, vector<1x128x16xf32>
    %1 = vector.shape_cast %0 : vector<1x128x16xf32> to vector<128x16xf32>
    %c0_2 = arith.constant 0 : index
    %c0_3 = arith.constant 0 : index
    %c0_4 = arith.constant 0 : index
    %2 = vector.load %arg3[%c0_2, %c0_3, %c0_4] : memref<1x128x16xf32, #tpu.memory_space<vmem>>, vector<1x128x16xf32>
    %3 = vector.shape_cast %2 : vector<1x128x16xf32> to vector<128x16xf32>
    %4 = arith.addf %1, %3 : vector<128x16xf32>
    %c0_5 = arith.constant 0 : index
    %c0_6 = arith.constant 0 : index
    %5 = vector.load %arg5[%c0_5, %c0_6] : memref<128x16xf32, #tpu.memory_space<vmem>>, vector<128x16xf32>
    tpu.vector_store %arg5[%c0_5, %c0_6], %4 {strides = array<i32>} : memref<128x16xf32, #tpu.memory_space<vmem>>, vector<128x16xf32>,
    %c0_7 = arith.constant 0 : index
    %c0_8 = arith.constant 0 : index
    %6 = tpu.strided_load %arg5[%c0_7, %c0_8] {strides = array<i32: 2, 1>} : memref<128x16xf32, #tpu.memory_space<vmem>>, vector<64x16xf32>
    %c1 = arith.constant 1 : index
    %c0_9 = arith.constant 0 : index
    %7 = tpu.strided_load %arg5[%c1, %c0_9] {strides = array<i32: 2, 1>} : memref<128x16xf32, #tpu.memory_space<vmem>>, vector<64x16xf32>
    %8 = arith.addf %6, %7 : vector<64x16xf32>
    %cst = arith.constant 2.500000e-01 : f32
    %9 = vector.broadcast %cst : f32 to vector<64x16xf32>
    %10 = arith.mulf %8, %9 : vector<64x16xf32>
    %c0_10 = arith.constant 0 : index
    %c0_11 = arith.constant 0 : index
    %c0_12 = arith.constant 0 : index
    %11 = vector.load %arg4[%c0_10, %c0_11, %c0_12] : memref<1x64x16xf32, #tpu.memory_space<vmem>>, vector<1x64x16xf32>
    %12 = vector.shape_cast %11 : vector<1x64x16xf32> to vector<64x16xf32>
    %13 = vector.shape_cast %10 : vector<64x16xf32> to vector<1x64x16xf32>
    tpu.vector_store %arg4[%c0_10, %c0_11, %c0_12], %13 {strides = array<i32>} : memref<1x64x16xf32, #tpu.memory_space<vmem>>, vector<1x64x16xf32>,
    return
  }
  func.func @transform_0(%arg0: i32, %arg1: i32) -> (i32, i32, i32) {
    %c0_i32 = arith.constant 0 : i32
    %c0_i32_0 = arith.constant 0 : i32
    return %arg0, %arg1, %c0_i32 : i32, i32, i32
  }
  func.func @transform_1(%arg0: i32, %arg1: i32) -> (i32, i32, i32) {
    %c0_i32 = arith.constant 0 : i32
    %c0_i32_0 = arith.constant 0 : i32
    return %arg0, %arg1, %c0_i32 : i32, i32, i32
  }
  func.func @transform_2(%arg0: i32, %arg1: i32) -> (i32, i32, i32) {
    %c0_i32 = arith.constant 0 : i32
    %c0_i32_0 = arith.constant 0 : i32
    return %arg0, %arg1, %c0_i32 : i32, i32, i32
  }
}

module attributes {stable_mosaic.version = 11 : i64} {
  func.func @_conv_kernel(%arg0: i32, %arg1: i32, %arg2: i32, %arg3: i32, %arg4: memref<1x64x144xf32, #tpu.memory_space<vmem>>, %arg5: memref<144x16xf32, #tpu.memory_space<vmem>>, %arg6: memref<1x16xf32, #tpu.memory_space<vmem>>, %arg7: memref<1x64x16xf32, #tpu.memory_space<vmem>>, %arg8: memref<64x16xf32, #tpu.memory_space<vmem>>) attributes {dimension_semantics = [#tpu.dimension_semantics<parallel>, #tpu.dimension_semantics<parallel>, #tpu.dimension_semantics<parallel>, #tpu.dimension_semantics<arbitrary>], iteration_bounds = array<i64: 2, 1, 1, 1>, scalar_prefetch = 0 : i64, scratch_operands = 1 : i64, tpu.core_type = #tpu.core_type<tc>, window_params = [{transform_indices = @transform_0, window_bounds = array<i64: 1, 64, 144>}, {transform_indices = @transform_1, window_bounds = array<i64: 144, 16>}, {transform_indices = @transform_2, window_bounds = array<i64: 1, 16>}, {transform_indices = @transform_3, window_bounds = array<i64: 1, 64, 16>}]} {
    %c0_i32 = arith.constant 0 : i32
    %0 = arith.cmpi eq, %arg3, %c0_i32 : i32
    %1 = arith.extui %0 : i1 to i32
    %c0_i32_0 = arith.constant 0 : i32
    %2 = arith.cmpi ne, %1, %c0_i32_0 : i32
    scf.if %2 {
      %cst_11 = arith.constant 0.000000e+00 : f32
      %13 = vector.broadcast %cst_11 : f32 to vector<64x16xf32>
      %c0_12 = arith.constant 0 : index
      %c0_13 = arith.constant 0 : index
      %14 = vector.load %arg8[%c0_12, %c0_13] : memref<64x16xf32, #tpu.memory_space<vmem>>, vector<64x16xf32>
      tpu.vector_store %arg8[%c0_12, %c0_13], %13 {strides = array<i32>} : memref<64x16xf32, #tpu.memory_space<vmem>>, vector<64x16xf32>,
    } else {
    }
    %c0 = arith.constant 0 : index
    %c0_1 = arith.constant 0 : index
    %3 = vector.load %arg8[%c0, %c0_1] : memref<64x16xf32, #tpu.memory_space<vmem>>, vector<64x16xf32>
    %c0_2 = arith.constant 0 : index
    %c0_3 = arith.constant 0 : index
    %c0_4 = arith.constant 0 : index
    %4 = vector.load %arg4[%c0_2, %c0_3, %c0_4] : memref<1x64x144xf32, #tpu.memory_space<vmem>>, vector<1x64x144xf32>
    %5 = vector.shape_cast %4 : vector<1x64x144xf32> to vector<64x144xf32>
    %c0_5 = arith.constant 0 : index
    %c0_6 = arith.constant 0 : index
    %6 = vector.load %arg5[%c0_5, %c0_6] : memref<144x16xf32, #tpu.memory_space<vmem>>, vector<144x16xf32>
    %cst = arith.constant dense<0.000000e+00> : vector<64x16xf32>
    %7 = tpu.matmul %5, %6, %cst {dimension_numbers = #tpu.dot_dimension_numbers<[1], [0], [0], [1], [0, 0, 1, 1], [], []>, precision = #tpu.contract_precision<fp32>} : vector<64x144xf32>, vector<144x16xf32>, vector<64x16xf32> -> vector<64x16xf32>
    %8 = arith.addf %3, %7 : vector<64x16xf32>
    %c0_7 = arith.constant 0 : index
    %c0_8 = arith.constant 0 : index
    %9 = vector.load %arg8[%c0_7, %c0_8] : memref<64x16xf32, #tpu.memory_space<vmem>>, vector<64x16xf32>
    tpu.vector_store %arg8[%c0_7, %c0_8], %8 {strides = array<i32>} : memref<64x16xf32, #tpu.memory_space<vmem>>, vector<64x16xf32>,
    %c0_i32_9 = arith.constant 0 : i32
    %10 = arith.cmpi eq, %arg3, %c0_i32_9 : i32
    %11 = arith.extui %10 : i1 to i32
    %c0_i32_10 = arith.constant 0 : i32
    %12 = arith.cmpi ne, %11, %c0_i32_10 : i32
    scf.if %12 {
      %c0_11 = arith.constant 0 : index
      %c0_12 = arith.constant 0 : index
      %13 = vector.load %arg8[%c0_11, %c0_12] : memref<64x16xf32, #tpu.memory_space<vmem>>, vector<64x16xf32>
      %c0_13 = arith.constant 0 : index
      %c0_14 = arith.constant 0 : index
      %14 = vector.load %arg6[%c0_13, %c0_14] : memref<1x16xf32, #tpu.memory_space<vmem>>, vector<1x16xf32>
      %15 = vector.broadcast %14 : vector<1x16xf32> to vector<64x16xf32>
      %16 = arith.addf %13, %15 : vector<64x16xf32>
      %cst_15 = arith.constant 0.000000e+00 : f32
      %17 = vector.broadcast %cst_15 : f32 to vector<64x16xf32>
      %18 = arith.cmpf oge, %16, %17 : vector<64x16xf32>
      %cst_16 = arith.constant 2.000000e-01 : f32
      %19 = vector.broadcast %cst_16 : f32 to vector<64x16xf32>
      %20 = arith.mulf %19, %16 : vector<64x16xf32>
      %21 = arith.select %18, %16, %20 : vector<64x16xi1>, vector<64x16xf32>
      %c0_17 = arith.constant 0 : index
      %c0_18 = arith.constant 0 : index
      %c0_19 = arith.constant 0 : index
      %22 = vector.load %arg7[%c0_17, %c0_18, %c0_19] : memref<1x64x16xf32, #tpu.memory_space<vmem>>, vector<1x64x16xf32>
      %23 = vector.shape_cast %22 : vector<1x64x16xf32> to vector<64x16xf32>
      %24 = vector.shape_cast %21 : vector<64x16xf32> to vector<1x64x16xf32>
      tpu.vector_store %arg7[%c0_17, %c0_18, %c0_19], %24 {strides = array<i32>} : memref<1x64x16xf32, #tpu.memory_space<vmem>>, vector<1x64x16xf32>,
    } else {
    }
    return
  }
  func.func @transform_0(%arg0: i32, %arg1: i32, %arg2: i32, %arg3: i32) -> (i32, i32, i32) {
    %c0_i32 = arith.constant 0 : i32
    return %arg0, %arg1, %arg3 : i32, i32, i32
  }
  func.func @transform_1(%arg0: i32, %arg1: i32, %arg2: i32, %arg3: i32) -> (i32, i32) {
    %c0_i32 = arith.constant 0 : i32
    return %arg3, %arg2 : i32, i32
  }
  func.func @transform_2(%arg0: i32, %arg1: i32, %arg2: i32, %arg3: i32) -> (i32, i32) {
    %c0_i32 = arith.constant 0 : i32
    %c0_i32_0 = arith.constant 0 : i32
    return %c0_i32, %arg2 : i32, i32
  }
  func.func @transform_3(%arg0: i32, %arg1: i32, %arg2: i32, %arg3: i32) -> (i32, i32, i32) {
    %c0_i32 = arith.constant 0 : i32
    return %arg0, %arg1, %arg2 : i32, i32, i32
  }
}

module attributes {stable_mosaic.version = 11 : i64} {
  func.func @_conv_kernel(%arg0: i32, %arg1: i32, %arg2: i32, %arg3: i32, %arg4: memref<1x64x144xf32, #tpu.memory_space<vmem>>, %arg5: memref<144x32xf32, #tpu.memory_space<vmem>>, %arg6: memref<1x32xf32, #tpu.memory_space<vmem>>, %arg7: memref<1x64x16xf32, #tpu.memory_space<vmem>>, %arg8: memref<16x32xf32, #tpu.memory_space<vmem>>, %arg9: memref<1x64x32xf32, #tpu.memory_space<vmem>>, %arg10: memref<64x32xf32, #tpu.memory_space<vmem>>) attributes {dimension_semantics = [#tpu.dimension_semantics<parallel>, #tpu.dimension_semantics<parallel>, #tpu.dimension_semantics<parallel>, #tpu.dimension_semantics<arbitrary>], iteration_bounds = array<i64: 2, 1, 1, 1>, scalar_prefetch = 0 : i64, scratch_operands = 1 : i64, tpu.core_type = #tpu.core_type<tc>, window_params = [{transform_indices = @transform_0, window_bounds = array<i64: 1, 64, 144>}, {transform_indices = @transform_1, window_bounds = array<i64: 144, 32>}, {transform_indices = @transform_2, window_bounds = array<i64: 1, 32>}, {transform_indices = @transform_3, window_bounds = array<i64: 1, 64, 16>}, {transform_indices = @transform_4, window_bounds = array<i64: 16, 32>}, {transform_indices = @transform_5, window_bounds = array<i64: 1, 64, 32>}]} {
    %c0_i32 = arith.constant 0 : i32
    %0 = arith.cmpi eq, %arg3, %c0_i32 : i32
    %1 = arith.extui %0 : i1 to i32
    %c0_i32_0 = arith.constant 0 : i32
    %2 = arith.cmpi ne, %1, %c0_i32_0 : i32
    scf.if %2 {
      %cst_11 = arith.constant 0.000000e+00 : f32
      %13 = vector.broadcast %cst_11 : f32 to vector<64x32xf32>
      %c0_12 = arith.constant 0 : index
      %c0_13 = arith.constant 0 : index
      %14 = vector.load %arg10[%c0_12, %c0_13] : memref<64x32xf32, #tpu.memory_space<vmem>>, vector<64x32xf32>
      tpu.vector_store %arg10[%c0_12, %c0_13], %13 {strides = array<i32>} : memref<64x32xf32, #tpu.memory_space<vmem>>, vector<64x32xf32>,
    } else {
    }
    %c0 = arith.constant 0 : index
    %c0_1 = arith.constant 0 : index
    %3 = vector.load %arg10[%c0, %c0_1] : memref<64x32xf32, #tpu.memory_space<vmem>>, vector<64x32xf32>
    %c0_2 = arith.constant 0 : index
    %c0_3 = arith.constant 0 : index
    %c0_4 = arith.constant 0 : index
    %4 = vector.load %arg4[%c0_2, %c0_3, %c0_4] : memref<1x64x144xf32, #tpu.memory_space<vmem>>, vector<1x64x144xf32>
    %5 = vector.shape_cast %4 : vector<1x64x144xf32> to vector<64x144xf32>
    %c0_5 = arith.constant 0 : index
    %c0_6 = arith.constant 0 : index
    %6 = vector.load %arg5[%c0_5, %c0_6] : memref<144x32xf32, #tpu.memory_space<vmem>>, vector<144x32xf32>
    %cst = arith.constant dense<0.000000e+00> : vector<64x32xf32>
    %7 = tpu.matmul %5, %6, %cst {dimension_numbers = #tpu.dot_dimension_numbers<[1], [0], [0], [1], [0, 0, 1, 1], [], []>, precision = #tpu.contract_precision<fp32>} : vector<64x144xf32>, vector<144x32xf32>, vector<64x32xf32> -> vector<64x32xf32>
    %8 = arith.addf %3, %7 : vector<64x32xf32>
    %c0_7 = arith.constant 0 : index
    %c0_8 = arith.constant 0 : index
    %9 = vector.load %arg10[%c0_7, %c0_8] : memref<64x32xf32, #tpu.memory_space<vmem>>, vector<64x32xf32>
    tpu.vector_store %arg10[%c0_7, %c0_8], %8 {strides = array<i32>} : memref<64x32xf32, #tpu.memory_space<vmem>>, vector<64x32xf32>,
    %c0_i32_9 = arith.constant 0 : i32
    %10 = arith.cmpi eq, %arg3, %c0_i32_9 : i32
    %11 = arith.extui %10 : i1 to i32
    %c0_i32_10 = arith.constant 0 : i32
    %12 = arith.cmpi ne, %11, %c0_i32_10 : i32
    scf.if %12 {
      %c0_11 = arith.constant 0 : index
      %c0_12 = arith.constant 0 : index
      %13 = vector.load %arg10[%c0_11, %c0_12] : memref<64x32xf32, #tpu.memory_space<vmem>>, vector<64x32xf32>
      %c0_13 = arith.constant 0 : index
      %c0_14 = arith.constant 0 : index
      %14 = vector.load %arg6[%c0_13, %c0_14] : memref<1x32xf32, #tpu.memory_space<vmem>>, vector<1x32xf32>
      %15 = vector.broadcast %14 : vector<1x32xf32> to vector<64x32xf32>
      %16 = arith.addf %13, %15 : vector<64x32xf32>
      %c0_15 = arith.constant 0 : index
      %c0_16 = arith.constant 0 : index
      %c0_17 = arith.constant 0 : index
      %17 = vector.load %arg7[%c0_15, %c0_16, %c0_17] : memref<1x64x16xf32, #tpu.memory_space<vmem>>, vector<1x64x16xf32>
      %18 = vector.shape_cast %17 : vector<1x64x16xf32> to vector<64x16xf32>
      %c0_18 = arith.constant 0 : index
      %c0_19 = arith.constant 0 : index
      %19 = vector.load %arg8[%c0_18, %c0_19] : memref<16x32xf32, #tpu.memory_space<vmem>>, vector<16x32xf32>
      %cst_20 = arith.constant dense<0.000000e+00> : vector<64x32xf32>
      %20 = tpu.matmul %18, %19, %cst_20 {dimension_numbers = #tpu.dot_dimension_numbers<[1], [0], [0], [1], [0, 0, 1, 1], [], []>, precision = #tpu.contract_precision<fp32>} : vector<64x16xf32>, vector<16x32xf32>, vector<64x32xf32> -> vector<64x32xf32>
      %21 = arith.addf %16, %20 : vector<64x32xf32>
      %cst_21 = arith.constant 0.707106769 : f32
      %22 = vector.broadcast %cst_21 : f32 to vector<64x32xf32>
      %23 = arith.mulf %21, %22 : vector<64x32xf32>
      %c0_22 = arith.constant 0 : index
      %c0_23 = arith.constant 0 : index
      %c0_24 = arith.constant 0 : index
      %24 = vector.load %arg9[%c0_22, %c0_23, %c0_24] : memref<1x64x32xf32, #tpu.memory_space<vmem>>, vector<1x64x32xf32>
      %25 = vector.shape_cast %24 : vector<1x64x32xf32> to vector<64x32xf32>
      %26 = vector.shape_cast %23 : vector<64x32xf32> to vector<1x64x32xf32>
      tpu.vector_store %arg9[%c0_22, %c0_23, %c0_24], %26 {strides = array<i32>} : memref<1x64x32xf32, #tpu.memory_space<vmem>>, vector<1x64x32xf32>,
    } else {
    }
    return
  }
  func.func @transform_0(%arg0: i32, %arg1: i32, %arg2: i32, %arg3: i32) -> (i32, i32, i32) {
    %c0_i32 = arith.constant 0 : i32
    return %arg0, %arg1, %arg3 : i32, i32, i32
  }
  func.func @transform_1(%arg0: i32, %arg1: i32, %arg2: i32, %arg3: i32) -> (i32, i32) {
    %c0_i32 = arith.constant 0 : i32
    return %arg3, %arg2 : i32, i32
  }
  func.func @transform_2(%arg0: i32, %arg1: i32, %arg2: i32, %arg3: i32) -> (i32, i32) {
    %c0_i32 = arith.constant 0 : i32
    %c0_i32_0 = arith.constant 0 : i32
    return %c0_i32, %arg2 : i32, i32
  }
  func.func @transform_3(%arg0: i32, %arg1: i32, %arg2: i32, %arg3: i32) -> (i32, i32, i32) {
    %c0_i32 = arith.constant 0 : i32
    %c0_i32_0 = arith.constant 0 : i32
    return %arg0, %arg1, %c0_i32 : i32, i32, i32
  }
  func.func @transform_4(%arg0: i32, %arg1: i32, %arg2: i32, %arg3: i32) -> (i32, i32) {
    %c0_i32 = arith.constant 0 : i32
    %c0_i32_0 = arith.constant 0 : i32
    return %c0_i32, %arg2 : i32, i32
  }
  func.func @transform_5(%arg0: i32, %arg1: i32, %arg2: i32, %arg3: i32) -> (i32, i32, i32) {
    %c0_i32 = arith.constant 0 : i32
    return %arg0, %arg1, %arg2 : i32, i32, i32
  }
}

module attributes {stable_mosaic.version = 11 : i64} {
  func.func @_leaky_kernel(%arg0: i32, %arg1: i32, %arg2: memref<1x64x32xf32, #tpu.memory_space<vmem>>, %arg3: memref<1x64x32xf32, #tpu.memory_space<vmem>>) attributes {dimension_semantics = [#tpu.dimension_semantics<parallel>, #tpu.dimension_semantics<parallel>], iteration_bounds = array<i64: 2, 1>, scalar_prefetch = 0 : i64, scratch_operands = 0 : i64, tpu.core_type = #tpu.core_type<tc>, window_params = [{transform_indices = @transform_0, window_bounds = array<i64: 1, 64, 32>}, {transform_indices = @transform_1, window_bounds = array<i64: 1, 64, 32>}]} {
    %c0 = arith.constant 0 : index
    %c0_0 = arith.constant 0 : index
    %c0_1 = arith.constant 0 : index
    %0 = vector.load %arg2[%c0, %c0_0, %c0_1] : memref<1x64x32xf32, #tpu.memory_space<vmem>>, vector<1x64x32xf32>
    %cst = arith.constant 0.000000e+00 : f32
    %1 = vector.broadcast %cst : f32 to vector<1x64x32xf32>
    %2 = arith.cmpf oge, %0, %1 : vector<1x64x32xf32>
    %cst_2 = arith.constant 2.000000e-01 : f32
    %3 = vector.broadcast %cst_2 : f32 to vector<1x64x32xf32>
    %4 = arith.mulf %3, %0 : vector<1x64x32xf32>
    %5 = arith.select %2, %0, %4 : vector<1x64x32xi1>, vector<1x64x32xf32>
    %c0_3 = arith.constant 0 : index
    %c0_4 = arith.constant 0 : index
    %c0_5 = arith.constant 0 : index
    %6 = vector.load %arg3[%c0_3, %c0_4, %c0_5] : memref<1x64x32xf32, #tpu.memory_space<vmem>>, vector<1x64x32xf32>
    tpu.vector_store %arg3[%c0_3, %c0_4, %c0_5], %5 {strides = array<i32>} : memref<1x64x32xf32, #tpu.memory_space<vmem>>, vector<1x64x32xf32>,
    return
  }
  func.func @transform_0(%arg0: i32, %arg1: i32) -> (i32, i32, i32) {
    %c0_i32 = arith.constant 0 : i32
    %c0_i32_0 = arith.constant 0 : i32
    return %arg0, %arg1, %c0_i32 : i32, i32, i32
  }
  func.func @transform_1(%arg0: i32, %arg1: i32) -> (i32, i32, i32) {
    %c0_i32 = arith.constant 0 : i32
    %c0_i32_0 = arith.constant 0 : i32
    return %arg0, %arg1, %c0_i32 : i32, i32, i32
  }
}

module attributes {stable_mosaic.version = 11 : i64} {
  func.func @_pool_kernel(%arg0: i32, %arg1: i32, %arg2: memref<1x32x32xf32, #tpu.memory_space<vmem>>, %arg3: memref<1x32x32xf32, #tpu.memory_space<vmem>>, %arg4: memref<1x16x32xf32, #tpu.memory_space<vmem>>, %arg5: memref<32x32xf32, #tpu.memory_space<vmem>>) attributes {dimension_semantics = [#tpu.dimension_semantics<parallel>, #tpu.dimension_semantics<parallel>], iteration_bounds = array<i64: 2, 1>, scalar_prefetch = 0 : i64, scratch_operands = 1 : i64, tpu.core_type = #tpu.core_type<tc>, window_params = [{transform_indices = @transform_0, window_bounds = array<i64: 1, 32, 32>}, {transform_indices = @transform_1, window_bounds = array<i64: 1, 32, 32>}, {transform_indices = @transform_2, window_bounds = array<i64: 1, 16, 32>}]} {
    %c0 = arith.constant 0 : index
    %c0_0 = arith.constant 0 : index
    %c0_1 = arith.constant 0 : index
    %0 = vector.load %arg2[%c0, %c0_0, %c0_1] : memref<1x32x32xf32, #tpu.memory_space<vmem>>, vector<1x32x32xf32>
    %1 = vector.shape_cast %0 : vector<1x32x32xf32> to vector<32x32xf32>
    %c0_2 = arith.constant 0 : index
    %c0_3 = arith.constant 0 : index
    %c0_4 = arith.constant 0 : index
    %2 = vector.load %arg3[%c0_2, %c0_3, %c0_4] : memref<1x32x32xf32, #tpu.memory_space<vmem>>, vector<1x32x32xf32>
    %3 = vector.shape_cast %2 : vector<1x32x32xf32> to vector<32x32xf32>
    %4 = arith.addf %1, %3 : vector<32x32xf32>
    %c0_5 = arith.constant 0 : index
    %c0_6 = arith.constant 0 : index
    %5 = vector.load %arg5[%c0_5, %c0_6] : memref<32x32xf32, #tpu.memory_space<vmem>>, vector<32x32xf32>
    tpu.vector_store %arg5[%c0_5, %c0_6], %4 {strides = array<i32>} : memref<32x32xf32, #tpu.memory_space<vmem>>, vector<32x32xf32>,
    %c0_7 = arith.constant 0 : index
    %c0_8 = arith.constant 0 : index
    %6 = tpu.strided_load %arg5[%c0_7, %c0_8] {strides = array<i32: 2, 1>} : memref<32x32xf32, #tpu.memory_space<vmem>>, vector<16x32xf32>
    %c1 = arith.constant 1 : index
    %c0_9 = arith.constant 0 : index
    %7 = tpu.strided_load %arg5[%c1, %c0_9] {strides = array<i32: 2, 1>} : memref<32x32xf32, #tpu.memory_space<vmem>>, vector<16x32xf32>
    %8 = arith.addf %6, %7 : vector<16x32xf32>
    %cst = arith.constant 2.500000e-01 : f32
    %9 = vector.broadcast %cst : f32 to vector<16x32xf32>
    %10 = arith.mulf %8, %9 : vector<16x32xf32>
    %c0_10 = arith.constant 0 : index
    %c0_11 = arith.constant 0 : index
    %c0_12 = arith.constant 0 : index
    %11 = vector.load %arg4[%c0_10, %c0_11, %c0_12] : memref<1x16x32xf32, #tpu.memory_space<vmem>>, vector<1x16x32xf32>
    %12 = vector.shape_cast %11 : vector<1x16x32xf32> to vector<16x32xf32>
    %13 = vector.shape_cast %10 : vector<16x32xf32> to vector<1x16x32xf32>
    tpu.vector_store %arg4[%c0_10, %c0_11, %c0_12], %13 {strides = array<i32>} : memref<1x16x32xf32, #tpu.memory_space<vmem>>, vector<1x16x32xf32>,
    return
  }
  func.func @transform_0(%arg0: i32, %arg1: i32) -> (i32, i32, i32) {
    %c0_i32 = arith.constant 0 : i32
    %c0_i32_0 = arith.constant 0 : i32
    return %arg0, %arg1, %c0_i32 : i32, i32, i32
  }
  func.func @transform_1(%arg0: i32, %arg1: i32) -> (i32, i32, i32) {
    %c0_i32 = arith.constant 0 : i32
    %c0_i32_0 = arith.constant 0 : i32
    return %arg0, %arg1, %c0_i32 : i32, i32, i32
  }
  func.func @transform_2(%arg0: i32, %arg1: i32) -> (i32, i32, i32) {
    %c0_i32 = arith.constant 0 : i32
    %c0_i32_0 = arith.constant 0 : i32
    return %arg0, %arg1, %c0_i32 : i32, i32, i32
  }
}

module attributes {stable_mosaic.version = 11 : i64} {
  func.func @_conv_kernel(%arg0: i32, %arg1: i32, %arg2: i32, %arg3: i32, %arg4: memref<1x16x288xf32, #tpu.memory_space<vmem>>, %arg5: memref<288x32xf32, #tpu.memory_space<vmem>>, %arg6: memref<1x32xf32, #tpu.memory_space<vmem>>, %arg7: memref<1x16x32xf32, #tpu.memory_space<vmem>>, %arg8: memref<16x32xf32, #tpu.memory_space<vmem>>) attributes {dimension_semantics = [#tpu.dimension_semantics<parallel>, #tpu.dimension_semantics<parallel>, #tpu.dimension_semantics<parallel>, #tpu.dimension_semantics<arbitrary>], iteration_bounds = array<i64: 2, 1, 1, 1>, scalar_prefetch = 0 : i64, scratch_operands = 1 : i64, tpu.core_type = #tpu.core_type<tc>, window_params = [{transform_indices = @transform_0, window_bounds = array<i64: 1, 16, 288>}, {transform_indices = @transform_1, window_bounds = array<i64: 288, 32>}, {transform_indices = @transform_2, window_bounds = array<i64: 1, 32>}, {transform_indices = @transform_3, window_bounds = array<i64: 1, 16, 32>}]} {
    %c0_i32 = arith.constant 0 : i32
    %0 = arith.cmpi eq, %arg3, %c0_i32 : i32
    %1 = arith.extui %0 : i1 to i32
    %c0_i32_0 = arith.constant 0 : i32
    %2 = arith.cmpi ne, %1, %c0_i32_0 : i32
    scf.if %2 {
      %cst_11 = arith.constant 0.000000e+00 : f32
      %13 = vector.broadcast %cst_11 : f32 to vector<16x32xf32>
      %c0_12 = arith.constant 0 : index
      %c0_13 = arith.constant 0 : index
      %14 = vector.load %arg8[%c0_12, %c0_13] : memref<16x32xf32, #tpu.memory_space<vmem>>, vector<16x32xf32>
      tpu.vector_store %arg8[%c0_12, %c0_13], %13 {strides = array<i32>} : memref<16x32xf32, #tpu.memory_space<vmem>>, vector<16x32xf32>,
    } else {
    }
    %c0 = arith.constant 0 : index
    %c0_1 = arith.constant 0 : index
    %3 = vector.load %arg8[%c0, %c0_1] : memref<16x32xf32, #tpu.memory_space<vmem>>, vector<16x32xf32>
    %c0_2 = arith.constant 0 : index
    %c0_3 = arith.constant 0 : index
    %c0_4 = arith.constant 0 : index
    %4 = vector.load %arg4[%c0_2, %c0_3, %c0_4] : memref<1x16x288xf32, #tpu.memory_space<vmem>>, vector<1x16x288xf32>
    %5 = vector.shape_cast %4 : vector<1x16x288xf32> to vector<16x288xf32>
    %c0_5 = arith.constant 0 : index
    %c0_6 = arith.constant 0 : index
    %6 = vector.load %arg5[%c0_5, %c0_6] : memref<288x32xf32, #tpu.memory_space<vmem>>, vector<288x32xf32>
    %cst = arith.constant dense<0.000000e+00> : vector<16x32xf32>
    %7 = tpu.matmul %5, %6, %cst {dimension_numbers = #tpu.dot_dimension_numbers<[1], [0], [0], [1], [0, 0, 1, 1], [], []>, precision = #tpu.contract_precision<fp32>} : vector<16x288xf32>, vector<288x32xf32>, vector<16x32xf32> -> vector<16x32xf32>
    %8 = arith.addf %3, %7 : vector<16x32xf32>
    %c0_7 = arith.constant 0 : index
    %c0_8 = arith.constant 0 : index
    %9 = vector.load %arg8[%c0_7, %c0_8] : memref<16x32xf32, #tpu.memory_space<vmem>>, vector<16x32xf32>
    tpu.vector_store %arg8[%c0_7, %c0_8], %8 {strides = array<i32>} : memref<16x32xf32, #tpu.memory_space<vmem>>, vector<16x32xf32>,
    %c0_i32_9 = arith.constant 0 : i32
    %10 = arith.cmpi eq, %arg3, %c0_i32_9 : i32
    %11 = arith.extui %10 : i1 to i32
    %c0_i32_10 = arith.constant 0 : i32
    %12 = arith.cmpi ne, %11, %c0_i32_10 : i32
    scf.if %12 {
      %c0_11 = arith.constant 0 : index
      %c0_12 = arith.constant 0 : index
      %13 = vector.load %arg8[%c0_11, %c0_12] : memref<16x32xf32, #tpu.memory_space<vmem>>, vector<16x32xf32>
      %c0_13 = arith.constant 0 : index
      %c0_14 = arith.constant 0 : index
      %14 = vector.load %arg6[%c0_13, %c0_14] : memref<1x32xf32, #tpu.memory_space<vmem>>, vector<1x32xf32>
      %15 = vector.broadcast %14 : vector<1x32xf32> to vector<16x32xf32>
      %16 = arith.addf %13, %15 : vector<16x32xf32>
      %cst_15 = arith.constant 0.000000e+00 : f32
      %17 = vector.broadcast %cst_15 : f32 to vector<16x32xf32>
      %18 = arith.cmpf oge, %16, %17 : vector<16x32xf32>
      %cst_16 = arith.constant 2.000000e-01 : f32
      %19 = vector.broadcast %cst_16 : f32 to vector<16x32xf32>
      %20 = arith.mulf %19, %16 : vector<16x32xf32>
      %21 = arith.select %18, %16, %20 : vector<16x32xi1>, vector<16x32xf32>
      %c0_17 = arith.constant 0 : index
      %c0_18 = arith.constant 0 : index
      %c0_19 = arith.constant 0 : index
      %22 = vector.load %arg7[%c0_17, %c0_18, %c0_19] : memref<1x16x32xf32, #tpu.memory_space<vmem>>, vector<1x16x32xf32>
      %23 = vector.shape_cast %22 : vector<1x16x32xf32> to vector<16x32xf32>
      %24 = vector.shape_cast %21 : vector<16x32xf32> to vector<1x16x32xf32>
      tpu.vector_store %arg7[%c0_17, %c0_18, %c0_19], %24 {strides = array<i32>} : memref<1x16x32xf32, #tpu.memory_space<vmem>>, vector<1x16x32xf32>,
    } else {
    }
    return
  }
  func.func @transform_0(%arg0: i32, %arg1: i32, %arg2: i32, %arg3: i32) -> (i32, i32, i32) {
    %c0_i32 = arith.constant 0 : i32
    return %arg0, %arg1, %arg3 : i32, i32, i32
  }
  func.func @transform_1(%arg0: i32, %arg1: i32, %arg2: i32, %arg3: i32) -> (i32, i32) {
    %c0_i32 = arith.constant 0 : i32
    return %arg3, %arg2 : i32, i32
  }
  func.func @transform_2(%arg0: i32, %arg1: i32, %arg2: i32, %arg3: i32) -> (i32, i32) {
    %c0_i32 = arith.constant 0 : i32
    %c0_i32_0 = arith.constant 0 : i32
    return %c0_i32, %arg2 : i32, i32
  }
  func.func @transform_3(%arg0: i32, %arg1: i32, %arg2: i32, %arg3: i32) -> (i32, i32, i32) {
    %c0_i32 = arith.constant 0 : i32
    return %arg0, %arg1, %arg2 : i32, i32, i32
  }
}

module attributes {stable_mosaic.version = 11 : i64} {
  func.func @_conv_kernel(%arg0: i32, %arg1: i32, %arg2: i32, %arg3: i32, %arg4: memref<1x16x288xf32, #tpu.memory_space<vmem>>, %arg5: memref<288x32xf32, #tpu.memory_space<vmem>>, %arg6: memref<1x32xf32, #tpu.memory_space<vmem>>, %arg7: memref<1x16x32xf32, #tpu.memory_space<vmem>>, %arg8: memref<1x16x32xf32, #tpu.memory_space<vmem>>, %arg9: memref<16x32xf32, #tpu.memory_space<vmem>>) attributes {dimension_semantics = [#tpu.dimension_semantics<parallel>, #tpu.dimension_semantics<parallel>, #tpu.dimension_semantics<parallel>, #tpu.dimension_semantics<arbitrary>], iteration_bounds = array<i64: 2, 1, 1, 1>, scalar_prefetch = 0 : i64, scratch_operands = 1 : i64, tpu.core_type = #tpu.core_type<tc>, window_params = [{transform_indices = @transform_0, window_bounds = array<i64: 1, 16, 288>}, {transform_indices = @transform_1, window_bounds = array<i64: 288, 32>}, {transform_indices = @transform_2, window_bounds = array<i64: 1, 32>}, {transform_indices = @transform_3, window_bounds = array<i64: 1, 16, 32>}, {transform_indices = @transform_4, window_bounds = array<i64: 1, 16, 32>}]} {
    %c0_i32 = arith.constant 0 : i32
    %0 = arith.cmpi eq, %arg3, %c0_i32 : i32
    %1 = arith.extui %0 : i1 to i32
    %c0_i32_0 = arith.constant 0 : i32
    %2 = arith.cmpi ne, %1, %c0_i32_0 : i32
    scf.if %2 {
      %cst_11 = arith.constant 0.000000e+00 : f32
      %13 = vector.broadcast %cst_11 : f32 to vector<16x32xf32>
      %c0_12 = arith.constant 0 : index
      %c0_13 = arith.constant 0 : index
      %14 = vector.load %arg9[%c0_12, %c0_13] : memref<16x32xf32, #tpu.memory_space<vmem>>, vector<16x32xf32>
      tpu.vector_store %arg9[%c0_12, %c0_13], %13 {strides = array<i32>} : memref<16x32xf32, #tpu.memory_space<vmem>>, vector<16x32xf32>,
    } else {
    }
    %c0 = arith.constant 0 : index
    %c0_1 = arith.constant 0 : index
    %3 = vector.load %arg9[%c0, %c0_1] : memref<16x32xf32, #tpu.memory_space<vmem>>, vector<16x32xf32>
    %c0_2 = arith.constant 0 : index
    %c0_3 = arith.constant 0 : index
    %c0_4 = arith.constant 0 : index
    %4 = vector.load %arg4[%c0_2, %c0_3, %c0_4] : memref<1x16x288xf32, #tpu.memory_space<vmem>>, vector<1x16x288xf32>
    %5 = vector.shape_cast %4 : vector<1x16x288xf32> to vector<16x288xf32>
    %c0_5 = arith.constant 0 : index
    %c0_6 = arith.constant 0 : index
    %6 = vector.load %arg5[%c0_5, %c0_6] : memref<288x32xf32, #tpu.memory_space<vmem>>, vector<288x32xf32>
    %cst = arith.constant dense<0.000000e+00> : vector<16x32xf32>
    %7 = tpu.matmul %5, %6, %cst {dimension_numbers = #tpu.dot_dimension_numbers<[1], [0], [0], [1], [0, 0, 1, 1], [], []>, precision = #tpu.contract_precision<fp32>} : vector<16x288xf32>, vector<288x32xf32>, vector<16x32xf32> -> vector<16x32xf32>
    %8 = arith.addf %3, %7 : vector<16x32xf32>
    %c0_7 = arith.constant 0 : index
    %c0_8 = arith.constant 0 : index
    %9 = vector.load %arg9[%c0_7, %c0_8] : memref<16x32xf32, #tpu.memory_space<vmem>>, vector<16x32xf32>
    tpu.vector_store %arg9[%c0_7, %c0_8], %8 {strides = array<i32>} : memref<16x32xf32, #tpu.memory_space<vmem>>, vector<16x32xf32>,
    %c0_i32_9 = arith.constant 0 : i32
    %10 = arith.cmpi eq, %arg3, %c0_i32_9 : i32
    %11 = arith.extui %10 : i1 to i32
    %c0_i32_10 = arith.constant 0 : i32
    %12 = arith.cmpi ne, %11, %c0_i32_10 : i32
    scf.if %12 {
      %c0_11 = arith.constant 0 : index
      %c0_12 = arith.constant 0 : index
      %13 = vector.load %arg9[%c0_11, %c0_12] : memref<16x32xf32, #tpu.memory_space<vmem>>, vector<16x32xf32>
      %c0_13 = arith.constant 0 : index
      %c0_14 = arith.constant 0 : index
      %14 = vector.load %arg6[%c0_13, %c0_14] : memref<1x32xf32, #tpu.memory_space<vmem>>, vector<1x32xf32>
      %15 = vector.broadcast %14 : vector<1x32xf32> to vector<16x32xf32>
      %16 = arith.addf %13, %15 : vector<16x32xf32>
      %c0_15 = arith.constant 0 : index
      %c0_16 = arith.constant 0 : index
      %c0_17 = arith.constant 0 : index
      %17 = vector.load %arg7[%c0_15, %c0_16, %c0_17] : memref<1x16x32xf32, #tpu.memory_space<vmem>>, vector<1x16x32xf32>
      %18 = vector.shape_cast %17 : vector<1x16x32xf32> to vector<16x32xf32>
      %19 = arith.addf %16, %18 : vector<16x32xf32>
      %cst_18 = arith.constant 0.707106769 : f32
      %20 = vector.broadcast %cst_18 : f32 to vector<16x32xf32>
      %21 = arith.mulf %19, %20 : vector<16x32xf32>
      %c0_19 = arith.constant 0 : index
      %c0_20 = arith.constant 0 : index
      %c0_21 = arith.constant 0 : index
      %22 = vector.load %arg8[%c0_19, %c0_20, %c0_21] : memref<1x16x32xf32, #tpu.memory_space<vmem>>, vector<1x16x32xf32>
      %23 = vector.shape_cast %22 : vector<1x16x32xf32> to vector<16x32xf32>
      %24 = vector.shape_cast %21 : vector<16x32xf32> to vector<1x16x32xf32>
      tpu.vector_store %arg8[%c0_19, %c0_20, %c0_21], %24 {strides = array<i32>} : memref<1x16x32xf32, #tpu.memory_space<vmem>>, vector<1x16x32xf32>,
    } else {
    }
    return
  }
  func.func @transform_0(%arg0: i32, %arg1: i32, %arg2: i32, %arg3: i32) -> (i32, i32, i32) {
    %c0_i32 = arith.constant 0 : i32
    return %arg0, %arg1, %arg3 : i32, i32, i32
  }
  func.func @transform_1(%arg0: i32, %arg1: i32, %arg2: i32, %arg3: i32) -> (i32, i32) {
    %c0_i32 = arith.constant 0 : i32
    return %arg3, %arg2 : i32, i32
  }
  func.func @transform_2(%arg0: i32, %arg1: i32, %arg2: i32, %arg3: i32) -> (i32, i32) {
    %c0_i32 = arith.constant 0 : i32
    %c0_i32_0 = arith.constant 0 : i32
    return %c0_i32, %arg2 : i32, i32
  }
  func.func @transform_3(%arg0: i32, %arg1: i32, %arg2: i32, %arg3: i32) -> (i32, i32, i32) {
    %c0_i32 = arith.constant 0 : i32
    return %arg0, %arg1, %arg2 : i32, i32, i32
  }
  func.func @transform_4(%arg0: i32, %arg1: i32, %arg2: i32, %arg3: i32) -> (i32, i32, i32) {
    %c0_i32 = arith.constant 0 : i32
    return %arg0, %arg1, %arg2 : i32, i32, i32
  }
}

module attributes {stable_mosaic.version = 11 : i64} {
  func.func @_head_kernel(%arg0: i32, %arg1: memref<2x512xf32, #tpu.memory_space<vmem>>, %arg2: memref<512x32xf32, #tpu.memory_space<vmem>>, %arg3: memref<1x32xf32, #tpu.memory_space<vmem>>, %arg4: memref<32x32xf32, #tpu.memory_space<vmem>>, %arg5: memref<1x32xf32, #tpu.memory_space<vmem>>, %arg6: memref<2x32xf32, #tpu.memory_space<vmem>>) attributes {dimension_semantics = [#tpu.dimension_semantics<arbitrary>], iteration_bounds = array<i64: 1>, scalar_prefetch = 0 : i64, scratch_operands = 0 : i64, tpu.core_type = #tpu.core_type<tc>, window_params = [{pipeline_mode = #tpu.pipeline_mode<synchronous>, transform_indices = @transform_0, window_bounds = array<i64: 2, 512>}, {pipeline_mode = #tpu.pipeline_mode<synchronous>, transform_indices = @transform_1, window_bounds = array<i64: 512, 32>}, {pipeline_mode = #tpu.pipeline_mode<synchronous>, transform_indices = @transform_2, window_bounds = array<i64: 1, 32>}, {pipeline_mode = #tpu.pipeline_mode<synchronous>, transform_indices = @transform_3, window_bounds = array<i64: 32, 32>}, {pipeline_mode = #tpu.pipeline_mode<synchronous>, transform_indices = @transform_4, window_bounds = array<i64: 1, 32>}, {pipeline_mode = #tpu.pipeline_mode<synchronous>, transform_indices = @transform_5, window_bounds = array<i64: 2, 32>}]} {
    %c0 = arith.constant 0 : index
    %c0_0 = arith.constant 0 : index
    %0 = vector.load %arg1[%c0, %c0_0] : memref<2x512xf32, #tpu.memory_space<vmem>>, vector<2x512xf32>
    %cst = arith.constant 0.000000e+00 : f32
    %1 = vector.broadcast %cst : f32 to vector<2x512xf32>
    %2 = arith.cmpf oge, %0, %1 : vector<2x512xf32>
    %cst_1 = arith.constant 2.000000e-01 : f32
    %3 = vector.broadcast %cst_1 : f32 to vector<2x512xf32>
    %4 = arith.mulf %3, %0 : vector<2x512xf32>
    %5 = arith.select %2, %0, %4 : vector<2x512xi1>, vector<2x512xf32>
    %c0_2 = arith.constant 0 : index
    %c0_3 = arith.constant 0 : index
    %6 = vector.load %arg2[%c0_2, %c0_3] : memref<512x32xf32, #tpu.memory_space<vmem>>, vector<512x32xf32>
    %cst_4 = arith.constant dense<0.000000e+00> : vector<2x32xf32>
    %7 = tpu.matmul %5, %6, %cst_4 {dimension_numbers = #tpu.dot_dimension_numbers<[1], [0], [0], [1], [0, 0, 1, 1], [], []>, precision = #tpu.contract_precision<fp32>} : vector<2x512xf32>, vector<512x32xf32>, vector<2x32xf32> -> vector<2x32xf32>
    %c0_5 = arith.constant 0 : index
    %c0_6 = arith.constant 0 : index
    %8 = vector.load %arg3[%c0_5, %c0_6] : memref<1x32xf32, #tpu.memory_space<vmem>>, vector<1x32xf32>
    %9 = vector.broadcast %8 : vector<1x32xf32> to vector<2x32xf32>
    %10 = arith.addf %7, %9 : vector<2x32xf32>
    %cst_7 = arith.constant 0.000000e+00 : f32
    %11 = vector.broadcast %cst_7 : f32 to vector<2x32xf32>
    %12 = arith.cmpf oge, %10, %11 : vector<2x32xf32>
    %cst_8 = arith.constant 2.000000e-01 : f32
    %13 = vector.broadcast %cst_8 : f32 to vector<2x32xf32>
    %14 = arith.mulf %13, %10 : vector<2x32xf32>
    %15 = arith.select %12, %10, %14 : vector<2x32xi1>, vector<2x32xf32>
    %c0_9 = arith.constant 0 : index
    %c0_10 = arith.constant 0 : index
    %16 = vector.load %arg4[%c0_9, %c0_10] : memref<32x32xf32, #tpu.memory_space<vmem>>, vector<32x32xf32>
    %cst_11 = arith.constant dense<0.000000e+00> : vector<2x32xf32>
    %17 = tpu.matmul %15, %16, %cst_11 {dimension_numbers = #tpu.dot_dimension_numbers<[1], [0], [0], [1], [0, 0, 1, 1], [], []>, precision = #tpu.contract_precision<fp32>} : vector<2x32xf32>, vector<32x32xf32>, vector<2x32xf32> -> vector<2x32xf32>
    %c0_12 = arith.constant 0 : index
    %c0_13 = arith.constant 0 : index
    %18 = vector.load %arg5[%c0_12, %c0_13] : memref<1x32xf32, #tpu.memory_space<vmem>>, vector<1x32xf32>
    %19 = vector.broadcast %18 : vector<1x32xf32> to vector<2x32xf32>
    %20 = arith.addf %17, %19 : vector<2x32xf32>
    %c0_14 = arith.constant 0 : index
    %c0_15 = arith.constant 0 : index
    %21 = vector.load %arg6[%c0_14, %c0_15] : memref<2x32xf32, #tpu.memory_space<vmem>>, vector<2x32xf32>
    tpu.vector_store %arg6[%c0_14, %c0_15], %20 {strides = array<i32>} : memref<2x32xf32, #tpu.memory_space<vmem>>, vector<2x32xf32>,
    return
  }
  func.func @transform_0(%arg0: i32) -> (i32, i32) {
    %c0_i32 = arith.constant 0 : i32
    %c0_i32_0 = arith.constant 0 : i32
    %c0_i32_1 = arith.constant 0 : i32
    return %c0_i32, %c0_i32_0 : i32, i32
  }
  func.func @transform_1(%arg0: i32) -> (i32, i32) {
    %c0_i32 = arith.constant 0 : i32
    %c0_i32_0 = arith.constant 0 : i32
    %c0_i32_1 = arith.constant 0 : i32
    return %c0_i32, %c0_i32_0 : i32, i32
  }
  func.func @transform_2(%arg0: i32) -> (i32, i32) {
    %c0_i32 = arith.constant 0 : i32
    %c0_i32_0 = arith.constant 0 : i32
    %c0_i32_1 = arith.constant 0 : i32
    return %c0_i32, %c0_i32_0 : i32, i32
  }
  func.func @transform_3(%arg0: i32) -> (i32, i32) {
    %c0_i32 = arith.constant 0 : i32
    %c0_i32_0 = arith.constant 0 : i32
    %c0_i32_1 = arith.constant 0 : i32
    return %c0_i32, %c0_i32_0 : i32, i32
  }
  func.func @transform_4(%arg0: i32) -> (i32, i32) {
    %c0_i32 = arith.constant 0 : i32
    %c0_i32_0 = arith.constant 0 : i32
    %c0_i32_1 = arith.constant 0 : i32
    return %c0_i32, %c0_i32_0 : i32, i32
  }
  func.func @transform_5(%arg0: i32) -> (i32, i32) {
    %c0_i32 = arith.constant 0 : i32
    %c0_i32_0 = arith.constant 0 : i32
    %c0_i32_1 = arith.constant 0 : i32
    return %c0_i32, %c0_i32_0 : i32, i32
  }
}

</mosaic_0001>

<bundles_post_ra>
// kernel: style_encoder_forward.12
= control target key start
LH: loop header
LB: loop body
LE: loop exit
PB: predicated region body
PF: predicated region fallthrough
CT: control target
= control target key end

     0   :  { %s475_s6 = smov 0   ;;  %s477_s7 = smov 0   ;;  %s619_s0 = inlined_call_operand.vmem [shape: f32[2,256,16], index: 0, kind: input, shape index: {}]   ;;  %s620_s1 = inlined_call_operand.vmem [shape: f32[2,256,16], index: 1, kind: output, shape index: {}]  }
   0x1   :  { %s479_s8 = smov 0  }
   0x2 LB: > { %s23_s9 = sadd.s32 1, %s459_s7  ;;  %p408_p0 = scmp.ge.s32.totalorder %s463_s8, 1  ;;  %s463_s8 = sphi %s479_s8, %s11_s8   ;;  %s459_s7 = sphi %s477_s7, %s622_s7   ;;  %s455_s6 = sphi %s475_s6, %s621_s6  }
   0x3   : > { %p25_p1 = scmp.ge.s32.totalorder %s23_s9, 2  ;;  %p108_p2 = scmp.lt.s32.totalorder %s463_s8, 3 }
   0x5   : > { %s624_s9 = smov (%p25_p1, %s23_s9), 0  ;;  %p109_p3 = pnand %p408_p0, %p108_p2 }
   0x6   : > { %p137_p4 = scmp.lt.s32.totalorder (!%p109_p3), %s455_s6, 1 }
   0x7   : > { %112 = sbr.rel (%p109_p3) target bundleno = 45 (0x2d), region = 24 }
   0xc   : > { %s626_s6 = smov (!%p137_p4, %s455_s6), 1  ;;  %vm284_vm0 = vcmask 130048  }
   0xd   : > { %s415_s10 = sshll.u32 %s626_s6, 8 }
   0xe   : > { %s496_s13 = scalar_lea.vmem %s619_s0, %s415_s10  ;;  %s504_s16 = scalar_lea.vmem %s620_s1, %s415_s10 }
   0xf   : > { %v156_v0 = vld [vmem:[%s496_s13] sm:$0xff]  ;;  %v157_v1 = vld [vmem:[%s496_s13 + $0x8] sm:$0xff]  ;;  %v158_v2 = vld [vmem:[%s496_s13 + $0x10] sm:$0xff] }
  0x10   : > { %vm188_vm1 = vcmp.ge.f32.partialorder %v156_v0, 0.0  ;;  %v220_v3 = vmul.f32 0.2, %v156_v0  ;;  %vm189_vm2 = vcmp.ge.f32.partialorder %v157_v1, 0.0  ;;  %v221_v4 = vmul.f32 0.2, %v157_v1 }
  0x11   : > { %vm190_vm3 = vcmp.ge.f32.partialorder %v158_v2, 0.0  ;;  %v222_v5 = vmul.f32 0.2, %v158_v2  ;;  %v159_v6 = vld [vmem:[%s496_s13 + $0x18] sm:$0xff]  ;;  %v160_v7 = vld [vmem:[%s496_s13 + $0x20] sm:$0xff]  ;;  %v161_v8 = vld [vmem:[%s496_s13 + $0x28] sm:$0xff] }
  0x12   : > { %v252_v9 = vsel %vm188_vm1, %v156_v0, %v220_v3  ;;  %v253_v10 = vsel %vm189_vm2, %v157_v1, %v221_v4  ;;  %vm191_vm4 = vcmp.ge.f32.partialorder %v159_v6, 0.0  ;;  %v223_v11 = vmul.f32 0.2, %v159_v6  ;;  %v162_v12 = vld [vmem:[%s496_s13 + $0x30] sm:$0xff]  ;;  %v163_v13 = vld [vmem:[%s496_s13 + $0x38] sm:$0xff]  ;;  %v164_v14 = vld [vmem:[%s496_s13 + $0x40] sm:$0xff] }
  0x13   : > { %285 = vst.msk [vmem:[%s504_s16] sm:$0xff] %vm284_vm0, %v252_v9  ;;  %286 = vst.msk [vmem:[%s504_s16 + $0x8] sm:$0xff] %vm284_vm0, %v253_v10  ;;  %v254_v15 = vsel %vm190_vm3, %v158_v2, %v222_v5  ;;  %vm192_vm5 = vcmp.ge.f32.partialorder %v160_v7, 0.0  ;;  %v224_v16 = vmul.f32 0.2, %v160_v7  ;;  %vm193_vm6 = vcmp.ge.f32.partialorder %v161_v8, 0.0 }
  0x14   : > { %v165_v17 = vld [vmem:[%s496_s13 + $0x48] sm:$0xff]  ;;  %287 = vst.msk [vmem:[%s504_s16 + $0x10] sm:$0xff] %vm284_vm0, %v254_v15  ;;  %v255_v18 = vsel %vm191_vm4, %v159_v6, %v223_v11  ;;  %v225_v19 = vmul.f32 0.2, %v161_v8  ;;  %vm194_vm7 = vcmp.ge.f32.partialorder %v162_v12, 0.0  ;;  %v166_v21 = vld [vmem:[%s496_s13 + $0x50] sm:$0xff] }
  0x15   : > { %v226_v20 = vmul.f32 0.2, %v162_v12  ;;  %288 = vst.msk [vmem:[%s504_s16 + $0x18] sm:$0xff] %vm284_vm0, %v255_v18  ;;  %v256_v22 = vsel %vm192_vm5, %v160_v7, %v224_v16  ;;  %vm195_vm8 = vcmp.ge.f32.partialorder %v163_v13, 0.0  ;;  %v227_v23 = vmul.f32 0.2, %v163_v13 }
  0x16   : > { %vm196_vm9 = vcmp.ge.f32.partialorder %v164_v14, 0.0  ;;  %v167_v24 = vld [vmem:[%s496_s13 + $0x58] sm:$0xff]  ;;  %v168_v25 = vld [vmem:[%s496_s13 + $0x60] sm:$0xff]  ;;  %289 = vst.msk [vmem:[%s504_s16 + $0x20] sm:$0xff] %vm284_vm0, %v256_v22  ;;  %v257_v26 = vsel %vm193_vm6, %v161_v8, %v225_v19  ;;  %v228_v28 = vmul.f32 0.2, %v164_v14 }
  0x17   : > { %v258_v27 = vsel %vm194_vm7, %v162_v12, %v226_v20  ;;  %vm197_vm10 = vcmp.ge.f32.partialorder %v165_v17, 0.0  ;;  %v169_v29 = vld [vmem:[%s496_s13 + $0x68] sm:$0xff]  ;;  %290 = vst.msk [vmem:[%s504_s16 + $0x28] sm:$0xff] %vm284_vm0, %v257_v26  ;;  %v259_v30 = vsel %vm195_vm8, %v163_v13, %v227_v23  ;;  %v229_v31 = vmul.f32 0.2, %v165_v17  ;;  %v170_v33 = vld [vmem:[%s496_s13 + $0x70] sm:$0xff] }
  0x18   : > { %291 = vst.msk [vmem:[%s504_s16 + $0x30] sm:$0xff] %vm284_vm0, %v258_v27  ;;  %vm198_vm11 = vcmp.ge.f32.partialorder %v166_v21, 0.0  ;;  %v230_v32 = vmul.f32 0.2, %v166_v21  ;;  %292 = vst.msk [vmem:[%s504_s16 + $0x38] sm:$0xff] %vm284_vm0, %v259_v30  ;;  %v260_v34 = vsel %vm196_vm9, %v164_v14, %v228_v28  ;;  %vm199_vm12 = vcmp.ge.f32.partialorder %v167_v24, 0.0 }
  0x19   : > { %v231_v35 = vmul.f32 0.2, %v167_v24  ;;  %vm200_vm13 = vcmp.ge.f32.partialorder %v168_v25, 0.0  ;;  %v171_v36 = vld [vmem:[%s496_s13 + $0x78] sm:$0xff]  ;;  %v172_v37 = vld [vmem:[%s496_s13 + $0x80] sm:$0xff]  ;;  %293 = vst.msk [vmem:[%s504_s16 + $0x40] sm:$0xff] %vm284_vm0, %v260_v34  ;;  %v261_v38 = vsel %vm197_vm10, %v165_v17, %v229_v31 }
  0x1a   : > { %v262_v39 = vsel %vm198_vm11, %v166_v21, %v230_v32  ;;  %v232_v40 = vmul.f32 0.2, %v168_v25  ;;  %vm201_vm14 = vcmp.ge.f32.partialorder %v169_v29, 0.0  ;;  %v173_v41 = vld [vmem:[%s496_s13 + $0x88] sm:$0xff]  ;;  %294 = vst.msk [vmem:[%s504_s16 + $0x48] sm:$0xff] %vm284_vm0, %v261_v38  ;;  %vm202_vm15 = vcmp.ge.f32.partialorder %v170_v33, 0.0 }
  0x1b   : > { %295 = vst.msk [vmem:[%s504_s16 + $0x50] sm:$0xff] %vm284_vm0, %v262_v39  ;;  %v263_v42 = vsel %vm199_vm12, %v167_v24, %v231_v35  ;;  %v233_v43 = vmul.f32 0.2, %v169_v29  ;;  %v234_v44 = vmul.f32 0.2, %v170_v33  ;;  %v174_v45 = vld [vmem:[%s496_s13 + $0x90] sm:$0xff] }
  0x1c   : > { %296 = vst.msk [vmem:[%s504_s16 + $0x58] sm:$0xff] %vm284_vm0, %v263_v42  ;;  %v264_v46 = vsel %vm200_vm13, %v168_v25, %v232_v40  ;;  %vm203_vm1 = vcmp.ge.f32.partialorder %v171_v36, 0.0  ;;  %v235_v47 = vmul.f32 0.2, %v171_v36  ;;  %vm204_vm2 = vcmp.ge.f32.partialorder %v172_v37, 0.0  ;;  %v175_v48 = vld [vmem:[%s496_s13 + $0x98] sm:$0xff] }
  0x1d   : > { %v176_v49 = vld [vmem:[%s496_s13 + $0xa0] sm:$0xff]  ;;  %297 = vst.msk [vmem:[%s504_s16 + $0x60] sm:$0xff] %vm284_vm0, %v264_v46  ;;  %v265_v50 = vsel %vm201_vm14, %v169_v29, %v233_v43  ;;  %v266_v51 = vsel %vm202_vm15, %v170_v33, %v234_v44  ;;  %v236_v52 = vmul.f32 0.2, %v172_v37  ;;  %vm205_vm3 = vcmp.ge.f32.partialorder %v173_v41, 0.0  ;;  %v177_v53 = vld [vmem:[%s496_s13 + $0xa8] sm:$0xff] }
  0x1e   : > { %298 = vst.msk [vmem:[%s504_s16 + $0x68] sm:$0xff] %vm284_vm0, %v265_v50  ;;  %299 = vst.msk [vmem:[%s504_s16 + $0x70] sm:$0xff] %vm284_vm0, %v266_v51  ;;  %v267_v54 = vsel %vm203_vm1, %v171_v36, %v235_v47  ;;  %v237_v55 = vmul.f32 0.2, %v173_v41  ;;  %vm206_vm4 = vcmp.ge.f32.partialorder %v174_v45, 0.0  ;;  %v178_v57 = vld [vmem:[%s496_s13 + $0xb0] sm:$0xff] }
  0x1f   : > { %v238_v56 = vmul.f32 0.2, %v174_v45  ;;  %300 = vst.msk [vmem:[%s504_s16 + $0x78] sm:$0xff] %vm284_vm0, %v267_v54  ;;  %v268_v58 = vsel %vm204_vm2, %v172_v37, %v236_v52  ;;  %vm207_vm5 = vcmp.ge.f32.partialorder %v175_v48, 0.0  ;;  %v239_v59 = vmul.f32 0.2, %v175_v48 }
  0x20   : > { %vm208_vm6 = vcmp.ge.f32.partialorder %v176_v49, 0.0  ;;  %v179_v60 = vld [vmem:[%s496_s13 + $0xb8] sm:$0xff]  ;;  %v180_v61 = vld [vmem:[%s496_s13 + $0xc0] sm:$0xff]  ;;  %301 = vst.msk [vmem:[%s504_s16 + $0x80] sm:$0xff] %vm284_vm0, %v268_v58  ;;  %v269_v62 = vsel %vm205_vm3, %v173_v41, %v237_v55  ;;  %v240_v0 = vmul.f32 0.2, %v176_v49 }
  0x21   : > { %v270_v63 = vsel %vm206_vm4, %v174_v45, %v238_v56  ;;  %vm209_vm7 = vcmp.ge.f32.partialorder %v177_v53, 0.0  ;;  %v181_v1 = vld [vmem:[%s496_s13 + $0xc8] sm:$0xff]  ;;  %302 = vst.msk [vmem:[%s504_s16 + $0x88] sm:$0xff] %vm284_vm0, %v269_v62  ;;  %v271_v2 = vsel %vm207_vm5, %v175_v48, %v239_v59  ;;  %v241_v3 = vmul.f32 0.2, %v177_v53  ;;  %v182_v5 = vld [vmem:[%s496_s13 + $0xd0] sm:$0xff] }
  0x22   : > { %303 = vst.msk [vmem:[%s504_s16 + $0x90] sm:$0xff] %vm284_vm0, %v270_v63  ;;  %vm210_vm8 = vcmp.ge.f32.partialorder %v178_v57, 0.0  ;;  %v242_v4 = vmul.f32 0.2, %v178_v57  ;;  %304 = vst.msk [vmem:[%s504_s16 + $0x98] sm:$0xff] %vm284_vm0, %v271_v2  ;;  %v272_v6 = vsel %vm208_vm6, %v176_v49, %v240_v0  ;;  %vm211_vm9 = vcmp.ge.f32.partialorder %v179_v60, 0.0 }
  0x23   : > { %v243_v7 = vmul.f32 0.2, %v179_v60  ;;  %vm212_vm10 = vcmp.ge.f32.partialorder %v180_v61, 0.0  ;;  %v183_v8 = vld [vmem:[%s496_s13 + $0xd8] sm:$0xff]  ;;  %v184_v9 = vld [vmem:[%s496_s13 + $0xe0] sm:$0xff]  ;;  %305 = vst.msk [vmem:[%s504_s16 + $0xa0] sm:$0xff] %vm284_vm0, %v272_v6  ;;  %v273_v10 = vsel %vm209_vm7, %v177_v53, %v241_v3 }
  0x24   : > { %v274_v11 = vsel %vm210_vm8, %v178_v57, %v242_v4  ;;  %v244_v12 = vmul.f32 0.2, %v180_v61  ;;  %vm213_vm11 = vcmp.ge.f32.partialorder %v181_v1, 0.0  ;;  %v185_v13 = vld [vmem:[%s496_s13 + $0xe8] sm:$0xff]  ;;  %306 = vst.msk [vmem:[%s504_s16 + $0xa8] sm:$0xff] %vm284_vm0, %v273_v10  ;;  %vm214_vm12 = vcmp.ge.f32.partialorder %v182_v5, 0.0 }
  0x25   : > { %307 = vst.msk [vmem:[%s504_s16 + $0xb0] sm:$0xff] %vm284_vm0, %v274_v11  ;;  %v275_v14 = vsel %vm211_vm9, %v179_v60, %v243_v7  ;;  %v245_v15 = vmul.f32 0.2, %v181_v1  ;;  %v246_v16 = vmul.f32 0.2, %v182_v5  ;;  %v186_v17 = vld [vmem:[%s496_s13 + $0xf0] sm:$0xff] }
  0x26   : > { %308 = vst.msk [vmem:[%s504_s16 + $0xb8] sm:$0xff] %vm284_vm0, %v275_v14  ;;  %v276_v18 = vsel %vm212_vm10, %v180_v61, %v244_v12  ;;  %vm215_vm13 = vcmp.ge.f32.partialorder %v183_v8, 0.0  ;;  %v247_v19 = vmul.f32 0.2, %v183_v8  ;;  %vm216_vm14 = vcmp.ge.f32.partialorder %v184_v9, 0.0  ;;  %v187_v20 = vld [vmem:[%s496_s13 + $0xf8] sm:$0xff] }
  0x27   : > { %309 = vst.msk [vmem:[%s504_s16 + $0xc0] sm:$0xff] %vm284_vm0, %v276_v18  ;;  %v277_v21 = vsel %vm213_vm11, %v181_v1, %v245_v15  ;;  %v278_v22 = vsel %vm214_vm12, %v182_v5, %v246_v16  ;;  %v248_v23 = vmul.f32 0.2, %v184_v9  ;;  %vm217_vm15 = vcmp.ge.f32.partialorder %v185_v13, 0.0 }
  0x28   : > { %310 = vst.msk [vmem:[%s504_s16 + $0xc8] sm:$0xff] %vm284_vm0, %v277_v21  ;;  %311 = vst.msk [vmem:[%s504_s16 + $0xd0] sm:$0xff] %vm284_vm0, %v278_v22  ;;  %v279_v24 = vsel %vm215_vm13, %v183_v8, %v247_v19  ;;  %v249_v25 = vmul.f32 0.2, %v185_v13  ;;  %vm218_vm1 = vcmp.ge.f32.partialorder %v186_v17, 0.0  ;;  %vm219_vm2 = vcmp.ge.f32.partialorder %v187_v20, 0.0 }
  0x29   : > { %v250_v26 = vmul.f32 0.2, %v186_v17  ;;  %312 = vst.msk [vmem:[%s504_s16 + $0xd8] sm:$0xff] %vm284_vm0, %v279_v24  ;;  %v280_v27 = vsel %vm216_vm14, %v184_v9, %v248_v23  ;;  %v251_v28 = vmul.f32 0.2, %v187_v20 }
  0x2a   : > { %313 = vst.msk [vmem:[%s504_s16 + $0xe0] sm:$0xff] %vm284_vm0, %v280_v27  ;;  %v281_v29 = vsel %vm217_vm15, %v185_v13, %v249_v25 }
  0x2b   : > { %v282_v30 = vsel %vm218_vm1, %v186_v17, %v250_v26  ;;  %314 = vst.msk [vmem:[%s504_s16 + $0xe8] sm:$0xff] %vm284_vm0, %v281_v29  ;;  %v283_v31 = vsel %vm219_vm2, %v187_v20, %v251_v28 }
  0x2c   : > { %315 = vst.msk [vmem:[%s504_s16 + $0xf0] sm:$0xff] %vm284_vm0, %v282_v30  ;;  %316 = vst.msk [vmem:[%s504_s16 + $0xf8] sm:$0xff] %vm284_vm0, %v283_v31 }
  0x2d PF: > { %s11_s8 = sadd.s32 1, %s463_s8   ;;  %s621_s6 = smov %s459_s7 }
  0x2e   : > { %p8_p5 = scmp.ge.s32.totalorder %s11_s8, 4   ;;  %s622_s7 = smov %s624_s9 }
  0x30   :  { %10 = sbr.rel (!%p8_p5) target bundleno = 2 (0x2), region = 54 }

// kernel: style_encoder_forward.10
= control target key start
LH: loop header
LB: loop body
LE: loop exit
PB: predicated region body
PF: predicated region fallthrough
CT: control target
= control target key end

     0   :  { %s3259_s12 = smov 0   ;;  %s3261_s13 = smov 0   ;;  %s4383_s0 = inlined_call_operand.vmem [shape: f32[2,256,27], index: 0, kind: input, shape index: {}]   ;;  %s4384_s1 = inlined_call_operand.vmem [shape: f32[27,16], index: 1, kind: input, shape index: {}]   ;;  %s4385_s2 = inlined_call_operand.vmem [shape: f32[1,16], index: 2, kind: input, shape index: {}]   ;;  %s4386_s3 = inlined_call_operand.vmem [shape: f32[2,256,16], index: 3, kind: output, shape index: {}]  }
   0x1   :  { %s3263_s14 = smov 0  }
   0x2 LB: > { %s39_s15 = sadd.s32 1, %s3232_s13  ;;  %p2627_p0 = scmp.ge.s32.totalorder %s3236_s14, 1  ;;  %s3236_s14 = sphi %s3263_s14, %s13_s14   ;;  %s3232_s13 = sphi %s3261_s13, %s4612_s13   ;;  %s3228_s12 = sphi %s3259_s12, %s4611_s12  }
   0x3   : > { %p41_p1 = scmp.ge.s32.totalorder %s39_s15, 2  ;;  %p203_p2 = scmp.lt.s32.totalorder %s3236_s14, 3 }
   0x5   : > { %s4614_s15 = smov (%p41_p1, %s39_s15), 0  ;;  %p204_p3 = pnand %p2627_p0, %p203_p2 }
   0x7   : > { %207 = sbr.rel (%p204_p3) target bundleno = 431 (0x1af), region = 32 }
   0xc   : > { %v394_v0 = vld [vmem:[%s4384_s1 + $0x18] sm:$0x7]  ;;  %vm492_vm0 = vcmask 1042432   ;;  %v393_v1 = vld [vmem:[%s4384_s1 + $0x10] sm:$0xff]  ;;  %v392_v2 = vld [vmem:[%s4384_s1 + $0x8] sm:$0xff]  ;;  %p253_p4 = scmp.lt.s32.totalorder %s3228_s12, 1 }
   0xd   : > { %v494_v3 = vsel %vm492_vm0, %v394_v0, 0  ;;  %v3286_v4 = vand.u32 4294901760, %v393_v1  ;;  %v3288_v5 = vand.u32 4294901760, %v392_v2  ;;  %v391_v6 = vld [vmem:[%s4384_s1] sm:$0xff]  ;;  %vm395_vm1 = vcmask 220160  }
   0xe   : > { %v3293_v7 = vand.u32 4294901760, %v494_v3  ;;  %v3295_v8 = vand.u32 4294901760, %v391_v6  ;;  %s4616_s12 = smov (!%p253_p4, %s3228_s12), 1  ;;  %vm294_vm2 = vcmask 130048  }
   0xf   : > { %v3300_v9 = vsub.f32 %v393_v1, %v3286_v4  ;;  %v3303_v10 = vsub.f32 %v392_v2, %v3288_v5  ;;  %s2635_s24 = sshll.u32 %s4616_s12, 8 }
  0x10   : > { %2853 = vmatprep.subr.mxu0 %v3293_v7  ;;  %v3307_v11 = vsub.f32 %v494_v3, %v3293_v7  ;;  %v3311_v12 = vsub.f32 %v391_v6, %v3295_v8  ;;  %s3325_s27 = scalar_lea.vmem %s4383_s0, %s2635_s24  ;;  %s4180_s5 = scalar_lea.vmem %s4386_s3, %s2635_s24 }
  0x11   : > { %2854 = vmatpush3.msra.mxu0 %v3293_v7  ;;  %v3315_v13 = vand.u32 4294901760, %v3300_v9  ;;  %v3318_v14 = vand.u32 4294901760, %v3303_v10  ;;  %v359_v16 = vld [vmem:[%s3325_s27] sm:$0xff]  ;;  %v360_v18 = vld [vmem:[%s3325_s27 + $0x8] sm:$0xff]  ;;  %v361_v19 = vld [vmem:[%s3325_s27 + $0x10] sm:$0xff] }
  0x12   : > { %2855 = vmatprep.subr.mxu0 %v3286_v4  ;;  %v3329_v15 = vand.u32 4294901760, %v3307_v11  ;;  %v3333_v17 = vand.u32 4294901760, %v3311_v12  ;;  %v397_v22 = vsel %vm395_vm1, %v359_v16, 0  ;;  %v400_v23 = vsel %vm395_vm1, %v360_v18, 0  ;;  %v362_v24 = vld [vmem:[%s3325_s27 + $0x18] sm:$0xff]  ;;  %v363_v29 = vld [vmem:[%s3325_s27 + $0x20] sm:$0xff] }
  0x13   : > { %2856 = vmatpush3.msra.mxu0 %v3286_v4  ;;  %v920_v20 = vsub.f32 %v3300_v9, %v3315_v13  ;;  %v927_v21 = vsub.f32 %v3303_v10, %v3318_v14  ;;  %v3348_v26 = vand.u32 4294901760, %v397_v22  ;;  %v3352_v28 = vand.u32 4294901760, %v400_v23  ;;  %v364_v30 = vld [vmem:[%s3325_s27 + $0x28] sm:$0xff]  ;;  %v365_v39 = vld [vmem:[%s3325_s27 + $0x30] sm:$0xff]  ;;  %v366_v40 = vld [vmem:[%s3325_s27 + $0x38] sm:$0xff] }
  0x14   : > { %v913_v25 = vsub.f32 %v3307_v11, %v3329_v15  ;;  %2857 = vmatprep.subr.mxu0 %v3288_v5  ;;  %v934_v27 = vsub.f32 %v3311_v12, %v3333_v17  ;;  %v403_v33 = vsel %vm395_vm1, %v361_v19, 0  ;;  %v406_v34 = vsel %vm395_vm1, %v362_v24, 0  ;;  %v367_v61 = vld [vmem:[%s3325_s27 + $0x40] sm:$0xff]  ;;  %v368_v62 = vld [vmem:[%s3325_s27 + $0x48] sm:$0xff]  ;;  %v370_v24 = vld [vmem:[%s3325_s27 + $0x58] sm:$0xff] }
  0x15   : > { %4447 = vst [vmem:[#allocation3_spill] sm:$0xff] %v3348_v26  ;;  %4448 = vst [vmem:[#allocation4_spill] sm:$0xff] %v3352_v28  ;;  %v921_v31 = vand.u32 4294901760, %v920_v20  ;;  %2858 = vmatpush3.msra.mxu0 %v3288_v5  ;;  %v928_v32 = vand.u32 4294901760, %v927_v21  ;;  %v3361_v36 = vsub.f32 %v397_v22, %v3348_v26  ;;  %v3364_v38 = vsub.f32 %v400_v23, %v3352_v28  ;;  %v369_v23 = vld [vmem:[%s3325_s27 + $0x50] sm:$0xff] }
  0x16   : > { %v914_v35 = vand.u32 4294901760, %v913_v25  ;;  %2859 = vmatprep.subr.mxu0 %v3295_v8  ;;  %v935_v37 = vand.u32 4294901760, %v934_v27  ;;  %2917 = vmatprep.mubr.f32.mxu1 %v3348_v26  ;;  %v3370_v41 = vand.u32 4294901760, %v403_v33  ;;  %v3372_v42 = vand.u32 4294901760, %v406_v34 }
  0x17   : > { %2860 = vmatpush3.msra.mxu0 %v3295_v8  ;;  %v409_v43 = vsel %vm395_vm1, %v363_v29, 0  ;;  %v412_v44 = vsel %vm395_vm1, %v364_v30, 0  ;;  %v4400_v45 = vand.u32 4294901760, %v3361_v36  ;;  %v4399_v46 = vand.u32 4294901760, %v3364_v38 }
  0x18   : > { %4449 = vst [vmem:[#allocation5_spill] sm:$0xff] %v3370_v41  ;;  %4450 = vst [vmem:[#allocation6_spill] sm:$0xff] %v3372_v42  ;;  %2909 = vmatprep.subr.mxu1 %v914_v35  ;;  %2965 = vmatprep.subr.mxu0 %v3307_v11  ;;  %v3379_v47 = vand.u32 4294901760, %v409_v43  ;;  %v3381_v48 = vand.u32 4294901760, %v412_v44  ;;  %v3384_v49 = vsub.f32 %v403_v33, %v3370_v41  ;;  %v415_v51 = vsel %vm395_vm1, %v365_v39, 0 }
  0x19   : > { %2910 = vmatpush3.msra.mxu1 %v914_v35  ;;  %v3387_v50 = vsub.f32 %v406_v34, %v3372_v42  ;;  %v418_v52 = vsel %vm395_vm1, %v366_v40, 0  ;;  %v568_v53 = vsub.f32 %v3361_v36, %v4400_v45  ;;  %v578_v54 = vsub.f32 %v3364_v38, %v4399_v46  ;;  %v371_v35 = vld [vmem:[%s3325_s27 + $0x60] sm:$0xff] }
  0x1a   : > { %4451 = vst [vmem:[#allocation7_spill] sm:$0xff] %v3379_v47  ;;  %4452 = vst [vmem:[#allocation8_spill] sm:$0xff] %v3381_v48  ;;  %2911 = vmatprep.subr.mxu1 %v921_v31  ;;  %v3398_v55 = vsub.f32 %v409_v43, %v3379_v47  ;;  %v3401_v56 = vsub.f32 %v412_v44, %v3381_v48  ;;  %v4398_v57 = vand.u32 4294901760, %v3384_v49  ;;  %v3405_v59 = vand.u32 4294901760, %v415_v51 }
  0x1b   : > { %2912 = vmatpush3.msra.mxu1 %v921_v31  ;;  %v4396_v58 = vand.u32 4294901760, %v3387_v50  ;;  %v3407_v60 = vand.u32 4294901760, %v418_v52  ;;  %v569_v63 = vand.u32 4294901760, %v568_v53  ;;  %v579_v0 = vand.u32 4294901760, %v578_v54  ;;  %v373_v54 = vld [vmem:[%s3325_s27 + $0x70] sm:$0xff] }
  0x1c   : > { %4453 = vst [vmem:[#allocation9_spill] sm:$0xff] %v3405_v59  ;;  %2913 = vmatprep.subr.mxu1 %v928_v32  ;;  %v4395_v1 = vand.u32 4294901760, %v3398_v55  ;;  %v4393_v2 = vand.u32 4294901760, %v3401_v56  ;;  %v588_v3 = vsub.f32 %v3384_v49, %v4398_v57  ;;  %v3420_v16 = vsub.f32 %v415_v51, %v3405_v59 }
  0x1d   : > { %4454 = vst [vmem:[#allocation10_spill] sm:$0xff] %v3407_v60  ;;  %2914 = vmatpush3.msra.mxu1 %v928_v32  ;;  %v598_v6 = vsub.f32 %v3387_v50, %v4396_v58  ;;  %v3423_v18 = vsub.f32 %v418_v52, %v3407_v60  ;;  %2861 = vmatprep.mubr.f32.mxu0 %v569_v63  ;;  %v421_v21 = vsel %vm395_vm1, %v367_v61, 0  ;;  %v424_v22 = vsel %vm395_vm1, %v368_v62, 0  ;;  %v374_v61 = vld [vmem:[%s3325_s27 + $0x78] sm:$0xff] }
  0x1e   : > { %2915 = vmatprep.subr.mxu1 %v935_v37  ;;  %v608_v19 = vsub.f32 %v3398_v55, %v4395_v1  ;;  %v618_v20 = vsub.f32 %v3401_v56, %v4393_v2  ;;  %2862 = vmatmul.mubr.f32.vlgmr.msra.gmra.mxu0 %v579_v0  ;;  %v589_v25 = vand.u32 4294901760, %v588_v3  ;;  %v4390_v29 = vand.u32 4294901760, %v3420_v16  ;;  %v380_v2 = vld [vmem:[%s3325_s27 + $0xa8] sm:$0xff] }
  0x1f   : > { %2916 = vmatpush3.msra.mxu1 %v935_v37  ;;  %v599_v27 = vand.u32 4294901760, %v598_v6  ;;  %v4389_v30 = vand.u32 4294901760, %v3423_v18  ;;  %2966 = vmatpush3.msra.mxu0 %v3307_v11  ;;  %v3439_v33 = vand.u32 4294901760, %v421_v21  ;;  %v3441_v34 = vand.u32 4294901760, %v424_v22  ;;  %v372_v37 = vld [vmem:[%s3325_s27 + $0x68] sm:$0xff] }
  0x20   : > { %2918 = vmatmul.mubr.f32.vlgmr.msra.gmra.mxu1 %v3352_v28  ;;  %v609_v31 = vand.u32 4294901760, %v608_v19  ;;  %v619_v32 = vand.u32 4294901760, %v618_v20  ;;  %3021 = vmatprep.subr.mxu1 %v3293_v7  ;;  %v628_v39 = vsub.f32 %v3420_v16, %v4390_v29  ;;  %v427_v40 = vsel %vm395_vm1, %v369_v23, 0 }
  0x21   : > { %4455 = vst [vmem:[#allocation11_spill] sm:$0xff] %v3439_v33  ;;  %4456 = vst [vmem:[#allocation12_spill] sm:$0xff] %v3441_v34  ;;  %2864 = vmatprep.mubr.f32.mxu0 %v589_v25  ;;  %v638_v11 = vsub.f32 %v3423_v18, %v4389_v30  ;;  %v430_v43 = vsel %vm395_vm1, %v370_v24, 0  ;;  %3022 = vmatpush3.msra.mxu1 %v3293_v7  ;;  %v3457_v44 = vsub.f32 %v421_v21, %v3439_v33  ;;  %v378_v30 = vld [vmem:[%s3325_s27 + $0x98] sm:$0xff] }
  0x22   : > { %2920 = vmatprep.mubr.f32.mxu1 %v3370_v41  ;;  %v3460_v51 = vsub.f32 %v424_v22, %v3441_v34  ;;  %v3462_v52 = vand.u32 4294901760, %v427_v40  ;;  %v3464_v53 = vand.u32 4294901760, %v430_v43  ;;  %2865 = vmatmul.mubr.f32.gmra.mxu0 %v599_v27  ;;  %v629_v62 = vand.u32 4294901760, %v628_v39 }
  0x23   : > { %v639_v63 = vand.u32 4294901760, %v638_v11  ;;  %2967 = vmatprep.subr.mxu0 %v3300_v9  ;;  %v433_v0 = vsel %vm395_vm1, %v371_v35, 0  ;;  %v436_v3 = vsel %vm395_vm1, %v372_v37, 0  ;;  %2867 = vmatprep.mubr.f32.mxu0 %v609_v31  ;;  %v4388_v6 = vand.u32 4294901760, %v3457_v44 }
  0x24   : > { %4457 = vst [vmem:[#allocation13_spill] sm:$0xff] %v3462_v52  ;;  %4458 = vst [vmem:[#allocation14_spill] sm:$0xff] %v3464_v53  ;;  %2921 = vmatmul.mubr.f32.gmra.mxu1 %v3372_v42  ;;  %v4387_v19 = vand.u32 4294901760, %v3460_v51  ;;  %v3475_v20 = vsub.f32 %v427_v40, %v3462_v52  ;;  %v3478_v21 = vsub.f32 %v430_v43, %v3464_v53  ;;  %2968 = vmatpush3.msra.mxu0 %v3300_v9  ;;  %v375_v43 = vld [vmem:[%s3325_s27 + $0x80] sm:$0xff] }
  0x25   : > { %2923 = vmatprep.mubr.f32.mxu1 %v3379_v47  ;;  %v3482_v22 = vand.u32 4294901760, %v433_v0  ;;  %v3484_v23 = vand.u32 4294901760, %v436_v3  ;;  %v439_v24 = vsel %vm395_vm1, %v373_v54, 0  ;;  %v442_v25 = vsel %vm395_vm1, %v374_v61, 0  ;;  %3023 = vmatprep.subr.mxu1 %v3286_v4  ;;  %v376_v54 = vld [vmem:[%s3325_s27 + $0x88] sm:$0xff] }
  0x26   : > { %v648_v27 = vsub.f32 %v3457_v44, %v4388_v6  ;;  %v658_v31 = vsub.f32 %v3460_v51, %v4387_v19  ;;  %v4391_v9 = vand.u32 4294901760, %v3475_v20  ;;  %v4392_v35 = vand.u32 4294901760, %v3478_v21  ;;  %2969 = vmatprep.subr.mxu0 %v3303_v10  ;;  %2868 = vmatmul.mubr.f32.gmra.mxu0 %v619_v32  ;;  %v377_v6 = vld [vmem:[%s3325_s27 + $0x90] sm:$0xff] }
  0x27   : > { %4459 = vst [vmem:[#allocation15_spill] sm:$0xff] %v3482_v22  ;;  %4460 = vst [vmem:[#allocation16_spill] sm:$0xff] %v3484_v23  ;;  %3024 = vmatpush3.msra.mxu1 %v3286_v4  ;;  %v3500_v37 = vsub.f32 %v433_v0, %v3482_v22  ;;  %v3503_v39 = vsub.f32 %v436_v3, %v3484_v23  ;;  %v3505_v11 = vand.u32 4294901760, %v439_v24  ;;  %v3507_v40 = vand.u32 4294901760, %v442_v25 }
  0x28   : > { %2924 = vmatmul.mubr.f32.gmra.mxu1 %v3381_v48  ;;  %2870 = vmatprep.mubr.f32.mxu0 %v629_v62  ;;  %v649_v32 = vand.u32 4294901760, %v648_v27  ;;  %v668_v61 = vsub.f32 %v3475_v20, %v4391_v9  ;;  %v659_v29 = vand.u32 4294901760, %v658_v31  ;;  %v445_v27 = vsel %vm395_vm1, %v375_v43, 0 }
  0x29   : > { %4461 = vst [vmem:[#allocation17_spill] sm:$0xff] %v3505_v11  ;;  %4462 = vst [vmem:[#allocation18_spill] sm:$0xff] %v3507_v40  ;;  %2926 = vmatprep.mubr.f32.mxu1 %v3405_v59  ;;  %v4394_v0 = vand.u32 4294901760, %v3500_v37  ;;  %v4397_v3 = vand.u32 4294901760, %v3503_v39  ;;  %v3519_v19 = vsub.f32 %v439_v24, %v3505_v11  ;;  %2970 = vmatpush3.msra.mxu0 %v3303_v10  ;;  %v448_v9 = vsel %vm395_vm1, %v376_v54, 0 }
  0x2a   : > { %v3525_v62 = vsub.f32 %v442_v25, %v3507_v40  ;;  %3025 = vmatprep.subr.mxu1 %v3288_v5  ;;  %2971 = vmatprep.subr.mxu0 %v3311_v12  ;;  %v669_v24 = vand.u32 4294901760, %v668_v61  ;;  %v678_v10 = vsub.f32 %v3478_v21, %v4392_v35  ;;  %v3540_v43 = vand.u32 4294901760, %v445_v27  ;;  %v379_v35 = vld [vmem:[%s3325_s27 + $0xa0] sm:$0xff] }
  0x2b   : > { %2871 = vmatmul.mubr.f32.gmra.mxu0 %v639_v63  ;;  %v688_v25 = vsub.f32 %v3500_v37, %v4394_v0  ;;  %v4401_v31 = vand.u32 4294901760, %v3519_v19  ;;  %3026 = vmatpush3.msra.mxu1 %v3288_v5  ;;  %v3542_v63 = vand.u32 4294901760, %v448_v9  ;;  %v451_v54 = vsel %vm395_vm1, %v377_v6, 0 }
  0x2c   : > { %2927 = vmatmul.mubr.f32.gmra.mxu1 %v3407_v60  ;;  %2873 = vmatprep.mubr.f32.mxu0 %v649_v32  ;;  %4463 = vst [vmem:[#allocation19_spill] sm:$0xff] %v3540_v43  ;;  %v454_v61 = vsel %vm395_vm1, %v378_v30, 0  ;;  %v698_v0 = vsub.f32 %v3503_v39, %v4397_v3  ;;  %v4406_v32 = vand.u32 4294901760, %v3525_v62  ;;  %v3555_v1 = vsub.f32 %v445_v27, %v3540_v43  ;;  %v381_v30 = vld [vmem:[%s3325_s27 + $0xb0] sm:$0xff] }
  0x2d   : > { %4464 = vst [vmem:[#allocation20_spill] sm:$0xff] %v3542_v63  ;;  %2929 = vmatprep.mubr.f32.mxu1 %v3439_v33  ;;  %2972 = vmatpush3.msra.mxu0 %v3311_v12  ;;  %v3558_v58 = vsub.f32 %v448_v9, %v3542_v63  ;;  %v3560_v6 = vand.u32 4294901760, %v451_v54  ;;  %v679_v3 = vand.u32 4294901760, %v678_v10  ;;  %v3565_v57 = vand.u32 4294901760, %v454_v61  ;;  %v382_v10 = vld [vmem:[%s3325_s27 + $0xb8] sm:$0xff]  ;;  %v384_v33 = vld [vmem:[%s3325_s27 + $0xc8] sm:$0xff] }
  0x2e   : > { %3027 = vmatprep.subr.mxu1 %v3295_v8  ;;  %3077 = vmatprep.subr.mxu0 %v3329_v15  ;;  %v457_v12 = vsel %vm395_vm1, %v379_v35, 0  ;;  %v460_v27 = vsel %vm395_vm1, %v380_v2, 0  ;;  %v689_v9 = vand.u32 4294901760, %v688_v25  ;;  %v708_v46 = vsub.f32 %v3519_v19, %v4401_v31 }
  0x2f   : > { %2874 = vmatmul.mubr.f32.gmra.mxu0 %v659_v29  ;;  %4465 = vst [vmem:[#allocation21_spill] sm:$0xff] %v3565_v57  ;;  %3028 = vmatpush3.msra.mxu1 %v3295_v8  ;;  %v3576_v29 = vsub.f32 %v451_v54, %v3560_v6  ;;  %v3580_v2 = vand.u32 4294901760, %v457_v12  ;;  %v463_v35 = vsel %vm395_vm1, %v381_v30, 0  ;;  %v718_v25 = vsub.f32 %v3525_v62, %v4406_v32 }
  0x30   : > { %2930 = vmatmul.mubr.f32.gmra.mxu1 %v3441_v34  ;;  %2876 = vmatprep.mubr.f32.mxu0 %v669_v24  ;;  %v699_v24 = vand.u32 4294901760, %v698_v0  ;;  %v3588_v45 = vand.u32 4294901760, %v460_v27  ;;  %v3591_v54 = vsub.f32 %v454_v61, %v3565_v57  ;;  %v3596_v30 = vand.u32 4294901760, %v463_v35  ;;  %v383_v34 = vld [vmem:[%s3325_s27 + $0xc0] sm:$0xff] }
  0x31   : > { %2932 = vmatprep.mubr.f32.mxu1 %v3462_v52  ;;  %4466 = vst [vmem:[#allocation22_spill] sm:$0xff] %v3580_v2  ;;  %3133 = vmatprep.subr.mxu1 %v3293_v7  ;;  %v3594_v52 = vsub.f32 %v457_v12, %v3580_v2  ;;  %v466_v0 = vsel %vm395_vm1, %v382_v10, 0  ;;  %v709_v32 = vand.u32 4294901760, %v708_v46  ;;  %v4467_v31 = vand.u32 4294901760, %v3555_v1 }
  0x32   : > { %v3608_v12 = vsub.f32 %v460_v27, %v3588_v45  ;;  %v3611_v60 = vsub.f32 %v463_v35, %v3596_v30  ;;  %v3613_v10 = vand.u32 4294901760, %v466_v0  ;;  %v469_v46 = vsel %vm395_vm1, %v383_v34, 0 }
  0x33   : > { %2877 = vmatmul.mubr.f32.gmra.mxu0 %v679_v3  ;;  %v728_v3 = vsub.f32 %v3555_v1, %v4467_v31  ;;  %v4468_v31 = vand.u32 4294901760, %v3558_v58  ;;  %v4469_v59 = vand.u32 4294901760, %v3576_v29  ;;  %v3626_v48 = vand.u32 4294901760, %v469_v46 }
  0x34   : > { %2933 = vmatmul.mubr.f32.gmra.mxu1 %v3464_v53  ;;  %2879 = vmatprep.mubr.f32.mxu0 %v689_v9  ;;  %v385_v9 = vld [vmem:[%s3325_s27 + $0xd0] sm:$0xff]  ;;  %v719_v53 = vand.u32 4294901760, %v718_v25 }
  0x35   : > { %2935 = vmatprep.mubr.f32.mxu1 %v3482_v22  ;;  %v738_v61 = vsub.f32 %v3558_v58, %v4468_v31  ;;  %v729_v35 = vand.u32 4294901760, %v728_v3  ;;  %v748_v34 = vsub.f32 %v3576_v29, %v4469_v59  ;;  %v475_v25 = vsel %vm395_vm1, %v385_v9, 0  ;;  %v386_v31 = vld [vmem:[%s3325_s27 + $0xd8] sm:$0xff]  ;;  %v387_v3 = vld [vmem:[%s3325_s27 + $0xe0] sm:$0xff]  ;;  %v388_v22 = vld [vmem:[%s3325_s27 + $0xe8] sm:$0xff] }
  0x37   : > { %2880 = vmatmul.mubr.f32.gmra.mxu0 %v699_v24  ;;  %v472_v24 = vsel %vm395_vm1, %v384_v33, 0  ;;  %v739_v59 = vand.u32 4294901760, %v738_v61  ;;  %v749_v27 = vand.u32 4294901760, %v748_v34  ;;  %v478_v61 = vsel %vm395_vm1, %v386_v31, 0 }
  0x38   : > { %2936 = vmatmul.mubr.f32.gmra.mxu1 %v3484_v23  ;;  %2882 = vmatprep.mubr.f32.mxu0 %v709_v32  ;;  %v3635_v32 = vsub.f32 %v466_v0, %v3613_v10  ;;  %v4470_v23 = vand.u32 4294901760, %v3591_v54  ;;  %v3644_v47 = vand.u32 4294901760, %v472_v24  ;;  %v3648_v0 = vsub.f32 %v469_v46, %v3626_v48 }
  0x39   : > { %2938 = vmatprep.mubr.f32.mxu1 %v3505_v11  ;;  %v4471_v11 = vand.u32 4294901760, %v3594_v52  ;;  %v484_v46 = vsel %vm395_vm1, %v388_v22, 0 }
  0x3a   : > { %v758_v33 = vsub.f32 %v3591_v54, %v4470_v23  ;;  %v481_v23 = vsel %vm395_vm1, %v387_v3, 0  ;;  %v3667_v3 = vand.u32 4294901760, %v478_v61  ;;  %v4474_v26 = vand.u32 4294901760, %v3635_v32 }
  0x3b   : > { %2883 = vmatmul.mubr.f32.gmra.mxu0 %v719_v53  ;;  %v768_v9 = vsub.f32 %v3594_v52, %v4471_v11  ;;  %v3650_v53 = vand.u32 4294901760, %v475_v25  ;;  %v4472_v11 = vand.u32 4294901760, %v3608_v12 }
  0x3c   : > { %2939 = vmatmul.mubr.f32.gmra.mxu1 %v3507_v40  ;;  %2885 = vmatprep.mubr.f32.mxu0 %v729_v35  ;;  %v4473_v35 = vand.u32 4294901760, %v3611_v60  ;;  %v389_v40 = vld [vmem:[%s3325_s27 + $0xf0] sm:$0xff]  ;;  %v759_v41 = vand.u32 4294901760, %v758_v33 }
  0x3d   : > { %2941 = vmatprep.mubr.f32.mxu1 %v3540_v43  ;;  %v778_v42 = vsub.f32 %v3608_v12, %v4472_v11  ;;  %v769_v31 = vand.u32 4294901760, %v768_v9  ;;  %v3665_v43 = vsub.f32 %v472_v24, %v3644_v47  ;;  %v3672_v28 = vsub.f32 %v475_v25, %v3650_v53 }
  0x3e   : > { %v788_v34 = vsub.f32 %v3611_v60, %v4473_v35  ;;  %v3674_v35 = vand.u32 4294901760, %v481_v23  ;;  %v487_v24 = vsel %vm395_vm1, %v389_v40, 0  ;;  %v3685_v25 = vsub.f32 %v478_v61, %v3667_v3 }
  0x3f   : > { %2886 = vmatmul.mubr.f32.gmra.mxu0 %v739_v59  ;;  %v390_v59 = vld [vmem:[%s3325_s27 + $0xf8] sm:$0xff]  ;;  %v779_v33 = vand.u32 4294901760, %v778_v42  ;;  %v4443_v11 = vand.u32 4294901760, %v3665_v43  ;;  %v4475_v42 = vand.u32 4294901760, %v3648_v0 }
  0x40   : > { %2942 = vmatmul.mubr.f32.gmra.mxu1 %v3542_v63  ;;  %2888 = vmatprep.mubr.f32.mxu0 %v749_v27  ;;  %v789_v9 = vand.u32 4294901760, %v788_v34  ;;  %v798_v27 = vsub.f32 %v3635_v32, %v4474_v26  ;;  %v3687_v63 = vand.u32 4294901760, %v484_v46  ;;  %v490_v22 = vsel %vm395_vm1, %v390_v59, 0 }
  0x41   : > { %2944 = vmatprep.mubr.f32.mxu1 %v3560_v6  ;;  %v808_v40 = vsub.f32 %v3648_v0, %v4475_v42  ;;  %v4444_v34 = vand.u32 4294901760, %v3672_v28  ;;  %v3696_v26 = vsub.f32 %v481_v23, %v3674_v35  ;;  %v818_v59 = vsub.f32 %v3665_v43, %v4443_v11 }
  0x42   : > { %v799_v61 = vand.u32 4294901760, %v798_v27  ;;  %v3708_v42 = vand.u32 4294901760, %v490_v22 }
  0x43   : > { %2889 = vmatmul.mubr.f32.gmra.mxu0 %v759_v41  ;;  %v3698_v41 = vand.u32 4294901760, %v487_v24  ;;  %v809_v23 = vand.u32 4294901760, %v808_v40  ;;  %v828_v27 = vsub.f32 %v3672_v28, %v4444_v34 }
  0x44   : > { %2945 = vmatmul.mubr.f32.gmra.mxu1 %v3565_v57  ;;  %2891 = vmatprep.mubr.f32.mxu0 %v769_v31  ;;  %v4445_v31 = vand.u32 4294901760, %v3685_v25  ;;  %v3706_v57 = vsub.f32 %v484_v46, %v3687_v63  ;;  %v819_v46 = vand.u32 4294901760, %v818_v59  ;;  %v3724_v40 = vsub.f32 %v490_v22, %v3708_v42 }
  0x45   : > { %2947 = vmatprep.mubr.f32.mxu1 %v3580_v2  ;;  %v3716_v2 = vsub.f32 %v487_v24, %v3698_v41  ;;  %v829_v34 = vand.u32 4294901760, %v828_v27 }
  0x46   : > { %v838_v11 = vsub.f32 %v3685_v25, %v4445_v31  ;;  %v877_v22 = vand.u32 4294901760, %v3724_v40 }
  0x47   : > { %2892 = vmatmul.mubr.f32.gmra.mxu0 %v779_v33  ;;  %v4446_v33 = vand.u32 4294901760, %v3696_v26 }
  0x48   : > { %2948 = vmatmul.mubr.f32.gmra.mxu1 %v3588_v45  ;;  %2894 = vmatprep.mubr.f32.mxu0 %v789_v9  ;;  %v857_v9 = vand.u32 4294901760, %v3706_v57  ;;  %v839_v59 = vand.u32 4294901760, %v838_v11  ;;  %v878_v11 = vsub.f32 %v3724_v40, %v877_v22 }
  0x49   : > { %2950 = vmatprep.mubr.f32.mxu1 %v3596_v30  ;;  %v848_v24 = vsub.f32 %v3696_v26, %v4446_v33 }
  0x4a   : > { %v858_v31 = vsub.f32 %v3706_v57, %v857_v9 }
  0x4b   : > { %2895 = vmatmul.mubr.f32.gmra.mxu0 %v799_v61  ;;  %v867_v61 = vand.u32 4294901760, %v3716_v2 }
  0x4c   : > { %2951 = vmatmul.mubr.f32.gmra.mxu1 %v3613_v10  ;;  %2897 = vmatprep.mubr.f32.mxu0 %v809_v23  ;;  %v849_v23 = vand.u32 4294901760, %v848_v24  ;;  %v859_v33 = vand.u32 4294901760, %v858_v31  ;;  %v4476_v31 = vand.u32 4294901760, %v3361_v36  ;;  %v4478_v24 = vand.u32 4294901760, %v3384_v49 }
  0x4d   : > { %2953 = vmatprep.mubr.f32.mxu1 %v3626_v48  ;;  %v868_v27 = vsub.f32 %v3716_v2, %v867_v61 }
  0x4f   : > { %2898 = vmatmul.mubr.f32.gmra.mxu0 %v819_v46  ;;  %v869_v46 = vand.u32 4294901760, %v868_v27  ;;  %v4524_v27 = vld [vmem:[#allocation22_spill] sm:$0xff] }
  0x50   : > { %2954 = vmatmul.mubr.f32.gmra.mxu1 %v3644_v47  ;;  %2900 = vmatprep.mubr.f32.mxu0 %v829_v34  ;;  %v879_v34 = vand.u32 4294901760, %v878_v11 }
  0x51   : > { %2956 = vmatprep.mubr.f32.mxu1 %v3650_v53 }
  0x53   : > { %2901 = vmatmul.mubr.f32.gmra.mxu0 %v839_v59  ;;  %v4521_v59 = vld [vmem:[#allocation19_spill] sm:$0xff] }
  0x54   : > { %2957 = vmatmul.mubr.f32.gmra.mxu1 %v3667_v3  ;;  %2903 = vmatprep.mubr.f32.mxu0 %v849_v23  ;;  %v4523_v23 = vld [vmem:[#allocation21_spill] sm:$0xff] }
  0x55   : > { %2959 = vmatprep.mubr.f32.mxu1 %v3674_v35 }
  0x57   : > { %2904 = vmatmul.mubr.f32.gmra.mxu0 %v859_v33  ;;  %v4477_v33 = vand.u32 4294901760, %v3364_v38 }
  0x58   : > { %2960 = vmatmul.mubr.f32.gmra.mxu1 %v3687_v63  ;;  %2906 = vmatprep.mubr.f32.mxu0 %v869_v46 }
  0x59   : > { %2962 = vmatprep.mubr.f32.mxu1 %v3698_v41 }
  0x5b   : > { %2907 = vmatmul.mubr.f32.gmra.mxu0 %v879_v34 }
  0x5c   : > { %2963 = vmatmul.mubr.f32.gmra.mxu1 %v3708_v42  ;;  %2973 = vmatprep.mubr.f32.mxu0 %v3361_v36  ;;  %v4479_v36 = vand.u32 4294901760, %v3387_v50 }
  0x5d   : > { %3029 = vmatprep.mubr.f32.mxu1 %v4476_v31 }
  0x5f   : > { %2974 = vmatmul.mubr.f32.vlgmr.msra.gmra.mxu0 %v3364_v38  ;;  %v4482_v38 = vand.u32 4294901760, %v3420_v16 }
  0x60   : > { %3078 = vmatpush3.msra.mxu0 %v3329_v15  ;;  %3030 = vmatmul.mubr.f32.vlgmr.msra.gmra.mxu1 %v4477_v33  ;;  %v4480_v15 = vand.u32 4294901760, %v3398_v55 }
  0x61   : > { %3134 = vmatpush3.msra.mxu1 %v3293_v7  ;;  %2976 = vmatprep.mubr.f32.mxu0 %v3384_v49  ;;  %v4481_v7 = vand.u32 4294901760, %v3401_v56  ;;  %v4487_v49 = vand.u32 4294901760, %v3478_v21 }
  0x62   : > { %3032 = vmatprep.mubr.f32.mxu1 %v4478_v24  ;;  %3079 = vmatprep.subr.mxu0 %v3315_v13 }
  0x63   : > { %2977 = vmatmul.mubr.f32.gmra.mxu0 %v3387_v50  ;;  %3135 = vmatprep.subr.mxu1 %v3286_v4  ;;  %v4490_v50 = vand.u32 4294901760, %v3519_v19 }
  0x64   : > { %3033 = vmatmul.mubr.f32.gmra.mxu1 %v4479_v36  ;;  %2979 = vmatprep.mubr.f32.mxu0 %v3398_v55  ;;  %v4491_v55 = vand.u32 4294901760, %v3525_v62 }
  0x65   : > { %3035 = vmatprep.mubr.f32.mxu1 %v4480_v15  ;;  %3080 = vmatpush3.msra.mxu0 %v3315_v13  ;;  %v4484_v13 = vand.u32 4294901760, %v3457_v44 }
  0x66   : > { %3136 = vmatpush3.msra.mxu1 %v3286_v4  ;;  %3081 = vmatprep.subr.mxu0 %v3318_v14  ;;  %v4483_v4 = vand.u32 4294901760, %v3423_v18 }
  0x67   : > { %2980 = vmatmul.mubr.f32.gmra.mxu0 %v3401_v56  ;;  %3137 = vmatprep.subr.mxu1 %v3288_v5  ;;  %v4492_v56 = vand.u32 4294901760, %v3555_v1 }
  0x68   : > { %3036 = vmatmul.mubr.f32.gmra.mxu1 %v4481_v7  ;;  %2982 = vmatprep.mubr.f32.mxu0 %v3420_v16  ;;  %v4493_v16 = vand.u32 4294901760, %v3558_v58 }
  0x69   : > { %3038 = vmatprep.mubr.f32.mxu1 %v4482_v38  ;;  %3082 = vmatpush3.msra.mxu0 %v3318_v14  ;;  %v4486_v14 = vand.u32 4294901760, %v3475_v20 }
  0x6a   : > { %3138 = vmatpush3.msra.mxu1 %v3288_v5  ;;  %3083 = vmatprep.subr.mxu0 %v3333_v17  ;;  %v4485_v5 = vand.u32 4294901760, %v3460_v51 }
  0x6b   : > { %2983 = vmatmul.mubr.f32.gmra.mxu0 %v3423_v18  ;;  %3139 = vmatprep.subr.mxu1 %v3295_v8  ;;  %v4494_v18 = vand.u32 4294901760, %v3576_v29 }
  0x6c   : > { %3039 = vmatmul.mubr.f32.gmra.mxu1 %v4483_v4  ;;  %2985 = vmatprep.mubr.f32.mxu0 %v3457_v44  ;;  %v4495_v44 = vand.u32 4294901760, %v3591_v54 }
  0x6d   : > { %3041 = vmatprep.mubr.f32.mxu1 %v4484_v13  ;;  %3084 = vmatpush3.msra.mxu0 %v3333_v17  ;;  %v4488_v17 = vand.u32 4294901760, %v3500_v37 }
  0x6e   : > { %3140 = vmatpush3.msra.mxu1 %v3295_v8  ;;  %v4489_v8 = vand.u32 4294901760, %v3503_v39 }
  0x6f   : > { %2986 = vmatmul.mubr.f32.gmra.mxu0 %v3460_v51  ;;  %v4498_v51 = vand.u32 4294901760, %v3611_v60 }
  0x70   : > { %3042 = vmatmul.mubr.f32.gmra.mxu1 %v4485_v5  ;;  %2988 = vmatprep.mubr.f32.mxu0 %v3475_v20  ;;  %v4501_v20 = vand.u32 4294901760, %v3665_v43 }
  0x71   : > { %3044 = vmatprep.mubr.f32.mxu1 %v4486_v14 }
  0x73   : > { %2989 = vmatmul.mubr.f32.gmra.mxu0 %v3478_v21  ;;  %v4503_v21 = vand.u32 4294901760, %v3685_v25 }
  0x74   : > { %3045 = vmatmul.mubr.f32.gmra.mxu1 %v4487_v49  ;;  %2991 = vmatprep.mubr.f32.mxu0 %v3500_v37  ;;  %v4504_v37 = vand.u32 4294901760, %v3696_v26 }
  0x75   : > { %3047 = vmatprep.mubr.f32.mxu1 %v4488_v17 }
  0x77   : > { %2992 = vmatmul.mubr.f32.gmra.mxu0 %v3503_v39  ;;  %v4506_v39 = vld [vmem:[#allocation4_spill] sm:$0xff] }
  0x78   : > { %3048 = vmatmul.mubr.f32.gmra.mxu1 %v4489_v8  ;;  %2994 = vmatprep.mubr.f32.mxu0 %v3519_v19  ;;  %v4499_v19 = vand.u32 4294901760, %v3635_v32 }
  0x79   : > { %3050 = vmatprep.mubr.f32.mxu1 %v4490_v50 }
  0x7b   : > { %2995 = vmatmul.mubr.f32.gmra.mxu0 %v3525_v62  ;;  %v4508_v62 = vld [vmem:[#allocation6_spill] sm:$0xff] }
  0x7c   : > { %3051 = vmatmul.mubr.f32.gmra.mxu1 %v4491_v55  ;;  %2997 = vmatprep.mubr.f32.mxu0 %v3555_v1  ;;  %v4496_v1 = vand.u32 4294901760, %v3594_v52 }
  0x7d   : > { %3053 = vmatprep.mubr.f32.mxu1 %v4492_v56 }
  0x7f   : > { %2998 = vmatmul.mubr.f32.gmra.mxu0 %v3558_v58  ;;  %v4497_v58 = vand.u32 4294901760, %v3608_v12 }
  0x80   : > { %3054 = vmatmul.mubr.f32.gmra.mxu1 %v4493_v16  ;;  %3000 = vmatprep.mubr.f32.mxu0 %v3576_v29  ;;  %v4510_v29 = vld [vmem:[#allocation8_spill] sm:$0xff] }
  0x81   : > { %3056 = vmatprep.mubr.f32.mxu1 %v4494_v18 }
  0x83   : > { %3001 = vmatmul.mubr.f32.gmra.mxu0 %v3591_v54  ;;  %v4512_v54 = vld [vmem:[#allocation10_spill] sm:$0xff] }
  0x84   : > { %3057 = vmatmul.mubr.f32.gmra.mxu1 %v4495_v44  ;;  %3003 = vmatprep.mubr.f32.mxu0 %v3594_v52  ;;  %v4500_v52 = vand.u32 4294901760, %v3648_v0 }
  0x85   : > { %3059 = vmatprep.mubr.f32.mxu1 %v4496_v1 }
  0x87   : > { %3004 = vmatmul.mubr.f32.gmra.mxu0 %v3608_v12  ;;  %v4513_v12 = vld [vmem:[#allocation11_spill] sm:$0xff] }
  0x88   : > { %3060 = vmatmul.mubr.f32.gmra.mxu1 %v4497_v58  ;;  %3006 = vmatprep.mubr.f32.mxu0 %v3611_v60  ;;  %v4502_v60 = vand.u32 4294901760, %v3672_v28 }
  0x89   : > { %3062 = vmatprep.mubr.f32.mxu1 %v4498_v51 }
  0x8b   : > { %3007 = vmatmul.mubr.f32.gmra.mxu0 %v3635_v32  ;;  %v4514_v32 = vld [vmem:[#allocation12_spill] sm:$0xff] }
  0x8c   : > { %3063 = vmatmul.mubr.f32.gmra.mxu1 %v4499_v19  ;;  %3009 = vmatprep.mubr.f32.mxu0 %v3648_v0  ;;  %v4515_v0 = vld [vmem:[#allocation13_spill] sm:$0xff] }
  0x8d   : > { %3065 = vmatprep.mubr.f32.mxu1 %v4500_v52 }
  0x8f   : > { %3010 = vmatmul.mubr.f32.gmra.mxu0 %v3665_v43  ;;  %v4509_v43 = vld [vmem:[#allocation7_spill] sm:$0xff] }
  0x90   : > { %3066 = vmatmul.mubr.f32.gmra.mxu1 %v4501_v20  ;;  %3012 = vmatprep.mubr.f32.mxu0 %v3672_v28  ;;  %v4505_v28 = vld [vmem:[#allocation3_spill] sm:$0xff] }
  0x91   : > { %3068 = vmatprep.mubr.f32.mxu1 %v4502_v60 }
  0x93   : > { %3013 = vmatmul.mubr.f32.gmra.mxu0 %v3685_v25  ;;  %v4516_v25 = vld [vmem:[#allocation14_spill] sm:$0xff] }
  0x94   : > { %3069 = vmatmul.mubr.f32.gmra.mxu1 %v4503_v21  ;;  %3015 = vmatprep.mubr.f32.mxu0 %v3696_v26  ;;  %v4517_v26 = vld [vmem:[#allocation15_spill] sm:$0xff] }
  0x95   : > { %3071 = vmatprep.mubr.f32.mxu1 %v4504_v37 }
  0x97   : > { %3016 = vmatmul.mubr.f32.gmra.mxu0 %v3706_v57  ;;  %v4507_v57 = vld [vmem:[#allocation5_spill] sm:$0xff] }
  0x98   : > { %3072 = vmatmul.mubr.f32.gmra.mxu1 %v857_v9  ;;  %3018 = vmatprep.mubr.f32.mxu0 %v3716_v2  ;;  %v4511_v2 = vld [vmem:[#allocation9_spill] sm:$0xff]  ;;  %v4518_v9 = vld [vmem:[#allocation16_spill] sm:$0xff] }
  0x99   : > { %3074 = vmatprep.mubr.f32.mxu1 %v867_v61  ;;  %v4520_v61 = vld [vmem:[#allocation18_spill] sm:$0xff] }
  0x9b   : > { %3019 = vmatmul.mubr.f32.gmra.mxu0 %v3724_v40  ;;  %v4519_v40 = vld [vmem:[#allocation17_spill] sm:$0xff] }
  0x9c   : > { %3075 = vmatmul.mubr.f32.gmra.mxu1 %v877_v22  ;;  %3085 = vmatprep.mubr.f32.mxu0 %v4505_v28  ;;  %v4522_v22 = vld [vmem:[#allocation20_spill] sm:$0xff] }
  0x9d   : > { %3141 = vmatprep.mubr.f32.mxu1 %v4505_v28 }
  0x9f   : > { %3086 = vmatmul.mubr.f32.vlgmr.msra.gmra.mxu0 %v4506_v39 }
  0xa0   : > { %3142 = vmatmul.mubr.f32.vlgmr.msra.gmra.mxu1 %v4506_v39  ;;  %3088 = vmatprep.mubr.f32.mxu0 %v4507_v57 }
  0xa1   : > { %3144 = vmatprep.mubr.f32.mxu1 %v4507_v57 }
  0xa3   : > { %3089 = vmatmul.mubr.f32.gmra.mxu0 %v4508_v62 }
  0xa4   : > { %3145 = vmatmul.mubr.f32.gmra.mxu1 %v4508_v62  ;;  %3091 = vmatprep.mubr.f32.mxu0 %v4509_v43 }
  0xa5   : > { %3147 = vmatprep.mubr.f32.mxu1 %v4509_v43 }
  0xa7   : > { %3092 = vmatmul.mubr.f32.gmra.mxu0 %v4510_v29 }
  0xa8   : > { %3148 = vmatmul.mubr.f32.gmra.mxu1 %v4510_v29  ;;  %3094 = vmatprep.mubr.f32.mxu0 %v4511_v2 }
  0xa9   : > { %3150 = vmatprep.mubr.f32.mxu1 %v4511_v2 }
  0xab   : > { %3095 = vmatmul.mubr.f32.gmra.mxu0 %v4512_v54 }
  0xac   : > { %3151 = vmatmul.mubr.f32.gmra.mxu1 %v4512_v54  ;;  %3097 = vmatprep.mubr.f32.mxu0 %v4513_v12 }
  0xad   : > { %3153 = vmatprep.mubr.f32.mxu1 %v4513_v12 }
  0xaf   : > { %3098 = vmatmul.mubr.f32.gmra.mxu0 %v4514_v32 }
  0xb0   : > { %3154 = vmatmul.mubr.f32.gmra.mxu1 %v4514_v32  ;;  %3100 = vmatprep.mubr.f32.mxu0 %v4515_v0 }
  0xb1   : > { %3156 = vmatprep.mubr.f32.mxu1 %v4515_v0 }
  0xb3   : > { %3101 = vmatmul.mubr.f32.gmra.mxu0 %v4516_v25 }
  0xb4   : > { %3157 = vmatmul.mubr.f32.gmra.mxu1 %v4516_v25  ;;  %3103 = vmatprep.mubr.f32.mxu0 %v4517_v26 }
  0xb5   : > { %3159 = vmatprep.mubr.f32.mxu1 %v4517_v26 }
  0xb7   : > { %3104 = vmatmul.mubr.f32.gmra.mxu0 %v4518_v9 }
  0xb8   : > { %3160 = vmatmul.mubr.f32.gmra.mxu1 %v4518_v9  ;;  %3106 = vmatprep.mubr.f32.mxu0 %v4519_v40 }
  0xb9   : > { %3162 = vmatprep.mubr.f32.mxu1 %v4519_v40 }
  0xbb   : > { %3107 = vmatmul.mubr.f32.gmra.mxu0 %v4520_v61 }
  0xbc   : > { %3163 = vmatmul.mubr.f32.gmra.mxu1 %v4520_v61  ;;  %3109 = vmatprep.mubr.f32.mxu0 %v4521_v59 }
  0xbd   : > { %3165 = vmatprep.mubr.f32.mxu1 %v4521_v59 }
  0xbf   : > { %3110 = vmatmul.mubr.f32.gmra.mxu0 %v4522_v22 }
  0xc0   : > { %3166 = vmatmul.mubr.f32.gmra.mxu1 %v4522_v22  ;;  %3112 = vmatprep.mubr.f32.mxu0 %v3560_v6 }
  0xc1   : > { %3168 = vmatprep.mubr.f32.mxu1 %v3560_v6 }
  0xc3   : > { %3113 = vmatmul.mubr.f32.gmra.mxu0 %v4523_v23 }
  0xc4   : > { %3169 = vmatmul.mubr.f32.gmra.mxu1 %v4523_v23  ;;  %3115 = vmatprep.mubr.f32.mxu0 %v4524_v27 }
  0xc5   : > { %3171 = vmatprep.mubr.f32.mxu1 %v4524_v27 }
  0xc7   : > { %3116 = vmatmul.mubr.f32.gmra.mxu0 %v3588_v45 }
  0xc8   : > { %3172 = vmatmul.mubr.f32.gmra.mxu1 %v3588_v45  ;;  %3118 = vmatprep.mubr.f32.mxu0 %v3596_v30  ;;  %v3238_v45 = vmov 0.0  }
  0xc9   : > { %3174 = vmatprep.mubr.f32.mxu1 %v3596_v30  ;;  %296 = vst.msk [vmem:[#allocation2 + $0x8] sm:$0xff] %vm294_vm2, %v3238_v45  ;;  %295 = vst.msk [vmem:[#allocation2] sm:$0xff] %vm294_vm2, %v3238_v45 }
  0xca   : > { %297 = vst.msk [vmem:[#allocation2 + $0x10] sm:$0xff] %vm294_vm2, %v3238_v45  ;;  %298 = vst.msk [vmem:[#allocation2 + $0x18] sm:$0xff] %vm294_vm2, %v3238_v45 }
  0xcb   : > { %3119 = vmatmul.mubr.f32.gmra.mxu0 %v3613_v10  ;;  %299 = vst.msk [vmem:[#allocation2 + $0x20] sm:$0xff] %vm294_vm2, %v3238_v45  ;;  %300 = vst.msk [vmem:[#allocation2 + $0x28] sm:$0xff] %vm294_vm2, %v3238_v45 }
  0xcc   : > { %3175 = vmatmul.mubr.f32.gmra.mxu1 %v3613_v10  ;;  %3121 = vmatprep.mubr.f32.mxu0 %v3626_v48  ;;  %301 = vst.msk [vmem:[#allocation2 + $0x30] sm:$0xff] %vm294_vm2, %v3238_v45  ;;  %302 = vst.msk [vmem:[#allocation2 + $0x38] sm:$0xff] %vm294_vm2, %v3238_v45 }
  0xcd   : > { %3177 = vmatprep.mubr.f32.mxu1 %v3626_v48  ;;  %303 = vst.msk [vmem:[#allocation2 + $0x40] sm:$0xff] %vm294_vm2, %v3238_v45  ;;  %304 = vst.msk [vmem:[#allocation2 + $0x48] sm:$0xff] %vm294_vm2, %v3238_v45 }
  0xce   : > { %305 = vst.msk [vmem:[#allocation2 + $0x50] sm:$0xff] %vm294_vm2, %v3238_v45  ;;  %306 = vst.msk [vmem:[#allocation2 + $0x58] sm:$0xff] %vm294_vm2, %v3238_v45 }
  0xcf   : > { %3122 = vmatmul.mubr.f32.gmra.mxu0 %v3644_v47  ;;  %307 = vst.msk [vmem:[#allocation2 + $0x60] sm:$0xff] %vm294_vm2, %v3238_v45  ;;  %308 = vst.msk [vmem:[#allocation2 + $0x68] sm:$0xff] %vm294_vm2, %v3238_v45 }
  0xd0   : > { %3178 = vmatmul.mubr.f32.gmra.mxu1 %v3644_v47  ;;  %3124 = vmatprep.mubr.f32.mxu0 %v3650_v53  ;;  %309 = vst.msk [vmem:[#allocation2 + $0x70] sm:$0xff] %vm294_vm2, %v3238_v45  ;;  %310 = vst.msk [vmem:[#allocation2 + $0x78] sm:$0xff] %vm294_vm2, %v3238_v45 }
  0xd1   : > { %3180 = vmatprep.mubr.f32.mxu1 %v3650_v53  ;;  %311 = vst.msk [vmem:[#allocation2 + $0x80] sm:$0xff] %vm294_vm2, %v3238_v45  ;;  %312 = vst.msk [vmem:[#allocation2 + $0x88] sm:$0xff] %vm294_vm2, %v3238_v45 }
  0xd2   : > { %313 = vst.msk [vmem:[#allocation2 + $0x90] sm:$0xff] %vm294_vm2, %v3238_v45  ;;  %314 = vst.msk [vmem:[#allocation2 + $0x98] sm:$0xff] %vm294_vm2, %v3238_v45 }
  0xd3   : > { %3125 = vmatmul.mubr.f32.gmra.mxu0 %v3667_v3  ;;  %315 = vst.msk [vmem:[#allocation2 + $0xa0] sm:$0xff] %vm294_vm2, %v3238_v45  ;;  %316 = vst.msk [vmem:[#allocation2 + $0xa8] sm:$0xff] %vm294_vm2, %v3238_v45 }
  0xd4   : > { %3181 = vmatmul.mubr.f32.gmra.mxu1 %v3667_v3  ;;  %3127 = vmatprep.mubr.f32.mxu0 %v3674_v35  ;;  %317 = vst.msk [vmem:[#allocation2 + $0xb0] sm:$0xff] %vm294_vm2, %v3238_v45  ;;  %318 = vst.msk [vmem:[#allocation2 + $0xb8] sm:$0xff] %vm294_vm2, %v3238_v45 }
  0xd5   : > { %3183 = vmatprep.mubr.f32.mxu1 %v3674_v35  ;;  %319 = vst.msk [vmem:[#allocation2 + $0xc0] sm:$0xff] %vm294_vm2, %v3238_v45  ;;  %320 = vst.msk [vmem:[#allocation2 + $0xc8] sm:$0xff] %vm294_vm2, %v3238_v45 }
  0xd6   : > { %321 = vst.msk [vmem:[#allocation2 + $0xd0] sm:$0xff] %vm294_vm2, %v3238_v45  ;;  %322 = vst.msk [vmem:[#allocation2 + $0xd8] sm:$0xff] %vm294_vm2, %v3238_v45 }
  0xd7   : > { %3128 = vmatmul.mubr.f32.gmra.mxu0 %v3687_v63  ;;  %323 = vst.msk [vmem:[#allocation2 + $0xe0] sm:$0xff] %vm294_vm2, %v3238_v45  ;;  %324 = vst.msk [vmem:[#allocation2 + $0xe8] sm:$0xff] %vm294_vm2, %v3238_v45 }
  0xd8   : > { %3184 = vmatmul.mubr.f32.gmra.mxu1 %v3687_v63  ;;  %3130 = vmatprep.mubr.f32.mxu0 %v3698_v41  ;;  %325 = vst.msk [vmem:[#allocation2 + $0xf0] sm:$0xff] %vm294_vm2, %v3238_v45  ;;  %326 = vst.msk [vmem:[#allocation2 + $0xf8] sm:$0xff] %vm294_vm2, %v3238_v45 }
  0xd9   : > { %3186 = vmatprep.mubr.f32.mxu1 %v3698_v41 }
  0xdb   : > { %3131 = vmatmul.mubr.f32.gmra.mxu0 %v3708_v42 }
  0xdc   : > { %3187 = vmatmul.mubr.f32.gmra.mxu1 %v3708_v42 }
  0xde   : > { %v2863_v47 = vpop.f32.mrf.mxu0 }
  0xe0   : > { %v2919_v48 = vpop.f32.mrf.mxu1  ;;  %v571_v6 = vpop.f32.mrf.mxu0 }
  0xe1   : > { %v3955_v63 = vadd.f32 %v2919_v48, %v2863_v47 }
  0xe2   : > { %v972_v30 = vpop.f32.mrf.mxu1  ;;  %v2866_v53 = vpop.f32.mrf.mxu0 }
  0xe3   : > { %v3957_v10 = vadd.f32 %v972_v30, %v571_v6 }
  0xe4   : > { %v2922_v3 = vpop.f32.mrf.mxu1  ;;  %v591_v41 = vpop.f32.mrf.mxu0 }
  0xe5   : > { %v3959_v35 = vadd.f32 %v2922_v3, %v2866_v53 }
  0xe6   : > { %v984_v42 = vpop.f32.mrf.mxu1  ;;  %v2869_v46 = vpop.f32.mrf.mxu0 }
  0xe7   : > { %v3961_v11 = vadd.f32 %v984_v42, %v591_v41 }
  0xe8   : > { %v2925_v34 = vpop.f32.mrf.mxu1  ;;  %v611_v33 = vpop.f32.mrf.mxu0 }
  0xe9   : > { %v3963_v31 = vadd.f32 %v2925_v34, %v2869_v46 }
  0xea   : > { %v996_v24 = vpop.f32.mrf.mxu1 }
  0xeb   : > { %v3965_v36 = vadd.f32 %v996_v24, %v611_v33  ;;  %v2872_v15 = vpop.f32.mrf.mxu0 }
  0xec   : > { %v2928_v7 = vpop.f32.mrf.mxu1 }
  0xed   : > { %v3967_v38 = vadd.f32 %v2928_v7, %v2872_v15  ;;  %v631_v4 = vpop.f32.mrf.mxu0 }
  0xee   : > { %v1008_v13 = vpop.f32.mrf.mxu1 }
  0xef   : > { %v3969_v5 = vadd.f32 %v1008_v13, %v631_v4  ;;  %v2875_v14 = vpop.f32.mrf.mxu0 }
  0xf0   : > { %v2931_v49 = vpop.f32.mrf.mxu1 }
  0xf1   : > { %v3971_v17 = vadd.f32 %v2931_v49, %v2875_v14  ;;  %v651_v8 = vpop.f32.mrf.mxu0 }
  0xf2   : > { %v1020_v50 = vpop.f32.mrf.mxu1 }
  0xf3   : > { %v3973_v55 = vadd.f32 %v1020_v50, %v651_v8  ;;  %v2878_v56 = vpop.f32.mrf.mxu0 }
  0xf4   : > { %v2934_v16 = vpop.f32.mrf.mxu1 }
  0xf5   : > { %v3975_v18 = vadd.f32 %v2934_v16, %v2878_v56  ;;  %v671_v44 = vpop.f32.mrf.mxu0 }
  0xf6   : > { %v1032_v1 = vpop.f32.mrf.mxu1 }
  0xf7   : > { %v3977_v58 = vadd.f32 %v1032_v1, %v671_v44  ;;  %v2881_v51 = vpop.f32.mrf.mxu0 }
  0xf8   : > { %v2937_v19 = vpop.f32.mrf.mxu1 }
  0xf9   : > { %v3979_v52 = vadd.f32 %v2937_v19, %v2881_v51  ;;  %v691_v20 = vpop.f32.mrf.mxu0 }
  0xfa   : > { %v1044_v60 = vpop.f32.mrf.mxu1 }
  0xfb   : > { %v3981_v21 = vadd.f32 %v1044_v60, %v691_v20  ;;  %v2884_v37 = vpop.f32.mrf.mxu0 }
  0xfc   : > { %v2940_v28 = vpop.f32.mrf.mxu1 }
  0xfd   : > { %v3983_v39 = vadd.f32 %v2940_v28, %v2884_v37  ;;  %v711_v57 = vpop.f32.mrf.mxu0 }
  0xfe   : > { %v1056_v62 = vpop.f32.mrf.mxu1 }
  0xff   : > { %v3985_v43 = vadd.f32 %v1056_v62, %v711_v57  ;;  %v2887_v29 = vpop.f32.mrf.mxu0 }
 0x100   : > { %v2943_v2 = vpop.f32.mrf.mxu1 }
 0x101   : > { %v3987_v54 = vadd.f32 %v2943_v2, %v2887_v29  ;;  %v731_v12 = vpop.f32.mrf.mxu0 }
 0x102   : > { %v1068_v32 = vpop.f32.mrf.mxu1 }
 0x103   : > { %v3989_v0 = vadd.f32 %v1068_v32, %v731_v12  ;;  %v2890_v25 = vpop.f32.mrf.mxu0 }
 0x104   : > { %v2946_v26 = vpop.f32.mrf.mxu1 }
 0x105   : > { %v3991_v9 = vadd.f32 %v2946_v26, %v2890_v25  ;;  %v751_v40 = vpop.f32.mrf.mxu0 }
 0x106   : > { %v1080_v61 = vpop.f32.mrf.mxu1 }
 0x107   : > { %4525 = vst [vmem:[#allocation3_spill] sm:$0xff] %v3991_v9  ;;  %v3993_v59 = vadd.f32 %v1080_v61, %v751_v40  ;;  %v2893_v22 = vpop.f32.mrf.mxu0 }
 0x108   : > { %v2949_v23 = vpop.f32.mrf.mxu1 }
 0x109   : > { %4526 = vst [vmem:[#allocation4_spill] sm:$0xff] %v3993_v59  ;;  %v3995_v27 = vadd.f32 %v2949_v23, %v2893_v22  ;;  %v771_v45 = vpop.f32.mrf.mxu0 }
 0x10a   : > { %v1092_v47 = vpop.f32.mrf.mxu1 }
 0x10b   : > { %4527 = vst [vmem:[#allocation5_spill] sm:$0xff] %v3995_v27  ;;  %v3997_v48 = vadd.f32 %v1092_v47, %v771_v45  ;;  %v2896_v6 = vpop.f32.mrf.mxu0 }
 0x10c   : > { %v2952_v30 = vpop.f32.mrf.mxu1 }
 0x10d   : > { %4528 = vst [vmem:[#allocation6_spill] sm:$0xff] %v3997_v48  ;;  %v3999_v53 = vadd.f32 %v2952_v30, %v2896_v6  ;;  %v791_v3 = vpop.f32.mrf.mxu0 }
 0x10e   : > { %v1104_v41 = vpop.f32.mrf.mxu1 }
 0x10f   : > { %4529 = vst [vmem:[#allocation7_spill] sm:$0xff] %v3999_v53  ;;  %v4001_v42 = vadd.f32 %v1104_v41, %v791_v3  ;;  %v2899_v46 = vpop.f32.mrf.mxu0 }
 0x110   : > { %v2955_v34 = vpop.f32.mrf.mxu1 }
 0x111   : > { %4530 = vst [vmem:[#allocation8_spill] sm:$0xff] %v4001_v42  ;;  %v4003_v33 = vadd.f32 %v2955_v34, %v2899_v46  ;;  %v811_v24 = vpop.f32.mrf.mxu0 }
 0x112   : > { %v1116_v15 = vpop.f32.mrf.mxu1 }
 0x113   : > { %4531 = vst [vmem:[#allocation9_spill] sm:$0xff] %v4003_v33  ;;  %v4005_v7 = vadd.f32 %v1116_v15, %v811_v24  ;;  %v2902_v4 = vpop.f32.mrf.mxu0 }
 0x114   : > { %v2958_v13 = vpop.f32.mrf.mxu1 }
 0x115   : > { %4532 = vst [vmem:[#allocation10_spill] sm:$0xff] %v4005_v7  ;;  %v4007_v14 = vadd.f32 %v2958_v13, %v2902_v4  ;;  %v831_v49 = vpop.f32.mrf.mxu0 }
 0x116   : > { %v1128_v8 = vpop.f32.mrf.mxu1 }
 0x117   : > { %4533 = vst [vmem:[#allocation11_spill] sm:$0xff] %v4007_v14  ;;  %v4009_v50 = vadd.f32 %v1128_v8, %v831_v49  ;;  %v2905_v56 = vpop.f32.mrf.mxu0 }
 0x118   : > { %v2961_v16 = vpop.f32.mrf.mxu1 }
 0x119   : > { %4534 = vst [vmem:[#allocation12_spill] sm:$0xff] %v4009_v50  ;;  %v4011_v44 = vadd.f32 %v2961_v16, %v2905_v56  ;;  %v851_v1 = vpop.f32.mrf.mxu0 }
 0x11a   : > { %v1140_v51 = vpop.f32.mrf.mxu1 }
 0x11b   : > { %4535 = vst [vmem:[#allocation13_spill] sm:$0xff] %v4011_v44  ;;  %v4013_v19 = vadd.f32 %v1140_v51, %v851_v1  ;;  %v2908_v20 = vpop.f32.mrf.mxu0 }
 0x11c   : > { %v2964_v60 = vpop.f32.mrf.mxu1 }
 0x11d   : > { %4536 = vst [vmem:[#allocation14_spill] sm:$0xff] %v4013_v19  ;;  %v4015_v37 = vadd.f32 %v2964_v60, %v2908_v20  ;;  %v871_v28 = vpop.f32.mrf.mxu0 }
 0x11e   : > { %v1152_v57 = vpop.f32.mrf.mxu1 }
 0x11f   : > { %4537 = vst [vmem:[#allocation15_spill] sm:$0xff] %v4015_v37  ;;  %v4017_v62 = vadd.f32 %v1152_v57, %v871_v28  ;;  %v2975_v29 = vpop.f32.mrf.mxu0 }
 0x120   : > { %v4019_v2 = vpop.f32.mrf.mxu1 }
 0x121   : > { %4538 = vst [vmem:[#allocation16_spill] sm:$0xff] %v4017_v62  ;;  %v1238_v12 = vpop.f32.mrf.mxu0 }
 0x122   : > { %v4021_v32 = vpop.f32.mrf.mxu1 }
 0x123   : > { %v2978_v25 = vpop.f32.mrf.mxu0 }
 0x124   : > { %v4023_v26 = vpop.f32.mrf.mxu1 }
 0x125   : > { %v4025_v40 = vpop.f32.mrf.mxu0 }
 0x126   : > { %v4027_v61 = vpop.f32.mrf.mxu1 }
 0x127   : > { %v4029_v22 = vpop.f32.mrf.mxu0 }
 0x128   : > { %v4031_v23 = vpop.f32.mrf.mxu1 }
 0x129   : > { %v4033_v45 = vpop.f32.mrf.mxu0 }
 0x12a   : > { %v4035_v47 = vpop.f32.mrf.mxu1 }
 0x12b   : > { %v4037_v6 = vpop.f32.mrf.mxu0 }
 0x12c   : > { %v4039_v30 = vpop.f32.mrf.mxu1 }
 0x12d   : > { %v4041_v3 = vpop.f32.mrf.mxu0 }
 0x12e   : > { %v4043_v41 = vpop.f32.mrf.mxu1 }
 0x12f   : > { %v4045_v46 = vpop.f32.mrf.mxu0 }
 0x130   : > { %v4047_v34 = vpop.f32.mrf.mxu1 }
 0x131   : > { %v4049_v24 = vpop.f32.mrf.mxu0 }
 0x132   : > { %v4051_v15 = vpop.f32.mrf.mxu1 }
 0x133   : > { %v4053_v4 = vpop.f32.mrf.mxu0 }
 0x134   : > { %v4055_v13 = vpop.f32.mrf.mxu1 }
 0x135   : > { %v4057_v49 = vpop.f32.mrf.mxu0 }
 0x136   : > { %v4059_v8 = vpop.f32.mrf.mxu1 }
 0x137   : > { %v4061_v56 = vpop.f32.mrf.mxu0 }
 0x138   : > { %v4063_v16 = vpop.f32.mrf.mxu1 }
 0x139   : > { %v4065_v1 = vpop.f32.mrf.mxu0 }
 0x13a   : > { %v4067_v51 = vpop.f32.mrf.mxu1 }
 0x13b   : > { %v4069_v20 = vpop.f32.mrf.mxu0 }
 0x13c   : > { %v4071_v60 = vpop.f32.mrf.mxu1 }
 0x13d   : > { %v4073_v28 = vpop.f32.mrf.mxu0 }
 0x13e   : > { %v4075_v57 = vpop.f32.mrf.mxu1 }
 0x13f   : > { %v4077_v62 = vpop.f32.mrf.mxu0 }
 0x140   : > { %v4079_v37 = vpop.f32.mrf.mxu1 }
 0x141   : > { %v4081_v19 = vpop.f32.mrf.mxu0 }
 0x142   : > { %v4083_v44 = vpop.f32.mrf.mxu1 }
 0x143   : > { %4539 = vst [vmem:[#allocation17_spill] sm:$0xff] %v4083_v44  ;;  %v4085_v50 = vpop.f32.mrf.mxu0 }
 0x144   : > { %4540 = vst [vmem:[#allocation18_spill] sm:$0xff] %v4085_v50  ;;  %v4087_v14 = vpop.f32.mrf.mxu1 }
 0x145   : > { %4541 = vst [vmem:[#allocation19_spill] sm:$0xff] %v4087_v14  ;;  %v4089_v7 = vpop.f32.mrf.mxu0 }
 0x146   : > { %4542 = vst [vmem:[#allocation20_spill] sm:$0xff] %v4089_v7  ;;  %v4091_v33 = vpop.f32.mrf.mxu1 }
 0x147   : > { %4543 = vst [vmem:[#allocation21_spill] sm:$0xff] %v4091_v33  ;;  %v4093_v42 = vpop.f32.mrf.mxu0 }
 0x148   : > { %4544 = vst [vmem:[#allocation22_spill] sm:$0xff] %v4093_v42  ;;  %v4095_v53 = vpop.f32.mrf.mxu1 }
 0x149   : > { %4545 = vst [vmem:[#allocation23_spill] sm:$0xff] %v4095_v53  ;;  %v4097_v48 = vpop.f32.mrf.mxu0 }
 0x14a   : > { %4546 = vst [vmem:[#allocation24_spill] sm:$0xff] %v4097_v48  ;;  %v4099_v27 = vpop.f32.mrf.mxu1 }
 0x14b   : > { %4547 = vst [vmem:[#allocation25_spill] sm:$0xff] %v4099_v27  ;;  %v4101_v59 = vpop.f32.mrf.mxu0 }
 0x14c   : > { %4548 = vst [vmem:[#allocation26_spill] sm:$0xff] %v4101_v59  ;;  %v4103_v9 = vpop.f32.mrf.mxu1 }
 0x14d   : > { %4549 = vst [vmem:[#allocation27_spill] sm:$0xff] %v4103_v9  ;;  %v4105_v44 = vpop.f32.mrf.mxu0 }
 0x14e   : > { %4550 = vst [vmem:[#allocation28_spill] sm:$0xff] %v4105_v44  ;;  %v4107_v50 = vpop.f32.mrf.mxu1 }
 0x14f   : > { %4551 = vst [vmem:[#allocation29_spill] sm:$0xff] %v4107_v50  ;;  %v4109_v14 = vpop.f32.mrf.mxu0 }
 0x150   : > { %4552 = vst [vmem:[#allocation30_spill] sm:$0xff] %v4109_v14  ;;  %v4111_v7 = vpop.f32.mrf.mxu1 }
 0x151   : > { %4553 = vst [vmem:[#allocation31_spill] sm:$0xff] %v4111_v7  ;;  %v4113_v33 = vpop.f32.mrf.mxu0  ;;  %v1246_v7 = vadd.f32 %v2975_v29, %v3955_v63  ;;  %v1253_v63 = vadd.f32 %v4025_v40, %v3961_v11 }
 0x152   : > { %4554 = vst [vmem:[#allocation32_spill] sm:$0xff] %v4113_v33  ;;  %v4115_v42 = vpop.f32.mrf.mxu1 }
 0x153   : > { %4555 = vst [vmem:[#allocation33_spill] sm:$0xff] %v4115_v42  ;;  %v4117_v53 = vpop.f32.mrf.mxu0  ;;  %v1239_v42 = vadd.f32 %v1238_v12, %v3957_v10  ;;  %v1274_v10 = vadd.f32 %v4029_v22, %v3963_v31  ;;  %v328_v12 = vld [vmem:[#allocation2 + $0x8] sm:$0xff]  ;;  %v330_v22 = vld [vmem:[#allocation2 + $0x18] sm:$0xff] }
 0x154   : > { %4556 = vst [vmem:[#allocation34_spill] sm:$0xff] %v4117_v53  ;;  %v4119_v48 = vpop.f32.mrf.mxu1 }
 0x155   : > { %4557 = vst [vmem:[#allocation35_spill] sm:$0xff] %v4119_v48  ;;  %v4121_v27 = vpop.f32.mrf.mxu0  ;;  %v1573_v31 = vadd.f32 %v4031_v23, %v1274_v10 }
 0x156   : > { %4558 = vst [vmem:[#allocation36_spill] sm:$0xff] %v4121_v27  ;;  %v4123_v59 = vpop.f32.mrf.mxu1 }
 0x157   : > { %4559 = vst [vmem:[#allocation37_spill] sm:$0xff] %v4123_v59  ;;  %v4125_v9 = vpop.f32.mrf.mxu0  ;;  %v1541_v59 = vadd.f32 %v4019_v2, %v1246_v7 }
 0x158   : > { %4560 = vst [vmem:[#allocation38_spill] sm:$0xff] %v4125_v9  ;;  %v4127_v44 = vpop.f32.mrf.mxu1  ;;  %v1260_v9 = vadd.f32 %v2978_v25, %v3959_v35  ;;  %v1267_v25 = vadd.f32 %v4033_v45, %v3965_v36 }
 0x159   : > { %4561 = vst [vmem:[#allocation39_spill] sm:$0xff] %v4127_v44  ;;  %v4129_v50 = vpop.f32.mrf.mxu0 }
 0x15a   : > { %4562 = vst [vmem:[#allocation40_spill] sm:$0xff] %v4129_v50  ;;  %v4132_v14 = vpop.f32.mrf.mxu1  ;;  %v1533_v50 = vadd.f32 %v4021_v32, %v1239_v42  ;;  %v1549_v32 = vadd.f32 %v4027_v61, %v1253_v63  ;;  %v329_v61 = vld [vmem:[#allocation2 + $0x10] sm:$0xff] }
 0x15b   : > { %4563 = vst [vmem:[#allocation41_spill] sm:$0xff] %v4132_v14  ;;  %v4134_v33 = vpop.f32.mrf.mxu0 }
 0x15c   : > { %4564 = vst [vmem:[#allocation42_spill] sm:$0xff] %v4134_v33  ;;  %v4137_v53 = vpop.f32.mrf.mxu1 }
 0x15d   : > { %4565 = vst [vmem:[#allocation43_spill] sm:$0xff] %v4137_v53  ;;  %v4139_v48 = vpop.f32.mrf.mxu0 }
 0x15e   : > { %4566 = vst [vmem:[#allocation44_spill] sm:$0xff] %v4139_v48  ;;  %v4143_v27 = vpop.f32.mrf.mxu1  ;;  %v1557_v48 = vadd.f32 %v4023_v26, %v1260_v9  ;;  %v1288_v9 = vadd.f32 %v4037_v6, %v3967_v38  ;;  %v1565_v26 = vadd.f32 %v4035_v47, %v1267_v25  ;;  %v1302_v38 = vadd.f32 %v4045_v46, %v3971_v17  ;;  %v331_v17 = vld [vmem:[#allocation2 + $0x20] sm:$0xff] }
 0x15f   : > { %4567 = vst [vmem:[#allocation45_spill] sm:$0xff] %v4143_v27  ;;  %v3087_v44 = vpop.f32.mrf.mxu0  ;;  %v327_v27 = vld [vmem:[#allocation2] sm:$0xff] }
 0x160   : > { %v1870_v29 = vadd.f32 %v3087_v44, %v1541_v59  ;;  %v3143_v14 = vpop.f32.mrf.mxu1 }
 0x161   : > { %v1863_v53 = vpop.f32.mrf.mxu0 }
 0x162   : > { %v2131_v7 = vadd.f32 %v3143_v14, %v1870_v29  ;;  %v1864_v2 = vadd.f32 %v1863_v53, %v1533_v50  ;;  %v2124_v35 = vpop.f32.mrf.mxu1 }
 0x163   : > { %v3090_v42 = vpop.f32.mrf.mxu0 }
 0x164   : > { %v2315_v11 = vadd.f32 %v2131_v7, %v328_v12  ;;  %v2125_v59 = vadd.f32 %v2124_v35, %v1864_v2  ;;  %v1882_v44 = vadd.f32 %v3090_v42, %v1557_v48  ;;  %v3146_v40 = vpop.f32.mrf.mxu1  ;;  %v1281_v48 = vadd.f32 %v4041_v3, %v3969_v5  ;;  %v4171_v2 = vld [vmem:[%s4385_s2] ss:$0 sm:$0xff] }
 0x165   : > { %v1875_v33 = vpop.f32.mrf.mxu0  ;;  %v1295_v3 = vadd.f32 %v4049_v24, %v3973_v55  ;;  %v1605_v55 = vadd.f32 %v4047_v34, %v1302_v38  ;;  %v1316_v24 = vadd.f32 %v4053_v4, %v3975_v18  ;;  %v1309_v34 = vadd.f32 %v4057_v49, %v3977_v58  ;;  %v336_v49 = vld [vmem:[#allocation2 + $0x48] sm:$0xff] }
 0x166   : > { %2348 = vst.msk [vmem:[#allocation2 + $0x8] sm:$0xff] %vm294_vm2, %v2315_v11  ;;  %v2314_v53 = vadd.f32 %v2125_v59, %v327_v27  ;;  %v2143_v14 = vadd.f32 %v3146_v40, %v1882_v44  ;;  %v1876_v36 = vadd.f32 %v1875_v33, %v1549_v32  ;;  %v2136_v50 = vpop.f32.mrf.mxu1  ;;  %v332_v27 = vld [vmem:[#allocation2 + $0x28] sm:$0xff]  ;;  %v1589_v33 = vadd.f32 %v4039_v30, %v1288_v9 }
 0x167   : > { %v3093_v45 = vpop.f32.mrf.mxu0  ;;  %v1581_v35 = vadd.f32 %v4043_v41, %v1281_v48  ;;  %v334_v41 = vld [vmem:[#allocation2 + $0x38] sm:$0xff]  ;;  %v1621_v48 = vadd.f32 %v4055_v13, %v1316_v24  ;;  %v1323_v13 = vadd.f32 %v4065_v1, %v3981_v21 }
 0x168   : > { %2347 = vst.msk [vmem:[#allocation2] sm:$0xff] %vm294_vm2, %v2314_v53  ;;  %v2317_v23 = vadd.f32 %v2143_v14, %v330_v22  ;;  %v2137_v63 = vadd.f32 %v2136_v50, %v1876_v36  ;;  %v1894_v29 = vadd.f32 %v3093_v45, %v1573_v31  ;;  %v3149_v10 = vpop.f32.mrf.mxu1  ;;  %v1597_v53 = vadd.f32 %v4051_v15, %v1295_v3  ;;  %v333_v36 = vld [vmem:[#allocation2 + $0x30] sm:$0xff]  ;;  %v338_v1 = vld [vmem:[#allocation2 + $0x58] sm:$0xff] }
 0x169   : > { %v1887_v6 = vpop.f32.mrf.mxu0  ;;  %v1330_v15 = vadd.f32 %v4061_v56, %v3979_v52  ;;  %v335_v56 = vld [vmem:[#allocation2 + $0x40] sm:$0xff] }
 0x16a   : > { %2350 = vst.msk [vmem:[#allocation2 + $0x18] sm:$0xff] %vm294_vm2, %v2317_v23  ;;  %v2316_v47 = vadd.f32 %v2137_v63, %v329_v61  ;;  %v2155_v12 = vadd.f32 %v3149_v10, %v1894_v29  ;;  %v1888_v7 = vadd.f32 %v1887_v6, %v1565_v26  ;;  %v2148_v5 = vpop.f32.mrf.mxu1  ;;  %v1613_v6 = vadd.f32 %v4059_v8, %v1309_v34 }
 0x16b   : > { %v3096_v46 = vpop.f32.mrf.mxu0  ;;  %v1344_v8 = vadd.f32 %v4069_v20, %v3983_v39  ;;  %v337_v20 = vld [vmem:[#allocation2 + $0x50] sm:$0xff] }
 0x16c   : > { %2349 = vst.msk [vmem:[#allocation2 + $0x10] sm:$0xff] %vm294_vm2, %v2316_v47  ;;  %v2319_v30 = vadd.f32 %v2155_v12, %v332_v27  ;;  %v2149_v25 = vadd.f32 %v2148_v5, %v1888_v7  ;;  %v1906_v42 = vadd.f32 %v3096_v46, %v1589_v33  ;;  %v3152_v32 = vpop.f32.mrf.mxu1 }
 0x16d   : > { %v2383_v11 = vld [vmem:[#allocation2 + $0x8] sm:$0xff]  ;;  %v1899_v59 = vpop.f32.mrf.mxu0 }
 0x16e   : > { %v2422_v44 = vadd.f32 %v4171_v2, %v2383_v11  ;;  %2352 = vst.msk [vmem:[#allocation2 + $0x28] sm:$0xff] %vm294_vm2, %v2319_v30  ;;  %v2318_v40 = vadd.f32 %v2149_v25, %v331_v17  ;;  %v2167_v31 = vadd.f32 %v3152_v32, %v1906_v42  ;;  %v1900_v22 = vadd.f32 %v1899_v59, %v1581_v35  ;;  %v2160_v9 = vpop.f32.mrf.mxu1 }
 0x16f   : > { %v2382_v14 = vld [vmem:[#allocation2] sm:$0xff]  ;;  %v3099_v18 = vpop.f32.mrf.mxu0  ;;  %v1637_v17 = vadd.f32 %v4063_v16, %v1330_v15  ;;  %v1337_v16 = vadd.f32 %v4073_v28, %v3985_v43  ;;  %v340_v28 = vld [vmem:[#allocation2 + $0x68] sm:$0xff] }
 0x170   : > { %2454 = vst.msk [vmem:[%s4180_s5 + $0x8] sm:$0xff] %vm294_vm2, %v2422_v44  ;;  %v2421_v4 = vadd.f32 %v4171_v2, %v2382_v14  ;;  %2351 = vst.msk [vmem:[#allocation2 + $0x20] sm:$0xff] %vm294_vm2, %v2318_v40  ;;  %v2321_v50 = vadd.f32 %v2167_v31, %v334_v41  ;;  %v2161_v26 = vadd.f32 %v2160_v9, %v1900_v22  ;;  %v3155_v45 = vpop.f32.mrf.mxu1 }
 0x171   : > { %v1918_v61 = vadd.f32 %v3099_v18, %v1605_v55  ;;  %v2385_v58 = vld [vmem:[#allocation2 + $0x18] sm:$0xff]  ;;  %v1911_v23 = vpop.f32.mrf.mxu0  ;;  %v1629_v55 = vadd.f32 %v4067_v51, %v1323_v13  ;;  %v1653_v31 = vadd.f32 %v4071_v60, %v1344_v8  ;;  %v1358_v51 = vadd.f32 %v4077_v62, %v3987_v54  ;;  %v339_v62 = vld [vmem:[#allocation2 + $0x60] sm:$0xff] }
 0x172   : > { %2453 = vst.msk [vmem:[%s4180_s5] sm:$0xff] %vm294_vm2, %v2421_v4  ;;  %v2424_v63 = vadd.f32 %v4171_v2, %v2385_v58  ;;  %2354 = vst.msk [vmem:[#allocation2 + $0x38] sm:$0xff] %vm294_vm2, %v2321_v50  ;;  %v2320_v29 = vadd.f32 %v2161_v26, %v333_v36  ;;  %v1912_v38 = vadd.f32 %v1911_v23, %v1597_v53  ;;  %v2172_v27 = vpop.f32.mrf.mxu1  ;;  %v4569_v58 = vld [vmem:[#allocation18_spill] sm:$0xff] }
 0x173   : > { %v2179_v10 = vadd.f32 %v3155_v45, %v1918_v61  ;;  %v2384_v52 = vld [vmem:[#allocation2 + $0x10] sm:$0xff]  ;;  %v3102_v33 = vpop.f32.mrf.mxu0  ;;  %v1645_v18 = vadd.f32 %v4075_v57, %v1337_v16  ;;  %v1351_v60 = vadd.f32 %v4081_v19, %v3989_v0  ;;  %v1669_v15 = vadd.f32 %v4079_v37, %v1358_v51  ;;  %v4568_v57 = vld [vmem:[#allocation3_spill] sm:$0xff]  ;;  %v342_v19 = vld [vmem:[#allocation2 + $0x78] sm:$0xff] }
 0x174   : > { %2456 = vst.msk [vmem:[%s4180_s5 + $0x18] sm:$0xff] %vm294_vm2, %v2424_v63  ;;  %v2423_v47 = vadd.f32 %v4171_v2, %v2384_v52  ;;  %2353 = vst.msk [vmem:[#allocation2 + $0x30] sm:$0xff] %vm294_vm2, %v2320_v29  ;;  %v2173_v7 = vadd.f32 %v2172_v27, %v1912_v38  ;;  %v1930_v5 = vadd.f32 %v3102_v33, %v1621_v48  ;;  %v3158_v3 = vpop.f32.mrf.mxu1  ;;  %v4571_v37 = vld [vmem:[#allocation4_spill] sm:$0xff]  ;;  %v343_v51 = vld [vmem:[#allocation2 + $0x80] sm:$0xff] }
 0x175   : > { %v2323_v12 = vadd.f32 %v2179_v10, %v336_v49  ;;  %v2387_v21 = vld [vmem:[#allocation2 + $0x28] sm:$0xff]  ;;  %v1923_v46 = vpop.f32.mrf.mxu0  ;;  %v1372_v49 = vadd.f32 %v4569_v58, %v4568_v57  ;;  %v4582_v57 = vld [vmem:[#allocation25_spill] sm:$0xff] }
 0x176   : > { %2455 = vst.msk [vmem:[%s4180_s5 + $0x10] sm:$0xff] %vm294_vm2, %v2423_v47  ;;  %v2426_v35 = vadd.f32 %v4171_v2, %v2387_v21  ;;  %v2322_v30 = vadd.f32 %v2173_v7, %v335_v56  ;;  %v2191_v25 = vadd.f32 %v3158_v3, %v1930_v5  ;;  %v1924_v42 = vadd.f32 %v1923_v46, %v1613_v6  ;;  %v2184_v32 = vpop.f32.mrf.mxu1  ;;  %v4570_v6 = vld [vmem:[#allocation17_spill] sm:$0xff]  ;;  %v4572_v52 = vld [vmem:[#allocation20_spill] sm:$0xff]  ;;  %v4573_v21 = vld [vmem:[#allocation19_spill] sm:$0xff] }
 0x177   : > { %2356 = vst.msk [vmem:[#allocation2 + $0x48] sm:$0xff] %vm294_vm2, %v2323_v12  ;;  %v2386_v39 = vld [vmem:[#allocation2 + $0x20] sm:$0xff]  ;;  %v3105_v24 = vpop.f32.mrf.mxu0  ;;  %v1661_v13 = vadd.f32 %v4570_v6, %v1351_v60  ;;  %v1365_v56 = vadd.f32 %v4572_v52, %v4571_v37  ;;  %v341_v47 = vld [vmem:[#allocation2 + $0x70] sm:$0xff]  ;;  %v4581_v60 = vld [vmem:[#allocation26_spill] sm:$0xff] }
 0x178   : > { %2458 = vst.msk [vmem:[%s4180_s5 + $0x28] sm:$0xff] %vm294_vm2, %v2426_v35  ;;  %v2425_v11 = vadd.f32 %v4171_v2, %v2386_v39  ;;  %2355 = vst.msk [vmem:[#allocation2 + $0x40] sm:$0xff] %vm294_vm2, %v2322_v30  ;;  %v2325_v41 = vadd.f32 %v2191_v25, %v338_v1  ;;  %v2185_v59 = vadd.f32 %v2184_v32, %v1924_v42  ;;  %v3161_v40 = vpop.f32.mrf.mxu1  ;;  %v4574_v46 = vld [vmem:[#allocation5_spill] sm:$0xff]  ;;  %v4575_v35 = vld [vmem:[#allocation22_spill] sm:$0xff] }
 0x179   : > { %v1942_v44 = vadd.f32 %v3105_v24, %v1637_v17  ;;  %v2389_v43 = vld [vmem:[#allocation2 + $0x38] sm:$0xff]  ;;  %v1935_v22 = vpop.f32.mrf.mxu0  ;;  %v1685_v1 = vadd.f32 %v4573_v21, %v1372_v49  ;;  %v1386_v30 = vadd.f32 %v4575_v35, %v4574_v46  ;;  %v344_v42 = vld [vmem:[#allocation2 + $0x88] sm:$0xff]  ;;  %v4585_v37 = vld [vmem:[#allocation27_spill] sm:$0xff] }
 0x17a   : > { %2457 = vst.msk [vmem:[%s4180_s5 + $0x20] sm:$0xff] %vm294_vm2, %v2425_v11  ;;  %v2428_v9 = vadd.f32 %v4171_v2, %v2389_v43  ;;  %2358 = vst.msk [vmem:[#allocation2 + $0x58] sm:$0xff] %vm294_vm2, %v2325_v41  ;;  %v2324_v53 = vadd.f32 %v2185_v59, %v337_v20  ;;  %v1936_v14 = vadd.f32 %v1935_v22, %v1629_v55  ;;  %v2196_v36 = vpop.f32.mrf.mxu1  ;;  %v4576_v11 = vld [vmem:[#allocation21_spill] sm:$0xff]  ;;  %v4577_v59 = vld [vmem:[#allocation6_spill] sm:$0xff] }
 0x17b   : > { %v2203_v34 = vadd.f32 %v3161_v40, %v1942_v44  ;;  %v2388_v54 = vld [vmem:[#allocation2 + $0x30] sm:$0xff]  ;;  %v3108_v4 = vpop.f32.mrf.mxu0  ;;  %v1677_v41 = vadd.f32 %v4576_v11, %v1365_v56  ;;  %v4578_v44 = vld [vmem:[#allocation24_spill] sm:$0xff] }
 0x17c   : > { %2460 = vst.msk [vmem:[%s4180_s5 + $0x38] sm:$0xff] %vm294_vm2, %v2428_v9  ;;  %v2427_v50 = vadd.f32 %v4171_v2, %v2388_v54  ;;  %2357 = vst.msk [vmem:[#allocation2 + $0x50] sm:$0xff] %vm294_vm2, %v2324_v53  ;;  %v2197_v61 = vadd.f32 %v2196_v36, %v1936_v14  ;;  %v1954_v45 = vadd.f32 %v3108_v4, %v1653_v31  ;;  %v3164_v48 = vpop.f32.mrf.mxu1  ;;  %v4579_v14 = vld [vmem:[#allocation23_spill] sm:$0xff]  ;;  %v346_v4 = vld [vmem:[#allocation2 + $0x98] sm:$0xff] }
 0x17d   : > { %v2327_v26 = vadd.f32 %v2203_v34, %v340_v28  ;;  %v1947_v23 = vpop.f32.mrf.mxu0  ;;  %v1379_v40 = vadd.f32 %v4578_v44, %v4577_v59  ;;  %v1701_v36 = vadd.f32 %v4579_v14, %v1386_v30  ;;  %v4583_v49 = vld [vmem:[#allocation8_spill] sm:$0xff]  ;;  %v4586_v56 = vld [vmem:[#allocation9_spill] sm:$0xff]  ;;  %v4589_v30 = vld [vmem:[#allocation10_spill] sm:$0xff] }
 0x17e   : > { %v2391_v0 = vld [vmem:[#allocation2 + $0x48] sm:$0xff]  ;;  %2459 = vst.msk [vmem:[%s4180_s5 + $0x30] sm:$0xff] %vm294_vm2, %v2427_v50  ;;  %v2326_v29 = vadd.f32 %v2197_v61, %v339_v62  ;;  %v2215_v10 = vadd.f32 %v3164_v48, %v1954_v45  ;;  %v1948_v38 = vadd.f32 %v1947_v23, %v1645_v18  ;;  %v2208_v27 = vpop.f32.mrf.mxu1  ;;  %v4580_v18 = vld [vmem:[#allocation7_spill] sm:$0xff]  ;;  %v4588_v46 = vld [vmem:[#allocation29_spill] sm:$0xff] }
 0x17f   : > { %v2430_v63 = vadd.f32 %v4171_v2, %v2391_v0  ;;  %2360 = vst.msk [vmem:[#allocation2 + $0x68] sm:$0xff] %vm294_vm2, %v2327_v26  ;;  %v2390_v33 = vld [vmem:[#allocation2 + $0x40] sm:$0xff]  ;;  %v3111_v12 = vpop.f32.mrf.mxu0  ;;  %v1400_v54 = vadd.f32 %v4581_v60, %v4580_v18  ;;  %v1693_v58 = vadd.f32 %v4582_v57, %v1379_v40  ;;  %v4584_v0 = vld [vmem:[#allocation28_spill] sm:$0xff]  ;;  %v4594_v18 = vld [vmem:[#allocation33_spill] sm:$0xff] }
 0x180   : > { %v2429_v7 = vadd.f32 %v4171_v2, %v2390_v33  ;;  %2359 = vst.msk [vmem:[#allocation2 + $0x60] sm:$0xff] %vm294_vm2, %v2326_v29  ;;  %v2329_v5 = vadd.f32 %v2215_v10, %v342_v19  ;;  %v2209_v3 = vadd.f32 %v2208_v27, %v1948_v38  ;;  %v1966_v17 = vadd.f32 %v3111_v12, %v1669_v15  ;;  %v3167_v8 = vpop.f32.mrf.mxu1  ;;  %v4587_v33 = vld [vmem:[#allocation30_spill] sm:$0xff]  ;;  %v4591_v59 = vld [vmem:[#allocation31_spill] sm:$0xff] }
 0x181   : > { %2462 = vst.msk [vmem:[%s4180_s5 + $0x48] sm:$0xff] %vm294_vm2, %v2430_v63  ;;  %v2393_v25 = vld [vmem:[#allocation2 + $0x58] sm:$0xff]  ;;  %v1959_v32 = vpop.f32.mrf.mxu0  ;;  %v1393_v19 = vadd.f32 %v4584_v0, %v4583_v49  ;;  %v345_v63 = vld [vmem:[#allocation2 + $0x90] sm:$0xff]  ;;  %v1717_v52 = vadd.f32 %v4585_v37, %v1400_v54  ;;  %v4592_v40 = vld [vmem:[#allocation11_spill] sm:$0xff] }
 0x182   : > { %2461 = vst.msk [vmem:[%s4180_s5 + $0x40] sm:$0xff] %vm294_vm2, %v2429_v7  ;;  %v2432_v55 = vadd.f32 %v4171_v2, %v2393_v25  ;;  %2362 = vst.msk [vmem:[#allocation2 + $0x78] sm:$0xff] %vm294_vm2, %v2329_v5  ;;  %v2328_v16 = vadd.f32 %v2209_v3, %v341_v47  ;;  %v2227_v39 = vadd.f32 %v3167_v8, %v1966_v17  ;;  %v2220_v24 = vpop.f32.mrf.mxu1  ;;  %v348_v7 = vld [vmem:[#allocation2 + $0xa8] sm:$0xff]  ;;  %v4597_v49 = vld [vmem:[#allocation35_spill] sm:$0xff] }
 0x183   : > { %v1960_v20 = vadd.f32 %v1959_v32, %v1661_v13  ;;  %v2392_v31 = vld [vmem:[#allocation2 + $0x50] sm:$0xff]  ;;  %v3114_v43 = vpop.f32.mrf.mxu0  ;;  %v1414_v47 = vadd.f32 %v4587_v33, %v4586_v56  ;;  %v1709_v35 = vadd.f32 %v4588_v46, %v1393_v19  ;;  %v4590_v25 = vld [vmem:[#allocation32_spill] sm:$0xff] }
 0x184   : > { %2464 = vst.msk [vmem:[%s4180_s5 + $0x58] sm:$0xff] %vm294_vm2, %v2432_v55  ;;  %v2431_v28 = vadd.f32 %v4171_v2, %v2392_v31  ;;  %2361 = vst.msk [vmem:[#allocation2 + $0x70] sm:$0xff] %vm294_vm2, %v2328_v16  ;;  %v2331_v22 = vadd.f32 %v2227_v39, %v344_v42  ;;  %v1978_v53 = vadd.f32 %v3114_v43, %v1685_v1  ;;  %v3170_v34 = vpop.f32.mrf.mxu1  ;;  %v347_v55 = vld [vmem:[#allocation2 + $0xa0] sm:$0xff]  ;;  %v4593_v31 = vld [vmem:[#allocation34_spill] sm:$0xff] }
 0x185   : > { %v2221_v9 = vadd.f32 %v2220_v24, %v1960_v20  ;;  %v1971_v50 = vpop.f32.mrf.mxu0  ;;  %v1407_v42 = vadd.f32 %v4590_v25, %v4589_v30  ;;  %v1733_v44 = vadd.f32 %v4591_v59, %v1414_v47  ;;  %v4595_v54 = vld [vmem:[#allocation12_spill] sm:$0xff]  ;;  %v4598_v19 = vld [vmem:[#allocation13_spill] sm:$0xff]  ;;  %v4601_v47 = vld [vmem:[#allocation14_spill] sm:$0xff] }
 0x186   : > { %v2395_v62 = vld [vmem:[#allocation2 + $0x68] sm:$0xff]  ;;  %2463 = vst.msk [vmem:[%s4180_s5 + $0x50] sm:$0xff] %vm294_vm2, %v2431_v28  ;;  %2364 = vst.msk [vmem:[#allocation2 + $0x88] sm:$0xff] %vm294_vm2, %v2331_v22  ;;  %v2239_v45 = vadd.f32 %v3170_v34, %v1978_v53  ;;  %v1972_v48 = vadd.f32 %v1971_v50, %v1677_v41  ;;  %v2232_v15 = vpop.f32.mrf.mxu1  ;;  %v350_v28 = vld [vmem:[#allocation2 + $0xb8] sm:$0xff] }
 0x187   : > { %v2434_v26 = vadd.f32 %v4171_v2, %v2395_v62  ;;  %v2330_v61 = vadd.f32 %v2221_v9, %v343_v51  ;;  %v2394_v23 = vld [vmem:[#allocation2 + $0x60] sm:$0xff]  ;;  %v3117_v29 = vpop.f32.mrf.mxu0  ;;  %v1428_v51 = vadd.f32 %v4593_v31, %v4592_v40  ;;  %v1725_v60 = vadd.f32 %v4594_v18, %v1407_v42  ;;  %v4596_v62 = vld [vmem:[#allocation36_spill] sm:$0xff]  ;;  %v4600_v56 = vld [vmem:[#allocation37_spill] sm:$0xff] }
 0x188   : > { %v2433_v10 = vadd.f32 %v4171_v2, %v2394_v23  ;;  %v2333_v38 = vadd.f32 %v2239_v45, %v346_v4  ;;  %v2233_v27 = vadd.f32 %v2232_v15, %v1972_v48  ;;  %v1990_v6 = vadd.f32 %v3117_v29, %v1701_v36  ;;  %v3173_v13 = vpop.f32.mrf.mxu1  ;;  %v4599_v23 = vld [vmem:[#allocation38_spill] sm:$0xff]  ;;  %v4603_v30 = vld [vmem:[#allocation39_spill] sm:$0xff]  ;;  %v4606_v40 = vld [vmem:[#allocation41_spill] sm:$0xff] }
 0x189   : > { %2466 = vst.msk [vmem:[%s4180_s5 + $0x68] sm:$0xff] %vm294_vm2, %v2434_v26  ;;  %2363 = vst.msk [vmem:[#allocation2 + $0x80] sm:$0xff] %vm294_vm2, %v2330_v61  ;;  %v2397_v12 = vld [vmem:[#allocation2 + $0x78] sm:$0xff]  ;;  %v1983_v5 = vpop.f32.mrf.mxu0  ;;  %v1421_v4 = vadd.f32 %v4596_v62, %v4595_v54  ;;  %v349_v26 = vld [vmem:[#allocation2 + $0xb0] sm:$0xff]  ;;  %v1749_v0 = vadd.f32 %v4597_v49, %v1428_v51 }
 0x18a   : > { %2465 = vst.msk [vmem:[%s4180_s5 + $0x60] sm:$0xff] %vm294_vm2, %v2433_v10  ;;  %v2436_v3 = vadd.f32 %v4171_v2, %v2397_v12  ;;  %2366 = vst.msk [vmem:[#allocation2 + $0x98] sm:$0xff] %vm294_vm2, %v2333_v38  ;;  %v2332_v17 = vadd.f32 %v2233_v27, %v345_v63  ;;  %v2251_v8 = vadd.f32 %v3173_v13, %v1990_v6  ;;  %v2244_v1 = vpop.f32.mrf.mxu1  ;;  %v352_v10 = vld [vmem:[#allocation2 + $0xc8] sm:$0xff]  ;;  %v4604_v42 = vld [vmem:[#allocation15_spill] sm:$0xff] }
 0x18b   : > { %v1984_v21 = vadd.f32 %v1983_v5, %v1693_v58  ;;  %v2396_v32 = vld [vmem:[#allocation2 + $0x70] sm:$0xff]  ;;  %v3120_v16 = vpop.f32.mrf.mxu0  ;;  %v1442_v63 = vadd.f32 %v4599_v23, %v4598_v19  ;;  %v1741_v33 = vadd.f32 %v4600_v56, %v1421_v4  ;;  %v4602_v12 = vld [vmem:[#allocation40_spill] sm:$0xff]  ;;  %v4609_v54 = vld [vmem:[#allocation43_spill] sm:$0xff] }
 0x18c   : > { %2468 = vst.msk [vmem:[%s4180_s5 + $0x78] sm:$0xff] %vm294_vm2, %v2436_v3  ;;  %v2435_v39 = vadd.f32 %v4171_v2, %v2396_v32  ;;  %2365 = vst.msk [vmem:[#allocation2 + $0x90] sm:$0xff] %vm294_vm2, %v2332_v17  ;;  %v2335_v20 = vadd.f32 %v2251_v8, %v348_v7  ;;  %v2002_v11 = vadd.f32 %v3120_v16, %v1717_v52  ;;  %v3176_v41 = vpop.f32.mrf.mxu1  ;;  %v351_v3 = vld [vmem:[#allocation2 + $0xc0] sm:$0xff]  ;;  %v4605_v32 = vld [vmem:[#allocation42_spill] sm:$0xff] }
 0x18d   : > { %v2245_v24 = vadd.f32 %v2244_v1, %v1984_v21  ;;  %v2399_v43 = vld [vmem:[#allocation2 + $0x88] sm:$0xff]  ;;  %v1995_v22 = vpop.f32.mrf.mxu0  ;;  %v1435_v7 = vadd.f32 %v4602_v12, %v4601_v47  ;;  %v1765_v25 = vadd.f32 %v4603_v30, %v1442_v63  ;;  %v355_v19 = vld [vmem:[#allocation2 + $0xe0] sm:$0xff] }
 0x18e   : > { %2467 = vst.msk [vmem:[%s4180_s5 + $0x70] sm:$0xff] %vm294_vm2, %v2435_v39  ;;  %v2438_v9 = vadd.f32 %v4171_v2, %v2399_v43  ;;  %2368 = vst.msk [vmem:[#allocation2 + $0xa8] sm:$0xff] %vm294_vm2, %v2335_v20  ;;  %v2263_v34 = vadd.f32 %v3176_v41, %v2002_v11  ;;  %v1996_v14 = vadd.f32 %v1995_v22, %v1709_v35  ;;  %v2256_v36 = vpop.f32.mrf.mxu1  ;;  %v354_v39 = vld [vmem:[#allocation2 + $0xd8] sm:$0xff]  ;;  %v4607_v51 = vld [vmem:[#allocation16_spill] sm:$0xff] }
 0x18f   : > { %v2334_v53 = vadd.f32 %v2245_v24, %v347_v55  ;;  %v3123_v61 = vpop.f32.mrf.mxu0  ;;  %v1456_v55 = vadd.f32 %v4605_v32, %v4604_v42  ;;  %v1757_v31 = vadd.f32 %v4606_v40, %v1435_v7  ;;  %v4608_v43 = vld [vmem:[#allocation44_spill] sm:$0xff] }
 0x190   : > { %v2398_v50 = vld [vmem:[#allocation2 + $0x80] sm:$0xff]  ;;  %2470 = vst.msk [vmem:[%s4180_s5 + $0x88] sm:$0xff] %vm294_vm2, %v2438_v9  ;;  %v2337_v48 = vadd.f32 %v2263_v34, %v350_v28  ;;  %v2257_v15 = vadd.f32 %v2256_v36, %v1996_v14  ;;  %v2014_v57 = vadd.f32 %v3123_v61, %v1733_v44  ;;  %v3179_v58 = vpop.f32.mrf.mxu1  ;;  %v1449_v28 = vadd.f32 %v4608_v43, %v4607_v51  ;;  %v353_v9 = vld [vmem:[#allocation2 + $0xd0] sm:$0xff] }
 0x191   : > { %v2437_v45 = vadd.f32 %v4171_v2, %v2398_v50  ;;  %2367 = vst.msk [vmem:[#allocation2 + $0xa0] sm:$0xff] %vm294_vm2, %v2334_v53  ;;  %v2401_v29 = vld [vmem:[#allocation2 + $0x98] sm:$0xff]  ;;  %v2007_v38 = vpop.f32.mrf.mxu0  ;;  %v1781_v62 = vadd.f32 %v4609_v54, %v1456_v55  ;;  %v356_v50 = vld [vmem:[#allocation2 + $0xe8] sm:$0xff] }
 0x192   : > { %v2440_v27 = vadd.f32 %v4171_v2, %v2401_v29  ;;  %2370 = vst.msk [vmem:[#allocation2 + $0xb8] sm:$0xff] %vm294_vm2, %v2337_v48  ;;  %v2336_v6 = vadd.f32 %v2257_v15, %v349_v26  ;;  %v2275_v13 = vadd.f32 %v3179_v58, %v2014_v57  ;;  %v2008_v37 = vadd.f32 %v2007_v38, %v1725_v60  ;;  %v2268_v52 = vpop.f32.mrf.mxu1  ;;  %v4610_v58 = vld [vmem:[#allocation45_spill] sm:$0xff] }
 0x193   : > { %2469 = vst.msk [vmem:[%s4180_s5 + $0x80] sm:$0xff] %vm294_vm2, %v2437_v45  ;;  %v2400_v5 = vld [vmem:[#allocation2 + $0x90] sm:$0xff]  ;;  %v3126_v17 = vpop.f32.mrf.mxu0  ;;  %v1773_v49 = vadd.f32 %v4610_v58, %v1449_v28 }
 0x194   : > { %2472 = vst.msk [vmem:[%s4180_s5 + $0x98] sm:$0xff] %vm294_vm2, %v2440_v27  ;;  %v2439_v8 = vadd.f32 %v4171_v2, %v2400_v5  ;;  %2369 = vst.msk [vmem:[#allocation2 + $0xb0] sm:$0xff] %vm294_vm2, %v2336_v6  ;;  %v2339_v21 = vadd.f32 %v2275_v13, %v352_v10  ;;  %v2269_v1 = vadd.f32 %v2268_v52, %v2008_v37  ;;  %v3182_v35 = vpop.f32.mrf.mxu1  ;;  %v358_v13 = vld [vmem:[#allocation2 + $0xf8] sm:$0xff]  ;;  %v357_v5 = vld [vmem:[#allocation2 + $0xf0] sm:$0xff] }
 0x195   : > { %v2026_v46 = vadd.f32 %v3126_v17, %v1749_v0  ;;  %v2403_v16 = vld [vmem:[#allocation2 + $0xa8] sm:$0xff]  ;;  %v2019_v20 = vpop.f32.mrf.mxu0 }
 0x196   : > { %2471 = vst.msk [vmem:[%s4180_s5 + $0x90] sm:$0xff] %vm294_vm2, %v2439_v8  ;;  %v2442_v24 = vadd.f32 %v4171_v2, %v2403_v16  ;;  %2372 = vst.msk [vmem:[#allocation2 + $0xc8] sm:$0xff] %vm294_vm2, %v2339_v21  ;;  %v2338_v11 = vadd.f32 %v2269_v1, %v351_v3  ;;  %v2020_v59 = vadd.f32 %v2019_v20, %v1741_v33  ;;  %v2280_v44 = vpop.f32.mrf.mxu1 }
 0x197   : > { %v2287_v41 = vadd.f32 %v3182_v35, %v2026_v46  ;;  %v3129_v53 = vpop.f32.mrf.mxu0 }
 0x198   : > { %v2402_v22 = vld [vmem:[#allocation2 + $0xa0] sm:$0xff]  ;;  %2474 = vst.msk [vmem:[%s4180_s5 + $0xa8] sm:$0xff] %vm294_vm2, %v2442_v24  ;;  %2371 = vst.msk [vmem:[#allocation2 + $0xc0] sm:$0xff] %vm294_vm2, %v2338_v11  ;;  %v2281_v36 = vadd.f32 %v2280_v44, %v2020_v59  ;;  %v2038_v18 = vadd.f32 %v3129_v53, %v1765_v25  ;;  %v3185_v60 = vpop.f32.mrf.mxu1 }
 0x199   : > { %v2441_v34 = vadd.f32 %v4171_v2, %v2402_v22  ;;  %v2341_v14 = vadd.f32 %v2287_v41, %v354_v39  ;;  %v2405_v4 = vld [vmem:[#allocation2 + $0xb8] sm:$0xff]  ;;  %v2031_v26 = vpop.f32.mrf.mxu0 }
 0x19a   : > { %v2444_v61 = vadd.f32 %v4171_v2, %v2405_v4  ;;  %v2340_v45 = vadd.f32 %v2281_v36, %v353_v9  ;;  %v2299_v48 = vadd.f32 %v3185_v60, %v2038_v18  ;;  %v2032_v15 = vadd.f32 %v2031_v26, %v1757_v31  ;;  %v2292_v57 = vpop.f32.mrf.mxu1 }
 0x19b   : > { %2473 = vst.msk [vmem:[%s4180_s5 + $0xa0] sm:$0xff] %vm294_vm2, %v2441_v34  ;;  %2374 = vst.msk [vmem:[#allocation2 + $0xd8] sm:$0xff] %vm294_vm2, %v2341_v14  ;;  %v2404_v0 = vld [vmem:[#allocation2 + $0xb0] sm:$0xff]  ;;  %v3132_v23 = vpop.f32.mrf.mxu0 }
 0x19c   : > { %2476 = vst.msk [vmem:[%s4180_s5 + $0xb8] sm:$0xff] %vm294_vm2, %v2444_v61  ;;  %v2443_v63 = vadd.f32 %v4171_v2, %v2404_v0  ;;  %2373 = vst.msk [vmem:[#allocation2 + $0xd0] sm:$0xff] %vm294_vm2, %v2340_v45  ;;  %v2343_v29 = vadd.f32 %v2299_v48, %v356_v50  ;;  %v2293_v10 = vadd.f32 %v2292_v57, %v2032_v15  ;;  %v3188_v27 = vpop.f32.mrf.mxu1 }
 0x19d   : > { %v2050_v38 = vadd.f32 %v3132_v23, %v1781_v62  ;;  %v2407_v6 = vld [vmem:[#allocation2 + $0xc8] sm:$0xff]  ;;  %v2043_v37 = vpop.f32.mrf.mxu0 }
 0x19e   : > { %2475 = vst.msk [vmem:[%s4180_s5 + $0xb0] sm:$0xff] %vm294_vm2, %v2443_v63  ;;  %v2446_v52 = vadd.f32 %v4171_v2, %v2407_v6  ;;  %2376 = vst.msk [vmem:[#allocation2 + $0xe8] sm:$0xff] %vm294_vm2, %v2343_v29  ;;  %v2342_v56 = vadd.f32 %v2293_v10, %v355_v19  ;;  %v2044_v47 = vadd.f32 %v2043_v37, %v1773_v49  ;;  %v2304_v12 = vpop.f32.mrf.mxu1 }
 0x19f   : > { %v2311_v33 = vadd.f32 %v3188_v27, %v2050_v38  ;;  %v2406_v7 = vld [vmem:[#allocation2 + $0xc0] sm:$0xff] }
 0x1a0   : > { %2478 = vst.msk [vmem:[%s4180_s5 + $0xc8] sm:$0xff] %vm294_vm2, %v2446_v52  ;;  %v2445_v3 = vadd.f32 %v4171_v2, %v2406_v7  ;;  %2375 = vst.msk [vmem:[#allocation2 + $0xe0] sm:$0xff] %vm294_vm2, %v2342_v56  ;;  %v2305_v8 = vadd.f32 %v2304_v12, %v2044_v47 }
 0x1a1   : > { %v2345_v17 = vadd.f32 %v2311_v33, %v358_v13 }
 0x1a2   : > { %v2409_v21 = vld [vmem:[#allocation2 + $0xd8] sm:$0xff]  ;;  %2477 = vst.msk [vmem:[%s4180_s5 + $0xc0] sm:$0xff] %vm294_vm2, %v2445_v3  ;;  %v2344_v46 = vadd.f32 %v2305_v8, %v357_v5 }
 0x1a3   : > { %v2448_v1 = vadd.f32 %v4171_v2, %v2409_v21  ;;  %2378 = vst.msk [vmem:[#allocation2 + $0xf8] sm:$0xff] %vm294_vm2, %v2345_v17  ;;  %v2408_v35 = vld [vmem:[#allocation2 + $0xd0] sm:$0xff] }
 0x1a4   : > { %v2447_v30 = vadd.f32 %v4171_v2, %v2408_v35  ;;  %2377 = vst.msk [vmem:[#allocation2 + $0xf0] sm:$0xff] %vm294_vm2, %v2344_v46 }
 0x1a5   : > { %2480 = vst.msk [vmem:[%s4180_s5 + $0xd8] sm:$0xff] %vm294_vm2, %v2448_v1  ;;  %v2411_v25 = vld [vmem:[#allocation2 + $0xe8] sm:$0xff] }
 0x1a6   : > { %2479 = vst.msk [vmem:[%s4180_s5 + $0xd0] sm:$0xff] %vm294_vm2, %v2447_v30  ;;  %v2450_v42 = vadd.f32 %v4171_v2, %v2411_v25 }
 0x1a7   : > { %v2410_v32 = vld [vmem:[#allocation2 + $0xe0] sm:$0xff] }
 0x1a8   : > { %2482 = vst.msk [vmem:[%s4180_s5 + $0xe8] sm:$0xff] %vm294_vm2, %v2450_v42  ;;  %v2449_v55 = vadd.f32 %v4171_v2, %v2410_v32 }
 0x1aa   : > { %v2413_v16 = vld [vmem:[#allocation2 + $0xf8] sm:$0xff]  ;;  %2481 = vst.msk [vmem:[%s4180_s5 + $0xe0] sm:$0xff] %vm294_vm2, %v2449_v55 }
 0x1ab   : > { %v2452_v39 = vadd.f32 %v4171_v2, %v2413_v16  ;;  %v2412_v20 = vld [vmem:[#allocation2 + $0xf0] sm:$0xff] }
 0x1ac   : > { %v2451_v24 = vadd.f32 %v4171_v2, %v2412_v20 }
 0x1ad   : > { %2484 = vst.msk [vmem:[%s4180_s5 + $0xf8] sm:$0xff] %vm294_vm2, %v2452_v39 }
 0x1ae   : > { %2483 = vst.msk [vmem:[%s4180_s5 + $0xf0] sm:$0xff] %vm294_vm2, %v2451_v24 }
 0x1af PF: > { %s13_s14 = sadd.s32 1, %s3236_s14   ;;  %s4611_s12 = smov %s3232_s13 }
 0x1b0   : > { %p10_p5 = scmp.ge.s32.totalorder %s13_s14, 4   ;;  %s4612_s13 = smov %s4614_s15 }
 0x1b2   :  { %12 = sbr.rel (!%p10_p5) target bundleno = 2 (0x2), region = 76 }

// kernel: style_encoder_forward.11
= control target key start
LH: loop header
LB: loop body
LE: loop exit
PB: predicated region body
PF: predicated region fallthrough
CT: control target
= control target key end

     0   :  { %s523_s9 = smov 0   ;;  %s525_s10 = smov 0   ;;  %s633_s0 = inlined_call_operand.vmem [shape: f32[2,128,16], index: 0, kind: input, shape index: {}]   ;;  %s634_s1 = inlined_call_operand.vmem [shape: f32[2,128,16], index: 1, kind: input, shape index: {}]   ;;  %s635_s2 = inlined_call_operand.vmem [shape: f32[2,64,16], index: 2, kind: output, shape index: {}]  }
   0x1   :  { %s527_s11 = smov 0  }
   0x2 LB: > { %s24_s12 = sadd.s32 1, %s502_s10  ;;  %p448_p0 = scmp.ge.s32.totalorder %s506_s11, 1  ;;  %s506_s11 = sphi %s527_s11, %s12_s11   ;;  %s502_s10 = sphi %s525_s10, %s637_s10   ;;  %s498_s9 = sphi %s523_s9, %s636_s9  }
   0x3   : > { %p26_p1 = scmp.ge.s32.totalorder %s24_s12, 2  ;;  %p150_p2 = scmp.lt.s32.totalorder %s506_s11, 3 }
   0x5   : > { %s639_s12 = smov (%p26_p1, %s24_s12), 0  ;;  %p151_p3 = pnand %p448_p0, %p150_p2 }
   0x6   : > { %p190_p4 = scmp.lt.s32.totalorder (!%p151_p3), %s498_s9, 1 }
   0x7   : > { %154 = sbr.rel (%p151_p3) target bundleno = 43 (0x2b), region = 28 }
   0xc   : > { %s641_s9 = smov (!%p190_p4, %s498_s9), 1  ;;  %vm267_vm0 = vcmask 130048  }
   0xd   : > { %s457_s13 = sshll.u32 %s641_s9, 7  ;;  %s459_s20 = sshll.u32 %s641_s9, 6 }
   0xe   : > { %s547_s16 = scalar_lea.vmem %s633_s0, %s457_s13  ;;  %s552_s19 = scalar_lea.vmem %s634_s1, %s457_s13 }
   0xf   : > { %v219_v0 = vld [vmem:[%s547_s16] sm:$0xff]  ;;  %v220_v2 = vld [vmem:[%s547_s16 + $0x8] sm:$0xff]  ;;  %v221_v5 = vld [vmem:[%s547_s16 + $0x10] sm:$0xff]  ;;  %s606_s23 = scalar_lea.vmem %s635_s2, %s459_s20 }
  0x10   : > { %v235_v1 = vld [vmem:[%s552_s19] sm:$0xff]  ;;  %v236_v4 = vld [vmem:[%s552_s19 + $0x8] sm:$0xff]  ;;  %v237_v6 = vld [vmem:[%s552_s19 + $0x10] sm:$0xff] }
  0x11   : > { %v251_v3 = vadd.f32 %v235_v1, %v219_v0  ;;  %v252_v7 = vadd.f32 %v236_v4, %v220_v2  ;;  %v253_v8 = vadd.f32 %v237_v6, %v221_v5  ;;  %v222_v9 = vld [vmem:[%s547_s16 + $0x18] sm:$0xff]  ;;  %v223_v11 = vld [vmem:[%s547_s16 + $0x20] sm:$0xff]  ;;  %v224_v14 = vld [vmem:[%s547_s16 + $0x28] sm:$0xff] }
  0x12   : > { %v238_v10 = vld [vmem:[%s552_s19 + $0x18] sm:$0xff]  ;;  %v239_v13 = vld [vmem:[%s552_s19 + $0x20] sm:$0xff]  ;;  %v240_v15 = vld [vmem:[%s552_s19 + $0x28] sm:$0xff] }
  0x13   : > { %268 = vst.msk [vmem:[#allocation2] sm:$0xff] %vm267_vm0, %v251_v3  ;;  %v254_v12 = vadd.f32 %v238_v10, %v222_v9  ;;  %269 = vst.msk [vmem:[#allocation2 + $0x8] sm:$0xff] %vm267_vm0, %v252_v7  ;;  %v255_v16 = vadd.f32 %v239_v13, %v223_v11  ;;  %v256_v17 = vadd.f32 %v240_v15, %v224_v14  ;;  %v225_v18 = vld [vmem:[%s547_s16 + $0x30] sm:$0xff]  ;;  %v226_v20 = vld [vmem:[%s547_s16 + $0x38] sm:$0xff] }
  0x14   : > { %270 = vst.msk [vmem:[#allocation2 + $0x10] sm:$0xff] %vm267_vm0, %v253_v8  ;;  %v241_v19 = vld [vmem:[%s552_s19 + $0x30] sm:$0xff]  ;;  %v242_v22 = vld [vmem:[%s552_s19 + $0x38] sm:$0xff]  ;;  %v227_v23 = vld [vmem:[%s547_s16 + $0x40] sm:$0xff] }
  0x15   : > { %271 = vst.msk [vmem:[#allocation2 + $0x18] sm:$0xff] %vm267_vm0, %v254_v12  ;;  %v257_v21 = vadd.f32 %v241_v19, %v225_v18  ;;  %v243_v24 = vld [vmem:[%s552_s19 + $0x40] sm:$0xff]  ;;  %272 = vst.msk [vmem:[#allocation2 + $0x20] sm:$0xff] %vm267_vm0, %v255_v16  ;;  %v258_v25 = vadd.f32 %v242_v22, %v226_v20  ;;  %v228_v27 = vld [vmem:[%s547_s16 + $0x48] sm:$0xff] }
  0x16   : > { %273 = vst.msk [vmem:[#allocation2 + $0x28] sm:$0xff] %vm267_vm0, %v256_v17  ;;  %v259_v26 = vadd.f32 %v243_v24, %v227_v23  ;;  %v244_v28 = vld [vmem:[%s552_s19 + $0x48] sm:$0xff]  ;;  %v229_v29 = vld [vmem:[%s547_s16 + $0x50] sm:$0xff]  ;;  %v230_v32 = vld [vmem:[%s547_s16 + $0x58] sm:$0xff] }
  0x17   : > { %274 = vst.msk [vmem:[#allocation2 + $0x30] sm:$0xff] %vm267_vm0, %v257_v21  ;;  %v260_v30 = vadd.f32 %v244_v28, %v228_v27  ;;  %v245_v31 = vld [vmem:[%s552_s19 + $0x50] sm:$0xff]  ;;  %v246_v33 = vld [vmem:[%s552_s19 + $0x58] sm:$0xff]  ;;  %275 = vst.msk [vmem:[#allocation2 + $0x38] sm:$0xff] %vm267_vm0, %v258_v25 }
  0x18   : > { %276 = vst.msk [vmem:[#allocation2 + $0x40] sm:$0xff] %vm267_vm0, %v259_v26  ;;  %v261_v34 = vadd.f32 %v245_v31, %v229_v29  ;;  %v262_v35 = vadd.f32 %v246_v33, %v230_v32  ;;  %v231_v36 = vld [vmem:[%s547_s16 + $0x60] sm:$0xff]  ;;  %v232_v38 = vld [vmem:[%s547_s16 + $0x68] sm:$0xff]  ;;  %v233_v41 = vld [vmem:[%s547_s16 + $0x70] sm:$0xff] }
  0x19   : > { %v247_v37 = vld [vmem:[%s552_s19 + $0x60] sm:$0xff]  ;;  %277 = vst.msk [vmem:[#allocation2 + $0x48] sm:$0xff] %vm267_vm0, %v260_v30  ;;  %v248_v40 = vld [vmem:[%s552_s19 + $0x68] sm:$0xff]  ;;  %v249_v42 = vld [vmem:[%s552_s19 + $0x70] sm:$0xff] }
  0x1a   : > { %v263_v39 = vadd.f32 %v247_v37, %v231_v36  ;;  %278 = vst.msk [vmem:[#allocation2 + $0x50] sm:$0xff] %vm267_vm0, %v261_v34  ;;  %279 = vst.msk [vmem:[#allocation2 + $0x58] sm:$0xff] %vm267_vm0, %v262_v35  ;;  %v264_v43 = vadd.f32 %v248_v40, %v232_v38  ;;  %v265_v44 = vadd.f32 %v249_v42, %v233_v41  ;;  %v234_v45 = vld [vmem:[%s547_s16 + $0x78] sm:$0xff]  ;;  %v284_v48 = vld [vmem:[#allocation2] ss:$2 sm:$0xff] }
  0x1b   : > { %v250_v46 = vld [vmem:[%s552_s19 + $0x78] sm:$0xff]  ;;  %v300_v49 = vld [vmem:[#allocation2 + $0x1] ss:$2 sm:$0xff] }
  0x1c   : > { %280 = vst.msk [vmem:[#allocation2 + $0x60] sm:$0xff] %vm267_vm0, %v263_v39  ;;  %v266_v47 = vadd.f32 %v250_v46, %v234_v45  ;;  %281 = vst.msk [vmem:[#allocation2 + $0x68] sm:$0xff] %vm267_vm0, %v264_v43  ;;  %v315_v50 = vadd.f32 %v300_v49, %v284_v48  ;;  %v286_v51 = vld [vmem:[#allocation2 + $0x10] ss:$2 sm:$0xff]  ;;  %v302_v52 = vld [vmem:[#allocation2 + $0x11] ss:$2 sm:$0xff] }
  0x1d   : > { %282 = vst.msk [vmem:[#allocation2 + $0x70] sm:$0xff] %vm267_vm0, %v265_v44  ;;  %v316_v53 = vadd.f32 %v302_v52, %v286_v51  ;;  %v288_v54 = vld [vmem:[#allocation2 + $0x20] ss:$2 sm:$0xff]  ;;  %v304_v55 = vld [vmem:[#allocation2 + $0x21] ss:$2 sm:$0xff] }
  0x1e   : > { %283 = vst.msk [vmem:[#allocation2 + $0x78] sm:$0xff] %vm267_vm0, %v266_v47  ;;  %v323_v56 = vmul.f32 0.25, %v315_v50  ;;  %v317_v57 = vadd.f32 %v304_v55, %v288_v54  ;;  %v290_v59 = vld [vmem:[#allocation2 + $0x30] ss:$2 sm:$0xff]  ;;  %v306_v60 = vld [vmem:[#allocation2 + $0x31] ss:$2 sm:$0xff] }
  0x1f   : > { %v324_v58 = vmul.f32 0.25, %v316_v53  ;;  %v318_v62 = vadd.f32 %v306_v60, %v290_v59 }
  0x20   : > { %331 = vst.msk [vmem:[%s606_s23] sm:$0xff] %vm267_vm0, %v323_v56  ;;  %v325_v61 = vmul.f32 0.25, %v317_v57  ;;  %v292_v63 = vld [vmem:[#allocation2 + $0x40] ss:$2 sm:$0xff]  ;;  %v308_v0 = vld [vmem:[#allocation2 + $0x41] ss:$2 sm:$0xff] }
  0x21   : > { %332 = vst.msk [vmem:[%s606_s23 + $0x8] sm:$0xff] %vm267_vm0, %v324_v58  ;;  %v319_v1 = vadd.f32 %v308_v0, %v292_v63  ;;  %v294_v2 = vld [vmem:[#allocation2 + $0x50] ss:$2 sm:$0xff]  ;;  %v310_v3 = vld [vmem:[#allocation2 + $0x51] ss:$2 sm:$0xff]  ;;  %v326_v4 = vmul.f32 0.25, %v318_v62 }
  0x22   : > { %333 = vst.msk [vmem:[%s606_s23 + $0x10] sm:$0xff] %vm267_vm0, %v325_v61  ;;  %v320_v5 = vadd.f32 %v310_v3, %v294_v2 }
  0x23   : > { %v327_v6 = vmul.f32 0.25, %v319_v1  ;;  %v296_v7 = vld [vmem:[#allocation2 + $0x60] ss:$2 sm:$0xff]  ;;  %v312_v8 = vld [vmem:[#allocation2 + $0x61] ss:$2 sm:$0xff]  ;;  %334 = vst.msk [vmem:[%s606_s23 + $0x18] sm:$0xff] %vm267_vm0, %v326_v4 }
  0x24   : > { %v328_v9 = vmul.f32 0.25, %v320_v5  ;;  %v321_v10 = vadd.f32 %v312_v8, %v296_v7 }
  0x25   : > { %v298_v11 = vld [vmem:[#allocation2 + $0x70] ss:$2 sm:$0xff]  ;;  %v314_v12 = vld [vmem:[#allocation2 + $0x71] ss:$2 sm:$0xff]  ;;  %335 = vst.msk [vmem:[%s606_s23 + $0x20] sm:$0xff] %vm267_vm0, %v327_v6 }
  0x26   : > { %v322_v13 = vadd.f32 %v314_v12, %v298_v11  ;;  %336 = vst.msk [vmem:[%s606_s23 + $0x28] sm:$0xff] %vm267_vm0, %v328_v9  ;;  %v329_v14 = vmul.f32 0.25, %v321_v10 }
  0x28   : > { %v330_v15 = vmul.f32 0.25, %v322_v13  ;;  %337 = vst.msk [vmem:[%s606_s23 + $0x30] sm:$0xff] %vm267_vm0, %v329_v14 }
  0x2a   : > { %338 = vst.msk [vmem:[%s606_s23 + $0x38] sm:$0xff] %vm267_vm0, %v330_v15 }
  0x2b PF: > { %s12_s11 = sadd.s32 1, %s506_s11   ;;  %s636_s9 = smov %s502_s10 }
  0x2c   : > { %p9_p5 = scmp.ge.s32.totalorder %s12_s11, 4   ;;  %s637_s10 = smov %s639_s12 }
  0x2e   :  { %11 = sbr.rel (!%p9_p5) target bundleno = 2 (0x2), region = 76 }

// kernel: style_encoder_forward.16
= control target key start
LH: loop header
LB: loop body
LE: loop exit
PB: predicated region body
PF: predicated region fallthrough
CT: control target
= control target key end

     0   :  { %s355_s6 = smov 0   ;;  %s357_s7 = smov 0   ;;  %s406_s0 = inlined_call_operand.vmem [shape: f32[2,64,32], index: 0, kind: input, shape index: {}]   ;;  %s407_s1 = inlined_call_operand.vmem [shape: f32[2,64,32], index: 1, kind: output, shape index: {}]  }
   0x1   :  { %s359_s8 = smov 0  }
   0x2 LB: > { %s23_s9 = sadd.s32 1, %s339_s7  ;;  %p288_p0 = scmp.ge.s32.totalorder %s343_s8, 1  ;;  %s343_s8 = sphi %s359_s8, %s11_s8   ;;  %s339_s7 = sphi %s357_s7, %s409_s7   ;;  %s335_s6 = sphi %s355_s6, %s408_s6  }
   0x3   : > { %p25_p1 = scmp.ge.s32.totalorder %s23_s9, 2  ;;  %p108_p2 = scmp.lt.s32.totalorder %s343_s8, 3 }
   0x5   : > { %s411_s9 = smov (%p25_p1, %s23_s9), 0  ;;  %p109_p3 = pnand %p288_p0, %p108_p2 }
   0x6   : > { %p137_p4 = scmp.lt.s32.totalorder (!%p109_p3), %s335_s6, 1 }
   0x7   : > { %112 = sbr.rel (%p109_p3) target bundleno = 25 (0x19), region = 24 }
   0xc   : > { %s413_s6 = smov (!%p137_p4, %s335_s6), 1  ;;  %vm188_vm0 = vcmask 261120  }
   0xd   : > { %s295_s10 = sshll.u32 %s413_s6, 6 }
   0xe   : > { %s144_s13 = scalar_lea.vmem %s406_s0, %s295_s10  ;;  %s379_s16 = scalar_lea.vmem %s407_s1, %s295_s10 }
   0xf   : > { %v156_v0 = vld [vmem:[%s144_s13] sm:$0xff]  ;;  %v157_v1 = vld [vmem:[%s144_s13 + $0x8] sm:$0xff]  ;;  %v158_v2 = vld [vmem:[%s144_s13 + $0x10] sm:$0xff] }
  0x10   : > { %vm164_vm1 = vcmp.ge.f32.partialorder %v156_v0, 0.0  ;;  %v172_v3 = vmul.f32 0.2, %v156_v0  ;;  %vm165_vm2 = vcmp.ge.f32.partialorder %v157_v1, 0.0  ;;  %v173_v4 = vmul.f32 0.2, %v157_v1 }
  0x11   : > { %vm166_vm3 = vcmp.ge.f32.partialorder %v158_v2, 0.0  ;;  %v174_v5 = vmul.f32 0.2, %v158_v2  ;;  %v159_v6 = vld [vmem:[%s144_s13 + $0x18] sm:$0xff]  ;;  %v160_v7 = vld [vmem:[%s144_s13 + $0x20] sm:$0xff]  ;;  %v161_v8 = vld [vmem:[%s144_s13 + $0x28] sm:$0xff] }
  0x12   : > { %v180_v9 = vsel %vm164_vm1, %v156_v0, %v172_v3  ;;  %v181_v10 = vsel %vm165_vm2, %v157_v1, %v173_v4  ;;  %vm167_vm4 = vcmp.ge.f32.partialorder %v159_v6, 0.0  ;;  %v175_v11 = vmul.f32 0.2, %v159_v6  ;;  %v162_v12 = vld [vmem:[%s144_s13 + $0x30] sm:$0xff]  ;;  %v163_v13 = vld [vmem:[%s144_s13 + $0x38] sm:$0xff] }
  0x13   : > { %189 = vst.msk [vmem:[%s379_s16] sm:$0xff] %vm188_vm0, %v180_v9  ;;  %190 = vst.msk [vmem:[%s379_s16 + $0x8] sm:$0xff] %vm188_vm0, %v181_v10  ;;  %v182_v14 = vsel %vm166_vm3, %v158_v2, %v174_v5  ;;  %vm168_vm5 = vcmp.ge.f32.partialorder %v160_v7, 0.0  ;;  %v176_v15 = vmul.f32 0.2, %v160_v7  ;;  %vm169_vm6 = vcmp.ge.f32.partialorder %v161_v8, 0.0 }
  0x14   : > { %191 = vst.msk [vmem:[%s379_s16 + $0x10] sm:$0xff] %vm188_vm0, %v182_v14  ;;  %v183_v16 = vsel %vm167_vm4, %v159_v6, %v175_v11  ;;  %v177_v17 = vmul.f32 0.2, %v161_v8  ;;  %vm170_vm7 = vcmp.ge.f32.partialorder %v162_v12, 0.0  ;;  %v178_v18 = vmul.f32 0.2, %v162_v12 }
  0x15   : > { %192 = vst.msk [vmem:[%s379_s16 + $0x18] sm:$0xff] %vm188_vm0, %v183_v16  ;;  %v184_v19 = vsel %vm168_vm5, %v160_v7, %v176_v15  ;;  %vm171_vm8 = vcmp.ge.f32.partialorder %v163_v13, 0.0  ;;  %v179_v20 = vmul.f32 0.2, %v163_v13 }
  0x16   : > { %193 = vst.msk [vmem:[%s379_s16 + $0x20] sm:$0xff] %vm188_vm0, %v184_v19  ;;  %v185_v21 = vsel %vm169_vm6, %v161_v8, %v177_v17  ;;  %v186_v22 = vsel %vm170_vm7, %v162_v12, %v178_v18 }
  0x17   : > { %194 = vst.msk [vmem:[%s379_s16 + $0x28] sm:$0xff] %vm188_vm0, %v185_v21  ;;  %195 = vst.msk [vmem:[%s379_s16 + $0x30] sm:$0xff] %vm188_vm0, %v186_v22  ;;  %v187_v23 = vsel %vm171_vm8, %v163_v13, %v179_v20 }
  0x18   : > { %196 = vst.msk [vmem:[%s379_s16 + $0x38] sm:$0xff] %vm188_vm0, %v187_v23 }
  0x19 PF: > { %s11_s8 = sadd.s32 1, %s343_s8   ;;  %s408_s6 = smov %s339_s7 }
  0x1a   : > { %p8_p5 = scmp.ge.s32.totalorder %s11_s8, 4   ;;  %s409_s7 = smov %s411_s9 }
  0x1c   :  { %10 = sbr.rel (!%p8_p5) target bundleno = 2 (0x2), region = 54 }

// kernel: style_encoder_forward.13
= control target key start
LH: loop header
LB: loop body
LE: loop exit
PB: predicated region body
PF: predicated region fallthrough
CT: control target
= control target key end

     0   :  { %s1749_s12 = smov 0   ;;  %s1751_s13 = smov 0   ;;  %s2587_s0 = inlined_call_operand.vmem [shape: f32[2,64,144], index: 0, kind: input, shape index: {}]   ;;  %s2588_s1 = inlined_call_operand.vmem [shape: f32[144,16], index: 1, kind: input, shape index: {}]   ;;  %s2589_s2 = inlined_call_operand.vmem [shape: f32[1,16], index: 2, kind: input, shape index: {}]   ;;  %s2590_s3 = inlined_call_operand.vmem [shape: f32[2,64,16], index: 3, kind: output, shape index: {}]  }
   0x1   :  { %s1753_s14 = smov 0  }
   0x2 LB: > { %s39_s15 = sadd.s32 1, %s1722_s13  ;;  %p1669_p0 = scmp.ge.s32.totalorder %s1726_s14, 1  ;;  %s1726_s14 = sphi %s1753_s14, %s13_s14   ;;  %s1722_s13 = sphi %s1751_s13, %s2709_s13   ;;  %s1718_s12 = sphi %s1749_s12, %s2708_s12  }
   0x3   : > { %p41_p1 = scmp.ge.s32.totalorder %s39_s15, 2  ;;  %p206_p2 = scmp.lt.s32.totalorder %s1726_s14, 3 }
   0x5   : > { %s2711_s15 = smov (%p41_p1, %s39_s15), 0  ;;  %p207_p3 = pnand %p1669_p0, %p206_p2 }
   0x7   : > { %210 = sbr.rel (%p207_p3) target bundleno = 402 (0x192), region = 32 }
   0xc   : > { %v350_v0 = vld [vmem:[%s2588_s1 + $0x78] sm:$0xff]  ;;  %v349_v1 = vld [vmem:[%s2588_s1 + $0x70] sm:$0xff]  ;;  %v348_v2 = vld [vmem:[%s2588_s1 + $0x68] sm:$0xff]  ;;  %p259_p4 = scmp.lt.s32.totalorder %s1718_s12, 1  ;;  %vm302_vm0 = vcmask 130048   ;;  %v2622_v3 = vmov 0.0  }
   0xd   : > { %378 = vmatprep.subr.mxu0 %v2622_v3  ;;  %v1780_v4 = vand.u32 4294901760, %v350_v0  ;;  %v1782_v5 = vand.u32 4294901760, %v349_v1  ;;  %v1784_v6 = vand.u32 4294901760, %v348_v2  ;;  %v347_v7 = vld [vmem:[%s2588_s1 + $0x60] sm:$0xff]  ;;  %581 = vmatprep.subr.mxu1 %v2622_v3  ;;  %v346_v8 = vld [vmem:[%s2588_s1 + $0x58] sm:$0xff]  ;;  %v345_v9 = vld [vmem:[%s2588_s1 + $0x50] sm:$0xff] }
   0xe   : > { %303 = vst.msk [vmem:[#allocation2] sm:$0xff] %vm302_vm0, %v2622_v3  ;;  %304 = vst.msk [vmem:[#allocation2 + $0x8] sm:$0xff] %vm302_vm0, %v2622_v3  ;;  %v1812_v10 = vand.u32 4294901760, %v347_v7  ;;  %v1814_v11 = vand.u32 4294901760, %v346_v8  ;;  %v1816_v12 = vand.u32 4294901760, %v345_v9  ;;  %v344_v13 = vld [vmem:[%s2588_s1 + $0x48] sm:$0xff] }
   0xf   : > { %2638 = vst [vmem:[#allocation3_spill] sm:$0xff] %v1784_v6  ;;  %305 = vst.msk [vmem:[#allocation2 + $0x10] sm:$0xff] %vm302_vm0, %v2622_v3  ;;  %v343_v14 = vld [vmem:[%s2588_s1 + $0x40] sm:$0xff]  ;;  %380 = vmatpush1.msra.mxu0 %v1780_v4  ;;  %v1826_v15 = vsub.f32 %v350_v0, %v1780_v4  ;;  %v1829_v16 = vsub.f32 %v349_v1, %v1782_v5  ;;  %v1831_v17 = vand.u32 4294901760, %v344_v13  ;;  %v342_v19 = vld [vmem:[%s2588_s1 + $0x38] sm:$0xff]  ;;  %s2713_s12 = smov (!%p259_p4, %s1718_s12), 1 }
  0x10   : > { %306 = vst.msk [vmem:[#allocation2 + $0x18] sm:$0xff] %vm302_vm0, %v2622_v3  ;;  %307 = vst.msk [vmem:[#allocation2 + $0x20] sm:$0xff] %vm302_vm0, %v2622_v3  ;;  %v1834_v18 = vsub.f32 %v348_v2, %v1784_v6  ;;  %381 = vmatprep.subr.mxu0 %v2622_v3  ;;  %v1841_v20 = vsub.f32 %v347_v7, %v1812_v10  ;;  %v1844_v21 = vsub.f32 %v346_v8, %v1814_v11  ;;  %v341_v29 = vld [vmem:[%s2588_s1 + $0x30] sm:$0xff]  ;;  %v340_v34 = vld [vmem:[%s2588_s1 + $0x28] sm:$0xff]  ;;  %s1677_s11 = sshll.u32 %s2713_s12, 7  ;;  %s1678_s8 = sshll.u32 %s2713_s12, 6 }
  0x11   : > { %308 = vst.msk [vmem:[#allocation2 + $0x28] sm:$0xff] %vm302_vm0, %v2622_v3  ;;  %309 = vst.msk [vmem:[#allocation2 + $0x30] sm:$0xff] %vm302_vm0, %v2622_v3  ;;  %383 = vmatpush1.msra.mxu0 %v1782_v5  ;;  %v2608_v22 = vand.u32 4294901760, %v1826_v15  ;;  %v2606_v23 = vand.u32 4294901760, %v1829_v16  ;;  %v1855_v25 = vand.u32 4294901760, %v343_v14  ;;  %v1859_v27 = vand.u32 4294901760, %v342_v19  ;;  %s1913_s20 = scalar_lea.vmem %s2587_s0, %s1677_s11  ;;  %s2541_s11 = scalar_lea.vmem %s2590_s3, %s1678_s8 }
  0x12   : > { %310 = vst.msk [vmem:[#allocation2 + $0x38] sm:$0xff] %vm302_vm0, %v2622_v3  ;;  %2639 = vst [vmem:[#allocation4_spill] sm:$0xff] %v1814_v11  ;;  %v2604_v24 = vand.u32 4294901760, %v1834_v18  ;;  %384 = vmatprep.subr.mxu0 %v2622_v3  ;;  %v2601_v26 = vand.u32 4294901760, %v1841_v20  ;;  %v2599_v28 = vand.u32 4294901760, %v1844_v21  ;;  %v1866_v30 = vsub.f32 %v345_v9, %v1816_v12  ;;  %v339_v42 = vld [vmem:[%s2588_s1 + $0x20] sm:$0xff] }
  0x13   : > { %2640 = vst [vmem:[#allocation5_spill] sm:$0xff] %v1829_v16  ;;  %386 = vmatpush1.msra.mxu0 %v1784_v6  ;;  %v585_v31 = vsub.f32 %v1826_v15, %v2608_v22  ;;  %v592_v32 = vsub.f32 %v1829_v16, %v2606_v23  ;;  %v1882_v35 = vsub.f32 %v344_v13, %v1831_v17  ;;  %v1891_v40 = vand.u32 4294901760, %v341_v29  ;;  %v338_v49 = vld [vmem:[%s2588_s1 + $0x18] sm:$0xff]  ;;  %v337_v53 = vld [vmem:[%s2588_s1 + $0x10] sm:$0xff]  ;;  %v320_v56 = vld [vmem:[%s1913_s20 + $0x8] sm:$0xff] }
  0x14   : > { %v599_v33 = vsub.f32 %v1834_v18, %v2604_v24  ;;  %387 = vmatprep.subr.mxu0 %v2622_v3  ;;  %v2598_v36 = vand.u32 4294901760, %v1866_v30  ;;  %v606_v39 = vsub.f32 %v1841_v20, %v2601_v26  ;;  %v1894_v41 = vand.u32 4294901760, %v340_v34  ;;  %v319_v63 = vld [vmem:[%s1913_s20] sm:$0xff]  ;;  %v336_v2 = vld [vmem:[%s2588_s1 + $0x8] sm:$0xff]  ;;  %v326_v26 = vld [vmem:[%s1913_s20 + $0x38] sm:$0xff] }
  0x15   : > { %2641 = vst [vmem:[#allocation6_spill] sm:$0xff] %v1882_v35  ;;  %389 = vmatpush1.msra.mxu0 %v1812_v10  ;;  %v586_v37 = vand.u32 4294901760, %v585_v31  ;;  %v593_v38 = vand.u32 4294901760, %v592_v32  ;;  %v1900_v43 = vsub.f32 %v343_v14, %v1855_v25  ;;  %v613_v45 = vsub.f32 %v1844_v21, %v2599_v28  ;;  %v335_v7 = vld [vmem:[%s2588_s1] sm:$0xff] }
  0x16   : > { %390 = vmatprep.subr.mxu0 %v2622_v3  ;;  %v600_v44 = vand.u32 4294901760, %v599_v33  ;;  %v2596_v46 = vand.u32 4294901760, %v1882_v35  ;;  %v1908_v47 = vsub.f32 %v342_v19, %v1859_v27  ;;  %v620_v48 = vsub.f32 %v1866_v30, %v2598_v36 }
  0x17   : > { %392 = vmatpush1.msra.mxu0 %v1814_v11  ;;  %587 = vmatpush1.msra.mxu1 %v586_v37  ;;  %v607_v50 = vand.u32 4294901760, %v606_v39  ;;  %v1924_v51 = vand.u32 4294901760, %v339_v42  ;;  %v2595_v52 = vand.u32 4294901760, %v1900_v43  ;;  %v1931_v54 = vsub.f32 %v341_v29, %v1891_v40  ;;  %v322_v37 = vld [vmem:[%s1913_s20 + $0x18] sm:$0xff] }
  0x18   : > { %393 = vmatprep.subr.mxu0 %v2622_v3  ;;  %588 = vmatprep.subr.mxu1 %v2622_v3  ;;  %v2594_v55 = vand.u32 4294901760, %v1908_v47  ;;  %v614_v57 = vand.u32 4294901760, %v613_v45  ;;  %v627_v58 = vsub.f32 %v1882_v35, %v2596_v46  ;;  %v1941_v59 = vand.u32 4294901760, %v338_v49 }
  0x19   : > { %395 = vmatpush1.msra.mxu0 %v1816_v12  ;;  %594 = vmatpush1.msra.mxu1 %v593_v38  ;;  %v1944_v60 = vsub.f32 %v340_v34, %v1894_v41  ;;  %v621_v61 = vand.u32 4294901760, %v620_v48  ;;  %v1948_v62 = vand.u32 4294901760, %v337_v53  ;;  %v634_v0 = vsub.f32 %v1900_v43, %v2595_v52 }
  0x1a   : > { %396 = vmatprep.subr.mxu0 %v2622_v3  ;;  %595 = vmatprep.subr.mxu1 %v2622_v3  ;;  %v2593_v1 = vand.u32 4294901760, %v1931_v54  ;;  %v1963_v8 = vsub.f32 %v339_v42, %v1924_v51  ;;  %v355_v9 = vsel %vm302_vm0, %v320_v56, 0  ;;  %v641_v13 = vsub.f32 %v1908_v47, %v2594_v55 }
  0x1b   : > { %398 = vmatpush1.msra.mxu0 %v1831_v17  ;;  %601 = vmatpush1.msra.mxu1 %v600_v44  ;;  %v1971_v14 = vand.u32 4294901760, %v355_v9  ;;  %v628_v19 = vand.u32 4294901760, %v627_v58  ;;  %v2591_v29 = vand.u32 4294901760, %v1944_v60  ;;  %v1976_v31 = vsub.f32 %v338_v49, %v1941_v59  ;;  %v352_v44 = vld [vmem:[%s2588_s1 + $0x88] sm:$0xff] }
  0x1c   : > { %399 = vmatprep.subr.mxu0 %v2622_v3  ;;  %602 = vmatprep.subr.mxu1 %v2622_v3  ;;  %v1978_v32 = vand.u32 4294901760, %v319_v63  ;;  %v1982_v33 = vand.u32 4294901760, %v336_v2  ;;  %v1984_v34 = vand.u32 4294901760, %v335_v7  ;;  %v635_v38 = vand.u32 4294901760, %v634_v0 }
  0x1d   : > { %401 = vmatpush1.msra.mxu0 %v1855_v25  ;;  %608 = vmatpush1.msra.mxu1 %v607_v50  ;;  %2642 = vst [vmem:[#allocation7_spill] sm:$0xff] %v1971_v14  ;;  %v648_v39 = vsub.f32 %v1931_v54, %v2593_v1  ;;  %v2592_v42 = vand.u32 4294901760, %v1963_v8  ;;  %v1996_v45 = vsub.f32 %v337_v53, %v1948_v62  ;;  %v642_v48 = vand.u32 4294901760, %v641_v13  ;;  %v351_v53 = vld [vmem:[%s2588_s1 + $0x80] sm:$0xff] }
  0x1e   : > { %402 = vmatprep.subr.mxu0 %v2622_v3  ;;  %609 = vmatprep.subr.mxu1 %v2622_v3  ;;  %2643 = vst [vmem:[#allocation8_spill] sm:$0xff] %v1978_v32  ;;  %v2001_v49 = vsub.f32 %v355_v9, %v1971_v14  ;;  %v655_v50 = vsub.f32 %v1944_v60, %v2591_v29  ;;  %v2597_v56 = vand.u32 4294901760, %v1976_v31  ;;  %v358_v58 = vsel %vm302_vm0, %v322_v37, 0  ;;  %v321_v37 = vld [vmem:[%s1913_s20 + $0x10] sm:$0xff] }
  0x1f   : > { %404 = vmatpush1.msra.mxu0 %v1859_v27  ;;  %615 = vmatpush1.msra.mxu1 %v614_v57  ;;  %v2012_v57 = vsub.f32 %v319_v63, %v1978_v32  ;;  %v2020_v0 = vsub.f32 %v336_v2, %v1982_v33  ;;  %v649_v9 = vand.u32 4294901760, %v648_v39  ;;  %v662_v63 = vsub.f32 %v1963_v8, %v2592_v42  ;;  %v324_v39 = vld [vmem:[%s1913_s20 + $0x28] sm:$0xff] }
  0x20   : > { %405 = vmatprep.subr.mxu0 %v2622_v3  ;;  %616 = vmatprep.subr.mxu1 %v2622_v3  ;;  %v2600_v13 = vand.u32 4294901760, %v1996_v45  ;;  %v2033_v2 = vand.u32 4294901760, %v351_v53  ;;  %v2602_v29 = vand.u32 4294901760, %v2001_v49  ;;  %v656_v42 = vand.u32 4294901760, %v655_v50 }
  0x21   : > { %407 = vmatpush1.msra.mxu0 %v1891_v40  ;;  %622 = vmatpush1.msra.mxu1 %v621_v61  ;;  %v2017_v61 = vand.u32 4294901760, %v352_v44  ;;  %v2603_v1 = vand.u32 4294901760, %v2012_v57  ;;  %v2605_v55 = vand.u32 4294901760, %v2020_v0  ;;  %v2050_v46 = vand.u32 4294901760, %v321_v37 }
  0x22   : > { %408 = vmatprep.subr.mxu0 %v2622_v3  ;;  %623 = vmatprep.subr.mxu1 %v2622_v3  ;;  %2645 = vst [vmem:[#allocation10_spill] sm:$0xff] %v2033_v2  ;;  %v676_v50 = vsub.f32 %v1996_v45, %v2600_v13  ;;  %v361_v36 = vsel %vm302_vm0, %v324_v39, 0 }
  0x23   : > { %410 = vmatpush1.msra.mxu0 %v1894_v41  ;;  %629 = vmatpush1.msra.mxu1 %v628_v19  ;;  %2644 = vst [vmem:[#allocation9_spill] sm:$0xff] %v2017_v61  ;;  %v2028_v19 = vsub.f32 %v335_v7, %v1984_v34  ;;  %v669_v7 = vsub.f32 %v1976_v31, %v2597_v56  ;;  %2647 = vst [vmem:[#allocation12_spill] sm:$0xff] %v2050_v46 }
  0x24   : > { %411 = vmatprep.subr.mxu0 %v2622_v3  ;;  %630 = vmatprep.subr.mxu1 %v2622_v3  ;;  %v2048_v52 = vsub.f32 %v352_v44, %v2017_v61  ;;  %v463_v44 = vsub.f32 %v2001_v49, %v2602_v29  ;;  %v469_v39 = vsub.f32 %v2012_v57, %v2603_v1 }
  0x25   : > { %413 = vmatpush1.msra.mxu0 %v1924_v51  ;;  %636 = vmatpush1.msra.mxu1 %v635_v38  ;;  %v2036_v38 = vand.u32 4294901760, %v358_v58  ;;  %v2607_v56 = vand.u32 4294901760, %v2028_v19  ;;  %v670_v13 = vand.u32 4294901760, %v669_v7  ;;  %v2082_v29 = vsub.f32 %v321_v37, %v2050_v46  ;;  %v325_v37 = vld [vmem:[%s1913_s20 + $0x30] sm:$0xff] }
  0x26   : > { %414 = vmatprep.subr.mxu0 %v2622_v3  ;;  %637 = vmatprep.subr.mxu1 %v2622_v3  ;;  %v677_v7 = vand.u32 4294901760, %v676_v50  ;;  %v470_v50 = vand.u32 4294901760, %v469_v39  ;;  %v328_v39 = vld [vmem:[%s1913_s20 + $0x48] sm:$0xff] }
  0x27   : > { %2646 = vst [vmem:[#allocation11_spill] sm:$0xff] %v2036_v38  ;;  %416 = vmatpush1.msra.mxu0 %v1941_v59  ;;  %643 = vmatpush1.msra.mxu1 %v642_v48  ;;  %v663_v48 = vand.u32 4294901760, %v662_v63  ;;  %v2064_v28 = vsub.f32 %v358_v58, %v2036_v38  ;;  %v323_v63 = vld [vmem:[%s1913_s20 + $0x20] sm:$0xff]  ;;  %v683_v58 = vsub.f32 %v2020_v0, %v2605_v55  ;;  %2648 = vst [vmem:[#allocation13_spill] sm:$0xff] %v2082_v29 }
  0x28   : > { %417 = vmatprep.subr.mxu0 %v2622_v3  ;;  %644 = vmatprep.subr.mxu1 %v2622_v3  ;;  %v690_v1 = vsub.f32 %v2028_v19, %v2607_v56  ;;  %v2090_v24 = vand.u32 4294901760, %v323_v63  ;;  %v464_v55 = vand.u32 4294901760, %v463_v44 }
  0x29   : > { %419 = vmatpush1.msra.mxu0 %v1948_v62  ;;  %650 = vmatpush1.msra.mxu1 %v649_v9  ;;  %v2067_v9 = vsub.f32 %v351_v53, %v2033_v2  ;;  %v2609_v53 = vand.u32 4294901760, %v2048_v52  ;;  %v684_v56 = vand.u32 4294901760, %v683_v58 }
  0x2a   : > { %420 = vmatprep.subr.mxu0 %v2622_v3  ;;  %651 = vmatprep.subr.mxu1 %v2622_v3  ;;  %2649 = vst [vmem:[#allocation14_spill] sm:$0xff] %v2090_v24  ;;  %v691_v58 = vand.u32 4294901760, %v690_v1  ;;  %v2652_v1 = vand.u32 4294901760, %v2082_v29 }
  0x2b   : > { %422 = vmatpush1.msra.mxu0 %v1982_v33  ;;  %657 = vmatpush1.msra.mxu1 %v656_v42  ;;  %v2084_v42 = vand.u32 4294901760, %v361_v36  ;;  %v725_v44 = vsub.f32 %v2048_v52, %v2609_v53  ;;  %v2650_v53 = vand.u32 4294901760, %v2064_v28 }
  0x2c   : > { %423 = vmatprep.subr.mxu0 %v2622_v3  ;;  %658 = vmatprep.subr.mxu1 %v2622_v3 }
  0x2d   : > { %425 = vmatpush1.msra.mxu0 %v1984_v34  ;;  %664 = vmatpush1.msra.mxu1 %v663_v48  ;;  %v364_v48 = vsel %vm302_vm0, %v326_v26, 0  ;;  %v2105_v23 = vsub.f32 %v361_v36, %v2084_v42  ;;  %v2110_v26 = vsub.f32 %v323_v63, %v2090_v24  ;;  %v478_v22 = vsub.f32 %v2064_v28, %v2650_v53 }
  0x2e   : > { %454 = vmatprep.subr.mxu0 %v2622_v3  ;;  %665 = vmatprep.subr.mxu1 %v2622_v3  ;;  %v2651_v36 = vand.u32 4294901760, %v2067_v9  ;;  %v2123_v63 = vand.u32 4294901760, %v325_v37 }
  0x2f   : > { %456 = vmatpush2.msra.mxu0 %v2017_v61  ;;  %671 = vmatpush1.msra.mxu1 %v670_v13  ;;  %v2112_v13 = vand.u32 4294901760, %v364_v48 }
  0x30   : > { %457 = vmatprep.subr.mxu0 %v2622_v3  ;;  %672 = vmatprep.subr.mxu1 %v2622_v3  ;;  %v732_v61 = vsub.f32 %v2067_v9, %v2651_v36 }
  0x31   : > { %459 = vmatpush2.msra.mxu0 %v2033_v2  ;;  %678 = vmatpush1.msra.mxu1 %v677_v7  ;;  %v484_v7 = vsub.f32 %v2082_v29, %v2652_v1  ;;  %v367_v2 = vsel %vm302_vm0, %v328_v39, 0  ;;  %v327_v1 = vld [vmem:[%s1913_s20 + $0x40] sm:$0xff]  ;;  %v2142_v39 = vsub.f32 %v325_v37, %v2123_v63  ;;  %v330_v29 = vld [vmem:[%s1913_s20 + $0x58] sm:$0xff]  ;;  %v329_v37 = vld [vmem:[%s1913_s20 + $0x50] sm:$0xff] }
  0x32   : > { %465 = vmatprep.mubr.f32.mxu0 %v464_v55  ;;  %679 = vmatprep.subr.mxu1 %v2622_v3  ;;  %v726_v55 = vand.u32 4294901760, %v725_v44  ;;  %v479_v44 = vand.u32 4294901760, %v478_v22  ;;  %v733_v36 = vand.u32 4294901760, %v732_v61  ;;  %v2144_v53 = vand.u32 4294901760, %v367_v2 }
  0x33   : > { %792 = vmatprep.subr.mxu0 %v2622_v3  ;;  %471 = vmatmul.mubr.f32.vlgmr.msra.gmra.mxu0 %v470_v50  ;;  %v2617_v50 = vand.u32 4294901760, %v2110_v26 }
  0x34   : > { %685 = vmatpush1.msra.mxu1 %v684_v56  ;;  %795 = vmatpush1.msra.mxu0 %v1826_v15  ;;  %v2135_v56 = vsub.f32 %v364_v48, %v2112_v13  ;;  %v485_v48 = vand.u32 4294901760, %v484_v7 }
  0x35   : > { %686 = vmatprep.subr.mxu1 %v2622_v3  ;;  %796 = vmatprep.subr.mxu0 %v2622_v3  ;;  %v499_v61 = vsub.f32 %v2110_v26, %v2617_v50 }
  0x36   : > { %2653 = vst [vmem:[#allocation15_spill] sm:$0xff] %v2135_v56  ;;  %692 = vmatpush1.msra.mxu1 %v691_v58  ;;  %799 = vmatpush1.msra.mxu0 %v1829_v16  ;;  %v2654_v58 = vand.u32 4294901760, %v2105_v23  ;;  %v2157_v16 = vand.u32 4294901760, %v327_v1 }
  0x37   : > { %721 = vmatprep.subr.mxu1 %v2622_v3  ;;  %800 = vmatprep.subr.mxu0 %v2622_v3 }
  0x38   : > { %727 = vmatpush2.msra.mxu1 %v726_v55  ;;  %803 = vmatpush1.msra.mxu0 %v1834_v18  ;;  %v493_v22 = vsub.f32 %v2105_v23, %v2654_v58  ;;  %v370_v55 = vsel %vm302_vm0, %v330_v29, 0  ;;  %v2164_v58 = vsub.f32 %v367_v2, %v2144_v53  ;;  %v2656_v29 = vand.u32 4294901760, %v2135_v56  ;;  %v332_v2 = vld [vmem:[%s1913_s20 + $0x68] sm:$0xff] }
  0x39   : > { %728 = vmatprep.subr.mxu1 %v2622_v3  ;;  %804 = vmatprep.subr.mxu0 %v2622_v3  ;;  %v2176_v7 = vand.u32 4294901760, %v370_v55 }
  0x3a   : > { %480 = vmatprep.mubr.f32.mxu0 %v479_v44  ;;  %734 = vmatpush2.msra.mxu1 %v733_v36  ;;  %2655 = vst [vmem:[#allocation16_spill] sm:$0xff] %v2164_v58  ;;  %v494_v50 = vand.u32 4294901760, %v493_v22  ;;  %v500_v44 = vand.u32 4294901760, %v499_v61  ;;  %v508_v36 = vsub.f32 %v2135_v56, %v2656_v29  ;;  %v373_v29 = vsel %vm302_vm0, %v332_v2, 0  ;;  %v331_v61 = vld [vmem:[%s1913_s20 + $0x60] sm:$0xff] }
  0x3b   : > { %736 = vmatprep.mubr.f32.mxu1 %v1971_v14  ;;  %807 = vmatpush1.msra.mxu0 %v1841_v20  ;;  %v2174_v14 = vsub.f32 %v327_v1, %v2157_v16  ;;  %v2187_v1 = vand.u32 4294901760, %v329_v37  ;;  %v2194_v56 = vsub.f32 %v370_v55, %v2176_v7  ;;  %v2659_v2 = vand.u32 4294901760, %v2164_v58  ;;  %v334_v55 = vld [vmem:[%s1913_s20 + $0x78] sm:$0xff] }
  0x3c   : > { %486 = vmatmul.mubr.f32.gmra.mxu0 %v485_v48  ;;  %738 = vmatmul.mubr.f32.vlgmr.msra.gmra.mxu1 %v1978_v32  ;;  %v2657_v48 = vand.u32 4294901760, %v2142_v39  ;;  %v509_v32 = vand.u32 4294901760, %v508_v36 }
  0x3d   : > { %808 = vmatprep.subr.mxu0 %v2622_v3  ;;  %965 = vmatprep.subr.mxu1 %v2622_v3  ;;  %v2205_v36 = vsub.f32 %v329_v37, %v2187_v1  ;;  %v376_v37 = vsel %vm302_vm0, %v334_v55, 0  ;;  %v2661_v55 = vand.u32 4294901760, %v2194_v56 }
  0x3e   : > { %811 = vmatpush1.msra.mxu0 %v1844_v21  ;;  %967 = vmatpush1.msra.mxu1 %v1780_v4  ;;  %v514_v22 = vsub.f32 %v2142_v39, %v2657_v48  ;;  %v2658_v48 = vmov 0.0  }
  0x3f   : > { %812 = vmatprep.subr.mxu0 %v2622_v3  ;;  %968 = vmatprep.subr.mxu1 %v2622_v3  ;;  %v2207_v3 = vand.u32 4294901760, %v373_v29 }
  0x40   : > { %495 = vmatprep.mubr.f32.mxu0 %v494_v50  ;;  %815 = vmatpush1.msra.mxu0 %v1866_v30  ;;  %v515_v50 = vand.u32 4294901760, %v514_v22  ;;  %v2660_v22 = vand.u32 4294901760, %v2174_v14 }
  0x41   : > { %970 = vmatpush1.msra.mxu1 %v1782_v5  ;;  %501 = vmatmul.mubr.f32.gmra.mxu0 %v500_v44  ;;  %v523_v44 = vsub.f32 %v2164_v58, %v2659_v2  ;;  %v2217_v58 = vand.u32 4294901760, %v331_v61 }
  0x42   : > { %816 = vmatprep.subr.mxu0 %v2658_v48  ;;  %971 = vmatprep.subr.mxu1 %v2658_v48 }
  0x43   : > { %819 = vmatpush1.msra.mxu0 %v1882_v35  ;;  %973 = vmatpush1.msra.mxu1 %v1784_v6  ;;  %v529_v6 = vsub.f32 %v2174_v14, %v2660_v22  ;;  %v2225_v35 = vsub.f32 %v373_v29, %v2207_v3  ;;  %v333_v22 = vld [vmem:[%s1913_s20 + $0x70] sm:$0xff]  ;;  %v2662_v29 = vand.u32 4294901760, %v2205_v36 }
  0x44   : > { %743 = vmatprep.mubr.f32.mxu1 %v2036_v38  ;;  %820 = vmatprep.subr.mxu0 %v2658_v48  ;;  %v524_v38 = vand.u32 4294901760, %v523_v44  ;;  %v2236_v44 = vsub.f32 %v331_v61, %v2217_v58 }
  0x45   : > { %974 = vmatprep.subr.mxu1 %v2658_v48  ;;  %510 = vmatprep.mubr.f32.mxu0 %v509_v32  ;;  %v530_v2 = vand.u32 4294901760, %v529_v6  ;;  %v2238_v32 = vand.u32 4294901760, %v376_v37  ;;  %v544_v6 = vsub.f32 %v2205_v36, %v2662_v29 }
  0x46   : > { %745 = vmatmul.mubr.f32.gmra.mxu1 %v2050_v46  ;;  %823 = vmatpush1.msra.mxu0 %v1900_v43  ;;  %v552_v46 = vand.u32 4294901760, %v2225_v35 }
  0x47   : > { %976 = vmatpush1.msra.mxu1 %v1812_v10  ;;  %516 = vmatmul.mubr.f32.gmra.mxu0 %v515_v50  ;;  %v538_v50 = vsub.f32 %v2194_v56, %v2661_v55  ;;  %v2637_v55 = vand.u32 4294901760, %v2236_v44  ;;  %v545_v29 = vand.u32 4294901760, %v544_v6 }
  0x48   : > { %824 = vmatprep.subr.mxu0 %v2658_v48  ;;  %977 = vmatprep.subr.mxu1 %v2658_v48 }
  0x49   : > { %827 = vmatpush1.msra.mxu0 %v1908_v47  ;;  %979 = vmatpush1.msra.mxu1 %v1814_v11  ;;  %v2247_v11 = vand.u32 4294901760, %v333_v22  ;;  %v539_v61 = vand.u32 4294901760, %v538_v50 }
  0x4a   : > { %750 = vmatprep.mubr.f32.mxu1 %v2084_v42  ;;  %828 = vmatprep.subr.mxu0 %v2658_v48 }
  0x4b   : > { %980 = vmatprep.subr.mxu1 %v2658_v48  ;;  %525 = vmatprep.mubr.f32.mxu0 %v524_v38  ;;  %v2254_v38 = vsub.f32 %v376_v37, %v2238_v32  ;;  %v559_v37 = vsub.f32 %v2236_v44, %v2637_v55 }
  0x4c   : > { %752 = vmatmul.mubr.f32.gmra.mxu1 %v2090_v24  ;;  %831 = vmatpush1.msra.mxu0 %v1931_v54  ;;  %v553_v24 = vsub.f32 %v2225_v35, %v552_v46 }
  0x4d   : > { %982 = vmatpush1.msra.mxu1 %v1816_v12  ;;  %531 = vmatmul.mubr.f32.gmra.mxu0 %v530_v2  ;;  %v2264_v2 = vsub.f32 %v333_v22, %v2247_v11  ;;  %v567_v50 = vand.u32 4294901760, %v2254_v38 }
  0x4e   : > { %832 = vmatprep.subr.mxu0 %v2658_v48  ;;  %983 = vmatprep.subr.mxu1 %v2658_v48  ;;  %v554_v22 = vand.u32 4294901760, %v553_v24 }
  0x4f   : > { %835 = vmatpush1.msra.mxu0 %v1944_v60  ;;  %985 = vmatpush1.msra.mxu1 %v1831_v17  ;;  %v573_v6 = vand.u32 4294901760, %v2264_v2  ;;  %v568_v55 = vsub.f32 %v2254_v38, %v567_v50 }
  0x50   : > { %757 = vmatprep.mubr.f32.mxu1 %v2112_v13  ;;  %836 = vmatprep.subr.mxu0 %v2658_v48 }
  0x51   : > { %986 = vmatprep.subr.mxu1 %v2658_v48  ;;  %540 = vmatprep.mubr.f32.mxu0 %v539_v61  ;;  %v560_v61 = vand.u32 4294901760, %v559_v37  ;;  %v574_v24 = vsub.f32 %v2264_v2, %v573_v6 }
  0x52   : > { %759 = vmatmul.mubr.f32.gmra.mxu1 %v2123_v63  ;;  %839 = vmatpush1.msra.mxu0 %v1963_v8 }
  0x53   : > { %988 = vmatpush1.msra.mxu1 %v1855_v25  ;;  %546 = vmatmul.mubr.f32.gmra.mxu0 %v545_v29  ;;  %v569_v29 = vand.u32 4294901760, %v568_v55  ;;  %v575_v37 = vand.u32 4294901760, %v574_v24  ;;  %v2663_v55 = vand.u32 4294901760, %v1826_v15  ;;  %v2666_v24 = vld [vmem:[#allocation13_spill] sm:$0xff] }
  0x54   : > { %840 = vmatprep.subr.mxu0 %v2658_v48  ;;  %989 = vmatprep.subr.mxu1 %v2658_v48  ;;  %v2667_v15 = vld [vmem:[#allocation9_spill] sm:$0xff] }
  0x55   : > { %843 = vmatpush1.msra.mxu0 %v1976_v31  ;;  %991 = vmatpush1.msra.mxu1 %v1859_v27 }
  0x56   : > { %764 = vmatprep.mubr.f32.mxu1 %v2144_v53  ;;  %844 = vmatprep.subr.mxu0 %v2658_v48 }
  0x57   : > { %992 = vmatprep.subr.mxu1 %v2658_v48  ;;  %555 = vmatprep.mubr.f32.mxu0 %v554_v22  ;;  %v2664_v22 = vld [vmem:[#allocation5_spill] sm:$0xff] }
  0x58   : > { %766 = vmatmul.mubr.f32.gmra.mxu1 %v2157_v16  ;;  %847 = vmatpush1.msra.mxu0 %v1996_v45 }
  0x59   : > { %994 = vmatpush1.msra.mxu1 %v1891_v40  ;;  %561 = vmatmul.mubr.f32.gmra.mxu0 %v560_v61  ;;  %v2665_v61 = vand.u32 4294901760, %v2664_v22  ;;  %v2671_v22 = vand.u32 4294901760, %v1841_v20  ;;  %v2674_v20 = vld [vmem:[#allocation15_spill] sm:$0xff] }
  0x5a   : > { %848 = vmatprep.subr.mxu0 %v2658_v48  ;;  %995 = vmatprep.subr.mxu1 %v2658_v48 }
  0x5b   : > { %851 = vmatpush1.msra.mxu0 %v2020_v0  ;;  %997 = vmatpush1.msra.mxu1 %v1894_v41 }
  0x5c   : > { %771 = vmatprep.mubr.f32.mxu1 %v2176_v7  ;;  %852 = vmatprep.subr.mxu0 %v2658_v48 }
  0x5d   : > { %998 = vmatprep.subr.mxu1 %v2658_v48  ;;  %570 = vmatprep.mubr.f32.mxu0 %v569_v29  ;;  %v2668_v29 = vand.u32 4294901760, %v1834_v18  ;;  %v2673_v18 = vand.u32 4294901760, %v1844_v21  ;;  %v2677_v21 = vand.u32 4294901760, %v2666_v24 }
  0x5e   : > { %773 = vmatmul.mubr.f32.gmra.mxu1 %v2187_v1  ;;  %855 = vmatpush1.msra.mxu0 %v2028_v19 }
  0x5f   : > { %1000 = vmatpush1.msra.mxu1 %v1924_v51  ;;  %576 = vmatmul.mubr.f32.gmra.mxu0 %v575_v37  ;;  %v2669_v37 = vld [vmem:[#allocation10_spill] sm:$0xff] }
  0x60   : > { %884 = vmatprep.subr.mxu0 %v2658_v48  ;;  %1001 = vmatprep.subr.mxu1 %v2658_v48 }
  0x61   : > { %887 = vmatpush2.msra.mxu0 %v2048_v52  ;;  %1003 = vmatpush1.msra.mxu1 %v1941_v59 }
  0x62   : > { %778 = vmatprep.mubr.f32.mxu1 %v2207_v3  ;;  %888 = vmatprep.subr.mxu0 %v2658_v48 }
  0x63   : > { %1004 = vmatprep.subr.mxu1 %v2658_v48  ;;  %780 = vmatmul.mubr.f32.gmra.mxu1 %v2217_v58 }
  0x64   : > { %891 = vmatpush2.msra.mxu0 %v2067_v9  ;;  %894 = vmatprep.mubr.f32.mxu0 %v2001_v49 }
  0x65   : > { %1006 = vmatpush1.msra.mxu1 %v1948_v62  ;;  %897 = vmatmul.mubr.f32.vlgmr.msra.gmra.mxu0 %v2012_v57 }
  0x66   : > { %1007 = vmatprep.subr.mxu1 %v2658_v48  ;;  %1136 = vmatprep.subr.mxu0 %v2658_v48 }
  0x67   : > { %1009 = vmatpush1.msra.mxu1 %v1982_v33  ;;  %1140 = vmatpush1.msra.mxu0 %v2663_v55  ;;  %v2670_v55 = vand.u32 4294901760, %v2001_v49  ;;  %v2675_v49 = vand.u32 4294901760, %v2064_v28 }
  0x68   : > { %785 = vmatprep.mubr.f32.mxu1 %v2238_v32  ;;  %1010 = vmatprep.subr.mxu1 %v2658_v48 }
  0x69   : > { %1141 = vmatprep.subr.mxu0 %v2658_v48  ;;  %787 = vmatmul.mubr.f32.gmra.mxu1 %v2247_v11 }
  0x6a   : > { %903 = vmatprep.mubr.f32.mxu0 %v2064_v28  ;;  %1012 = vmatpush1.msra.mxu1 %v1984_v34  ;;  %v2681_v28 = vld [vmem:[#allocation16_spill] sm:$0xff] }
  0x6b   : > { %1145 = vmatpush1.msra.mxu0 %v2665_v61  ;;  %1041 = vmatprep.subr.mxu1 %v2658_v48  ;;  %v2672_v61 = vand.u32 4294901760, %v2012_v57  ;;  %v2676_v57 = vand.u32 4294901760, %v1866_v30  ;;  %v2683_v30 = vand.u32 4294901760, %v1900_v43  ;;  %v2689_v43 = vand.u32 4294901760, %v2142_v39 }
  0x6c   : > { %906 = vmatmul.mubr.f32.gmra.mxu0 %v2666_v24  ;;  %1146 = vmatprep.subr.mxu0 %v2658_v48  ;;  %v2684_v24 = vand.u32 4294901760, %v2110_v26 }
  0x6d   : > { %1043 = vmatpush2.msra.mxu1 %v2667_v15  ;;  %1150 = vmatpush1.msra.mxu0 %v2668_v29 }
  0x6e   : > { %1044 = vmatprep.subr.mxu1 %v2658_v48  ;;  %1151 = vmatprep.subr.mxu0 %v2658_v48 }
  0x6f   : > { %912 = vmatprep.mubr.f32.mxu0 %v2105_v23  ;;  %1046 = vmatpush2.msra.mxu1 %v2669_v37 }
  0x70   : > { %1050 = vmatprep.mubr.f32.mxu1 %v2670_v55  ;;  %1155 = vmatpush1.msra.mxu0 %v2671_v22  ;;  %v2680_v55 = vld [vmem:[#allocation3_spill] sm:$0xff]  ;;  %v2685_v22 = vand.u32 4294901760, %v1908_v47  ;;  %v2690_v47 = vand.u32 4294901760, %v1944_v60  ;;  %v2693_v60 = vand.u32 4294901760, %v2174_v14 }
  0x71   : > { %915 = vmatmul.mubr.f32.gmra.mxu0 %v2110_v26  ;;  %1054 = vmatmul.mubr.f32.vlgmr.msra.gmra.mxu1 %v2672_v61  ;;  %v2686_v61 = vld [vmem:[#allocation4_spill] sm:$0xff] }
  0x72   : > { %1156 = vmatprep.subr.mxu0 %v2658_v48  ;;  %1311 = vmatprep.subr.mxu1 %v2658_v48 }
  0x73   : > { %1160 = vmatpush1.msra.mxu0 %v2673_v18  ;;  %1313 = vmatpush1.msra.mxu1 %v1780_v4  ;;  %v2678_v4 = vld [vmem:[#allocation6_spill] sm:$0xff] }
  0x74   : > { %1161 = vmatprep.subr.mxu0 %v2658_v48  ;;  %1314 = vmatprep.subr.mxu1 %v2658_v48  ;;  %v2679_v29 = vand.u32 4294901760, %v2678_v4 }
  0x75   : > { %921 = vmatprep.mubr.f32.mxu0 %v2674_v20  ;;  %1061 = vmatprep.mubr.f32.mxu1 %v2675_v49 }
  0x76   : > { %1165 = vmatpush1.msra.mxu0 %v2676_v57  ;;  %1316 = vmatpush1.msra.mxu1 %v1782_v5  ;;  %v2682_v5 = vand.u32 4294901760, %v2105_v23  ;;  %v2688_v23 = vand.u32 4294901760, %v1931_v54  ;;  %v2692_v54 = vand.u32 4294901760, %v1963_v8  ;;  %v2696_v8 = vand.u32 4294901760, %v1996_v45 }
  0x77   : > { %924 = vmatmul.mubr.f32.gmra.mxu0 %v2142_v39  ;;  %1065 = vmatmul.mubr.f32.gmra.mxu1 %v2677_v21 }
  0x78   : > { %1166 = vmatprep.subr.mxu0 %v2658_v48  ;;  %1317 = vmatprep.subr.mxu1 %v2658_v48 }
  0x79   : > { %1170 = vmatpush1.msra.mxu0 %v2679_v29  ;;  %1319 = vmatpush1.msra.mxu1 %v2680_v55 }
  0x7a   : > { %1171 = vmatprep.subr.mxu0 %v2658_v48  ;;  %1320 = vmatprep.subr.mxu1 %v2658_v48 }
  0x7b   : > { %930 = vmatprep.mubr.f32.mxu0 %v2681_v28  ;;  %1072 = vmatprep.mubr.f32.mxu1 %v2682_v5 }
  0x7c   : > { %1175 = vmatpush1.msra.mxu0 %v2683_v30  ;;  %1322 = vmatpush1.msra.mxu1 %v1812_v10  ;;  %v2687_v10 = vand.u32 4294901760, %v2674_v20 }
  0x7d   : > { %933 = vmatmul.mubr.f32.gmra.mxu0 %v2174_v14  ;;  %1076 = vmatmul.mubr.f32.gmra.mxu1 %v2684_v24  ;;  %v2697_v14 = vand.u32 4294901760, %v2205_v36 }
  0x7e   : > { %1176 = vmatprep.subr.mxu0 %v2658_v48  ;;  %1323 = vmatprep.subr.mxu1 %v2658_v48 }
  0x7f   : > { %1180 = vmatpush1.msra.mxu0 %v2685_v22  ;;  %1325 = vmatpush1.msra.mxu1 %v2686_v61 }
  0x80   : > { %1181 = vmatprep.subr.mxu0 %v2658_v48  ;;  %1326 = vmatprep.subr.mxu1 %v2658_v48 }
  0x81   : > { %939 = vmatprep.mubr.f32.mxu0 %v2194_v56  ;;  %1083 = vmatprep.mubr.f32.mxu1 %v2687_v10 }
  0x82   : > { %1185 = vmatpush1.msra.mxu0 %v2688_v23  ;;  %1328 = vmatpush1.msra.mxu1 %v1816_v12  ;;  %v2691_v12 = vand.u32 4294901760, %v2681_v28 }
  0x83   : > { %942 = vmatmul.mubr.f32.gmra.mxu0 %v2205_v36  ;;  %1087 = vmatmul.mubr.f32.gmra.mxu1 %v2689_v43 }
  0x84   : > { %1186 = vmatprep.subr.mxu0 %v2658_v48  ;;  %1329 = vmatprep.subr.mxu1 %v2658_v48 }
  0x85   : > { %1190 = vmatpush1.msra.mxu0 %v2690_v47  ;;  %1331 = vmatpush1.msra.mxu1 %v1831_v17  ;;  %v2694_v17 = vand.u32 4294901760, %v1976_v31  ;;  %v2700_v31 = vand.u32 4294901760, %v2236_v44 }
  0x86   : > { %1191 = vmatprep.subr.mxu0 %v2658_v48  ;;  %1332 = vmatprep.subr.mxu1 %v2658_v48 }
  0x87   : > { %948 = vmatprep.mubr.f32.mxu0 %v2225_v35  ;;  %1094 = vmatprep.mubr.f32.mxu1 %v2691_v12  ;;  %v2702_v35 = vand.u32 4294901760, %v2067_v9 }
  0x88   : > { %1195 = vmatpush1.msra.mxu0 %v2692_v54  ;;  %1334 = vmatpush1.msra.mxu1 %v1855_v25  ;;  %v2695_v25 = vand.u32 4294901760, %v2194_v56 }
  0x89   : > { %951 = vmatmul.mubr.f32.gmra.mxu0 %v2236_v44  ;;  %1098 = vmatmul.mubr.f32.gmra.mxu1 %v2693_v60 }
  0x8a   : > { %1196 = vmatprep.subr.mxu0 %v2658_v48  ;;  %1335 = vmatprep.subr.mxu1 %v2658_v48 }
  0x8b   : > { %1200 = vmatpush1.msra.mxu0 %v2694_v17  ;;  %1337 = vmatpush1.msra.mxu1 %v1859_v27  ;;  %v2698_v27 = vand.u32 4294901760, %v2020_v0 }
  0x8c   : > { %1201 = vmatprep.subr.mxu0 %v2658_v48  ;;  %1338 = vmatprep.subr.mxu1 %v2658_v48 }
  0x8d   : > { %957 = vmatprep.mubr.f32.mxu0 %v2254_v38  ;;  %1105 = vmatprep.mubr.f32.mxu1 %v2695_v25 }
  0x8e   : > { %1205 = vmatpush1.msra.mxu0 %v2696_v8  ;;  %1340 = vmatpush1.msra.mxu1 %v1891_v40  ;;  %v2699_v40 = vand.u32 4294901760, %v2028_v19 }
  0x8f   : > { %960 = vmatmul.mubr.f32.gmra.mxu0 %v2264_v2  ;;  %1109 = vmatmul.mubr.f32.gmra.mxu1 %v2697_v14 }
  0x90   : > { %1206 = vmatprep.subr.mxu0 %v2658_v48  ;;  %1341 = vmatprep.subr.mxu1 %v2658_v48 }
  0x91   : > { %1210 = vmatpush1.msra.mxu0 %v2698_v27  ;;  %1343 = vmatpush1.msra.mxu1 %v1894_v41  ;;  %v2701_v41 = vand.u32 4294901760, %v2048_v52  ;;  %v2705_v52 = vld [vmem:[#allocation11_spill] sm:$0xff] }
  0x92   : > { %1211 = vmatprep.subr.mxu0 %v2658_v48  ;;  %1344 = vmatprep.subr.mxu1 %v2658_v48 }
  0x93   : > { %1116 = vmatprep.mubr.f32.mxu1 %v552_v46  ;;  %1215 = vmatpush1.msra.mxu0 %v2699_v40  ;;  %v2703_v46 = vld [vmem:[#allocation7_spill] sm:$0xff] }
  0x94   : > { %1346 = vmatpush1.msra.mxu1 %v1924_v51  ;;  %1244 = vmatprep.subr.mxu0 %v2658_v48  ;;  %v2704_v51 = vld [vmem:[#allocation8_spill] sm:$0xff] }
  0x95   : > { %1120 = vmatmul.mubr.f32.gmra.mxu1 %v2700_v31  ;;  %1347 = vmatprep.subr.mxu1 %v2658_v48 }
  0x96   : > { %1248 = vmatpush2.msra.mxu0 %v2701_v41  ;;  %1349 = vmatpush1.msra.mxu1 %v1941_v59  ;;  %v2706_v59 = vld [vmem:[#allocation12_spill] sm:$0xff] }
  0x97   : > { %1249 = vmatprep.subr.mxu0 %v2658_v48  ;;  %1350 = vmatprep.subr.mxu1 %v2658_v48 }
  0x98   : > { %1127 = vmatprep.mubr.f32.mxu1 %v567_v50  ;;  %1253 = vmatpush2.msra.mxu0 %v2702_v35 }
  0x99   : > { %1255 = vmatprep.mubr.f32.mxu0 %v2703_v46  ;;  %1352 = vmatpush1.msra.mxu1 %v1948_v62  ;;  %v2707_v62 = vld [vmem:[#allocation14_spill] sm:$0xff] }
  0x9a   : > { %1131 = vmatmul.mubr.f32.gmra.mxu1 %v573_v6  ;;  %1257 = vmatmul.mubr.f32.vlgmr.msra.gmra.mxu0 %v2704_v51 }
  0x9b   : > { %1353 = vmatprep.subr.mxu1 %v2658_v48  ;;  %1262 = vmatprep.mubr.f32.mxu0 %v2705_v52 }
  0x9c   : > { %1355 = vmatpush1.msra.mxu1 %v1982_v33  ;;  %1394 = vmatprep.mubr.f32.mxu1 %v2703_v46 }
  0x9d   : > { %1356 = vmatprep.subr.mxu1 %v2658_v48 }
  0x9e   : > { %1358 = vmatpush1.msra.mxu1 %v1984_v34  ;;  %1264 = vmatmul.mubr.f32.gmra.mxu0 %v2706_v59 }
  0x9f   : > { %1387 = vmatprep.subr.mxu1 %v2658_v48  ;;  %1269 = vmatprep.mubr.f32.mxu0 %v2084_v42 }
  0xa0   : > { %1389 = vmatpush2.msra.mxu1 %v2667_v15 }
  0xa1   : > { %1390 = vmatprep.subr.mxu1 %v2658_v48 }
  0xa2   : > { %1392 = vmatpush2.msra.mxu1 %v2669_v37  ;;  %1271 = vmatmul.mubr.f32.gmra.mxu0 %v2707_v62 }
  0xa3   : > { %1396 = vmatmul.mubr.f32.vlgmr.msra.gmra.mxu1 %v2704_v51  ;;  %1276 = vmatprep.mubr.f32.mxu0 %v2112_v13 }
  0xa4   : > { %1401 = vmatprep.mubr.f32.mxu1 %v2705_v52 }
  0xa6   : > { %1278 = vmatmul.mubr.f32.gmra.mxu0 %v2123_v63 }
  0xa7   : > { %1403 = vmatmul.mubr.f32.gmra.mxu1 %v2706_v59  ;;  %1283 = vmatprep.mubr.f32.mxu0 %v2144_v53 }
  0xa8   : > { %1408 = vmatprep.mubr.f32.mxu1 %v2084_v42 }
  0xaa   : > { %1285 = vmatmul.mubr.f32.gmra.mxu0 %v2157_v16 }
  0xab   : > { %1410 = vmatmul.mubr.f32.gmra.mxu1 %v2707_v62  ;;  %1290 = vmatprep.mubr.f32.mxu0 %v2176_v7 }
  0xac   : > { %1415 = vmatprep.mubr.f32.mxu1 %v2112_v13 }
  0xae   : > { %1292 = vmatmul.mubr.f32.gmra.mxu0 %v2187_v1 }
  0xaf   : > { %1417 = vmatmul.mubr.f32.gmra.mxu1 %v2123_v63  ;;  %1297 = vmatprep.mubr.f32.mxu0 %v2207_v3 }
  0xb0   : > { %1422 = vmatprep.mubr.f32.mxu1 %v2144_v53 }
  0xb2   : > { %1299 = vmatmul.mubr.f32.gmra.mxu0 %v2217_v58 }
  0xb3   : > { %1424 = vmatmul.mubr.f32.gmra.mxu1 %v2157_v16  ;;  %1304 = vmatprep.mubr.f32.mxu0 %v2238_v32 }
  0xb4   : > { %1429 = vmatprep.mubr.f32.mxu1 %v2176_v7 }
  0xb6   : > { %1306 = vmatmul.mubr.f32.gmra.mxu0 %v2247_v11 }
  0xb7   : > { %1431 = vmatmul.mubr.f32.gmra.mxu1 %v2187_v1 }
  0xb8   : > { %1436 = vmatprep.mubr.f32.mxu1 %v2207_v3 }
  0xbb   : > { %1438 = vmatmul.mubr.f32.gmra.mxu1 %v2217_v58 }
  0xbc   : > { %1443 = vmatprep.mubr.f32.mxu1 %v2238_v32 }
  0xbf   : > { %1445 = vmatmul.mubr.f32.gmra.mxu1 %v2247_v11 }
  0xf3   : > { %v472_v33 = vpop.f32.mrf.mxu0 }
  0xf5   : > { %v474_v34 = vpop.f32.mrf.mxu0 }
  0xfc   : > { %v487_v45 = vpop.f32.mrf.mxu0  ;;  %v739_v16 = vpop.f32.mrf.mxu1 }
  0xfd   : > { %v2493_v0 = vadd.f32 %v739_v16, %v472_v33 }
  0xfe   : > { %v489_v19 = vpop.f32.mrf.mxu0  ;;  %v741_v9 = vpop.f32.mrf.mxu1 }
 0x101   : > { %v502_v42 = vpop.f32.mrf.mxu0 }
 0x103   : > { %v504_v26 = vpop.f32.mrf.mxu0 }
 0x106   : > { %v746_v13 = vpop.f32.mrf.mxu1 }
 0x107   : > { %v2495_v63 = vadd.f32 %v746_v13, %v487_v45  ;;  %v517_v3 = vpop.f32.mrf.mxu0 }
 0x108   : > { %v748_v53 = vpop.f32.mrf.mxu1 }
 0x109   : > { %v519_v56 = vpop.f32.mrf.mxu0 }
 0x10c   : > { %v753_v39 = vpop.f32.mrf.mxu1 }
 0x10d   : > { %v2497_v7 = vadd.f32 %v753_v39, %v502_v42  ;;  %v532_v11 = vpop.f32.mrf.mxu0 }
 0x10e   : > { %v755_v58 = vpop.f32.mrf.mxu1 }
 0x10f   : > { %v534_v1 = vpop.f32.mrf.mxu0 }
 0x112   : > { %v760_v48 = vpop.f32.mrf.mxu1 }
 0x113   : > { %v2499_v36 = vadd.f32 %v760_v48, %v517_v3  ;;  %v547_v32 = vpop.f32.mrf.mxu0 }
 0x114   : > { %v762_v44 = vpop.f32.mrf.mxu1 }
 0x115   : > { %v549_v38 = vpop.f32.mrf.mxu0 }
 0x118   : > { %v767_v2 = vpop.f32.mrf.mxu1 }
 0x119   : > { %v2501_v50 = vadd.f32 %v767_v2, %v532_v11  ;;  %v562_v6 = vpop.f32.mrf.mxu0 }
 0x11a   : > { %v769_v15 = vpop.f32.mrf.mxu1 }
 0x11b   : > { %v564_v37 = vpop.f32.mrf.mxu0 }
 0x11e   : > { %v774_v18 = vpop.f32.mrf.mxu1 }
 0x11f   : > { %v2503_v20 = vadd.f32 %v774_v18, %v547_v32  ;;  %v577_v49 = vpop.f32.mrf.mxu0  ;;  %v311_v32 = vld [vmem:[#allocation2] sm:$0xff] }
 0x120   : > { %v776_v57 = vpop.f32.mrf.mxu1 }
 0x121   : > { %v579_v21 = vpop.f32.mrf.mxu0 }
 0x122   : > { %v312_v21 = vld [vmem:[#allocation2 + $0x8] sm:$0xff] }
 0x123   : > { %v781_v4 = vpop.f32.mrf.mxu1 }
 0x124   : > { %v2505_v29 = vadd.f32 %v781_v4, %v562_v6 }
 0x125   : > { %v898_v55 = vpop.f32.mrf.mxu0  ;;  %v783_v28 = vpop.f32.mrf.mxu1 }
 0x126   : > { %v899_v53 = vadd.f32 %v898_v55, %v2493_v0 }
 0x127   : > { %v900_v5 = vpop.f32.mrf.mxu0 }
 0x129   : > { %v788_v30 = vpop.f32.mrf.mxu1 }
 0x12a   : > { %v2507_v24 = vadd.f32 %v788_v30, %v577_v49 }
 0x12b   : > { %v790_v22 = vpop.f32.mrf.mxu1 }
 0x12c   : > { %v907_v61 = vpop.f32.mrf.mxu0 }
 0x12d   : > { %v908_v58 = vadd.f32 %v907_v61, %v2495_v63 }
 0x12e   : > { %v909_v10 = vpop.f32.mrf.mxu0 }
 0x12f   : > { %v313_v10 = vld [vmem:[#allocation2 + $0x10] sm:$0xff] }
 0x131   : > { %v916_v23 = vpop.f32.mrf.mxu0  ;;  %v1055_v43 = vpop.f32.mrf.mxu1 }
 0x132   : > { %v1056_v39 = vadd.f32 %v1055_v43, %v899_v53  ;;  %v917_v37 = vadd.f32 %v916_v23, %v2497_v7 }
 0x133   : > { %v918_v47 = vpop.f32.mrf.mxu0  ;;  %v1057_v12 = vpop.f32.mrf.mxu1 }
 0x134   : > { %v2530_v12 = vld [vmem:[%s2589_s2] ss:$0 sm:$0xff] }
 0x137   : > { %v925_v54 = vpop.f32.mrf.mxu0  ;;  %v1066_v60 = vpop.f32.mrf.mxu1 }
 0x138   : > { %v1067_v38 = vadd.f32 %v1066_v60, %v908_v58  ;;  %v926_v5 = vadd.f32 %v925_v54, %v2499_v36 }
 0x139   : > { %v927_v17 = vpop.f32.mrf.mxu0  ;;  %v1068_v25 = vpop.f32.mrf.mxu1 }
 0x13d   : > { %v934_v8 = vpop.f32.mrf.mxu0  ;;  %v1077_v14 = vpop.f32.mrf.mxu1 }
 0x13e   : > { %v1078_v4 = vadd.f32 %v1077_v14, %v917_v37  ;;  %v935_v17 = vadd.f32 %v934_v8, %v2501_v50 }
 0x13f   : > { %v936_v27 = vpop.f32.mrf.mxu0  ;;  %v1079_v40 = vpop.f32.mrf.mxu1 }
 0x140   : > { %v314_v27 = vld [vmem:[#allocation2 + $0x18] sm:$0xff] }
 0x143   : > { %v2509_v31 = vpop.f32.mrf.mxu0  ;;  %v1088_v41 = vpop.f32.mrf.mxu1 }
 0x144   : > { %v1089_v7 = vadd.f32 %v1088_v41, %v926_v5 }
 0x145   : > { %v945_v35 = vpop.f32.mrf.mxu0  ;;  %v1090_v46 = vpop.f32.mrf.mxu1 }
 0x149   : > { %v2511_v51 = vpop.f32.mrf.mxu0  ;;  %v1099_v52 = vpop.f32.mrf.mxu1 }
 0x14a   : > { %v1100_v41 = vadd.f32 %v1099_v52, %v935_v17 }
 0x14b   : > { %v954_v59 = vpop.f32.mrf.mxu0  ;;  %v1101_v62 = vpop.f32.mrf.mxu1 }
 0x14c   : > { %v944_v62 = vadd.f32 %v2509_v31, %v2503_v20 }
 0x14f   : > { %v2513_v33 = vpop.f32.mrf.mxu0  ;;  %v2515_v34 = vpop.f32.mrf.mxu1 }
 0x150   : > { %v962_v37 = vadd.f32 %v2513_v33, %v2507_v24 }
 0x151   : > { %v1112_v45 = vpop.f32.mrf.mxu1  ;;  %v963_v16 = vpop.f32.mrf.mxu0 }
 0x155   : > { %v2517_v19 = vpop.f32.mrf.mxu1 }
 0x157   : > { %v1123_v9 = vpop.f32.mrf.mxu1 }
 0x15a   : > { %v2519_v42 = vpop.f32.mrf.mxu1  ;;  %v1258_v26 = vpop.f32.mrf.mxu0 }
 0x15b   : > { %v1259_v1 = vadd.f32 %v1258_v26, %v1056_v39  ;;  %v315_v26 = vld [vmem:[#allocation2 + $0x20] sm:$0xff]  ;;  %v953_v39 = vadd.f32 %v2511_v51, %v2505_v29 }
 0x15c   : > { %v1260_v13 = vpop.f32.mrf.mxu0  ;;  %v1134_v3 = vpop.f32.mrf.mxu1 }
 0x15d   : > { %v1111_v3 = vadd.f32 %v2515_v34, %v944_v62 }
 0x15e   : > { %v1265_v56 = vpop.f32.mrf.mxu0 }
 0x15f   : > { %v1266_v18 = vadd.f32 %v1265_v56, %v1067_v38 }
 0x160   : > { %v1267_v11 = vpop.f32.mrf.mxu0 }
 0x162   : > { %v1272_v48 = vpop.f32.mrf.mxu0 }
 0x163   : > { %v1397_v44 = vpop.f32.mrf.mxu1  ;;  %v1273_v30 = vadd.f32 %v1272_v48, %v1078_v4 }
 0x164   : > { %v1398_v2 = vadd.f32 %v1397_v44, %v1259_v1  ;;  %v1274_v6 = vpop.f32.mrf.mxu0  ;;  %v316_v44 = vld [vmem:[#allocation2 + $0x28] sm:$0xff] }
 0x165   : > { %v1399_v15 = vpop.f32.mrf.mxu1 }
 0x166   : > { %v1450_v49 = vadd.f32 %v1398_v2, %v311_v32  ;;  %v1279_v57 = vpop.f32.mrf.mxu0  ;;  %v1122_v2 = vadd.f32 %v2517_v19, %v953_v39  ;;  %v317_v19 = vld [vmem:[#allocation2 + $0x30] sm:$0xff] }
 0x167   : > { %v1404_v0 = vpop.f32.mrf.mxu1  ;;  %v1280_v36 = vadd.f32 %v1279_v57, %v1089_v7 }
 0x168   : > { %1458 = vst.msk [vmem:[#allocation2] sm:$0xff] %vm302_vm0, %v1450_v49  ;;  %v1405_v55 = vadd.f32 %v1404_v0, %v1266_v18  ;;  %v1281_v63 = vpop.f32.mrf.mxu0 }
 0x169   : > { %v1406_v28 = vpop.f32.mrf.mxu1 }
 0x16a   : > { %v1451_v22 = vadd.f32 %v1405_v55, %v312_v21  ;;  %v1286_v61 = vpop.f32.mrf.mxu0  ;;  %v1133_v55 = vadd.f32 %v2519_v42, %v962_v37 }
 0x16b   : > { %v1411_v43 = vpop.f32.mrf.mxu1  ;;  %v1287_v8 = vadd.f32 %v1286_v61, %v1100_v41 }
 0x16c   : > { %1459 = vst.msk [vmem:[#allocation2 + $0x8] sm:$0xff] %vm302_vm0, %v1451_v22  ;;  %v1412_v23 = vadd.f32 %v1411_v43, %v1273_v30  ;;  %v1288_v47 = vpop.f32.mrf.mxu0 }
 0x16d   : > { %v1413_v60 = vpop.f32.mrf.mxu1 }
 0x16e   : > { %v1452_v54 = vadd.f32 %v1412_v23, %v313_v10  ;;  %v1293_v25 = vpop.f32.mrf.mxu0  ;;  %v318_v10 = vld [vmem:[#allocation2 + $0x38] sm:$0xff] }
 0x16f   : > { %v1469_v14 = vld [vmem:[#allocation2] sm:$0xff]  ;;  %v1418_v40 = vpop.f32.mrf.mxu1  ;;  %v1294_v1 = vadd.f32 %v1293_v25, %v1111_v3 }
 0x170   : > { %v1484_v35 = vadd.f32 %v2530_v12, %v1469_v14  ;;  %1460 = vst.msk [vmem:[#allocation2 + $0x10] sm:$0xff] %vm302_vm0, %v1452_v54  ;;  %v1419_v46 = vadd.f32 %v1418_v40, %v1280_v36  ;;  %v1295_v59 = vpop.f32.mrf.mxu0 }
 0x171   : > { %v1420_v45 = vpop.f32.mrf.mxu1 }
 0x172   : > { %vm1492_vm1 = vcmp.ge.f32.partialorder %v1484_v35, 0.0  ;;  %v1500_v50 = vmul.f32 0.2, %v1484_v35  ;;  %v1453_v52 = vadd.f32 %v1419_v46, %v314_v27  ;;  %v1300_v16 = vpop.f32.mrf.mxu0 }
 0x173   : > { %v1470_v9 = vld [vmem:[#allocation2 + $0x8] sm:$0xff]  ;;  %v1425_v13 = vpop.f32.mrf.mxu1  ;;  %v1301_v57 = vadd.f32 %v1300_v16, %v1122_v2 }
 0x174   : > { %v1508_v53 = vsel %vm1492_vm1, %v1484_v35, %v1500_v50  ;;  %v1485_v20 = vadd.f32 %v2530_v12, %v1470_v9  ;;  %1461 = vst.msk [vmem:[#allocation2 + $0x18] sm:$0xff] %vm302_vm0, %v1453_v52  ;;  %v1426_v31 = vadd.f32 %v1425_v13, %v1287_v8  ;;  %v1302_v56 = vpop.f32.mrf.mxu0 }
 0x175   : > { %1516 = vst.msk [vmem:[%s2541_s11] sm:$0xff] %vm302_vm0, %v1508_v53  ;;  %v1427_v11 = vpop.f32.mrf.mxu1 }
 0x176   : > { %vm1493_vm2 = vcmp.ge.f32.partialorder %v1485_v20, 0.0  ;;  %v1501_v58 = vmul.f32 0.2, %v1485_v20  ;;  %v1454_v48 = vadd.f32 %v1426_v31, %v315_v26  ;;  %v1307_v32 = vpop.f32.mrf.mxu0 }
 0x177   : > { %v1471_v34 = vld [vmem:[#allocation2 + $0x10] sm:$0xff]  ;;  %v1432_v38 = vpop.f32.mrf.mxu1  ;;  %v1308_v30 = vadd.f32 %v1307_v32, %v1133_v55 }
 0x178   : > { %v1509_v6 = vsel %vm1493_vm2, %v1485_v20, %v1501_v58  ;;  %v1486_v15 = vadd.f32 %v2530_v12, %v1471_v34  ;;  %1462 = vst.msk [vmem:[#allocation2 + $0x20] sm:$0xff] %vm302_vm0, %v1454_v48  ;;  %v1433_v29 = vadd.f32 %v1432_v38, %v1294_v1  ;;  %v1309_v51 = vpop.f32.mrf.mxu0 }
 0x179   : > { %1517 = vst.msk [vmem:[%s2541_s11 + $0x8] sm:$0xff] %vm302_vm0, %v1509_v6  ;;  %v1434_v18 = vpop.f32.mrf.mxu1 }
 0x17a   : > { %vm1494_vm3 = vcmp.ge.f32.partialorder %v1486_v15, 0.0  ;;  %v1502_v49 = vmul.f32 0.2, %v1486_v15  ;;  %v1455_v21 = vadd.f32 %v1433_v29, %v316_v44 }
 0x17b   : > { %v1472_v0 = vld [vmem:[#allocation2 + $0x18] sm:$0xff]  ;;  %v1439_v4 = vpop.f32.mrf.mxu1 }
 0x17c   : > { %v1510_v63 = vsel %vm1494_vm3, %v1486_v15, %v1502_v49  ;;  %v1487_v28 = vadd.f32 %v2530_v12, %v1472_v0  ;;  %1463 = vst.msk [vmem:[#allocation2 + $0x28] sm:$0xff] %vm302_vm0, %v1455_v21  ;;  %v1440_v5 = vadd.f32 %v1439_v4, %v1301_v57 }
 0x17d   : > { %1518 = vst.msk [vmem:[%s2541_s11 + $0x10] sm:$0xff] %vm302_vm0, %v1510_v63  ;;  %v1441_v24 = vpop.f32.mrf.mxu1 }
 0x17e   : > { %vm1495_vm4 = vcmp.ge.f32.partialorder %v1487_v28, 0.0  ;;  %v1503_v33 = vmul.f32 0.2, %v1487_v28  ;;  %v1456_v22 = vadd.f32 %v1440_v5, %v317_v19 }
 0x17f   : > { %v1473_v61 = vld [vmem:[#allocation2 + $0x20] sm:$0xff]  ;;  %v1446_v43 = vpop.f32.mrf.mxu1 }
 0x180   : > { %v1511_v7 = vsel %vm1495_vm4, %v1487_v28, %v1503_v33  ;;  %v1488_v42 = vadd.f32 %v2530_v12, %v1473_v61  ;;  %1464 = vst.msk [vmem:[#allocation2 + $0x30] sm:$0xff] %vm302_vm0, %v1456_v22  ;;  %v1447_v23 = vadd.f32 %v1446_v43, %v1308_v30 }
 0x181   : > { %1519 = vst.msk [vmem:[%s2541_s11 + $0x18] sm:$0xff] %vm302_vm0, %v1511_v7  ;;  %v1448_v47 = vpop.f32.mrf.mxu1 }
 0x182   : > { %vm1496_vm5 = vcmp.ge.f32.partialorder %v1488_v42, 0.0  ;;  %v1504_v60 = vmul.f32 0.2, %v1488_v42  ;;  %v1457_v17 = vadd.f32 %v1447_v23, %v318_v10 }
 0x183   : > { %v1474_v36 = vld [vmem:[#allocation2 + $0x28] sm:$0xff] }
 0x184   : > { %v1512_v54 = vsel %vm1496_vm5, %v1488_v42, %v1504_v60  ;;  %v1489_v25 = vadd.f32 %v2530_v12, %v1474_v36  ;;  %1465 = vst.msk [vmem:[#allocation2 + $0x38] sm:$0xff] %vm302_vm0, %v1457_v17 }
 0x185   : > { %1520 = vst.msk [vmem:[%s2541_s11 + $0x20] sm:$0xff] %vm302_vm0, %v1512_v54 }
 0x186   : > { %vm1497_vm6 = vcmp.ge.f32.partialorder %v1489_v25, 0.0  ;;  %v1505_v14 = vmul.f32 0.2, %v1489_v25 }
 0x187   : > { %v1475_v27 = vld [vmem:[#allocation2 + $0x30] sm:$0xff] }
 0x188   : > { %v1513_v40 = vsel %vm1497_vm6, %v1489_v25, %v1505_v14  ;;  %v1490_v41 = vadd.f32 %v2530_v12, %v1475_v27 }
 0x189   : > { %1521 = vst.msk [vmem:[%s2541_s11 + $0x28] sm:$0xff] %vm302_vm0, %v1513_v40 }
 0x18a   : > { %vm1498_vm7 = vcmp.ge.f32.partialorder %v1490_v41, 0.0  ;;  %v1506_v35 = vmul.f32 0.2, %v1490_v41 }
 0x18b   : > { %v1476_v46 = vld [vmem:[#allocation2 + $0x38] sm:$0xff] }
 0x18c   : > { %v1514_v59 = vsel %vm1498_vm7, %v1490_v41, %v1506_v35  ;;  %v1491_v62 = vadd.f32 %v2530_v12, %v1476_v46 }
 0x18d   : > { %1522 = vst.msk [vmem:[%s2541_s11 + $0x30] sm:$0xff] %vm302_vm0, %v1514_v59 }
 0x18e   : > { %vm1499_vm8 = vcmp.ge.f32.partialorder %v1491_v62, 0.0  ;;  %v1507_v45 = vmul.f32 0.2, %v1491_v62 }
 0x190   : > { %v1515_v50 = vsel %vm1499_vm8, %v1491_v62, %v1507_v45 }
 0x191   : > { %1523 = vst.msk [vmem:[%s2541_s11 + $0x38] sm:$0xff] %vm302_vm0, %v1515_v50 }
 0x192 PF: > { %s13_s14 = sadd.s32 1, %s1726_s14   ;;  %s2708_s12 = smov %s1722_s13 }
 0x193   : > { %p10_p5 = scmp.ge.s32.totalorder %s13_s14, 4   ;;  %s2709_s13 = smov %s2711_s15 }
 0x195   :  { %12 = sbr.rel (!%p10_p5) target bundleno = 2 (0x2), region = 76 }

// kernel: style_encoder_forward.14
= control target key start
LH: loop header
LB: loop body
LE: loop exit
PB: predicated region body
PF: predicated region fallthrough
CT: control target
= control target key end

     0   :  { %s2846_s18 = smov 0   ;;  %s2848_s19 = smov 0   ;;  %s3874_s0 = inlined_call_operand.vmem [shape: f32[2,64,144], index: 0, kind: input, shape index: {}]   ;;  %s3875_s1 = inlined_call_operand.vmem [shape: f32[144,32], index: 1, kind: input, shape index: {}]   ;;  %s3876_s2 = inlined_call_operand.vmem [shape: f32[1,32], index: 2, kind: input, shape index: {}]   ;;  %s3877_s3 = inlined_call_operand.vmem [shape: f32[2,64,16], index: 3, kind: input, shape index: {}]   ;;  %s3878_s4 = inlined_call_operand.vmem [shape: f32[16,32], index: 4, kind: input, shape index: {}]   ;;  %s3879_s5 = inlined_call_operand.vmem [shape: f32[2,64,32], index: 5, kind: output, shape index: {}]  }
   0x1   :  { %s2850_s20 = smov 0  }
   0x2 LB: > { %s41_s21 = sadd.s32 1, %s2809_s19  ;;  %p2597_p0 = scmp.ge.s32.totalorder %s2813_s20, 1  ;;  %s2813_s20 = sphi %s2850_s20, %s15_s20   ;;  %s2809_s19 = sphi %s2848_s19, %s3998_s19   ;;  %s2805_s18 = sphi %s2846_s18, %s3997_s18  }
   0x3   : > { %p43_p1 = scmp.ge.s32.totalorder %s41_s21, 2  ;;  %p282_p2 = scmp.lt.s32.totalorder %s2813_s20, 3 }
   0x5   : > { %s4000_s21 = smov (%p43_p1, %s41_s21), 0  ;;  %p283_p3 = pnand %p2597_p0, %p282_p2 }
   0x7   : > { %286 = sbr.rel (%p283_p3) target bundleno = 441 (0x1b9), region = 40 }
   0xc   : > { %v457_v0 = vld [vmem:[%s3875_s1 + $0x78] sm:$0xff]  ;;  %v456_v1 = vld [vmem:[%s3875_s1 + $0x70] sm:$0xff]  ;;  %v455_v2 = vld [vmem:[%s3875_s1 + $0x68] sm:$0xff]  ;;  %p352_p4 = scmp.lt.s32.totalorder %s2805_s18, 1  ;;  %v3911_v3 = vmov 0.0   ;;  %vm460_vm0 = vcmask 130048  }
   0xd   : > { %485 = vmatprep.subr.mxu0 %v3911_v3  ;;  %v2877_v4 = vand.u32 4294901760, %v457_v0  ;;  %v2879_v5 = vand.u32 4294901760, %v456_v1  ;;  %v2881_v6 = vand.u32 4294901760, %v455_v2  ;;  %v454_v7 = vld [vmem:[%s3875_s1 + $0x60] sm:$0xff]  ;;  %688 = vmatprep.subr.mxu1 %v3911_v3  ;;  %v453_v8 = vld [vmem:[%s3875_s1 + $0x58] sm:$0xff]  ;;  %v452_v9 = vld [vmem:[%s3875_s1 + $0x50] sm:$0xff] }
   0xe   : > { %v2893_v10 = vand.u32 4294901760, %v454_v7  ;;  %v2895_v11 = vand.u32 4294901760, %v453_v8  ;;  %v2897_v12 = vand.u32 4294901760, %v452_v9  ;;  %v451_v13 = vld [vmem:[%s3875_s1 + $0x48] sm:$0xff]  ;;  %v450_v14 = vld [vmem:[%s3875_s1 + $0x40] sm:$0xff]  ;;  %v449_v19 = vld [vmem:[%s3875_s1 + $0x38] sm:$0xff] }
   0xf   : > { %3927 = vst [vmem:[#allocation3_spill] sm:$0xff] %v2881_v6  ;;  %487 = vmatpush1.msra.mxu0 %v2877_v4  ;;  %v2907_v15 = vsub.f32 %v457_v0, %v2877_v4  ;;  %v2910_v16 = vsub.f32 %v456_v1, %v2879_v5  ;;  %v2912_v17 = vand.u32 4294901760, %v451_v13  ;;  %v2915_v18 = vsub.f32 %v455_v2, %v2881_v6  ;;  %s4002_s18 = smov (!%p352_p4, %s2805_s18), 1  ;;  %v448_v29 = vld [vmem:[%s3875_s1 + $0x30] sm:$0xff]  ;;  %v447_v34 = vld [vmem:[%s3875_s1 + $0x28] sm:$0xff]  ;;  %v446_v42 = vld [vmem:[%s3875_s1 + $0x20] sm:$0xff] }
  0x10   : > { %3928 = vst [vmem:[#allocation4_spill] sm:$0xff] %v2895_v11  ;;  %488 = vmatprep.subr.mxu0 %v3911_v3  ;;  %v2922_v20 = vsub.f32 %v454_v7, %v2893_v10  ;;  %v2925_v21 = vsub.f32 %v453_v8, %v2895_v11  ;;  %v2936_v25 = vand.u32 4294901760, %v450_v14  ;;  %v2940_v27 = vand.u32 4294901760, %v449_v19  ;;  %s2607_s23 = sshll.u32 %s4002_s18, 7  ;;  %v445_v49 = vld [vmem:[%s3875_s1 + $0x18] sm:$0xff]  ;;  %v444_v53 = vld [vmem:[%s3875_s1 + $0x10] sm:$0xff] }
  0x11   : > { %3929 = vst [vmem:[#allocation5_spill] sm:$0xff] %v2910_v16  ;;  %490 = vmatpush1.msra.mxu0 %v2879_v5  ;;  %v3897_v22 = vand.u32 4294901760, %v2907_v15  ;;  %v3895_v23 = vand.u32 4294901760, %v2910_v16  ;;  %v3893_v24 = vand.u32 4294901760, %v2915_v18  ;;  %v2947_v30 = vsub.f32 %v452_v9, %v2897_v12  ;;  %s2994_s28 = scalar_lea.vmem %s3874_s0, %s2607_s23  ;;  %v443_v2 = vld [vmem:[%s3875_s1 + $0x8] sm:$0xff]  ;;  %v442_v7 = vld [vmem:[%s3875_s1] sm:$0xff] }
  0x12   : > { %491 = vmatprep.subr.mxu0 %v3911_v3  ;;  %v3890_v26 = vand.u32 4294901760, %v2922_v20  ;;  %v3888_v28 = vand.u32 4294901760, %v2925_v21  ;;  %v2963_v35 = vsub.f32 %v451_v13, %v2912_v17  ;;  %v2972_v40 = vand.u32 4294901760, %v448_v29  ;;  %v427_v56 = vld [vmem:[%s2994_s28 + $0x8] sm:$0xff]  ;;  %v426_v63 = vld [vmem:[%s2994_s28] sm:$0xff]  ;;  %s2608_s24 = sshll.u32 %s4002_s18, 6 }
  0x13   : > { %493 = vmatpush1.msra.mxu0 %v2881_v6  ;;  %v692_v31 = vsub.f32 %v2907_v15, %v3897_v22  ;;  %v699_v32 = vsub.f32 %v2910_v16, %v3895_v23  ;;  %v706_v33 = vsub.f32 %v2915_v18, %v3893_v24  ;;  %v3887_v36 = vand.u32 4294901760, %v2947_v30  ;;  %s3558_s27 = scalar_lea.vmem %s3877_s3, %s2608_s24  ;;  %s3839_s7 = scalar_lea.vmem %s3879_s5, %s2608_s24 }
  0x14   : > { %3930 = vst [vmem:[#allocation6_spill] sm:$0xff] %v2963_v35  ;;  %494 = vmatprep.subr.mxu0 %v3911_v3  ;;  %v713_v39 = vsub.f32 %v2922_v20, %v3890_v26  ;;  %v2975_v41 = vand.u32 4294901760, %v447_v34  ;;  %v2981_v43 = vsub.f32 %v450_v14, %v2936_v25  ;;  %v720_v45 = vsub.f32 %v2925_v21, %v3888_v28  ;;  %v433_v26 = vld [vmem:[%s2994_s28 + $0x38] sm:$0xff] }
  0x15   : > { %496 = vmatpush1.msra.mxu0 %v2893_v10  ;;  %v693_v37 = vand.u32 4294901760, %v692_v31  ;;  %v700_v38 = vand.u32 4294901760, %v699_v32  ;;  %v707_v44 = vand.u32 4294901760, %v706_v33  ;;  %v3885_v46 = vand.u32 4294901760, %v2963_v35 }
  0x16   : > { %497 = vmatprep.subr.mxu0 %v3911_v3  ;;  %v2989_v47 = vsub.f32 %v449_v19, %v2940_v27  ;;  %v727_v48 = vsub.f32 %v2947_v30, %v3887_v36  ;;  %v714_v50 = vand.u32 4294901760, %v713_v39  ;;  %v3005_v51 = vand.u32 4294901760, %v446_v42 }
  0x17   : > { %499 = vmatpush1.msra.mxu0 %v2895_v11  ;;  %694 = vmatpush1.msra.mxu1 %v693_v37  ;;  %v3884_v52 = vand.u32 4294901760, %v2981_v43  ;;  %v3012_v54 = vsub.f32 %v448_v29, %v2972_v40  ;;  %v721_v57 = vand.u32 4294901760, %v720_v45  ;;  %v734_v58 = vsub.f32 %v2963_v35, %v3885_v46  ;;  %v429_v37 = vld [vmem:[%s2994_s28 + $0x18] sm:$0xff] }
  0x18   : > { %500 = vmatprep.subr.mxu0 %v3911_v3  ;;  %695 = vmatprep.subr.mxu1 %v3911_v3  ;;  %v3883_v55 = vand.u32 4294901760, %v2989_v47  ;;  %v3022_v59 = vand.u32 4294901760, %v445_v49  ;;  %v3025_v60 = vsub.f32 %v447_v34, %v2975_v41  ;;  %v728_v61 = vand.u32 4294901760, %v727_v48 }
  0x19   : > { %502 = vmatpush1.msra.mxu0 %v2897_v12  ;;  %701 = vmatpush1.msra.mxu1 %v700_v38  ;;  %v3029_v62 = vand.u32 4294901760, %v444_v53  ;;  %v741_v0 = vsub.f32 %v2981_v43, %v3884_v52  ;;  %v3882_v1 = vand.u32 4294901760, %v3012_v54  ;;  %v3044_v8 = vsub.f32 %v446_v42, %v3005_v51 }
  0x1a   : > { %503 = vmatprep.subr.mxu0 %v3911_v3  ;;  %702 = vmatprep.subr.mxu1 %v3911_v3  ;;  %v462_v9 = vsel %vm460_vm0, %v427_v56, 0  ;;  %v748_v13 = vsub.f32 %v2989_v47, %v3883_v55  ;;  %v735_v19 = vand.u32 4294901760, %v734_v58  ;;  %v3880_v29 = vand.u32 4294901760, %v3025_v60 }
  0x1b   : > { %505 = vmatpush1.msra.mxu0 %v2912_v17  ;;  %708 = vmatpush1.msra.mxu1 %v707_v44  ;;  %v3052_v14 = vand.u32 4294901760, %v462_v9  ;;  %v3057_v31 = vsub.f32 %v445_v49, %v3022_v59  ;;  %v3059_v32 = vand.u32 4294901760, %v426_v63  ;;  %v3063_v33 = vand.u32 4294901760, %v443_v2  ;;  %v459_v44 = vld [vmem:[%s3875_s1 + $0x88] sm:$0xff] }
  0x1c   : > { %506 = vmatprep.subr.mxu0 %v3911_v3  ;;  %709 = vmatprep.subr.mxu1 %v3911_v3  ;;  %v3065_v34 = vand.u32 4294901760, %v442_v7  ;;  %v742_v38 = vand.u32 4294901760, %v741_v0  ;;  %v755_v39 = vsub.f32 %v3012_v54, %v3882_v1  ;;  %v3881_v42 = vand.u32 4294901760, %v3044_v8 }
  0x1d   : > { %508 = vmatpush1.msra.mxu0 %v2936_v25  ;;  %715 = vmatpush1.msra.mxu1 %v714_v50  ;;  %3931 = vst [vmem:[#allocation7_spill] sm:$0xff] %v3052_v14  ;;  %3932 = vst [vmem:[#allocation8_spill] sm:$0xff] %v3059_v32  ;;  %v3077_v45 = vsub.f32 %v444_v53, %v3029_v62  ;;  %v749_v48 = vand.u32 4294901760, %v748_v13  ;;  %v3082_v49 = vsub.f32 %v462_v9, %v3052_v14  ;;  %v458_v53 = vld [vmem:[%s3875_s1 + $0x80] sm:$0xff]  ;;  %vm409_vm1 = vcmask 261120  }
  0x1e   : > { %509 = vmatprep.subr.mxu0 %v3911_v3  ;;  %716 = vmatprep.subr.mxu1 %v3911_v3  ;;  %v762_v50 = vsub.f32 %v3025_v60, %v3880_v29  ;;  %v3886_v56 = vand.u32 4294901760, %v3057_v31  ;;  %v465_v58 = vsel %vm460_vm0, %v429_v37, 0  ;;  %v3101_v0 = vsub.f32 %v443_v2, %v3063_v33  ;;  %v428_v37 = vld [vmem:[%s2994_s28 + $0x10] sm:$0xff] }
  0x1f   : > { %511 = vmatpush1.msra.mxu0 %v2940_v27  ;;  %722 = vmatpush1.msra.mxu1 %v721_v57  ;;  %v3093_v57 = vsub.f32 %v426_v63, %v3059_v32  ;;  %v756_v9 = vand.u32 4294901760, %v755_v39  ;;  %v769_v63 = vsub.f32 %v3044_v8, %v3881_v42  ;;  %v3889_v13 = vand.u32 4294901760, %v3077_v45  ;;  %v431_v39 = vld [vmem:[%s2994_s28 + $0x28] sm:$0xff] }
  0x20   : > { %512 = vmatprep.subr.mxu0 %v3911_v3  ;;  %723 = vmatprep.subr.mxu1 %v3911_v3  ;;  %v3114_v2 = vand.u32 4294901760, %v458_v53  ;;  %v3891_v29 = vand.u32 4294901760, %v3082_v49  ;;  %v763_v42 = vand.u32 4294901760, %v762_v50  ;;  %v3894_v55 = vand.u32 4294901760, %v3101_v0 }
  0x21   : > { %514 = vmatpush1.msra.mxu0 %v2972_v40  ;;  %729 = vmatpush1.msra.mxu1 %v728_v61  ;;  %v3098_v61 = vand.u32 4294901760, %v459_v44  ;;  %v3892_v1 = vand.u32 4294901760, %v3093_v57  ;;  %v3131_v46 = vand.u32 4294901760, %v428_v37  ;;  %v783_v50 = vsub.f32 %v3077_v45, %v3889_v13 }
  0x22   : > { %515 = vmatprep.subr.mxu0 %v3911_v3  ;;  %730 = vmatprep.subr.mxu1 %v3911_v3  ;;  %3934 = vst [vmem:[#allocation10_spill] sm:$0xff] %v3114_v2  ;;  %v468_v36 = vsel %vm460_vm0, %v431_v39, 0 }
  0x23   : > { %517 = vmatpush1.msra.mxu0 %v2975_v41  ;;  %736 = vmatpush1.msra.mxu1 %v735_v19  ;;  %3933 = vst [vmem:[#allocation9_spill] sm:$0xff] %v3098_v61  ;;  %v3109_v19 = vsub.f32 %v442_v7, %v3065_v34  ;;  %v776_v7 = vsub.f32 %v3057_v31, %v3886_v56  ;;  %3936 = vst [vmem:[#allocation12_spill] sm:$0xff] %v3131_v46 }
  0x24   : > { %518 = vmatprep.subr.mxu0 %v3911_v3  ;;  %737 = vmatprep.subr.mxu1 %v3911_v3  ;;  %v3129_v52 = vsub.f32 %v459_v44, %v3098_v61  ;;  %v570_v44 = vsub.f32 %v3082_v49, %v3891_v29  ;;  %v576_v39 = vsub.f32 %v3093_v57, %v3892_v1 }
  0x25   : > { %520 = vmatpush1.msra.mxu0 %v3005_v51  ;;  %743 = vmatpush1.msra.mxu1 %v742_v38  ;;  %v3117_v38 = vand.u32 4294901760, %v465_v58  ;;  %v3896_v56 = vand.u32 4294901760, %v3109_v19  ;;  %v777_v13 = vand.u32 4294901760, %v776_v7  ;;  %v3163_v29 = vsub.f32 %v428_v37, %v3131_v46  ;;  %v432_v37 = vld [vmem:[%s2994_s28 + $0x30] sm:$0xff] }
  0x26   : > { %521 = vmatprep.subr.mxu0 %v3911_v3  ;;  %744 = vmatprep.subr.mxu1 %v3911_v3  ;;  %v784_v7 = vand.u32 4294901760, %v783_v50  ;;  %v577_v50 = vand.u32 4294901760, %v576_v39  ;;  %v435_v39 = vld [vmem:[%s2994_s28 + $0x48] sm:$0xff] }
  0x27   : > { %3935 = vst [vmem:[#allocation11_spill] sm:$0xff] %v3117_v38  ;;  %523 = vmatpush1.msra.mxu0 %v3022_v59  ;;  %750 = vmatpush1.msra.mxu1 %v749_v48  ;;  %v770_v48 = vand.u32 4294901760, %v769_v63  ;;  %v3145_v28 = vsub.f32 %v465_v58, %v3117_v38  ;;  %v430_v63 = vld [vmem:[%s2994_s28 + $0x20] sm:$0xff]  ;;  %v790_v58 = vsub.f32 %v3101_v0, %v3894_v55  ;;  %3937 = vst [vmem:[#allocation13_spill] sm:$0xff] %v3163_v29 }
  0x28   : > { %524 = vmatprep.subr.mxu0 %v3911_v3  ;;  %751 = vmatprep.subr.mxu1 %v3911_v3  ;;  %v797_v1 = vsub.f32 %v3109_v19, %v3896_v56  ;;  %v3171_v24 = vand.u32 4294901760, %v430_v63  ;;  %v571_v55 = vand.u32 4294901760, %v570_v44 }
  0x29   : > { %526 = vmatpush1.msra.mxu0 %v3029_v62  ;;  %757 = vmatpush1.msra.mxu1 %v756_v9  ;;  %v3148_v9 = vsub.f32 %v458_v53, %v3114_v2  ;;  %v3898_v53 = vand.u32 4294901760, %v3129_v52  ;;  %v791_v56 = vand.u32 4294901760, %v790_v58 }
  0x2a   : > { %527 = vmatprep.subr.mxu0 %v3911_v3  ;;  %758 = vmatprep.subr.mxu1 %v3911_v3  ;;  %3938 = vst [vmem:[#allocation14_spill] sm:$0xff] %v3171_v24  ;;  %v798_v58 = vand.u32 4294901760, %v797_v1  ;;  %v3941_v1 = vand.u32 4294901760, %v3163_v29 }
  0x2b   : > { %529 = vmatpush1.msra.mxu0 %v3063_v33  ;;  %764 = vmatpush1.msra.mxu1 %v763_v42  ;;  %v3165_v42 = vand.u32 4294901760, %v468_v36  ;;  %v832_v44 = vsub.f32 %v3129_v52, %v3898_v53  ;;  %v3939_v53 = vand.u32 4294901760, %v3145_v28 }
  0x2c   : > { %530 = vmatprep.subr.mxu0 %v3911_v3  ;;  %765 = vmatprep.subr.mxu1 %v3911_v3 }
  0x2d   : > { %532 = vmatpush1.msra.mxu0 %v3065_v34  ;;  %771 = vmatpush1.msra.mxu1 %v770_v48  ;;  %v471_v48 = vsel %vm460_vm0, %v433_v26, 0  ;;  %v3186_v23 = vsub.f32 %v468_v36, %v3165_v42  ;;  %v3191_v26 = vsub.f32 %v430_v63, %v3171_v24  ;;  %v585_v22 = vsub.f32 %v3145_v28, %v3939_v53 }
  0x2e   : > { %561 = vmatprep.subr.mxu0 %v3911_v3  ;;  %772 = vmatprep.subr.mxu1 %v3911_v3  ;;  %v3940_v36 = vand.u32 4294901760, %v3148_v9  ;;  %v3204_v63 = vand.u32 4294901760, %v432_v37 }
  0x2f   : > { %563 = vmatpush2.msra.mxu0 %v3098_v61  ;;  %778 = vmatpush1.msra.mxu1 %v777_v13  ;;  %v3193_v13 = vand.u32 4294901760, %v471_v48 }
  0x30   : > { %564 = vmatprep.subr.mxu0 %v3911_v3  ;;  %779 = vmatprep.subr.mxu1 %v3911_v3  ;;  %v839_v61 = vsub.f32 %v3148_v9, %v3940_v36 }
  0x31   : > { %566 = vmatpush2.msra.mxu0 %v3114_v2  ;;  %785 = vmatpush1.msra.mxu1 %v784_v7  ;;  %v591_v7 = vsub.f32 %v3163_v29, %v3941_v1  ;;  %v474_v2 = vsel %vm460_vm0, %v435_v39, 0  ;;  %v434_v1 = vld [vmem:[%s2994_s28 + $0x40] sm:$0xff]  ;;  %v3223_v39 = vsub.f32 %v432_v37, %v3204_v63  ;;  %v437_v29 = vld [vmem:[%s2994_s28 + $0x58] sm:$0xff]  ;;  %v436_v37 = vld [vmem:[%s2994_s28 + $0x50] sm:$0xff] }
  0x32   : > { %572 = vmatprep.mubr.f32.mxu0 %v571_v55  ;;  %786 = vmatprep.subr.mxu1 %v3911_v3  ;;  %v833_v55 = vand.u32 4294901760, %v832_v44  ;;  %v586_v44 = vand.u32 4294901760, %v585_v22  ;;  %v840_v36 = vand.u32 4294901760, %v839_v61  ;;  %v3225_v53 = vand.u32 4294901760, %v474_v2 }
  0x33   : > { %899 = vmatprep.subr.mxu0 %v3911_v3  ;;  %578 = vmatmul.mubr.f32.vlgmr.msra.gmra.mxu0 %v577_v50  ;;  %v3906_v50 = vand.u32 4294901760, %v3191_v26 }
  0x34   : > { %792 = vmatpush1.msra.mxu1 %v791_v56  ;;  %902 = vmatpush1.msra.mxu0 %v2907_v15  ;;  %v3216_v56 = vsub.f32 %v471_v48, %v3193_v13  ;;  %v592_v48 = vand.u32 4294901760, %v591_v7 }
  0x35   : > { %793 = vmatprep.subr.mxu1 %v3911_v3  ;;  %903 = vmatprep.subr.mxu0 %v3911_v3  ;;  %v606_v61 = vsub.f32 %v3191_v26, %v3906_v50 }
  0x36   : > { %3942 = vst [vmem:[#allocation15_spill] sm:$0xff] %v3216_v56  ;;  %799 = vmatpush1.msra.mxu1 %v798_v58  ;;  %906 = vmatpush1.msra.mxu0 %v2910_v16  ;;  %v3943_v58 = vand.u32 4294901760, %v3186_v23  ;;  %v3238_v16 = vand.u32 4294901760, %v434_v1 }
  0x37   : > { %828 = vmatprep.subr.mxu1 %v3911_v3  ;;  %907 = vmatprep.subr.mxu0 %v3911_v3 }
  0x38   : > { %834 = vmatpush2.msra.mxu1 %v833_v55  ;;  %910 = vmatpush1.msra.mxu0 %v2915_v18  ;;  %v600_v22 = vsub.f32 %v3186_v23, %v3943_v58  ;;  %v477_v55 = vsel %vm460_vm0, %v437_v29, 0  ;;  %v3245_v58 = vsub.f32 %v474_v2, %v3225_v53  ;;  %v3945_v29 = vand.u32 4294901760, %v3216_v56  ;;  %v439_v2 = vld [vmem:[%s2994_s28 + $0x68] sm:$0xff] }
  0x39   : > { %835 = vmatprep.subr.mxu1 %v3911_v3  ;;  %911 = vmatprep.subr.mxu0 %v3911_v3  ;;  %v3257_v7 = vand.u32 4294901760, %v477_v55 }
  0x3a   : > { %587 = vmatprep.mubr.f32.mxu0 %v586_v44  ;;  %841 = vmatpush2.msra.mxu1 %v840_v36  ;;  %3944 = vst [vmem:[#allocation16_spill] sm:$0xff] %v3245_v58  ;;  %v601_v50 = vand.u32 4294901760, %v600_v22  ;;  %v607_v44 = vand.u32 4294901760, %v606_v61  ;;  %v615_v36 = vsub.f32 %v3216_v56, %v3945_v29  ;;  %v480_v29 = vsel %vm460_vm0, %v439_v2, 0  ;;  %v438_v61 = vld [vmem:[%s2994_s28 + $0x60] sm:$0xff] }
  0x3b   : > { %843 = vmatprep.mubr.f32.mxu1 %v3052_v14  ;;  %914 = vmatpush1.msra.mxu0 %v2922_v20  ;;  %v3255_v14 = vsub.f32 %v434_v1, %v3238_v16  ;;  %v3268_v1 = vand.u32 4294901760, %v436_v37  ;;  %v3275_v56 = vsub.f32 %v477_v55, %v3257_v7  ;;  %v3948_v2 = vand.u32 4294901760, %v3245_v58  ;;  %v441_v55 = vld [vmem:[%s2994_s28 + $0x78] sm:$0xff] }
  0x3c   : > { %593 = vmatmul.mubr.f32.gmra.mxu0 %v592_v48  ;;  %845 = vmatmul.mubr.f32.vlgmr.msra.gmra.mxu1 %v3059_v32  ;;  %v3946_v48 = vand.u32 4294901760, %v3223_v39  ;;  %v616_v32 = vand.u32 4294901760, %v615_v36 }
  0x3d   : > { %915 = vmatprep.subr.mxu0 %v3911_v3  ;;  %1072 = vmatprep.subr.mxu1 %v3911_v3  ;;  %v3286_v36 = vsub.f32 %v436_v37, %v3268_v1  ;;  %v483_v37 = vsel %vm460_vm0, %v441_v55, 0  ;;  %v3950_v55 = vand.u32 4294901760, %v3275_v56 }
  0x3e   : > { %918 = vmatpush1.msra.mxu0 %v2925_v21  ;;  %1074 = vmatpush1.msra.mxu1 %v2877_v4  ;;  %v621_v22 = vsub.f32 %v3223_v39, %v3946_v48  ;;  %v3947_v48 = vmov 0.0  }
  0x3f   : > { %919 = vmatprep.subr.mxu0 %v3911_v3  ;;  %1075 = vmatprep.subr.mxu1 %v3911_v3  ;;  %v3288_v3 = vand.u32 4294901760, %v480_v29  ;;  %410 = vst.msk [vmem:[#allocation2] sm:$0xff] %vm409_vm1, %v3947_v48  ;;  %411 = vst.msk [vmem:[#allocation2 + $0x8] sm:$0xff] %vm409_vm1, %v3947_v48 }
  0x40   : > { %602 = vmatprep.mubr.f32.mxu0 %v601_v50  ;;  %922 = vmatpush1.msra.mxu0 %v2947_v30  ;;  %v622_v50 = vand.u32 4294901760, %v621_v22  ;;  %v3949_v22 = vand.u32 4294901760, %v3255_v14  ;;  %412 = vst.msk [vmem:[#allocation2 + $0x10] sm:$0xff] %vm409_vm1, %v3947_v48  ;;  %413 = vst.msk [vmem:[#allocation2 + $0x18] sm:$0xff] %vm409_vm1, %v3947_v48 }
  0x41   : > { %1077 = vmatpush1.msra.mxu1 %v2879_v5  ;;  %608 = vmatmul.mubr.f32.gmra.mxu0 %v607_v44  ;;  %v630_v44 = vsub.f32 %v3245_v58, %v3948_v2  ;;  %v3298_v58 = vand.u32 4294901760, %v438_v61  ;;  %414 = vst.msk [vmem:[#allocation2 + $0x20] sm:$0xff] %vm409_vm1, %v3947_v48  ;;  %415 = vst.msk [vmem:[#allocation2 + $0x28] sm:$0xff] %vm409_vm1, %v3947_v48 }
  0x42   : > { %923 = vmatprep.subr.mxu0 %v3947_v48  ;;  %1078 = vmatprep.subr.mxu1 %v3947_v48  ;;  %416 = vst.msk [vmem:[#allocation2 + $0x30] sm:$0xff] %vm409_vm1, %v3947_v48  ;;  %417 = vst.msk [vmem:[#allocation2 + $0x38] sm:$0xff] %vm409_vm1, %v3947_v48 }
  0x43   : > { %926 = vmatpush1.msra.mxu0 %v2963_v35  ;;  %1080 = vmatpush1.msra.mxu1 %v2881_v6  ;;  %v636_v6 = vsub.f32 %v3255_v14, %v3949_v22  ;;  %v3306_v35 = vsub.f32 %v480_v29, %v3288_v3  ;;  %v440_v22 = vld [vmem:[%s2994_s28 + $0x70] sm:$0xff]  ;;  %v3951_v29 = vand.u32 4294901760, %v3286_v36 }
  0x44   : > { %850 = vmatprep.mubr.f32.mxu1 %v3117_v38  ;;  %927 = vmatprep.subr.mxu0 %v3947_v48  ;;  %v631_v38 = vand.u32 4294901760, %v630_v44  ;;  %v3317_v44 = vsub.f32 %v438_v61, %v3298_v58 }
  0x45   : > { %1081 = vmatprep.subr.mxu1 %v3947_v48  ;;  %617 = vmatprep.mubr.f32.mxu0 %v616_v32  ;;  %v637_v2 = vand.u32 4294901760, %v636_v6  ;;  %v3319_v32 = vand.u32 4294901760, %v483_v37  ;;  %v651_v6 = vsub.f32 %v3286_v36, %v3951_v29 }
  0x46   : > { %852 = vmatmul.mubr.f32.gmra.mxu1 %v3131_v46  ;;  %930 = vmatpush1.msra.mxu0 %v2981_v43  ;;  %v659_v46 = vand.u32 4294901760, %v3306_v35 }
  0x47   : > { %1083 = vmatpush1.msra.mxu1 %v2893_v10  ;;  %623 = vmatmul.mubr.f32.gmra.mxu0 %v622_v50  ;;  %v645_v50 = vsub.f32 %v3275_v56, %v3950_v55  ;;  %v3926_v55 = vand.u32 4294901760, %v3317_v44  ;;  %v652_v29 = vand.u32 4294901760, %v651_v6 }
  0x48   : > { %931 = vmatprep.subr.mxu0 %v3947_v48  ;;  %1084 = vmatprep.subr.mxu1 %v3947_v48 }
  0x49   : > { %934 = vmatpush1.msra.mxu0 %v2989_v47  ;;  %1086 = vmatpush1.msra.mxu1 %v2895_v11  ;;  %v3328_v11 = vand.u32 4294901760, %v440_v22  ;;  %v646_v61 = vand.u32 4294901760, %v645_v50 }
  0x4a   : > { %857 = vmatprep.mubr.f32.mxu1 %v3165_v42  ;;  %935 = vmatprep.subr.mxu0 %v3947_v48 }
  0x4b   : > { %1087 = vmatprep.subr.mxu1 %v3947_v48  ;;  %632 = vmatprep.mubr.f32.mxu0 %v631_v38  ;;  %v3335_v38 = vsub.f32 %v483_v37, %v3319_v32  ;;  %v666_v37 = vsub.f32 %v3317_v44, %v3926_v55 }
  0x4c   : > { %859 = vmatmul.mubr.f32.gmra.mxu1 %v3171_v24  ;;  %938 = vmatpush1.msra.mxu0 %v3012_v54  ;;  %v660_v24 = vsub.f32 %v3306_v35, %v659_v46 }
  0x4d   : > { %1089 = vmatpush1.msra.mxu1 %v2897_v12  ;;  %638 = vmatmul.mubr.f32.gmra.mxu0 %v637_v2  ;;  %v3345_v2 = vsub.f32 %v440_v22, %v3328_v11  ;;  %v674_v50 = vand.u32 4294901760, %v3335_v38 }
  0x4e   : > { %939 = vmatprep.subr.mxu0 %v3947_v48  ;;  %1090 = vmatprep.subr.mxu1 %v3947_v48  ;;  %v661_v22 = vand.u32 4294901760, %v660_v24 }
  0x4f   : > { %942 = vmatpush1.msra.mxu0 %v3025_v60  ;;  %1092 = vmatpush1.msra.mxu1 %v2912_v17  ;;  %v680_v6 = vand.u32 4294901760, %v3345_v2  ;;  %v675_v55 = vsub.f32 %v3335_v38, %v674_v50 }
  0x50   : > { %864 = vmatprep.mubr.f32.mxu1 %v3193_v13  ;;  %943 = vmatprep.subr.mxu0 %v3947_v48 }
  0x51   : > { %1093 = vmatprep.subr.mxu1 %v3947_v48  ;;  %647 = vmatprep.mubr.f32.mxu0 %v646_v61  ;;  %v667_v61 = vand.u32 4294901760, %v666_v37  ;;  %v681_v24 = vsub.f32 %v3345_v2, %v680_v6 }
  0x52   : > { %866 = vmatmul.mubr.f32.gmra.mxu1 %v3204_v63  ;;  %946 = vmatpush1.msra.mxu0 %v3044_v8 }
  0x53   : > { %1095 = vmatpush1.msra.mxu1 %v2936_v25  ;;  %653 = vmatmul.mubr.f32.gmra.mxu0 %v652_v29  ;;  %v676_v29 = vand.u32 4294901760, %v675_v55  ;;  %v682_v37 = vand.u32 4294901760, %v681_v24  ;;  %v3952_v55 = vand.u32 4294901760, %v2907_v15  ;;  %v3955_v24 = vld [vmem:[#allocation13_spill] sm:$0xff] }
  0x54   : > { %947 = vmatprep.subr.mxu0 %v3947_v48  ;;  %1096 = vmatprep.subr.mxu1 %v3947_v48  ;;  %v3956_v15 = vld [vmem:[#allocation9_spill] sm:$0xff] }
  0x55   : > { %950 = vmatpush1.msra.mxu0 %v3057_v31  ;;  %1098 = vmatpush1.msra.mxu1 %v2940_v27 }
  0x56   : > { %871 = vmatprep.mubr.f32.mxu1 %v3225_v53  ;;  %951 = vmatprep.subr.mxu0 %v3947_v48 }
  0x57   : > { %1099 = vmatprep.subr.mxu1 %v3947_v48  ;;  %662 = vmatprep.mubr.f32.mxu0 %v661_v22  ;;  %v3953_v22 = vld [vmem:[#allocation5_spill] sm:$0xff] }
  0x58   : > { %873 = vmatmul.mubr.f32.gmra.mxu1 %v3238_v16  ;;  %954 = vmatpush1.msra.mxu0 %v3077_v45 }
  0x59   : > { %1101 = vmatpush1.msra.mxu1 %v2972_v40  ;;  %668 = vmatmul.mubr.f32.gmra.mxu0 %v667_v61  ;;  %v3954_v61 = vand.u32 4294901760, %v3953_v22  ;;  %v3960_v22 = vand.u32 4294901760, %v2922_v20  ;;  %v3963_v20 = vld [vmem:[#allocation15_spill] sm:$0xff] }
  0x5a   : > { %955 = vmatprep.subr.mxu0 %v3947_v48  ;;  %1102 = vmatprep.subr.mxu1 %v3947_v48 }
  0x5b   : > { %958 = vmatpush1.msra.mxu0 %v3101_v0  ;;  %1104 = vmatpush1.msra.mxu1 %v2975_v41 }
  0x5c   : > { %878 = vmatprep.mubr.f32.mxu1 %v3257_v7  ;;  %959 = vmatprep.subr.mxu0 %v3947_v48 }
  0x5d   : > { %1105 = vmatprep.subr.mxu1 %v3947_v48  ;;  %677 = vmatprep.mubr.f32.mxu0 %v676_v29  ;;  %v3957_v29 = vand.u32 4294901760, %v2915_v18  ;;  %v3962_v18 = vand.u32 4294901760, %v2925_v21  ;;  %v3966_v21 = vand.u32 4294901760, %v3955_v24 }
  0x5e   : > { %880 = vmatmul.mubr.f32.gmra.mxu1 %v3268_v1  ;;  %962 = vmatpush1.msra.mxu0 %v3109_v19 }
  0x5f   : > { %1107 = vmatpush1.msra.mxu1 %v3005_v51  ;;  %683 = vmatmul.mubr.f32.gmra.mxu0 %v682_v37  ;;  %v3958_v37 = vld [vmem:[#allocation10_spill] sm:$0xff] }
  0x60   : > { %991 = vmatprep.subr.mxu0 %v3947_v48  ;;  %1108 = vmatprep.subr.mxu1 %v3947_v48 }
  0x61   : > { %994 = vmatpush2.msra.mxu0 %v3129_v52  ;;  %1110 = vmatpush1.msra.mxu1 %v3022_v59 }
  0x62   : > { %885 = vmatprep.mubr.f32.mxu1 %v3288_v3  ;;  %995 = vmatprep.subr.mxu0 %v3947_v48 }
  0x63   : > { %1111 = vmatprep.subr.mxu1 %v3947_v48  ;;  %887 = vmatmul.mubr.f32.gmra.mxu1 %v3298_v58 }
  0x64   : > { %998 = vmatpush2.msra.mxu0 %v3148_v9  ;;  %1001 = vmatprep.mubr.f32.mxu0 %v3082_v49 }
  0x65   : > { %1113 = vmatpush1.msra.mxu1 %v3029_v62  ;;  %1004 = vmatmul.mubr.f32.vlgmr.msra.gmra.mxu0 %v3093_v57 }
  0x66   : > { %1114 = vmatprep.subr.mxu1 %v3947_v48  ;;  %1243 = vmatprep.subr.mxu0 %v3947_v48 }
  0x67   : > { %1116 = vmatpush1.msra.mxu1 %v3063_v33  ;;  %1247 = vmatpush1.msra.mxu0 %v3952_v55  ;;  %v3959_v55 = vand.u32 4294901760, %v3082_v49  ;;  %v3964_v49 = vand.u32 4294901760, %v3145_v28 }
  0x68   : > { %892 = vmatprep.mubr.f32.mxu1 %v3319_v32  ;;  %1117 = vmatprep.subr.mxu1 %v3947_v48 }
  0x69   : > { %1248 = vmatprep.subr.mxu0 %v3947_v48  ;;  %894 = vmatmul.mubr.f32.gmra.mxu1 %v3328_v11 }
  0x6a   : > { %1010 = vmatprep.mubr.f32.mxu0 %v3145_v28  ;;  %1119 = vmatpush1.msra.mxu1 %v3065_v34  ;;  %v3970_v28 = vld [vmem:[#allocation16_spill] sm:$0xff] }
  0x6b   : > { %1252 = vmatpush1.msra.mxu0 %v3954_v61  ;;  %1148 = vmatprep.subr.mxu1 %v3947_v48  ;;  %v3961_v61 = vand.u32 4294901760, %v3093_v57  ;;  %v3965_v57 = vand.u32 4294901760, %v2947_v30  ;;  %v3972_v30 = vand.u32 4294901760, %v2981_v43  ;;  %v3978_v43 = vand.u32 4294901760, %v3223_v39 }
  0x6c   : > { %1013 = vmatmul.mubr.f32.gmra.mxu0 %v3955_v24  ;;  %1253 = vmatprep.subr.mxu0 %v3947_v48  ;;  %v3973_v24 = vand.u32 4294901760, %v3191_v26 }
  0x6d   : > { %1150 = vmatpush2.msra.mxu1 %v3956_v15  ;;  %1257 = vmatpush1.msra.mxu0 %v3957_v29 }
  0x6e   : > { %1151 = vmatprep.subr.mxu1 %v3947_v48  ;;  %1258 = vmatprep.subr.mxu0 %v3947_v48 }
  0x6f   : > { %1019 = vmatprep.mubr.f32.mxu0 %v3186_v23  ;;  %1153 = vmatpush2.msra.mxu1 %v3958_v37 }
  0x70   : > { %1157 = vmatprep.mubr.f32.mxu1 %v3959_v55  ;;  %1262 = vmatpush1.msra.mxu0 %v3960_v22  ;;  %v3969_v55 = vld [vmem:[#allocation3_spill] sm:$0xff]  ;;  %v3974_v22 = vand.u32 4294901760, %v2989_v47  ;;  %v3979_v47 = vand.u32 4294901760, %v3025_v60  ;;  %v3982_v60 = vand.u32 4294901760, %v3255_v14 }
  0x71   : > { %1022 = vmatmul.mubr.f32.gmra.mxu0 %v3191_v26  ;;  %1161 = vmatmul.mubr.f32.vlgmr.msra.gmra.mxu1 %v3961_v61  ;;  %v3975_v61 = vld [vmem:[#allocation4_spill] sm:$0xff]  ;;  %v1608_v26 = vld [vmem:[%s3878_s4] sm:$0xff] }
  0x72   : > { %1263 = vmatprep.subr.mxu0 %v3947_v48  ;;  %1418 = vmatprep.subr.mxu1 %v3947_v48 }
  0x73   : > { %1267 = vmatpush1.msra.mxu0 %v3962_v18  ;;  %1420 = vmatpush1.msra.mxu1 %v2877_v4  ;;  %v3967_v4 = vld [vmem:[#allocation6_spill] sm:$0xff] }
  0x74   : > { %1268 = vmatprep.subr.mxu0 %v3947_v48  ;;  %1421 = vmatprep.subr.mxu1 %v3947_v48  ;;  %v3968_v29 = vand.u32 4294901760, %v3967_v4 }
  0x75   : > { %1028 = vmatprep.mubr.f32.mxu0 %v3963_v20  ;;  %1168 = vmatprep.mubr.f32.mxu1 %v3964_v49 }
  0x76   : > { %1272 = vmatpush1.msra.mxu0 %v3965_v57  ;;  %1423 = vmatpush1.msra.mxu1 %v2879_v5  ;;  %v3971_v5 = vand.u32 4294901760, %v3186_v23  ;;  %v3977_v23 = vand.u32 4294901760, %v3012_v54  ;;  %v3981_v54 = vand.u32 4294901760, %v3044_v8  ;;  %v3984_v8 = vand.u32 4294901760, %v3275_v56  ;;  %v1603_v57 = vld [vmem:[%s3558_s27 + $0x18] sm:$0xff] }
  0x77   : > { %1031 = vmatmul.mubr.f32.gmra.mxu0 %v3223_v39  ;;  %1172 = vmatmul.mubr.f32.gmra.mxu1 %v3966_v21 }
  0x78   : > { %1273 = vmatprep.subr.mxu0 %v3947_v48  ;;  %1424 = vmatprep.subr.mxu1 %v3947_v48 }
  0x79   : > { %1277 = vmatpush1.msra.mxu0 %v3968_v29  ;;  %1426 = vmatpush1.msra.mxu1 %v3969_v55  ;;  %v1620_v55 = vsel %vm460_vm0, %v1603_v57, 0 }
  0x7a   : > { %1278 = vmatprep.subr.mxu0 %v3947_v48  ;;  %1427 = vmatprep.subr.mxu1 %v3947_v48 }
  0x7b   : > { %1037 = vmatprep.mubr.f32.mxu0 %v3970_v28  ;;  %1179 = vmatprep.mubr.f32.mxu1 %v3971_v5  ;;  %v1605_v5 = vld [vmem:[%s3558_s27 + $0x28] sm:$0xff] }
  0x7c   : > { %1282 = vmatpush1.msra.mxu0 %v3972_v30  ;;  %1429 = vmatpush1.msra.mxu1 %v2893_v10  ;;  %v3976_v10 = vand.u32 4294901760, %v3963_v20  ;;  %v1606_v30 = vld [vmem:[%s3558_s27 + $0x30] sm:$0xff] }
  0x7d   : > { %1040 = vmatmul.mubr.f32.gmra.mxu0 %v3255_v14  ;;  %1183 = vmatmul.mubr.f32.gmra.mxu1 %v3973_v24  ;;  %v3985_v14 = vand.u32 4294901760, %v3077_v45  ;;  %v3987_v45 = vand.u32 4294901760, %v3101_v0  ;;  %v3990_v0 = vand.u32 4294901760, %v3129_v52  ;;  %v3992_v52 = vld [vmem:[#allocation7_spill] sm:$0xff] }
  0x7e   : > { %1283 = vmatprep.subr.mxu0 %v3947_v48  ;;  %1430 = vmatprep.subr.mxu1 %v3947_v48 }
  0x7f   : > { %1287 = vmatpush1.msra.mxu0 %v3974_v22  ;;  %1432 = vmatpush1.msra.mxu1 %v3975_v61  ;;  %v3622_v61 = vand.u32 4294901760, %v1620_v55 }
  0x80   : > { %1288 = vmatprep.subr.mxu0 %v3947_v48  ;;  %1433 = vmatprep.subr.mxu1 %v3947_v48 }
  0x81   : > { %1046 = vmatprep.mubr.f32.mxu0 %v3275_v56  ;;  %1190 = vmatprep.mubr.f32.mxu1 %v3976_v10  ;;  %v3988_v56 = vand.u32 4294901760, %v3109_v19 }
  0x82   : > { %1292 = vmatpush1.msra.mxu0 %v3977_v23  ;;  %1435 = vmatpush1.msra.mxu1 %v2897_v12  ;;  %v3980_v12 = vand.u32 4294901760, %v3970_v28  ;;  %v1626_v23 = vsel %vm460_vm0, %v1605_v5, 0 }
  0x83   : > { %1049 = vmatmul.mubr.f32.gmra.mxu0 %v3286_v36  ;;  %1194 = vmatmul.mubr.f32.gmra.mxu1 %v3978_v43  ;;  %v1629_v43 = vsel %vm460_vm0, %v1606_v30, 0 }
  0x84   : > { %1293 = vmatprep.subr.mxu0 %v3947_v48  ;;  %1436 = vmatprep.subr.mxu1 %v3947_v48 }
  0x85   : > { %1297 = vmatpush1.msra.mxu0 %v3979_v47  ;;  %1438 = vmatpush1.msra.mxu1 %v2912_v17  ;;  %v3983_v17 = vand.u32 4294901760, %v3057_v31  ;;  %v1607_v47 = vld [vmem:[%s3558_s27 + $0x38] sm:$0xff] }
  0x86   : > { %1298 = vmatprep.subr.mxu0 %v3947_v48  ;;  %1439 = vmatprep.subr.mxu1 %v3947_v48 }
  0x87   : > { %1055 = vmatprep.mubr.f32.mxu0 %v3306_v35  ;;  %1201 = vmatprep.mubr.f32.mxu1 %v3980_v12 }
  0x88   : > { %1302 = vmatpush1.msra.mxu0 %v3981_v54  ;;  %1441 = vmatpush1.msra.mxu1 %v2936_v25  ;;  %v1609_v25 = vld [vmem:[%s3878_s4 + $0x8] sm:$0xff] }
  0x89   : > { %1058 = vmatmul.mubr.f32.gmra.mxu0 %v3317_v44  ;;  %1205 = vmatmul.mubr.f32.gmra.mxu1 %v3982_v60  ;;  %v3509_v31 = vand.u32 4294901760, %v1609_v25  ;;  %v3641_v60 = vsub.f32 %v1620_v55, %v3622_v61 }
  0x8a   : > { %1303 = vmatprep.subr.mxu0 %v3947_v48  ;;  %1442 = vmatprep.subr.mxu1 %v3947_v48 }
  0x8b   : > { %1307 = vmatpush1.msra.mxu0 %v3983_v17  ;;  %1444 = vmatpush1.msra.mxu1 %v2940_v27  ;;  %v3986_v27 = vand.u32 4294901760, %v3286_v36  ;;  %v3528_v39 = vsub.f32 %v1609_v25, %v3509_v31  ;;  %v1600_v36 = vld [vmem:[%s3558_s27] sm:$0xff]  ;;  %v3643_v17 = vand.u32 4294901760, %v1626_v23 }
  0x8c   : > { %1308 = vmatprep.subr.mxu0 %v3947_v48  ;;  %1445 = vmatprep.subr.mxu1 %v3947_v48 }
  0x8d   : > { %1064 = vmatprep.mubr.f32.mxu0 %v3335_v38  ;;  %1212 = vmatprep.mubr.f32.mxu1 %v3984_v8  ;;  %v3651_v8 = vand.u32 4294901760, %v1629_v43 }
  0x8e   : > { %1312 = vmatpush1.msra.mxu0 %v3985_v14  ;;  %1447 = vmatpush1.msra.mxu1 %v2972_v40  ;;  %v3521_v40 = vand.u32 4294901760, %v1608_v26  ;;  %v1632_v14 = vsel %vm460_vm0, %v1607_v47, 0 }
  0x8f   : > { %1067 = vmatmul.mubr.f32.gmra.mxu0 %v3345_v2  ;;  %1216 = vmatmul.mubr.f32.gmra.mxu1 %v3986_v27  ;;  %v1611_v2 = vsel %vm460_vm0, %v1600_v36, 0 }
  0x90   : > { %1313 = vmatprep.subr.mxu0 %v3947_v48  ;;  %1448 = vmatprep.subr.mxu1 %v3947_v48  ;;  %v3539_v35 = vsub.f32 %v1608_v26, %v3521_v40  ;;  %v3590_v20 = vand.u32 4294901760, %v1611_v2  ;;  %v3661_v26 = vsub.f32 %v1626_v23, %v3643_v17 }
  0x91   : > { %1317 = vmatpush1.msra.mxu0 %v3987_v45  ;;  %1450 = vmatpush1.msra.mxu1 %v2975_v41  ;;  %v3989_v41 = vand.u32 4294901760, %v3317_v44  ;;  %v3995_v44 = vld [vmem:[#allocation12_spill] sm:$0xff]  ;;  %v3663_v45 = vand.u32 4294901760, %v1632_v14 }
  0x92   : > { %1318 = vmatprep.subr.mxu0 %v3947_v48  ;;  %1451 = vmatprep.subr.mxu1 %v3947_v48  ;;  %v3564_v19 = vand.u32 4294901760, %v3539_v35  ;;  %v3602_v21 = vsub.f32 %v1611_v2, %v3590_v20 }
  0x93   : > { %1223 = vmatprep.mubr.f32.mxu1 %v659_v46  ;;  %1322 = vmatpush1.msra.mxu0 %v3988_v56  ;;  %v3545_v46 = vand.u32 4294901760, %v3528_v39 }
  0x94   : > { %1453 = vmatpush1.msra.mxu1 %v3005_v51  ;;  %1351 = vmatprep.subr.mxu0 %v3947_v48  ;;  %v3991_v51 = vand.u32 4294901760, %v3148_v9  ;;  %v3994_v9 = vld [vmem:[#allocation11_spill] sm:$0xff]  ;;  %v1820_v38 = vsub.f32 %v3539_v35, %v3564_v19  ;;  %v1703_v24 = vand.u32 4294901760, %v3602_v21 }
  0x95   : > { %1227 = vmatmul.mubr.f32.gmra.mxu1 %v3989_v41  ;;  %1454 = vmatprep.subr.mxu1 %v3947_v48 }
  0x96   : > { %1355 = vmatpush2.msra.mxu0 %v3990_v0  ;;  %1456 = vmatpush1.msra.mxu1 %v3022_v59  ;;  %v3993_v59 = vld [vmem:[#allocation8_spill] sm:$0xff]  ;;  %v1821_v18 = vand.u32 4294901760, %v1820_v38  ;;  %v1704_v12 = vsub.f32 %v3602_v21, %v1703_v24  ;;  %v3672_v0 = vsub.f32 %v1629_v43, %v3651_v8 }
  0x97   : > { %1356 = vmatprep.subr.mxu0 %v3947_v48  ;;  %1457 = vmatprep.subr.mxu1 %v3947_v48 }
  0x98   : > { %1234 = vmatprep.mubr.f32.mxu1 %v674_v50  ;;  %1360 = vmatpush2.msra.mxu0 %v3991_v51  ;;  %v1601_v50 = vld [vmem:[%s3558_s27 + $0x8] sm:$0xff]  ;;  %v1705_v56 = vand.u32 4294901760, %v1704_v12 }
  0x99   : > { %1362 = vmatprep.mubr.f32.mxu0 %v3992_v52  ;;  %1459 = vmatpush1.msra.mxu1 %v3029_v62  ;;  %v1813_v62 = vsub.f32 %v3528_v39, %v3545_v46 }
  0x9a   : > { %1238 = vmatmul.mubr.f32.gmra.mxu1 %v680_v6  ;;  %1364 = vmatmul.mubr.f32.vlgmr.msra.gmra.mxu0 %v3993_v59  ;;  %v3996_v6 = vld [vmem:[#allocation14_spill] sm:$0xff] }
  0x9b   : > { %1460 = vmatprep.subr.mxu1 %v3947_v48  ;;  %1369 = vmatprep.mubr.f32.mxu0 %v3994_v9 }
  0x9c   : > { %1462 = vmatpush1.msra.mxu1 %v3063_v33  ;;  %2670 = vmatprep.subr.mxu0 %v3509_v31  ;;  %v1814_v33 = vand.u32 4294901760, %v1813_v62  ;;  %v1763_v62 = vand.u32 4294901760, %v3672_v0 }
  0x9d   : > { %1463 = vmatprep.subr.mxu1 %v3947_v48  ;;  %1501 = vmatprep.mubr.f32.mxu1 %v3992_v52  ;;  %v1753_v52 = vand.u32 4294901760, %v3661_v26 }
  0x9e   : > { %1465 = vmatpush1.msra.mxu1 %v3065_v34  ;;  %1371 = vmatmul.mubr.f32.gmra.mxu0 %v3995_v44  ;;  %v1602_v34 = vld [vmem:[%s3558_s27 + $0x10] sm:$0xff] }
  0x9f   : > { %1494 = vmatprep.subr.mxu1 %v3947_v48  ;;  %1376 = vmatprep.mubr.f32.mxu0 %v3165_v42  ;;  %v1617_v49 = vsel %vm460_vm0, %v1602_v34, 0 }
  0xa0   : > { %1496 = vmatpush2.msra.mxu1 %v3956_v15  ;;  %2671 = vmatpush3.msra.mxu0 %v3509_v31  ;;  %v1614_v15 = vsel %vm460_vm0, %v1601_v50, 0  ;;  %v3608_v29 = vand.u32 4294901760, %v1617_v49 }
  0xa1   : > { %1497 = vmatprep.subr.mxu1 %v3947_v48  ;;  %2672 = vmatprep.subr.mxu0 %v3521_v40  ;;  %v3604_v4 = vand.u32 4294901760, %v1614_v15 }
  0xa2   : > { %1499 = vmatpush2.msra.mxu1 %v3958_v37  ;;  %1378 = vmatmul.mubr.f32.gmra.mxu0 %v3996_v6  ;;  %v1604_v37 = vld [vmem:[%s3558_s27 + $0x20] sm:$0xff] }
  0xa3   : > { %1503 = vmatmul.mubr.f32.vlgmr.msra.gmra.mxu1 %v3993_v59  ;;  %2686 = vmatprep.subr.mxu1 %v1814_v33  ;;  %v1623_v28 = vsel %vm460_vm0, %v1604_v37, 0  ;;  %v3620_v22 = vsub.f32 %v1614_v15, %v3604_v4  ;;  %v3681_v59 = vsub.f32 %v1632_v14, %v3663_v45 }
  0xa4   : > { %2687 = vmatpush3.msra.mxu1 %v1814_v33  ;;  %1383 = vmatprep.mubr.f32.mxu0 %v3193_v13  ;;  %v3629_v10 = vand.u32 4294901760, %v1623_v28  ;;  %v1764_v33 = vsub.f32 %v3672_v0, %v1763_v62 }
  0xa5   : > { %1508 = vmatprep.mubr.f32.mxu1 %v3994_v9  ;;  %2673 = vmatpush3.msra.mxu0 %v3521_v40  ;;  %v1713_v54 = vand.u32 4294901760, %v3620_v22  ;;  %v1773_v38 = vand.u32 4294901760, %v3681_v59 }
  0xa6   : > { %1385 = vmatmul.mubr.f32.gmra.mxu0 %v3204_v63  ;;  %2688 = vmatprep.subr.mxu1 %v1821_v18  ;;  %v3649_v25 = vsub.f32 %v1623_v28, %v3629_v10 }
  0xa7   : > { %1510 = vmatmul.mubr.f32.gmra.mxu1 %v3995_v44  ;;  %1390 = vmatprep.mubr.f32.mxu0 %v3225_v53  ;;  %v1714_v27 = vsub.f32 %v3620_v22, %v1713_v54  ;;  %v1754_v44 = vsub.f32 %v3661_v26, %v1753_v52  ;;  %v1774_v2 = vsub.f32 %v3681_v59, %v1773_v38 }
  0xa8   : > { %1515 = vmatprep.mubr.f32.mxu1 %v3165_v42  ;;  %2689 = vmatpush3.msra.mxu1 %v1821_v18  ;;  %v3627_v42 = vsub.f32 %v1617_v49, %v3608_v29  ;;  %v1743_v41 = vand.u32 4294901760, %v3649_v25 }
  0xa9   : > { %2702 = vmatprep.subr.mxu0 %v3528_v39  ;;  %2718 = vmatprep.subr.mxu1 %v3509_v31  ;;  %v1715_v51 = vand.u32 4294901760, %v1714_v27 }
  0xaa   : > { %1392 = vmatmul.mubr.f32.gmra.mxu0 %v3238_v16 }
  0xab   : > { %1517 = vmatmul.mubr.f32.gmra.mxu1 %v3996_v6  ;;  %1397 = vmatprep.mubr.f32.mxu0 %v3257_v7 }
  0xac   : > { %1522 = vmatprep.mubr.f32.mxu1 %v3193_v13  ;;  %v1723_v13 = vand.u32 4294901760, %v3627_v42 }
  0xae   : > { %1399 = vmatmul.mubr.f32.gmra.mxu0 %v3268_v1 }
  0xaf   : > { %1524 = vmatmul.mubr.f32.gmra.mxu1 %v3204_v63  ;;  %1404 = vmatprep.mubr.f32.mxu0 %v3288_v3  ;;  %v1733_v63 = vand.u32 4294901760, %v3641_v60 }
  0xb0   : > { %1529 = vmatprep.mubr.f32.mxu1 %v3225_v53  ;;  %v1724_v53 = vsub.f32 %v3627_v42, %v1723_v13 }
  0xb2   : > { %1406 = vmatmul.mubr.f32.gmra.mxu0 %v3298_v58  ;;  %v1725_v9 = vand.u32 4294901760, %v1724_v53 }
  0xb3   : > { %1531 = vmatmul.mubr.f32.gmra.mxu1 %v3238_v16  ;;  %1411 = vmatprep.mubr.f32.mxu0 %v3319_v32  ;;  %v1734_v16 = vsub.f32 %v3641_v60, %v1733_v63 }
  0xb4   : > { %1536 = vmatprep.mubr.f32.mxu1 %v3257_v7  ;;  %v1744_v7 = vsub.f32 %v3649_v25, %v1743_v41 }
  0xb5   : > { %v1735_v36 = vand.u32 4294901760, %v1734_v16 }
  0xb6   : > { %1413 = vmatmul.mubr.f32.gmra.mxu0 %v3328_v11 }
  0xb7   : > { %1538 = vmatmul.mubr.f32.gmra.mxu1 %v3268_v1  ;;  %2674 = vmatprep.mubr.f32.mxu0 %v1705_v56  ;;  %v1745_v1 = vand.u32 4294901760, %v1744_v7 }
  0xb8   : > { %1543 = vmatprep.mubr.f32.mxu1 %v3288_v3  ;;  %v1755_v3 = vand.u32 4294901760, %v1754_v44 }
  0xba   : > { %2675 = vmatmul.mubr.f32.vlgmr.msra.gmra.mxu0 %v1715_v51 }
  0xbb   : > { %1545 = vmatmul.mubr.f32.gmra.mxu1 %v3298_v58  ;;  %2677 = vmatprep.mubr.f32.mxu0 %v1725_v9  ;;  %v1765_v58 = vand.u32 4294901760, %v1764_v33 }
  0xbc   : > { %1550 = vmatprep.mubr.f32.mxu1 %v3319_v32  ;;  %2703 = vmatpush3.msra.mxu0 %v3528_v39  ;;  %v1775_v32 = vand.u32 4294901760, %v1774_v2 }
  0xbd   : > { %2704 = vmatprep.subr.mxu0 %v3539_v35 }
  0xbe   : > { %2678 = vmatmul.mubr.f32.gmra.mxu0 %v1735_v36 }
  0xbf   : > { %1552 = vmatmul.mubr.f32.gmra.mxu1 %v3328_v11  ;;  %2680 = vmatprep.mubr.f32.mxu0 %v1745_v1 }
  0xc0   : > { %2690 = vmatprep.mubr.f32.mxu1 %v3590_v20  ;;  %2705 = vmatpush3.msra.mxu0 %v3539_v35 }
  0xc1   : > { %2734 = vmatprep.subr.mxu0 %v3545_v46 }
  0xc2   : > { %2681 = vmatmul.mubr.f32.gmra.mxu0 %v1755_v3 }
  0xc3   : > { %2691 = vmatmul.mubr.f32.vlgmr.msra.gmra.mxu1 %v3604_v4  ;;  %2683 = vmatprep.mubr.f32.mxu0 %v1765_v58 }
  0xc4   : > { %2719 = vmatpush3.msra.mxu1 %v3509_v31  ;;  %2693 = vmatprep.mubr.f32.mxu1 %v3608_v29 }
  0xc5   : > { %2720 = vmatprep.subr.mxu1 %v3521_v40 }
  0xc6   : > { %2684 = vmatmul.mubr.f32.gmra.mxu0 %v1775_v32  ;;  %2721 = vmatpush3.msra.mxu1 %v3521_v40 }
  0xc7   : > { %2694 = vmatmul.mubr.f32.gmra.mxu1 %v3622_v61  ;;  %2706 = vmatprep.mubr.f32.mxu0 %v3602_v21 }
  0xc8   : > { %2696 = vmatprep.mubr.f32.mxu1 %v3629_v10  ;;  %2750 = vmatprep.subr.mxu1 %v3509_v31 }
  0xca   : > { %2707 = vmatmul.mubr.f32.vlgmr.msra.gmra.mxu0 %v3620_v22 }
  0xcb   : > { %2697 = vmatmul.mubr.f32.gmra.mxu1 %v3643_v17  ;;  %2709 = vmatprep.mubr.f32.mxu0 %v3627_v42 }
  0xcc   : > { %2699 = vmatprep.mubr.f32.mxu1 %v3651_v8  ;;  %2735 = vmatpush3.msra.mxu0 %v3545_v46 }
  0xcd   : > { %2736 = vmatprep.subr.mxu0 %v3564_v19 }
  0xce   : > { %2710 = vmatmul.mubr.f32.gmra.mxu0 %v3641_v60 }
  0xcf   : > { %2700 = vmatmul.mubr.f32.gmra.mxu1 %v3663_v45  ;;  %2712 = vmatprep.mubr.f32.mxu0 %v3649_v25 }
  0xd0   : > { %2722 = vmatprep.mubr.f32.mxu1 %v1703_v24  ;;  %2737 = vmatpush3.msra.mxu0 %v3564_v19 }
  0xd2   : > { %2713 = vmatmul.mubr.f32.gmra.mxu0 %v3661_v26 }
  0xd3   : > { %2723 = vmatmul.mubr.f32.vlgmr.msra.gmra.mxu1 %v1713_v54  ;;  %2715 = vmatprep.mubr.f32.mxu0 %v3672_v0 }
  0xd4   : > { %2751 = vmatpush3.msra.mxu1 %v3509_v31  ;;  %2725 = vmatprep.mubr.f32.mxu1 %v1723_v13 }
  0xd5   : > { %2752 = vmatprep.subr.mxu1 %v3521_v40 }
  0xd6   : > { %2716 = vmatmul.mubr.f32.gmra.mxu0 %v3681_v59  ;;  %2753 = vmatpush3.msra.mxu1 %v3521_v40 }
  0xd7   : > { %2726 = vmatmul.mubr.f32.gmra.mxu1 %v1733_v63  ;;  %2738 = vmatprep.mubr.f32.mxu0 %v3590_v20 }
  0xd8   : > { %2728 = vmatprep.mubr.f32.mxu1 %v1743_v41 }
  0xda   : > { %2739 = vmatmul.mubr.f32.vlgmr.msra.gmra.mxu0 %v3604_v4 }
  0xdb   : > { %2729 = vmatmul.mubr.f32.gmra.mxu1 %v1753_v52  ;;  %2741 = vmatprep.mubr.f32.mxu0 %v3608_v29 }
  0xdc   : > { %2731 = vmatprep.mubr.f32.mxu1 %v1763_v62 }
  0xde   : > { %2742 = vmatmul.mubr.f32.gmra.mxu0 %v3622_v61 }
  0xdf   : > { %2732 = vmatmul.mubr.f32.gmra.mxu1 %v1773_v38  ;;  %2744 = vmatprep.mubr.f32.mxu0 %v3629_v10 }
  0xe0   : > { %2754 = vmatprep.mubr.f32.mxu1 %v3590_v20 }
  0xe2   : > { %2745 = vmatmul.mubr.f32.gmra.mxu0 %v3643_v17 }
  0xe3   : > { %2755 = vmatmul.mubr.f32.vlgmr.msra.gmra.mxu1 %v3604_v4  ;;  %2747 = vmatprep.mubr.f32.mxu0 %v3651_v8 }
  0xe4   : > { %2757 = vmatprep.mubr.f32.mxu1 %v3608_v29 }
  0xe6   : > { %2748 = vmatmul.mubr.f32.gmra.mxu0 %v3663_v45 }
  0xe7   : > { %2758 = vmatmul.mubr.f32.gmra.mxu1 %v3622_v61 }
  0xe8   : > { %2760 = vmatprep.mubr.f32.mxu1 %v3629_v10 }
  0xeb   : > { %2761 = vmatmul.mubr.f32.gmra.mxu1 %v3643_v17 }
  0xec   : > { %2763 = vmatprep.mubr.f32.mxu1 %v3651_v8 }
  0xef   : > { %2764 = vmatmul.mubr.f32.gmra.mxu1 %v3663_v45 }
  0xf3   : > { %v579_v11 = vpop.f32.mrf.mxu0 }
  0xf5   : > { %v581_v48 = vpop.f32.mrf.mxu0 }
  0xfc   : > { %v594_v31 = vpop.f32.mrf.mxu0  ;;  %v846_v40 = vpop.f32.mrf.mxu1 }
  0xfd   : > { %v3776_v39 = vadd.f32 %v846_v40, %v579_v11 }
  0xfe   : > { %v596_v35 = vpop.f32.mrf.mxu0  ;;  %v848_v46 = vpop.f32.mrf.mxu1 }
 0x101   : > { %v609_v19 = vpop.f32.mrf.mxu0 }
 0x103   : > { %v611_v50 = vpop.f32.mrf.mxu0 }
 0x106   : > { %v853_v34 = vpop.f32.mrf.mxu1 }
 0x107   : > { %v3778_v6 = vadd.f32 %v853_v34, %v594_v31  ;;  %v624_v18 = vpop.f32.mrf.mxu0 }
 0x108   : > { %v855_v20 = vpop.f32.mrf.mxu1 }
 0x109   : > { %v626_v15 = vpop.f32.mrf.mxu0 }
 0x10c   : > { %v860_v49 = vpop.f32.mrf.mxu1 }
 0x10d   : > { %v3780_v57 = vadd.f32 %v860_v49, %v609_v19  ;;  %v639_v37 = vpop.f32.mrf.mxu0 }
 0x10e   : > { %v862_v21 = vpop.f32.mrf.mxu1 }
 0x10f   : > { %v641_v4 = vpop.f32.mrf.mxu0 }
 0x112   : > { %v867_v29 = vpop.f32.mrf.mxu1 }
 0x113   : > { %v3782_v55 = vadd.f32 %v867_v29, %v624_v18  ;;  %v654_v28 = vpop.f32.mrf.mxu0 }
 0x114   : > { %v869_v5 = vpop.f32.mrf.mxu1 }
 0x115   : > { %v656_v30 = vpop.f32.mrf.mxu0 }
 0x118   : > { %v874_v24 = vpop.f32.mrf.mxu1 }
 0x119   : > { %v3784_v22 = vadd.f32 %v874_v24, %v639_v37  ;;  %v669_v61 = vpop.f32.mrf.mxu0 }
 0x11a   : > { %v876_v42 = vpop.f32.mrf.mxu1 }
 0x11b   : > { %v671_v10 = vpop.f32.mrf.mxu0 }
 0x11e   : > { %v881_v23 = vpop.f32.mrf.mxu1 }
 0x11f   : > { %v3786_v43 = vadd.f32 %v881_v23, %v654_v28  ;;  %v684_v47 = vpop.f32.mrf.mxu0  ;;  %v418_v28 = vld [vmem:[#allocation2] sm:$0xff] }
 0x120   : > { %v883_v12 = vpop.f32.mrf.mxu1 }
 0x121   : > { %v686_v54 = vpop.f32.mrf.mxu0 }
 0x122   : > { %v419_v54 = vld [vmem:[#allocation2 + $0x8] sm:$0xff] }
 0x123   : > { %v888_v60 = vpop.f32.mrf.mxu1 }
 0x124   : > { %v3788_v17 = vadd.f32 %v888_v60, %v669_v61 }
 0x125   : > { %v1005_v13 = vpop.f32.mrf.mxu0  ;;  %v890_v25 = vpop.f32.mrf.mxu1 }
 0x126   : > { %v1006_v20 = vadd.f32 %v1005_v13, %v3776_v39 }
 0x127   : > { %v1007_v8 = vpop.f32.mrf.mxu0 }
 0x129   : > { %v895_v14 = vpop.f32.mrf.mxu1 }
 0x12a   : > { %v3790_v27 = vadd.f32 %v895_v14, %v684_v47 }
 0x12b   : > { %v897_v63 = vpop.f32.mrf.mxu1 }
 0x12c   : > { %v1014_v26 = vpop.f32.mrf.mxu0 }
 0x12d   : > { %v1015_v21 = vadd.f32 %v1014_v26, %v3778_v6 }
 0x12e   : > { %v1016_v45 = vpop.f32.mrf.mxu0 }
 0x12f   : > { %v420_v45 = vld [vmem:[#allocation2 + $0x10] sm:$0xff] }
 0x131   : > { %v1023_v56 = vpop.f32.mrf.mxu0  ;;  %v1162_v53 = vpop.f32.mrf.mxu1 }
 0x132   : > { %v1163_v49 = vadd.f32 %v1162_v53, %v1006_v20  ;;  %v1024_v10 = vadd.f32 %v1023_v56, %v3780_v57 }
 0x133   : > { %v1025_v41 = vpop.f32.mrf.mxu0  ;;  %v1164_v0 = vpop.f32.mrf.mxu1 }
 0x137   : > { %v1032_v51 = vpop.f32.mrf.mxu0  ;;  %v1173_v16 = vpop.f32.mrf.mxu1 }
 0x138   : > { %v1174_v30 = vadd.f32 %v1173_v16, %v1015_v21  ;;  %v1033_v8 = vadd.f32 %v1032_v51, %v3782_v55 }
 0x139   : > { %v1034_v52 = vpop.f32.mrf.mxu0  ;;  %v1175_v59 = vpop.f32.mrf.mxu1 }
 0x13d   : > { %v1041_v9 = vpop.f32.mrf.mxu0  ;;  %v1184_v7 = vpop.f32.mrf.mxu1 }
 0x13e   : > { %v1185_v60 = vadd.f32 %v1184_v7, %v1024_v10  ;;  %v1042_v16 = vadd.f32 %v1041_v9, %v3784_v22 }
 0x13f   : > { %v1043_v62 = vpop.f32.mrf.mxu0  ;;  %v1186_v36 = vpop.f32.mrf.mxu1 }
 0x140   : > { %v421_v62 = vld [vmem:[#allocation2 + $0x18] sm:$0xff] }
 0x143   : > { %v3792_v44 = vpop.f32.mrf.mxu0  ;;  %v1195_v38 = vpop.f32.mrf.mxu1 }
 0x144   : > { %v1196_v41 = vadd.f32 %v1195_v38, %v1033_v8  ;;  %v1051_v38 = vadd.f32 %v3792_v44, %v3786_v43 }
 0x145   : > { %v1052_v1 = vpop.f32.mrf.mxu0  ;;  %v1197_v33 = vpop.f32.mrf.mxu1 }
 0x149   : > { %v3794_v3 = vpop.f32.mrf.mxu0  ;;  %v1206_v2 = vpop.f32.mrf.mxu1 }
 0x14a   : > { %v1207_v1 = vadd.f32 %v1206_v2, %v1042_v16  ;;  %v1060_v2 = vadd.f32 %v3794_v3, %v3788_v17 }
 0x14b   : > { %v1061_v58 = vpop.f32.mrf.mxu0  ;;  %v1208_v32 = vpop.f32.mrf.mxu1 }
 0x14f   : > { %v3796_v11 = vpop.f32.mrf.mxu0  ;;  %v1217_v48 = vpop.f32.mrf.mxu1 }
 0x150   : > { %v1218_v22 = vadd.f32 %v1217_v48, %v1051_v38 }
 0x151   : > { %v1219_v31 = vpop.f32.mrf.mxu1  ;;  %v1070_v40 = vpop.f32.mrf.mxu0 }
 0x152   : > { %v422_v40 = vld [vmem:[#allocation2 + $0x20] sm:$0xff] }
 0x155   : > { %v3798_v35 = vpop.f32.mrf.mxu1 }
 0x156   : > { %v1229_v43 = vadd.f32 %v3798_v35, %v1060_v2 }
 0x157   : > { %v1230_v46 = vpop.f32.mrf.mxu1 }
 0x15a   : > { %v3800_v19 = vpop.f32.mrf.mxu1  ;;  %v1365_v50 = vpop.f32.mrf.mxu0 }
 0x15b   : > { %v1366_v4 = vadd.f32 %v1365_v50, %v1163_v49  ;;  %v423_v49 = vld [vmem:[#allocation2 + $0x28] sm:$0xff] }
 0x15c   : > { %v1367_v34 = vpop.f32.mrf.mxu0  ;;  %v1241_v18 = vpop.f32.mrf.mxu1 }
 0x15e   : > { %v1372_v15 = vpop.f32.mrf.mxu0 }
 0x15f   : > { %v1373_v23 = vadd.f32 %v1372_v15, %v1174_v30  ;;  %v424_v30 = vld [vmem:[#allocation2 + $0x30] sm:$0xff] }
 0x160   : > { %v1374_v37 = vpop.f32.mrf.mxu0 }
 0x162   : > { %v1379_v29 = vpop.f32.mrf.mxu0 }
 0x163   : > { %v1504_v5 = vpop.f32.mrf.mxu1  ;;  %v1380_v14 = vadd.f32 %v1379_v29, %v1185_v60 }
 0x164   : > { %v1505_v24 = vadd.f32 %v1504_v5, %v1366_v4  ;;  %v1381_v61 = vpop.f32.mrf.mxu0  ;;  %v1069_v4 = vadd.f32 %v3796_v11, %v3790_v27 }
 0x165   : > { %v1506_v42 = vpop.f32.mrf.mxu1 }
 0x166   : > { %v1557_v47 = vadd.f32 %v1505_v24, %v418_v28  ;;  %v1386_v12 = vpop.f32.mrf.mxu0  ;;  %v1240_v3 = vadd.f32 %v3800_v19, %v1069_v4 }
 0x167   : > { %v1511_v39 = vpop.f32.mrf.mxu1  ;;  %v1387_v52 = vadd.f32 %v1386_v12, %v1196_v41 }
 0x168   : > { %1566 = vst.msk [vmem:[#allocation2] sm:$0xff] %vm409_vm1, %v1557_v47  ;;  %v1512_v13 = vadd.f32 %v1511_v39, %v1373_v23  ;;  %v1388_v6 = vpop.f32.mrf.mxu0  ;;  %v425_v47 = vld [vmem:[#allocation2 + $0x38] sm:$0xff] }
 0x169   : > { %v1513_v25 = vpop.f32.mrf.mxu1 }
 0x16a   : > { %v1558_v63 = vadd.f32 %v1512_v13, %v419_v54  ;;  %v1393_v26 = vpop.f32.mrf.mxu0 }
 0x16b   : > { %v1518_v53 = vpop.f32.mrf.mxu1  ;;  %v1394_v58 = vadd.f32 %v1393_v26, %v1207_v1 }
 0x16c   : > { %1567 = vst.msk [vmem:[#allocation2 + $0x8] sm:$0xff] %vm409_vm1, %v1558_v63  ;;  %v1519_v57 = vadd.f32 %v1518_v53, %v1380_v14  ;;  %v1395_v56 = vpop.f32.mrf.mxu0 }
 0x16d   : > { %v1520_v0 = vpop.f32.mrf.mxu1 }
 0x16e   : > { %v1559_v59 = vadd.f32 %v1519_v57, %v420_v45  ;;  %v1400_v7 = vpop.f32.mrf.mxu0 }
 0x16f   : > { %v1525_v36 = vpop.f32.mrf.mxu1  ;;  %v1401_v18 = vadd.f32 %v1400_v7, %v1218_v22  ;;  %v1577_v4 = vld [vmem:[#allocation2] sm:$0xff] }
 0x170   : > { %1568 = vst.msk [vmem:[#allocation2 + $0x10] sm:$0xff] %vm409_vm1, %v1559_v59  ;;  %v1526_v55 = vadd.f32 %v1525_v36, %v1387_v52  ;;  %v1402_v51 = vpop.f32.mrf.mxu0 }
 0x171   : > { %v1527_v33 = vpop.f32.mrf.mxu1 }
 0x172   : > { %v1560_v32 = vadd.f32 %v1526_v55, %v421_v62  ;;  %v1407_v31 = vpop.f32.mrf.mxu0 }
 0x173   : > { %v1532_v46 = vpop.f32.mrf.mxu1  ;;  %v1408_v29 = vadd.f32 %v1407_v31, %v1229_v43 }
 0x174   : > { %1569 = vst.msk [vmem:[#allocation2 + $0x18] sm:$0xff] %vm409_vm1, %v1560_v32  ;;  %v1533_v9 = vadd.f32 %v1532_v46, %v1394_v58  ;;  %v1409_v50 = vpop.f32.mrf.mxu0 }
 0x175   : > { %v1534_v34 = vpop.f32.mrf.mxu1 }
 0x176   : > { %v1561_v20 = vadd.f32 %v1533_v9, %v422_v40  ;;  %v1414_v15 = vpop.f32.mrf.mxu0 }
 0x177   : > { %v1539_v37 = vpop.f32.mrf.mxu1  ;;  %v1415_v42 = vadd.f32 %v1414_v15, %v1240_v3 }
 0x178   : > { %1570 = vst.msk [vmem:[#allocation2 + $0x20] sm:$0xff] %vm409_vm1, %v1561_v20  ;;  %v1540_v44 = vadd.f32 %v1539_v37, %v1401_v18  ;;  %v1416_v21 = vpop.f32.mrf.mxu0  ;;  %v1578_v20 = vld [vmem:[#allocation2 + $0x8] sm:$0xff] }
 0x179   : > { %v1541_v48 = vpop.f32.mrf.mxu1 }
 0x17a   : > { %v1562_v28 = vadd.f32 %v1540_v44, %v423_v49  ;;  %v2676_v5 = vpop.f32.mrf.mxu0  ;;  %v3830_v48 = vld [vmem:[%s3876_s2] ss:$0 sm:$0xff] }
 0x17b   : > { %v1546_v17 = vpop.f32.mrf.mxu1 }
 0x17c   : > { %1571 = vst.msk [vmem:[#allocation2 + $0x28] sm:$0xff] %vm409_vm1, %v1562_v28  ;;  %v1547_v24 = vadd.f32 %v1546_v17, %v1408_v29  ;;  %v1707_v61 = vpop.f32.mrf.mxu0  ;;  %v1593_v28 = vadd.f32 %v3830_v48, %v1578_v20 }
 0x17d   : > { %v1548_v35 = vpop.f32.mrf.mxu1 }
 0x17e   : > { %v1563_v10 = vadd.f32 %v1547_v24, %v424_v30  ;;  %v2679_v23 = vpop.f32.mrf.mxu0 }
 0x17f   : > { %v1553_v12 = vpop.f32.mrf.mxu1 }
 0x180   : > { %1572 = vst.msk [vmem:[#allocation2 + $0x30] sm:$0xff] %vm409_vm1, %v1563_v10  ;;  %v1554_v27 = vadd.f32 %v1553_v12, %v1415_v42  ;;  %v1727_v11 = vpop.f32.mrf.mxu0 }
 0x181   : > { %v1555_v54 = vpop.f32.mrf.mxu1 }
 0x182   : > { %v1564_v39 = vadd.f32 %v1554_v27, %v425_v47  ;;  %v2682_v60 = vpop.f32.mrf.mxu0 }
 0x183   : > { %v2692_v13 = vpop.f32.mrf.mxu1 }
 0x184   : > { %1573 = vst.msk [vmem:[#allocation2 + $0x38] sm:$0xff] %vm409_vm1, %v1564_v39  ;;  %v1747_v19 = vpop.f32.mrf.mxu0  ;;  %v1865_v58 = vadd.f32 %v2692_v13, %v2676_v5  ;;  %v1579_v39 = vld [vmem:[#allocation2 + $0x10] sm:$0xff] }
 0x185   : > { %v1858_v6 = vpop.f32.mrf.mxu1 }
 0x186   : > { %v2685_v25 = vpop.f32.mrf.mxu0  ;;  %v1859_v40 = vadd.f32 %v1858_v6, %v1707_v61  ;;  %v1580_v61 = vld [vmem:[#allocation2 + $0x18] sm:$0xff] }
 0x187   : > { %v2695_v8 = vpop.f32.mrf.mxu1 }
 0x188   : > { %v3823_v14 = vpop.f32.mrf.mxu0  ;;  %v1877_v50 = vadd.f32 %v2695_v8, %v2679_v23  ;;  %v1592_v23 = vadd.f32 %v3830_v48, %v1577_v4 }
 0x189   : > { %v1870_v63 = vpop.f32.mrf.mxu1 }
 0x18a   : > { %v2708_v26 = vpop.f32.mrf.mxu0  ;;  %v1871_v49 = vadd.f32 %v1870_v63, %v1727_v11 }
 0x18b   : > { %v2698_v45 = vpop.f32.mrf.mxu1  ;;  %v1984_v46 = vadd.f32 %v2708_v26, %v1865_v58 }
 0x18c   : > { %v1976_v53 = vpop.f32.mrf.mxu0  ;;  %v1889_v29 = vadd.f32 %v2698_v45, %v2682_v60 }
 0x18d   : > { %v1882_v41 = vpop.f32.mrf.mxu1  ;;  %v1977_v34 = vadd.f32 %v1976_v53, %v1859_v40 }
 0x18e   : > { %v2711_v57 = vpop.f32.mrf.mxu0  ;;  %v1883_v35 = vadd.f32 %v1882_v41, %v1747_v19  ;;  %v1595_v19 = vadd.f32 %v3830_v48, %v1580_v61  ;;  %v1582_v41 = vld [vmem:[#allocation2 + $0x28] sm:$0xff] }
 0x18f   : > { %v2701_v56 = vpop.f32.mrf.mxu1  ;;  %v1998_v37 = vadd.f32 %v2711_v57, %v1877_v50 }
 0x190   : > { %v1990_v0 = vpop.f32.mrf.mxu0  ;;  %v1901_v60 = vadd.f32 %v2701_v56, %v2685_v25 }
 0x191   : > { %v1894_v16 = vpop.f32.mrf.mxu1  ;;  %v1991_v30 = vadd.f32 %v1990_v0, %v1871_v49 }
 0x192   : > { %v2714_v52 = vpop.f32.mrf.mxu0  ;;  %v1895_v57 = vadd.f32 %v1894_v16, %v3823_v14  ;;  %v1597_v14 = vadd.f32 %v3830_v48, %v1582_v41 }
 0x193   : > { %v2724_v59 = vpop.f32.mrf.mxu1  ;;  %v2012_v42 = vadd.f32 %v2714_v52, %v1889_v29  ;;  %v1594_v52 = vadd.f32 %v3830_v48, %v1579_v39 }
 0x194   : > { %v2004_v7 = vpop.f32.mrf.mxu0  ;;  %v2109_v2 = vadd.f32 %v2724_v59, %v1984_v46  ;;  %v1584_v46 = vld [vmem:[#allocation2 + $0x38] sm:$0xff] }
 0x195   : > { %v2100_v62 = vpop.f32.mrf.mxu1  ;;  %v2005_v13 = vadd.f32 %v2004_v7, %v1883_v35  ;;  %v1599_v49 = vadd.f32 %v3830_v48, %v1584_v46 }
 0x196   : > { %v2717_v36 = vpop.f32.mrf.mxu0  ;;  %v2101_v43 = vadd.f32 %v2100_v62, %v1977_v34 }
 0x197   : > { %v2727_v1 = vpop.f32.mrf.mxu1  ;;  %v2026_v25 = vadd.f32 %v2717_v36, %v1901_v60 }
 0x198   : > { %v3825_v55 = vpop.f32.mrf.mxu0  ;;  %v2125_v17 = vadd.f32 %v2727_v1, %v1998_v37 }
 0x199   : > { %v2116_v51 = vpop.f32.mrf.mxu1 }
 0x19a   : > { %v2740_v33 = vpop.f32.mrf.mxu0  ;;  %v2117_v12 = vadd.f32 %v2116_v51, %v1991_v30 }
 0x19b   : > { %v2730_v38 = vpop.f32.mrf.mxu1  ;;  %v2240_v44 = vadd.f32 %v2740_v33, %v2109_v2  ;;  %v1581_v33 = vld [vmem:[#allocation2 + $0x20] sm:$0xff] }
 0x19c   : > { %v2233_v32 = vpop.f32.mrf.mxu0  ;;  %v2141_v6 = vadd.f32 %v2730_v38, %v2012_v42  ;;  %v2019_v38 = vadd.f32 %v3825_v55, %v1895_v57  ;;  %v1596_v34 = vadd.f32 %v3830_v48, %v1581_v33 }
 0x19d   : > { %v2132_v31 = vpop.f32.mrf.mxu1  ;;  %v2234_v3 = vadd.f32 %v2233_v32, %v2101_v43  ;;  %v1583_v43 = vld [vmem:[#allocation2 + $0x30] sm:$0xff] }
 0x19e   : > { %v2743_v22 = vpop.f32.mrf.mxu0  ;;  %v2133_v56 = vadd.f32 %v2132_v31, %v2005_v13  ;;  %v1598_v30 = vadd.f32 %v3830_v48, %v1583_v43 }
 0x19f   : > { %v2733_v9 = vpop.f32.mrf.mxu1  ;;  %v2252_v27 = vadd.f32 %v2743_v22, %v2125_v17 }
 0x1a0   : > { %v2245_v18 = vpop.f32.mrf.mxu0  ;;  %v2157_v58 = vadd.f32 %v2733_v9, %v2026_v25 }
 0x1a1   : > { %v2148_v15 = vpop.f32.mrf.mxu1  ;;  %v2246_v63 = vadd.f32 %v2245_v18, %v2117_v12 }
 0x1a2   : > { %v2746_v21 = vpop.f32.mrf.mxu0  ;;  %v2149_v22 = vadd.f32 %v2148_v15, %v2019_v38 }
 0x1a3   : > { %v2756_v5 = vpop.f32.mrf.mxu1  ;;  %v2264_v7 = vadd.f32 %v2746_v21, %v2141_v6 }
 0x1a4   : > { %v2355_v24 = vadd.f32 %v2756_v5, %v2240_v44  ;;  %v2257_v10 = vpop.f32.mrf.mxu0 }
 0x1a5   : > { %v2348_v47 = vpop.f32.mrf.mxu1  ;;  %v2258_v36 = vadd.f32 %v2257_v10, %v2133_v56 }
 0x1a6   : > { %v2395_v11 = vadd.f32 %v2355_v24, %v1593_v28  ;;  %v2349_v54 = vadd.f32 %v2348_v47, %v2234_v3  ;;  %v2749_v0 = vpop.f32.mrf.mxu0 }
 0x1a7   : > { %v2759_v8 = vpop.f32.mrf.mxu1  ;;  %v2276_v18 = vadd.f32 %v2749_v0, %v2157_v58 }
 0x1a8   : > { %v2403_v26 = vmul.f32 0.70710677, %v2395_v11  ;;  %v2394_v45 = vadd.f32 %v2349_v54, %v1592_v23  ;;  %v2367_v53 = vadd.f32 %v2759_v8, %v2252_v27  ;;  %v2269_v50 = vpop.f32.mrf.mxu0 }
 0x1a9   : > { %v2360_v59 = vpop.f32.mrf.mxu1  ;;  %v2270_v44 = vadd.f32 %v2269_v50, %v2149_v22 }
 0x1aa   : > { %2411 = vst.msk [vmem:[%s3839_s7 + $0x8] sm:$0xff] %vm409_vm1, %v2403_v26  ;;  %v2402_v62 = vmul.f32 0.70710677, %v2394_v45  ;;  %v2397_v1 = vadd.f32 %v2367_v53, %v1595_v19  ;;  %v2361_v51 = vadd.f32 %v2360_v59, %v2246_v63 }
 0x1ab   : > { %v2762_v16 = vpop.f32.mrf.mxu1 }
 0x1ac   : > { %2410 = vst.msk [vmem:[%s3839_s7] sm:$0xff] %vm409_vm1, %v2402_v62  ;;  %v2405_v32 = vmul.f32 0.70710677, %v2397_v1  ;;  %v2396_v31 = vadd.f32 %v2361_v51, %v1594_v52  ;;  %v2379_v40 = vadd.f32 %v2762_v16, %v2264_v7 }
 0x1ad   : > { %v2372_v2 = vpop.f32.mrf.mxu1 }
 0x1ae   : > { %2413 = vst.msk [vmem:[%s3839_s7 + $0x18] sm:$0xff] %vm409_vm1, %v2405_v32  ;;  %v2404_v55 = vmul.f32 0.70710677, %v2396_v31  ;;  %v2399_v9 = vadd.f32 %v2379_v40, %v1597_v14  ;;  %v2373_v20 = vadd.f32 %v2372_v2, %v2258_v36 }
 0x1af   : > { %v2765_v37 = vpop.f32.mrf.mxu1 }
 0x1b0   : > { %2412 = vst.msk [vmem:[%s3839_s7 + $0x10] sm:$0xff] %vm409_vm1, %v2404_v55  ;;  %v2407_v15 = vmul.f32 0.70710677, %v2399_v9  ;;  %v2398_v21 = vadd.f32 %v2373_v20, %v1596_v34  ;;  %v2391_v4 = vadd.f32 %v2765_v37, %v2276_v18 }
 0x1b1   : > { %v2384_v29 = vpop.f32.mrf.mxu1 }
 0x1b2   : > { %2415 = vst.msk [vmem:[%s3839_s7 + $0x28] sm:$0xff] %vm409_vm1, %v2407_v15  ;;  %v2406_v28 = vmul.f32 0.70710677, %v2398_v21  ;;  %v2401_v5 = vadd.f32 %v2391_v4, %v1599_v49  ;;  %v2385_v17 = vadd.f32 %v2384_v29, %v2270_v44 }
 0x1b4   : > { %2414 = vst.msk [vmem:[%s3839_s7 + $0x20] sm:$0xff] %vm409_vm1, %v2406_v28  ;;  %v2409_v3 = vmul.f32 0.70710677, %v2401_v5  ;;  %v2400_v24 = vadd.f32 %v2385_v17, %v1598_v30 }
 0x1b6   : > { %2417 = vst.msk [vmem:[%s3839_s7 + $0x38] sm:$0xff] %vm409_vm1, %v2409_v3  ;;  %v2408_v61 = vmul.f32 0.70710677, %v2400_v24 }
 0x1b8   : > { %2416 = vst.msk [vmem:[%s3839_s7 + $0x30] sm:$0xff] %vm409_vm1, %v2408_v61 }
 0x1b9 PF: > { %s15_s20 = sadd.s32 1, %s2813_s20   ;;  %s3997_s18 = smov %s2809_s19 }
 0x1ba   : > { %p12_p5 = scmp.ge.s32.totalorder %s15_s20, 4   ;;  %s3998_s19 = smov %s4000_s21 }
 0x1bc   :  { %14 = sbr.rel (!%p12_p5) target bundleno = 2 (0x2), region = 90 }

// kernel: style_encoder_forward.15
= control target key start
LH: loop header
LB: loop body
LE: loop exit
PB: predicated region body
PF: predicated region fallthrough
CT: control target
= control target key end

     0   :  { %s433_s9 = smov 0   ;;  %s435_s10 = smov 0   ;;  %s475_s0 = inlined_call_operand.vmem [shape: f32[2,32,32], index: 0, kind: input, shape index: {}]   ;;  %s476_s1 = inlined_call_operand.vmem [shape: f32[2,32,32], index: 1, kind: input, shape index: {}]   ;;  %s477_s2 = inlined_call_operand.vmem [shape: f32[2,16,32], index: 2, kind: output, shape index: {}]  }
   0x1   :  { %s437_s11 = smov 0  }
   0x2 LB: > { %s24_s12 = sadd.s32 1, %s412_s10  ;;  %p358_p0 = scmp.ge.s32.totalorder %s416_s11, 1  ;;  %s416_s11 = sphi %s437_s11, %s12_s11   ;;  %s412_s10 = sphi %s435_s10, %s479_s10   ;;  %s408_s9 = sphi %s433_s9, %s478_s9  }
   0x3   : > { %p26_p1 = scmp.ge.s32.totalorder %s24_s12, 2  ;;  %p150_p2 = scmp.lt.s32.totalorder %s416_s11, 3 }
   0x5   : > { %s481_s12 = smov (%p26_p1, %s24_s12), 0  ;;  %p151_p3 = pnand %p358_p0, %p150_p2 }
   0x6   : > { %p190_p4 = scmp.lt.s32.totalorder (!%p151_p3), %s408_s9, 1 }
   0x7   : > { %154 = sbr.rel (%p151_p3) target bundleno = 34 (0x22), region = 28 }
   0xc   : > { %s483_s9 = smov (!%p190_p4, %s408_s9), 1  ;;  %vm231_vm0 = vcmask 261120  }
   0xd   : > { %s367_s13 = sshll.u32 %s483_s9, 5  ;;  %s369_s20 = sshll.u32 %s483_s9, 4 }
   0xe   : > { %s197_s16 = scalar_lea.vmem %s475_s0, %s367_s13  ;;  %s207_s19 = scalar_lea.vmem %s476_s1, %s367_s13 }
   0xf   : > { %v219_v0 = vld [vmem:[%s197_s16] sm:$0xff]  ;;  %v220_v2 = vld [vmem:[%s197_s16 + $0x8] sm:$0xff]  ;;  %v221_v5 = vld [vmem:[%s197_s16 + $0x10] sm:$0xff]  ;;  %s217_s23 = scalar_lea.vmem %s477_s2, %s369_s20 }
  0x10   : > { %v223_v1 = vld [vmem:[%s207_s19] sm:$0xff]  ;;  %v224_v4 = vld [vmem:[%s207_s19 + $0x8] sm:$0xff]  ;;  %v225_v6 = vld [vmem:[%s207_s19 + $0x10] sm:$0xff] }
  0x11   : > { %v227_v3 = vadd.f32 %v223_v1, %v219_v0  ;;  %v228_v7 = vadd.f32 %v224_v4, %v220_v2  ;;  %v229_v8 = vadd.f32 %v225_v6, %v221_v5  ;;  %v222_v9 = vld [vmem:[%s197_s16 + $0x18] sm:$0xff] }
  0x12   : > { %v226_v10 = vld [vmem:[%s207_s19 + $0x18] sm:$0xff] }
  0x13   : > { %232 = vst.msk [vmem:[#allocation2] sm:$0xff] %vm231_vm0, %v227_v3  ;;  %v230_v11 = vadd.f32 %v226_v10, %v222_v9  ;;  %233 = vst.msk [vmem:[#allocation2 + $0x8] sm:$0xff] %vm231_vm0, %v228_v7 }
  0x14   : > { %234 = vst.msk [vmem:[#allocation2 + $0x10] sm:$0xff] %vm231_vm0, %v229_v8 }
  0x15   : > { %235 = vst.msk [vmem:[#allocation2 + $0x18] sm:$0xff] %vm231_vm0, %v230_v11 }
  0x1a   : > { %v236_v12 = vld [vmem:[#allocation2] ss:$2 sm:$0xff]  ;;  %v240_v13 = vld [vmem:[#allocation2 + $0x1] ss:$2 sm:$0xff] }
  0x1b   : > { %v243_v14 = vadd.f32 %v240_v13, %v236_v12 }
  0x1c   : > { %v238_v15 = vld [vmem:[#allocation2 + $0x10] ss:$2 sm:$0xff]  ;;  %v242_v16 = vld [vmem:[#allocation2 + $0x11] ss:$2 sm:$0xff] }
  0x1d   : > { %v244_v17 = vadd.f32 %v242_v16, %v238_v15  ;;  %v245_v18 = vmul.f32 0.25, %v243_v14 }
  0x1f   : > { %v246_v19 = vmul.f32 0.25, %v244_v17  ;;  %247 = vst.msk [vmem:[%s217_s23] sm:$0xff] %vm231_vm0, %v245_v18 }
  0x21   : > { %248 = vst.msk [vmem:[%s217_s23 + $0x8] sm:$0xff] %vm231_vm0, %v246_v19 }
  0x22 PF: > { %s12_s11 = sadd.s32 1, %s416_s11   ;;  %s478_s9 = smov %s412_s10 }
  0x23   : > { %p9_p5 = scmp.ge.s32.totalorder %s12_s11, 4   ;;  %s479_s10 = smov %s481_s12 }
  0x25   :  { %11 = sbr.rel (!%p9_p5) target bundleno = 2 (0x2), region = 64 }

// kernel: style_encoder_forward.17
= control target key start
LH: loop header
LB: loop body
LE: loop exit
PB: predicated region body
PF: predicated region fallthrough
CT: control target
= control target key end

     0   :  { %s2382_s12 = smov 0   ;;  %s2384_s13 = smov 0   ;;  %s3266_s0 = inlined_call_operand.vmem [shape: f32[2,16,288], index: 0, kind: input, shape index: {}]   ;;  %s3267_s1 = inlined_call_operand.vmem [shape: f32[288,32], index: 1, kind: input, shape index: {}]   ;;  %s3268_s2 = inlined_call_operand.vmem [shape: f32[1,32], index: 2, kind: input, shape index: {}]   ;;  %s3269_s3 = inlined_call_operand.vmem [shape: f32[2,16,32], index: 3, kind: output, shape index: {}]  }
   0x1   :  { %s2386_s14 = smov 0  }
   0x2 LB: > { %s39_s15 = sadd.s32 1, %s2355_s13  ;;  %p1973_p0 = scmp.ge.s32.totalorder %s2359_s14, 1  ;;  %s2359_s14 = sphi %s2386_s14, %s13_s14   ;;  %s2355_s13 = sphi %s2384_s13, %s3447_s13   ;;  %s2351_s12 = sphi %s2382_s12, %s3446_s12  }
   0x3   : > { %p41_p1 = scmp.ge.s32.totalorder %s39_s15, 2  ;;  %p206_p2 = scmp.lt.s32.totalorder %s2359_s14, 3 }
   0x5   : > { %s3449_s15 = smov (%p41_p1, %s39_s15), 0  ;;  %p207_p3 = pnand %p1973_p0, %p206_p2 }
   0x7   : > { %210 = sbr.rel (%p207_p3) target bundleno = 378 (0x17a), region = 32 }
   0xc   : > { %v344_v0 = vld [vmem:[%s3267_s1 + $0xf8] sm:$0xff]  ;;  %v343_v2 = vld [vmem:[%s3267_s1 + $0xf0] sm:$0xff]  ;;  %v342_v7 = vld [vmem:[%s3267_s1 + $0xe8] sm:$0xff]  ;;  %p259_p4 = scmp.lt.s32.totalorder %s2351_s12, 1  ;;  %vm302_vm0 = vcmask 261120  }
   0xd   : > { %v328_v1 = vld [vmem:[%s3267_s1 + $0x78] sm:$0xff]  ;;  %v2411_v3 = vand.u32 4294901760, %v344_v0  ;;  %v2415_v5 = vand.u32 4294901760, %v343_v2  ;;  %v327_v6 = vld [vmem:[%s3267_s1 + $0x70] sm:$0xff]  ;;  %v326_v8 = vld [vmem:[%s3267_s1 + $0x68] sm:$0xff]  ;;  %v2428_v10 = vand.u32 4294901760, %v342_v7 }
   0xe   : > { %v2413_v4 = vand.u32 4294901760, %v328_v1  ;;  %v2426_v9 = vand.u32 4294901760, %v327_v6  ;;  %v2430_v11 = vand.u32 4294901760, %v326_v8  ;;  %v341_v12 = vld [vmem:[%s3267_s1 + $0xe0] sm:$0xff]  ;;  %v340_v14 = vld [vmem:[%s3267_s1 + $0xd8] sm:$0xff]  ;;  %v2459_v20 = vld [vmem:[%s3267_s1 + $0xd0] sm:$0xff] }
   0xf   : > { %v325_v13 = vld [vmem:[%s3267_s1 + $0x60] sm:$0xff]  ;;  %1981 = vmatprep.subr.mxu0 %v2411_v3  ;;  %v2442_v15 = vand.u32 4294901760, %v341_v12  ;;  %v2446_v17 = vand.u32 4294901760, %v340_v14  ;;  %v2449_v18 = vsub.f32 %v344_v0, %v2411_v3  ;;  %v2454_v19 = vld [vmem:[%s3267_s1 + $0x58] sm:$0xff]  ;;  %v2464_v21 = vld [vmem:[%s3267_s1 + $0x50] sm:$0xff]  ;;  %v2474_v24 = vand.u32 4294901760, %v2459_v20 }
  0x10   : > { %v2444_v16 = vand.u32 4294901760, %v325_v13  ;;  %1982 = vmatpush3.msra.mxu0 %v2413_v4  ;;  %v2468_v22 = vand.u32 4294901760, %v2454_v19  ;;  %v2471_v23 = vsub.f32 %v328_v1, %v2413_v4  ;;  %v2477_v25 = vsub.f32 %v343_v2, %v2415_v5  ;;  %v2482_v26 = vld [vmem:[%s3267_s1 + $0xc8] sm:$0xff]  ;;  %v2492_v28 = vld [vmem:[%s3267_s1 + $0xc0] sm:$0xff]  ;;  %v2544_v46 = vld [vmem:[%s3267_s1 + $0xb8] sm:$0xff]  ;;  %s3451_s12 = smov (!%p259_p4, %s2351_s12), 1 }
  0x11   : > { %3345 = vst [vmem:[#allocation3_spill] sm:$0xff] %v2474_v24  ;;  %v2487_v27 = vld [vmem:[%s3267_s1 + $0x48] sm:$0xff]  ;;  %1983 = vmatprep.subr.mxu0 %v2415_v5  ;;  %v3283_v29 = vand.u32 4294901760, %v2449_v18  ;;  %v2497_v30 = vand.u32 4294901760, %v2464_v21  ;;  %v2500_v31 = vsub.f32 %v327_v6, %v2426_v9  ;;  %v2503_v32 = vand.u32 4294901760, %v2482_v26  ;;  %v2517_v37 = vld [vmem:[%s3267_s1 + $0x40] sm:$0xff] }
  0x12   : > { %1984 = vmatpush3.msra.mxu0 %v2426_v9  ;;  %v3282_v33 = vand.u32 4294901760, %v2471_v23  ;;  %v3281_v34 = vand.u32 4294901760, %v2477_v25  ;;  %v2509_v35 = vsub.f32 %v342_v7, %v2428_v10  ;;  %v2512_v36 = vand.u32 4294901760, %v2487_v27  ;;  %v2557_v51 = vld [vmem:[%s3267_s1 + $0x38] sm:$0xff]  ;;  %v2567_v56 = vld [vmem:[%s3267_s1 + $0xb0] sm:$0xff]  ;;  %v2597_v2 = vld [vmem:[%s3267_s1 + $0xa8] sm:$0xff] }
  0x13   : > { %3346 = vst [vmem:[#allocation4_spill] sm:$0xff] %v2497_v30  ;;  %3347 = vst [vmem:[#allocation5_spill] sm:$0xff] %v2503_v32  ;;  %1985 = vmatprep.subr.mxu0 %v2428_v10  ;;  %v599_v38 = vsub.f32 %v2449_v18, %v3283_v29  ;;  %v3279_v39 = vand.u32 4294901760, %v2500_v31  ;;  %v2525_v40 = vsub.f32 %v326_v8, %v2430_v11  ;;  %v2528_v41 = vand.u32 4294901760, %v2492_v28  ;;  %v2582_v61 = vld [vmem:[%s3267_s1 + $0x30] sm:$0xff]  ;;  %s2311_s26 = smul.u32 48, %s3451_s12 }
  0x14   : > { %3348 = vst [vmem:[#allocation6_spill] sm:$0xff] %v2512_v36  ;;  %1986 = vmatpush3.msra.mxu0 %v2430_v11  ;;  %v487_v42 = vsub.f32 %v2471_v23, %v3282_v33  ;;  %v606_v43 = vsub.f32 %v2477_v25, %v3281_v34  ;;  %v3277_v44 = vand.u32 4294901760, %v2509_v35  ;;  %v2539_v45 = vsub.f32 %v341_v12, %v2442_v15  ;;  %v2740_v33 = vld [vmem:[%s3267_s1 + $0x88] sm:$0xff]  ;;  %s1980_s25 = sshll.u32 %s3451_s12, 4 }
  0x15   : > { %3349 = vst [vmem:[#allocation7_spill] sm:$0xff] %v2528_v41  ;;  %1987 = vmatprep.subr.mxu0 %v2442_v15  ;;  %v600_v47 = vand.u32 4294901760, %v599_v38  ;;  %v494_v48 = vsub.f32 %v2500_v31, %v3279_v39  ;;  %v3275_v49 = vand.u32 4294901760, %v2525_v40  ;;  %v2552_v50 = vand.u32 4294901760, %v2517_v37  ;;  %s2787_s8 = scalar_lea.vmem %s3266_s0, %s2311_s26  ;;  %s296_s28 = scalar_lea.vmem %s3269_s3, %s1980_s25 }
  0x16   : > { %1988 = vmatpush3.msra.mxu0 %v2444_v16  ;;  %v488_v52 = vand.u32 4294901760, %v487_v42  ;;  %v607_v53 = vand.u32 4294901760, %v606_v43  ;;  %v613_v54 = vsub.f32 %v2509_v35, %v3277_v44  ;;  %v3274_v55 = vand.u32 4294901760, %v2539_v45  ;;  %v2712_v44 = vld [vmem:[%s3267_s1 + $0x90] sm:$0xff] }
  0x17   : > { %3350 = vst [vmem:[#allocation8_spill] sm:$0xff] %v2552_v50  ;;  %1989 = vmatprep.subr.mxu0 %v2446_v17  ;;  %2019 = vmatprep.subr.mxu1 %v600_v47  ;;  %v495_v57 = vand.u32 4294901760, %v494_v48  ;;  %v501_v58 = vsub.f32 %v2525_v40, %v3275_v49  ;;  %v2574_v59 = vsub.f32 %v325_v13, %v2444_v16  ;;  %v2577_v60 = vand.u32 4294901760, %v2544_v46  ;;  %v2611_v13 = vld [vmem:[%s3267_s1 + $0x28] sm:$0xff]  ;;  %v2696_v49 = vld [vmem:[%s3267_s1 + $0x18] sm:$0xff] }
  0x18   : > { %1990 = vmatpush3.msra.mxu0 %v2468_v22  ;;  %2020 = vmatpush3.msra.mxu1 %v488_v52  ;;  %v614_v62 = vand.u32 4294901760, %v613_v54  ;;  %v620_v63 = vsub.f32 %v2539_v45, %v3274_v55  ;;  %v2589_v0 = vsub.f32 %v340_v14, %v2446_v17  ;;  %v2592_v1 = vand.u32 4294901760, %v2557_v51  ;;  %v2638_v52 = vld [vmem:[%s3267_s1 + $0xa0] sm:$0xff] }
  0x19   : > { %3351 = vst [vmem:[#allocation9_spill] sm:$0xff] %v2577_v60  ;;  %1991 = vmatprep.subr.mxu0 %v2474_v24  ;;  %2021 = vmatprep.subr.mxu1 %v607_v53  ;;  %v502_v6 = vand.u32 4294901760, %v501_v58  ;;  %v3272_v7 = vand.u32 4294901760, %v2574_v59  ;;  %v2603_v8 = vsub.f32 %v2454_v19, %v2468_v22  ;;  %v2606_v12 = vand.u32 4294901760, %v2567_v56 }
  0x1a   : > { %3352 = vst [vmem:[#allocation10_spill] sm:$0xff] %v2592_v1  ;;  %1992 = vmatpush3.msra.mxu0 %v2497_v30  ;;  %2022 = vmatpush3.msra.mxu1 %v495_v57  ;;  %v621_v14 = vand.u32 4294901760, %v620_v63  ;;  %v3271_v38 = vand.u32 4294901760, %v2589_v0  ;;  %v2618_v42 = vsub.f32 %v2459_v20, %v2474_v24  ;;  %v2621_v19 = vand.u32 4294901760, %v2582_v61 }
  0x1b   : > { %3353 = vst [vmem:[#allocation11_spill] sm:$0xff] %v2606_v12  ;;  %1993 = vmatprep.subr.mxu0 %v2503_v32  ;;  %2023 = vmatprep.subr.mxu1 %v614_v62  ;;  %v508_v43 = vsub.f32 %v2574_v59, %v3272_v7  ;;  %v3270_v47 = vand.u32 4294901760, %v2603_v8  ;;  %v2630_v48 = vsub.f32 %v2464_v21, %v2497_v30  ;;  %v2633_v20 = vand.u32 4294901760, %v2597_v2 }
  0x1c   : > { %3354 = vst [vmem:[#allocation12_spill] sm:$0xff] %v2621_v19  ;;  %1994 = vmatpush3.msra.mxu0 %v2512_v36  ;;  %2024 = vmatpush3.msra.mxu1 %v502_v6  ;;  %v627_v53 = vsub.f32 %v2589_v0, %v3271_v38  ;;  %v3273_v21 = vand.u32 4294901760, %v2618_v42  ;;  %v2647_v54 = vsub.f32 %v2482_v26, %v2503_v32  ;;  %v2650_v57 = vand.u32 4294901760, %v2611_v13  ;;  %v2664_v26 = vld [vmem:[%s3267_s1 + $0x20] sm:$0xff]  ;;  %v2682_v38 = vld [vmem:[%s3267_s1 + $0x98] sm:$0xff] }
  0x1d   : > { %3355 = vst [vmem:[#allocation13_spill] sm:$0xff] %v2633_v20  ;;  %1995 = vmatprep.subr.mxu0 %v2528_v41  ;;  %2025 = vmatprep.subr.mxu1 %v621_v14  ;;  %v509_v58 = vand.u32 4294901760, %v508_v43  ;;  %v515_v62 = vsub.f32 %v2603_v8, %v3270_v47  ;;  %v3276_v63 = vand.u32 4294901760, %v2630_v48  ;;  %v2659_v6 = vsub.f32 %v2487_v27, %v2512_v36 }
  0x1e   : > { %3356 = vst [vmem:[#allocation14_spill] sm:$0xff] %v2650_v57  ;;  %1996 = vmatpush3.msra.mxu0 %v2552_v50  ;;  %v628_v14 = vand.u32 4294901760, %v627_v53  ;;  %v634_v43 = vsub.f32 %v2618_v42, %v3273_v21  ;;  %v3278_v47 = vand.u32 4294901760, %v2647_v54  ;;  %v2677_v27 = vand.u32 4294901760, %v2638_v52 }
  0x1f   : > { %2026 = vmatpush3.msra.mxu1 %v509_v58  ;;  %1997 = vmatprep.subr.mxu0 %v2577_v60  ;;  %v516_v7 = vand.u32 4294901760, %v515_v62  ;;  %v522_v53 = vsub.f32 %v2630_v48, %v3276_v63  ;;  %v3280_v21 = vand.u32 4294901760, %v2659_v6  ;;  %v2691_v55 = vsub.f32 %v2492_v28, %v2528_v41 }
  0x20   : > { %3357 = vst [vmem:[#allocation15_spill] sm:$0xff] %v2677_v27  ;;  %2027 = vmatprep.subr.mxu1 %v628_v14  ;;  %1998 = vmatpush3.msra.mxu0 %v2592_v1  ;;  %v635_v58 = vand.u32 4294901760, %v634_v43  ;;  %v641_v62 = vsub.f32 %v2647_v54, %v3278_v47  ;;  %v2703_v63 = vand.u32 4294901760, %v2664_v26  ;;  %v2707_v28 = vsub.f32 %v2517_v37, %v2552_v50  ;;  %v2725_v37 = vld [vmem:[%s3267_s1 + $0x10] sm:$0xff] }
  0x21   : > { %2028 = vmatpush3.msra.mxu1 %v516_v7  ;;  %1999 = vmatprep.subr.mxu0 %v2606_v12  ;;  %v523_v14 = vand.u32 4294901760, %v522_v53  ;;  %v529_v43 = vsub.f32 %v2659_v6, %v3280_v21  ;;  %v3286_v47 = vand.u32 4294901760, %v2691_v55  ;;  %v2720_v39 = vand.u32 4294901760, %v2682_v38 }
  0x22   : > { %3358 = vst [vmem:[#allocation16_spill] sm:$0xff] %v2703_v63  ;;  %2029 = vmatprep.subr.mxu1 %v635_v58  ;;  %2000 = vmatpush3.msra.mxu0 %v2621_v19  ;;  %v642_v7 = vand.u32 4294901760, %v641_v62  ;;  %v3287_v53 = vand.u32 4294901760, %v2707_v28  ;;  %v2732_v21 = vsub.f32 %v2544_v46, %v2577_v60  ;;  %v2735_v34 = vand.u32 4294901760, %v2696_v49 }
  0x23   : > { %3359 = vst [vmem:[#allocation17_spill] sm:$0xff] %v2720_v39  ;;  %2030 = vmatpush3.msra.mxu1 %v523_v14  ;;  %2001 = vmatprep.subr.mxu0 %v2633_v20  ;;  %v530_v58 = vand.u32 4294901760, %v529_v43  ;;  %v648_v62 = vsub.f32 %v2691_v55, %v3286_v47  ;;  %v2748_v46 = vsub.f32 %v2557_v51, %v2592_v1  ;;  %v2751_v29 = vand.u32 4294901760, %v2712_v44  ;;  %v2768_v51 = vld [vmem:[%s3267_s1 + $0x8] sm:$0xff] }
  0x24   : > { %3360 = vst [vmem:[#allocation18_spill] sm:$0xff] %v2735_v34  ;;  %2031 = vmatprep.subr.mxu1 %v642_v7  ;;  %2002 = vmatpush3.msra.mxu0 %v2650_v57  ;;  %v536_v14 = vsub.f32 %v2707_v28, %v3287_v53  ;;  %v2760_v60 = vsub.f32 %v2567_v56, %v2606_v12  ;;  %v2763_v47 = vand.u32 4294901760, %v2725_v37  ;;  %v2777_v56 = vand.u32 4294901760, %v2740_v33  ;;  %v2782_v12 = vld [vmem:[%s3267_s1 + $0x80] sm:$0xff] }
  0x25   : > { %3361 = vst [vmem:[#allocation19_spill] sm:$0xff] %v2751_v29  ;;  %2032 = vmatpush3.msra.mxu1 %v530_v58  ;;  %2003 = vmatprep.subr.mxu0 %v2677_v27  ;;  %v649_v7 = vand.u32 4294901760, %v648_v62  ;;  %v2774_v43 = vsub.f32 %v2582_v61, %v2621_v19  ;;  %v3364_v62 = vand.u32 4294901760, %v2732_v21  ;;  %v2796_v19 = vsub.f32 %v2597_v2, %v2633_v20  ;;  %v2813_v2 = vld [vmem:[%s3267_s1] sm:$0xff] }
  0x26   : > { %3362 = vst [vmem:[#allocation20_spill] sm:$0xff] %v2763_v47  ;;  %3363 = vst [vmem:[#allocation21_spill] sm:$0xff] %v2777_v56  ;;  %2004 = vmatpush3.msra.mxu0 %v2703_v63  ;;  %v537_v58 = vand.u32 4294901760, %v536_v14  ;;  %v3306_v53 = vand.u32 4294901760, %v2760_v60  ;;  %v3366_v1 = vand.u32 4294901760, %v2748_v46  ;;  %v2804_v41 = vand.u32 4294901760, %v2768_v51 }
  0x27   : > { %v655_v61 = vsub.f32 %v2732_v21, %v3364_v62  ;;  %3365 = vst [vmem:[#allocation22_spill] sm:$0xff] %v2796_v19  ;;  %2033 = vmatprep.subr.mxu1 %v649_v7  ;;  %2005 = vmatprep.subr.mxu0 %v2720_v39  ;;  %v2808_v62 = vsub.f32 %v2611_v13, %v2650_v57  ;;  %v2821_v20 = vand.u32 4294901760, %v2782_v12  ;;  %v308_v13 = vld [vmem:[%s2787_s8 + $0x8] sm:$0xff]  ;;  %v3368_v36 = vand.u32 4294901760, %v2774_v43 }
  0x28   : > { %v543_v50 = vsub.f32 %v2748_v46, %v3366_v1  ;;  %2034 = vmatpush3.msra.mxu1 %v537_v58  ;;  %2006 = vmatpush3.msra.mxu0 %v2735_v34  ;;  %v662_v1 = vsub.f32 %v2760_v60, %v3306_v53  ;;  %v2831_v32 = vsub.f32 %v2638_v52, %v2677_v27  ;;  %v307_v53 = vld [vmem:[%s2787_s8] sm:$0xff]  ;;  %v3369_v30 = vand.u32 4294901760, %v2796_v19 }
  0x29   : > { %3367 = vst [vmem:[#allocation23_spill] sm:$0xff] %v2808_v62  ;;  %v656_v7 = vand.u32 4294901760, %v655_v61  ;;  %2007 = vmatprep.subr.mxu0 %v2751_v29  ;;  %v550_v58 = vsub.f32 %v2774_v43, %v3368_v36  ;;  %v2839_v24 = vand.u32 4294901760, %v2813_v2  ;;  %v2843_v36 = vsub.f32 %v2664_v26, %v2703_v63 }
  0x2a   : > { %v544_v57 = vand.u32 4294901760, %v543_v50  ;;  %v663_v14 = vand.u32 4294901760, %v662_v1  ;;  %2008 = vmatpush3.msra.mxu0 %v2763_v47  ;;  %v669_v50 = vsub.f32 %v2796_v19, %v3369_v30  ;;  %v3371_v52 = vand.u32 4294901760, %v2808_v62 }
  0x2b   : > { %2035 = vmatprep.subr.mxu1 %v656_v7  ;;  %3370 = vst [vmem:[#allocation24_spill] sm:$0xff] %v2843_v36  ;;  %v551_v61 = vand.u32 4294901760, %v550_v58  ;;  %2009 = vmatprep.subr.mxu0 %v2777_v56  ;;  %v3315_v1 = vand.u32 4294901760, %v2831_v32  ;;  %v2850_v27 = vand.u32 4294901760, %v308_v13  ;;  %v3316_v19 = vand.u32 4294901760, %v2843_v36 }
  0x2c   : > { %2036 = vmatpush3.msra.mxu1 %v544_v57  ;;  %v557_v7 = vsub.f32 %v2808_v62, %v3371_v52  ;;  %v670_v30 = vand.u32 4294901760, %v669_v50  ;;  %2010 = vmatpush3.msra.mxu0 %v2804_v41  ;;  %v2856_v57 = vsub.f32 %v2682_v38, %v2720_v39  ;;  %v2858_v26 = vand.u32 4294901760, %v307_v53 }
  0x2d   : > { %3372 = vst [vmem:[#allocation25_spill] sm:$0xff] %v2850_v27  ;;  %2037 = vmatprep.subr.mxu1 %v663_v14  ;;  %2011 = vmatprep.subr.mxu0 %v2821_v20  ;;  %v676_v52 = vsub.f32 %v2831_v32, %v3315_v1  ;;  %v2865_v14 = vsub.f32 %v308_v13, %v2850_v27 }
  0x2e   : > { %3373 = vst [vmem:[#allocation26_spill] sm:$0xff] %v2858_v26  ;;  %2038 = vmatpush3.msra.mxu1 %v551_v61  ;;  %v558_v58 = vand.u32 4294901760, %v557_v7  ;;  %v2869_v50 = vsub.f32 %v2696_v49, %v2735_v34  ;;  %2012 = vmatpush3.msra.mxu0 %v2839_v24  ;;  %v564_v38 = vsub.f32 %v2843_v36, %v3316_v19 }
  0x2f   : > { %2039 = vmatprep.subr.mxu1 %v670_v30  ;;  %v2877_v7 = vsub.f32 %v307_v53, %v2858_v26  ;;  %v2881_v13 = vsub.f32 %v2712_v44, %v2751_v29  ;;  %v677_v1 = vand.u32 4294901760, %v676_v52  ;;  %v3321_v49 = vand.u32 4294901760, %v2865_v14  ;;  %2057 = vmatprep.subr.mxu0 %v2449_v18 }
  0x30   : > { %3374 = vst [vmem:[#allocation27_spill] sm:$0xff] %v2869_v50  ;;  %2040 = vmatpush3.msra.mxu1 %v558_v58  ;;  %v3324_v30 = vand.u32 4294901760, %v2869_v50  ;;  %v2888_v19 = vsub.f32 %v2725_v37, %v2763_v47  ;;  %v565_v61 = vand.u32 4294901760, %v564_v38  ;;  %v3375_v53 = vand.u32 4294901760, %v2856_v57  ;;  %708 = vmatprep.mubr.f32.mxu1 %v2850_v27 }
  0x31   : > { %2041 = vmatprep.subr.mxu1 %v677_v1  ;;  %v455_v52 = vsub.f32 %v2865_v14, %v3321_v49  ;;  %v3376_v58 = vand.u32 4294901760, %v2877_v7  ;;  %v3377_v27 = vand.u32 4294901760, %v2881_v13  ;;  %v2915_v47 = vsub.f32 %v2768_v51, %v2804_v41 }
  0x32   : > { %v683_v34 = vsub.f32 %v2856_v57, %v3375_v53  ;;  %v571_v37 = vsub.f32 %v2869_v50, %v3324_v30  ;;  %v2905_v53 = vsub.f32 %v2740_v33, %v2777_v56  ;;  %2042 = vmatpush3.msra.mxu1 %v565_v61  ;;  %v3378_v29 = vand.u32 4294901760, %v2888_v19 }
  0x33   : > { %v461_v1 = vsub.f32 %v2877_v7, %v3376_v58  ;;  %v690_v49 = vsub.f32 %v2881_v13, %v3377_v27  ;;  %v456_v30 = vand.u32 4294901760, %v455_v52  ;;  %v3331_v58 = vand.u32 4294901760, %v2915_v47 }
  0x34   : > { %v684_v44 = vand.u32 4294901760, %v683_v34  ;;  %v572_v38 = vand.u32 4294901760, %v571_v37  ;;  %v578_v33 = vsub.f32 %v2888_v19, %v3378_v29  ;;  %v3332_v34 = vand.u32 4294901760, %v2905_v53 }
  0x35   : > { %v462_v61 = vand.u32 4294901760, %v461_v1  ;;  %v691_v56 = vand.u32 4294901760, %v690_v49  ;;  %v2924_v27 = vsub.f32 %v2782_v12, %v2821_v20  ;;  %457 = vmatprep.mubr.f32.mxu0 %v456_v30  ;;  %v2931_v29 = vsub.f32 %v2813_v2, %v2839_v24  ;;  %v311_v1 = vld [vmem:[%s2787_s8 + $0x20] sm:$0xff] }
  0x36   : > { %2043 = vmatprep.subr.mxu1 %v684_v44  ;;  %v579_v51 = vand.u32 4294901760, %v578_v33  ;;  %v697_v52 = vsub.f32 %v2905_v53, %v3332_v34  ;;  %v585_v49 = vsub.f32 %v2915_v47, %v3331_v58  ;;  %v3386_v58 = vld [vmem:[#allocation7_spill] sm:$0xff] }
  0x37   : > { %2044 = vmatpush3.msra.mxu1 %v572_v38  ;;  %3379 = vst [vmem:[#allocation28_spill] sm:$0xff] %v2931_v29  ;;  %463 = vmatmul.mubr.f32.vlgmr.msra.gmra.mxu0 %v462_v61  ;;  %v3330_v12 = vand.u32 4294901760, %v2924_v27  ;;  %v3329_v44 = vand.u32 4294901760, %v2931_v29  ;;  %v310_v61 = vld [vmem:[%s2787_s8 + $0x18] sm:$0xff] }
  0x38   : > { %2045 = vmatprep.subr.mxu1 %v691_v56  ;;  %2058 = vmatpush3.msra.mxu0 %v2471_v23  ;;  %v698_v30 = vand.u32 4294901760, %v697_v52  ;;  %v586_v2 = vand.u32 4294901760, %v585_v49  ;;  %v2959_v52 = vand.u32 4294901760, %v310_v61 }
  0x39   : > { %2046 = vmatpush3.msra.mxu1 %v579_v51  ;;  %2059 = vmatprep.subr.mxu0 %v2477_v25  ;;  %v704_v56 = vsub.f32 %v2924_v27, %v3330_v12  ;;  %v592_v37 = vsub.f32 %v2931_v29, %v3329_v44  ;;  %v2953_v51 = vand.u32 4294901760, %v311_v1  ;;  %v3385_v12 = vld [vmem:[#allocation6_spill] sm:$0xff] }
  0x3a   : > { %2060 = vmatpush3.msra.mxu0 %v2500_v31  ;;  %2047 = vmatprep.subr.mxu1 %v698_v30  ;;  %v2973_v30 = vsub.f32 %v310_v61, %v2959_v52  ;;  %v3384_v61 = vld [vmem:[#allocation5_spill] sm:$0xff] }
  0x3b   : > { %2061 = vmatprep.subr.mxu0 %v2509_v35  ;;  %2048 = vmatpush3.msra.mxu1 %v586_v2  ;;  %v705_v38 = vand.u32 4294901760, %v704_v56  ;;  %v593_v33 = vand.u32 4294901760, %v592_v37  ;;  %3380 = vst [vmem:[#allocation29_spill] sm:$0xff] %v2953_v51  ;;  %v2966_v49 = vsub.f32 %v311_v1, %v2953_v51  ;;  %v3381_v37 = vld [vmem:[#allocation3_spill] sm:$0xff]  ;;  %v3382_v1 = vld [vmem:[#allocation4_spill] sm:$0xff] }
  0x3c   : > { %2062 = vmatpush3.msra.mxu0 %v2525_v40  ;;  %v3337_v56 = vand.u32 4294901760, %v2973_v30 }
  0x3d   : > { %2049 = vmatprep.subr.mxu1 %v705_v38  ;;  %2063 = vmatprep.subr.mxu0 %v2539_v45  ;;  %v3333_v2 = vand.u32 4294901760, %v2966_v49 }
  0x3e   : > { %2050 = vmatpush3.msra.mxu1 %v593_v33  ;;  %2064 = vmatpush3.msra.mxu0 %v2574_v59  ;;  %v3383_v33 = vld [vmem:[#allocation22_spill] sm:$0xff]  ;;  %v476_v44 = vsub.f32 %v2973_v30, %v3337_v56  ;;  %v3390_v56 = vld [vmem:[#allocation11_spill] sm:$0xff] }
  0x3f   : > { %710 = vmatmul.mubr.f32.vlgmr.msra.gmra.mxu1 %v2858_v26  ;;  %2065 = vmatprep.subr.mxu0 %v2589_v0  ;;  %v470_v38 = vsub.f32 %v2966_v49, %v3333_v2  ;;  %v3387_v2 = vld [vmem:[#allocation8_spill] sm:$0xff]  ;;  %v3388_v26 = vld [vmem:[#allocation9_spill] sm:$0xff] }
  0x40   : > { %2095 = vmatprep.subr.mxu1 %v2411_v3  ;;  %2066 = vmatpush3.msra.mxu0 %v2603_v8 }
  0x41   : > { %2096 = vmatpush3.msra.mxu1 %v2413_v4  ;;  %2067 = vmatprep.subr.mxu0 %v2618_v42  ;;  %v471_v34 = vand.u32 4294901760, %v470_v38  ;;  %v3392_v38 = vld [vmem:[#allocation13_spill] sm:$0xff] }
  0x42   : > { %2097 = vmatprep.subr.mxu1 %v2415_v5  ;;  %2068 = vmatpush3.msra.mxu0 %v2630_v48 }
  0x43   : > { %2098 = vmatpush3.msra.mxu1 %v2426_v9  ;;  %2069 = vmatprep.subr.mxu0 %v2647_v54 }
  0x44   : > { %2099 = vmatprep.subr.mxu1 %v2428_v10  ;;  %2070 = vmatpush3.msra.mxu0 %v2659_v6 }
  0x45   : > { %2100 = vmatpush3.msra.mxu1 %v2430_v11  ;;  %2071 = vmatprep.subr.mxu0 %v2691_v55 }
  0x46   : > { %2101 = vmatprep.subr.mxu1 %v2442_v15  ;;  %2072 = vmatpush3.msra.mxu0 %v2707_v28 }
  0x47   : > { %2102 = vmatpush3.msra.mxu1 %v2444_v16  ;;  %2073 = vmatprep.subr.mxu0 %v2732_v21 }
  0x48   : > { %2103 = vmatprep.subr.mxu1 %v2446_v17  ;;  %2074 = vmatpush3.msra.mxu0 %v2748_v46 }
  0x49   : > { %2104 = vmatpush3.msra.mxu1 %v2468_v22  ;;  %2075 = vmatprep.subr.mxu0 %v2760_v60 }
  0x4a   : > { %2105 = vmatprep.subr.mxu1 %v3381_v37  ;;  %2076 = vmatpush3.msra.mxu0 %v2774_v43 }
  0x4b   : > { %2106 = vmatpush3.msra.mxu1 %v3382_v1  ;;  %2077 = vmatprep.subr.mxu0 %v3383_v33 }
  0x4c   : > { %2107 = vmatprep.subr.mxu1 %v3384_v61  ;;  %2078 = vmatpush3.msra.mxu0 %v2808_v62  ;;  %v477_v62 = vand.u32 4294901760, %v476_v44  ;;  %v3389_v61 = vld [vmem:[#allocation10_spill] sm:$0xff]  ;;  %v3394_v44 = vld [vmem:[#allocation15_spill] sm:$0xff] }
  0x4d   : > { %2108 = vmatpush3.msra.mxu1 %v3385_v12  ;;  %2079 = vmatprep.subr.mxu0 %v2831_v32 }
  0x4e   : > { %2109 = vmatprep.subr.mxu1 %v3386_v58  ;;  %2080 = vmatpush3.msra.mxu0 %v2843_v36  ;;  %v3391_v36 = vld [vmem:[#allocation12_spill] sm:$0xff] }
  0x4f   : > { %2110 = vmatpush3.msra.mxu1 %v3387_v2  ;;  %2081 = vmatprep.subr.mxu0 %v2856_v57 }
  0x50   : > { %2111 = vmatprep.subr.mxu1 %v3388_v26  ;;  %2082 = vmatpush3.msra.mxu0 %v2869_v50  ;;  %v3393_v50 = vld [vmem:[#allocation14_spill] sm:$0xff] }
  0x51   : > { %2112 = vmatpush3.msra.mxu1 %v3389_v61  ;;  %2083 = vmatprep.subr.mxu0 %v2881_v13 }
  0x52   : > { %2113 = vmatprep.subr.mxu1 %v3390_v56  ;;  %472 = vmatprep.mubr.f32.mxu0 %v471_v34  ;;  %v3396_v34 = vand.u32 4294901760, %v2471_v23  ;;  %v3403_v23 = vand.u32 4294901760, %v2509_v35  ;;  %v3408_v35 = vand.u32 4294901760, %v2877_v7 }
  0x53   : > { %2084 = vmatpush3.msra.mxu0 %v2888_v19  ;;  %2114 = vmatpush3.msra.mxu1 %v3391_v36 }
  0x54   : > { %478 = vmatmul.mubr.f32.gmra.mxu0 %v477_v62  ;;  %2085 = vmatprep.subr.mxu0 %v2905_v53  ;;  %v3395_v62 = vand.u32 4294901760, %v2449_v18  ;;  %v3402_v18 = vld [vmem:[#allocation21_spill] sm:$0xff] }
  0x55   : > { %2115 = vmatprep.subr.mxu1 %v3392_v38  ;;  %2086 = vmatpush3.msra.mxu0 %v2915_v47 }
  0x56   : > { %2116 = vmatpush3.msra.mxu1 %v3393_v50  ;;  %2087 = vmatprep.subr.mxu0 %v2924_v27 }
  0x57   : > { %2117 = vmatprep.subr.mxu1 %v3394_v44  ;;  %2088 = vmatpush3.msra.mxu0 %v2931_v29  ;;  %v3397_v44 = vld [vmem:[#allocation18_spill] sm:$0xff]  ;;  %v3398_v29 = vand.u32 4294901760, %v2477_v25  ;;  %v3404_v25 = vand.u32 4294901760, %v2525_v40  ;;  %v3410_v40 = vand.u32 4294901760, %v2603_v8  ;;  %v3419_v8 = vand.u32 4294901760, %v2732_v21 }
  0x58   : > { %852 = vmatprep.mubr.f32.mxu0 %v2865_v14  ;;  %2118 = vmatpush3.msra.mxu1 %v2703_v63  ;;  %v3399_v63 = vld [vmem:[#allocation19_spill] sm:$0xff] }
  0x59   : > { %715 = vmatprep.mubr.f32.mxu1 %v2953_v51  ;;  %855 = vmatmul.mubr.f32.vlgmr.msra.gmra.mxu0 %v2877_v7  ;;  %v3400_v51 = vld [vmem:[#allocation20_spill] sm:$0xff] }
  0x5a   : > { %2119 = vmatprep.subr.mxu1 %v2720_v39  ;;  %2133 = vmatprep.subr.mxu0 %v3395_v62  ;;  %v3401_v39 = vand.u32 4294901760, %v2500_v31  ;;  %v3406_v31 = vand.u32 4294901760, %v2865_v14  ;;  %v3409_v62 = vand.u32 4294901760, %v2589_v0  ;;  %v3413_v14 = vand.u32 4294901760, %v2630_v48 }
  0x5b   : > { %717 = vmatmul.mubr.f32.gmra.mxu1 %v2959_v52  ;;  %2134 = vmatpush3.msra.mxu0 %v3396_v34  ;;  %v3415_v0 = vand.u32 4294901760, %v2647_v54  ;;  %v3427_v54 = vand.u32 4294901760, %v2831_v32 }
  0x5c   : > { %2120 = vmatpush3.msra.mxu1 %v3397_v44  ;;  %2135 = vmatprep.subr.mxu0 %v3398_v29  ;;  %v3405_v29 = vand.u32 4294901760, %v2539_v45  ;;  %v3411_v45 = vand.u32 4294901760, %v2618_v42  ;;  %v3424_v42 = vld [vmem:[#allocation5_spill] sm:$0xff] }
  0x5d   : > { %2121 = vmatprep.subr.mxu1 %v3399_v63  ;;  %861 = vmatprep.mubr.f32.mxu0 %v2966_v49 }
  0x5e   : > { %2122 = vmatpush3.msra.mxu1 %v3400_v51  ;;  %2136 = vmatpush3.msra.mxu0 %v3401_v39  ;;  %v3407_v39 = vand.u32 4294901760, %v2574_v59  ;;  %v3412_v59 = vand.u32 4294901760, %v2966_v49  ;;  %v3431_v49 = vld [vmem:[#allocation27_spill] sm:$0xff] }
  0x5f   : > { %864 = vmatmul.mubr.f32.gmra.mxu0 %v2973_v30  ;;  %2123 = vmatprep.subr.mxu1 %v3402_v18 }
  0x60   : > { %2137 = vmatprep.subr.mxu0 %v3403_v23  ;;  %2124 = vmatpush3.msra.mxu1 %v2804_v41  ;;  %v3437_v23 = vand.u32 4294901760, %v2924_v27 }
  0x61   : > { %2138 = vmatpush3.msra.mxu0 %v3404_v25  ;;  %2125 = vmatprep.subr.mxu1 %v2821_v20  ;;  %v3438_v25 = vld [vmem:[#allocation15_spill] sm:$0xff] }
  0x62   : > { %2139 = vmatprep.subr.mxu0 %v3405_v29  ;;  %2126 = vmatpush3.msra.mxu1 %v2839_v24  ;;  %v3439_v29 = vld [vmem:[#allocation28_spill] sm:$0xff] }
  0x63   : > { %968 = vmatprep.mubr.f32.mxu1 %v3406_v31  ;;  %2140 = vmatpush3.msra.mxu0 %v3407_v39  ;;  %v3440_v31 = vand.u32 4294901760, %v3439_v29  ;;  %v3442_v39 = vld [vmem:[#allocation16_spill] sm:$0xff] }
  0x64   : > { %972 = vmatmul.mubr.f32.vlgmr.msra.gmra.mxu1 %v3408_v35  ;;  %2141 = vmatprep.subr.mxu0 %v3409_v62  ;;  %v3443_v35 = vld [vmem:[#allocation26_spill] sm:$0xff]  ;;  %v3444_v62 = vld [vmem:[#allocation17_spill] sm:$0xff] }
  0x65   : > { %2171 = vmatprep.subr.mxu1 %v2411_v3  ;;  %2142 = vmatpush3.msra.mxu0 %v3410_v40  ;;  %v3414_v3 = vand.u32 4294901760, %v2973_v30  ;;  %v3432_v30 = vand.u32 4294901760, %v3431_v49 }
  0x66   : > { %2172 = vmatpush3.msra.mxu1 %v2413_v4  ;;  %2143 = vmatprep.subr.mxu0 %v3411_v45  ;;  %v3416_v4 = vand.u32 4294901760, %v2659_v6  ;;  %v347_v6 = vld [vmem:[%s3267_s1 + $0x110] sm:$0xff] }
  0x67   : > { %2173 = vmatprep.subr.mxu1 %v2415_v5  ;;  %979 = vmatprep.mubr.f32.mxu1 %v3412_v59  ;;  %v3417_v5 = vand.u32 4294901760, %v2691_v55  ;;  %v3422_v55 = vand.u32 4294901760, %v2774_v43 }
  0x68   : > { %2144 = vmatpush3.msra.mxu0 %v3413_v14  ;;  %2174 = vmatpush3.msra.mxu1 %v2426_v9  ;;  %v3418_v9 = vand.u32 4294901760, %v2707_v28  ;;  %v3428_v28 = vld [vmem:[#allocation24_spill] sm:$0xff]  ;;  %v3445_v14 = vld [vmem:[#allocation29_spill] sm:$0xff] }
  0x69   : > { %983 = vmatmul.mubr.f32.gmra.mxu1 %v3414_v3  ;;  %2145 = vmatprep.subr.mxu0 %v3415_v0 }
  0x6a   : > { %2175 = vmatprep.subr.mxu1 %v2428_v10  ;;  %2146 = vmatpush3.msra.mxu0 %v3416_v4  ;;  %v3420_v10 = vand.u32 4294901760, %v2748_v46  ;;  %v3429_v46 = vand.u32 4294901760, %v3428_v28 }
  0x6b   : > { %2176 = vmatpush3.msra.mxu1 %v2430_v11  ;;  %2147 = vmatprep.subr.mxu0 %v3417_v5  ;;  %v3421_v11 = vand.u32 4294901760, %v2760_v60  ;;  %v3425_v60 = vld [vmem:[#allocation23_spill] sm:$0xff] }
  0x6c   : > { %2177 = vmatprep.subr.mxu1 %v2442_v15  ;;  %2148 = vmatpush3.msra.mxu0 %v3418_v9  ;;  %v309_v15 = vld [vmem:[%s2787_s8 + $0x10] sm:$0xff]  ;;  %v3426_v48 = vand.u32 4294901760, %v3425_v60 }
  0x6d   : > { %2178 = vmatpush3.msra.mxu1 %v2444_v16  ;;  %2149 = vmatprep.subr.mxu0 %v3419_v8  ;;  %v3423_v16 = vand.u32 4294901760, %v3383_v33  ;;  %v351_v21 = vsel %vm302_vm0, %v309_v15, 0 }
  0x6e   : > { %2179 = vmatprep.subr.mxu1 %v2446_v17  ;;  %2150 = vmatpush3.msra.mxu0 %v3420_v10  ;;  %v348_v17 = vld [vmem:[%s3267_s1 + $0x118] sm:$0xff]  ;;  %v3120_v32 = vand.u32 4294901760, %v351_v21 }
  0x6f   : > { %2180 = vmatpush3.msra.mxu1 %v2468_v22  ;;  %2151 = vmatprep.subr.mxu0 %v3421_v11  ;;  %v312_v22 = vld [vmem:[%s2787_s8 + $0x28] sm:$0xff]  ;;  %v3114_v43 = vand.u32 4294901760, %v348_v17 }
  0x70   : > { %2181 = vmatprep.subr.mxu1 %v3381_v37  ;;  %2152 = vmatpush3.msra.mxu0 %v3422_v55  ;;  %v354_v7 = vsel %vm302_vm0, %v312_v22, 0  ;;  %v346_v37 = vld [vmem:[%s3267_s1 + $0x108] sm:$0xff]  ;;  %v3150_v34 = vsub.f32 %v351_v21, %v3120_v32 }
  0x71   : > { %2182 = vmatpush3.msra.mxu1 %v3382_v1  ;;  %2153 = vmatprep.subr.mxu0 %v3423_v16  ;;  %v345_v1 = vld [vmem:[%s3267_s1 + $0x100] sm:$0xff]  ;;  %v3142_v33 = vsub.f32 %v348_v17, %v3114_v43 }
  0x72   : > { %2183 = vmatprep.subr.mxu1 %v3424_v42  ;;  %2154 = vmatpush3.msra.mxu0 %v3426_v48 }
  0x73   : > { %2184 = vmatpush3.msra.mxu1 %v3385_v12  ;;  %2155 = vmatprep.subr.mxu0 %v3427_v54  ;;  %v3430_v12 = vand.u32 4294901760, %v2856_v57  ;;  %v3133_v57 = vand.u32 4294901760, %v354_v7 }
  0x74   : > { %2185 = vmatprep.subr.mxu1 %v3386_v58  ;;  %2156 = vmatpush3.msra.mxu0 %v3429_v46  ;;  %v3125_v58 = vand.u32 4294901760, %v347_v6 }
  0x75   : > { %2186 = vmatpush3.msra.mxu1 %v3387_v2  ;;  %2157 = vmatprep.subr.mxu0 %v3430_v12  ;;  %v3433_v2 = vand.u32 4294901760, %v2881_v13  ;;  %v3147_v13 = vand.u32 4294901760, %v346_v37 }
  0x76   : > { %2187 = vmatprep.subr.mxu1 %v3388_v26  ;;  %2158 = vmatpush3.msra.mxu0 %v3432_v30  ;;  %v3434_v26 = vand.u32 4294901760, %v2888_v19  ;;  %v3436_v19 = vand.u32 4294901760, %v2915_v47  ;;  %v3168_v47 = vand.u32 4294901760, %v3142_v33 }
  0x77   : > { %2188 = vmatpush3.msra.mxu1 %v3389_v61  ;;  %2159 = vmatprep.subr.mxu0 %v3433_v2  ;;  %v3435_v61 = vand.u32 4294901760, %v2905_v53  ;;  %v3162_v53 = vsub.f32 %v354_v7, %v3133_v57  ;;  %v1403_v27 = vsub.f32 %v346_v37, %v3147_v13 }
  0x78   : > { %2189 = vmatprep.subr.mxu1 %v3390_v56  ;;  %2160 = vmatpush3.msra.mxu0 %v3434_v26  ;;  %v1396_v56 = vsub.f32 %v347_v6, %v3125_v58  ;;  %v1391_v3 = vsub.f32 %v3142_v33, %v3168_v47 }
  0x79   : > { %2190 = vmatpush3.msra.mxu1 %v3391_v36  ;;  %2161 = vmatprep.subr.mxu0 %v3435_v61  ;;  %v3159_v36 = vand.u32 4294901760, %v345_v1  ;;  %v1355_v45 = vand.u32 4294901760, %v3162_v53  ;;  %v1404_v0 = vand.u32 4294901760, %v1403_v27 }
  0x7a   : > { %2191 = vmatprep.subr.mxu1 %v3392_v38  ;;  %2162 = vmatpush3.msra.mxu0 %v3436_v19  ;;  %v3441_v38 = vld [vmem:[#allocation25_spill] sm:$0xff]  ;;  %v3176_v40 = vand.u32 4294901760, %v1396_v56  ;;  %v1392_v5 = vand.u32 4294901760, %v1391_v3 }
  0x7b   : > { %2192 = vmatpush3.msra.mxu1 %v3393_v50  ;;  %2163 = vmatprep.subr.mxu0 %v3437_v23  ;;  %v1345_v50 = vand.u32 4294901760, %v3150_v34  ;;  %v1410_v59 = vsub.f32 %v345_v1, %v3159_v36  ;;  %v1405_v9 = vsub.f32 %v1403_v27, %v1404_v0 }
  0x7c   : > { %2193 = vmatprep.subr.mxu1 %v3438_v25  ;;  %2164 = vmatpush3.msra.mxu0 %v3440_v31 }
  0x7d   : > { %1149 = vmatprep.mubr.f32.mxu0 %v3441_v38  ;;  %2194 = vmatpush3.msra.mxu1 %v3442_v39  ;;  %v1411_v4 = vand.u32 4294901760, %v1410_v59 }
  0x7e   : > { %1151 = vmatmul.mubr.f32.vlgmr.msra.gmra.mxu0 %v3443_v35  ;;  %2195 = vmatprep.subr.mxu1 %v3444_v62 }
  0x7f   : > { %2196 = vmatpush3.msra.mxu1 %v3397_v44  ;;  %2245 = vmatprep.subr.mxu0 %v3114_v43  ;;  %v1346_v44 = vsub.f32 %v3150_v34, %v1345_v50  ;;  %v1412_v10 = vsub.f32 %v1410_v59, %v1411_v4 }
  0x80   : > { %2197 = vmatprep.subr.mxu1 %v3399_v63  ;;  %1156 = vmatprep.mubr.f32.mxu0 %v3445_v14  ;;  %v1398_v63 = vsub.f32 %v1396_v56, %v3176_v40 }
  0x81   : > { %2198 = vmatpush3.msra.mxu1 %v3400_v51  ;;  %2246 = vmatpush3.msra.mxu0 %v3114_v43  ;;  %v1356_v51 = vsub.f32 %v3162_v53, %v1355_v45 }
  0x82   : > { %1158 = vmatmul.mubr.f32.gmra.mxu0 %v2959_v52  ;;  %2199 = vmatprep.subr.mxu1 %v3402_v18  ;;  %v1347_v18 = vand.u32 4294901760, %v1346_v44 }
  0x83   : > { %2247 = vmatprep.subr.mxu0 %v3125_v58  ;;  %2200 = vmatpush3.msra.mxu1 %v2804_v41  ;;  %v1399_v41 = vand.u32 4294901760, %v1398_v63  ;;  %v1357_v8 = vand.u32 4294901760, %v1356_v51 }
  0x84   : > { %2248 = vmatpush3.msra.mxu0 %v3125_v58  ;;  %2201 = vmatprep.subr.mxu1 %v2821_v20  ;;  %v1406_v20 = vand.u32 4294901760, %v1405_v9 }
  0x85   : > { %2249 = vmatprep.subr.mxu0 %v3147_v13  ;;  %2202 = vmatpush3.msra.mxu1 %v2839_v24  ;;  %v1413_v24 = vand.u32 4294901760, %v1412_v10 }
  0x86   : > { %1260 = vmatprep.mubr.f32.mxu1 %v3441_v38  ;;  %2250 = vmatpush3.msra.mxu0 %v3147_v13 }
  0x87   : > { %1262 = vmatmul.mubr.f32.vlgmr.msra.gmra.mxu1 %v3443_v35  ;;  %2251 = vmatprep.subr.mxu0 %v3159_v36 }
  0x88   : > { %2256 = vmatprep.subr.mxu1 %v1392_v5  ;;  %2252 = vmatpush3.msra.mxu0 %v3159_v36 }
  0x89   : > { %2257 = vmatpush3.msra.mxu1 %v1392_v5  ;;  %2253 = vmatprep.mubr.f32.mxu0 %v1347_v18 }
  0x8a   : > { %2258 = vmatprep.subr.mxu1 %v1399_v41  ;;  %2267 = vmatprep.subr.mxu0 %v3142_v33 }
  0x8b   : > { %1267 = vmatprep.mubr.f32.mxu1 %v3445_v14  ;;  %2254 = vmatmul.mubr.f32.vlgmr.msra.gmra.mxu0 %v1357_v8 }
  0x8c   : > { %2259 = vmatpush3.msra.mxu1 %v1399_v41  ;;  %2268 = vmatpush3.msra.mxu0 %v3142_v33 }
  0x8d   : > { %1269 = vmatmul.mubr.f32.gmra.mxu1 %v2959_v52  ;;  %2260 = vmatprep.subr.mxu1 %v1406_v20  ;;  %v2361_v52 = vmov 0.0  }
  0x8e   : > { %2269 = vmatprep.subr.mxu0 %v1396_v56  ;;  %2261 = vmatpush3.msra.mxu1 %v1406_v20  ;;  %304 = vst.msk [vmem:[#allocation2 + $0x8] sm:$0xff] %vm302_vm0, %v2361_v52  ;;  %303 = vst.msk [vmem:[#allocation2] sm:$0xff] %vm302_vm0, %v2361_v52 }
  0x8f   : > { %2270 = vmatpush3.msra.mxu0 %v1396_v56  ;;  %2262 = vmatprep.subr.mxu1 %v1413_v24 }
  0x90   : > { %2271 = vmatprep.subr.mxu0 %v1403_v27  ;;  %2263 = vmatpush3.msra.mxu1 %v1413_v24 }
  0x91   : > { %2264 = vmatprep.mubr.f32.mxu1 %v3120_v32  ;;  %2272 = vmatpush3.msra.mxu0 %v1403_v27 }
  0x92   : > { %2265 = vmatmul.mubr.f32.vlgmr.msra.gmra.mxu1 %v3133_v57  ;;  %2273 = vmatprep.subr.mxu0 %v1410_v59 }
  0x93   : > { %2278 = vmatprep.subr.mxu1 %v3114_v43  ;;  %2274 = vmatpush3.msra.mxu0 %v1410_v59 }
  0x94   : > { %2275 = vmatprep.mubr.f32.mxu0 %v3150_v34  ;;  %2279 = vmatpush3.msra.mxu1 %v3114_v43 }
  0x95   : > { %2276 = vmatmul.mubr.f32.vlgmr.msra.gmra.mxu0 %v3162_v53  ;;  %2280 = vmatprep.subr.mxu1 %v3125_v58 }
  0x96   : > { %2289 = vmatprep.subr.mxu0 %v3168_v47  ;;  %2281 = vmatpush3.msra.mxu1 %v3125_v58 }
  0x97   : > { %2290 = vmatpush3.msra.mxu0 %v3168_v47  ;;  %2282 = vmatprep.subr.mxu1 %v3147_v13 }
  0x98   : > { %2291 = vmatprep.subr.mxu0 %v3176_v40  ;;  %2283 = vmatpush3.msra.mxu1 %v3147_v13 }
  0x99   : > { %2292 = vmatpush3.msra.mxu0 %v3176_v40  ;;  %2284 = vmatprep.subr.mxu1 %v3159_v36 }
  0x9a   : > { %2293 = vmatprep.subr.mxu0 %v1404_v0  ;;  %2285 = vmatpush3.msra.mxu1 %v3159_v36 }
  0x9b   : > { %2286 = vmatprep.mubr.f32.mxu1 %v1345_v50  ;;  %2294 = vmatpush3.msra.mxu0 %v1404_v0 }
  0x9c   : > { %2287 = vmatmul.mubr.f32.vlgmr.msra.gmra.mxu1 %v1355_v45  ;;  %2295 = vmatprep.subr.mxu0 %v1411_v4 }
  0x9d   : > { %2300 = vmatprep.subr.mxu1 %v3114_v43  ;;  %2296 = vmatpush3.msra.mxu0 %v1411_v4 }
  0x9e   : > { %2297 = vmatprep.mubr.f32.mxu0 %v3120_v32  ;;  %2301 = vmatpush3.msra.mxu1 %v3114_v43 }
  0x9f   : > { %2298 = vmatmul.mubr.f32.vlgmr.msra.gmra.mxu0 %v3133_v57  ;;  %2302 = vmatprep.subr.mxu1 %v3125_v58 }
  0xa0   : > { %2303 = vmatpush3.msra.mxu1 %v3125_v58  ;;  %2308 = vmatprep.mubr.f32.mxu1 %v3120_v32 }
  0xa1   : > { %2304 = vmatprep.subr.mxu1 %v3147_v13 }
  0xa2   : > { %2305 = vmatpush3.msra.mxu1 %v3147_v13 }
  0xa3   : > { %2306 = vmatprep.subr.mxu1 %v3159_v36 }
  0xa4   : > { %2307 = vmatpush3.msra.mxu1 %v3159_v36 }
  0xa5   : > { %2309 = vmatmul.mubr.f32.vlgmr.msra.gmra.mxu1 %v3133_v57 }
  0xf7   : > { %v2013_v11 = vpop.f32.mrf.mxu0 }
  0xf9   : > { %v2014_v15 = vpop.f32.mrf.mxu0 }
  0xfa   : > { %v2015_v13 = vadd.f32 %v2014_v15, %v2013_v11  ;;  %v306_v15 = vld [vmem:[#allocation2 + $0x8] sm:$0xff] }
  0xff   : > { %v2051_v17 = vpop.f32.mrf.mxu1 }
 0x101   : > { %v2052_v42 = vpop.f32.mrf.mxu1 }
 0x102   : > { %v2053_v33 = vadd.f32 %v2052_v42, %v2051_v17 }
 0x104   : > { %v712_v36 = vadd.f32 %v2053_v33, %v2015_v13 }
 0x114   : > { %v2016_v55 = vpop.f32.mrf.mxu0 }
 0x116   : > { %v2017_v16 = vpop.f32.mrf.mxu0 }
 0x117   : > { %v2018_v32 = vadd.f32 %v2017_v16, %v2016_v55 }
 0x119   : > { %v2089_v22 = vpop.f32.mrf.mxu0 }
 0x11b   : > { %v2054_v60 = vpop.f32.mrf.mxu1  ;;  %v2090_v48 = vpop.f32.mrf.mxu0 }
 0x11c   : > { %v2091_v34 = vadd.f32 %v2090_v48, %v2089_v22  ;;  %v305_v22 = vld [vmem:[#allocation2] sm:$0xff] }
 0x11d   : > { %v2055_v21 = vpop.f32.mrf.mxu1 }
 0x11e   : > { %v2056_v49 = vadd.f32 %v2055_v21, %v2054_v60  ;;  %v857_v31 = vadd.f32 %v2091_v34, %v712_v36 }
 0x11f   : > { %v2092_v54 = vpop.f32.mrf.mxu0 }
 0x120   : > { %v719_v2 = vadd.f32 %v2056_v49, %v2018_v32 }
 0x121   : > { %v2093_v28 = vpop.f32.mrf.mxu0 }
 0x122   : > { %v2094_v57 = vadd.f32 %v2093_v28, %v2092_v54  ;;  %v1977_v54 = vld [vmem:[%s3268_s2] ss:$0 sm:$0xff] }
 0x124   : > { %v2127_v6 = vpop.f32.mrf.mxu1  ;;  %v866_v19 = vadd.f32 %v2094_v57, %v719_v2 }
 0x126   : > { %v2128_v46 = vpop.f32.mrf.mxu1 }
 0x127   : > { %v2129_v53 = vadd.f32 %v2128_v46, %v2127_v6 }
 0x129   : > { %v2130_v7 = vpop.f32.mrf.mxu1  ;;  %v974_v50 = vadd.f32 %v2129_v53, %v857_v31 }
 0x12b   : > { %v2131_v30 = vpop.f32.mrf.mxu1 }
 0x12c   : > { %v2132_v61 = vadd.f32 %v2131_v30, %v2130_v7 }
 0x12e   : > { %v985_v25 = vadd.f32 %v2132_v61, %v866_v19 }
 0x13e   : > { %v2165_v43 = vpop.f32.mrf.mxu0 }
 0x140   : > { %v2166_v12 = vpop.f32.mrf.mxu0 }
 0x141   : > { %v2167_v47 = vadd.f32 %v2166_v12, %v2165_v43 }
 0x142   : > { %v2168_v58 = vpop.f32.mrf.mxu0 }
 0x143   : > { %v1153_v40 = vadd.f32 %v2167_v47, %v974_v50 }
 0x144   : > { %v2169_v26 = vpop.f32.mrf.mxu0 }
 0x145   : > { %v2170_v56 = vadd.f32 %v2169_v26, %v2168_v58 }
 0x147   : > { %v2203_v37 = vpop.f32.mrf.mxu1  ;;  %v1160_v38 = vadd.f32 %v2170_v56, %v985_v25 }
 0x149   : > { %v2204_v1 = vpop.f32.mrf.mxu1 }
 0x14a   : > { %v2205_v27 = vadd.f32 %v2204_v1, %v2203_v37 }
 0x14b   : > { %v2255_v62 = vpop.f32.mrf.mxu0 }
 0x14c   : > { %v1264_v14 = vadd.f32 %v2205_v27, %v1153_v40 }
 0x14d   : > { %v2206_v23 = vpop.f32.mrf.mxu1  ;;  %v1349_v3 = vpop.f32.mrf.mxu0 }
 0x14e   : > { %v1350_v51 = vadd.f32 %v1349_v3, %v1264_v14 }
 0x14f   : > { %v2207_v29 = vpop.f32.mrf.mxu1 }
 0x150   : > { %v2208_v39 = vadd.f32 %v2207_v29, %v2206_v23 }
 0x152   : > { %v1271_v35 = vadd.f32 %v2208_v39, %v1160_v38  ;;  %v2266_v59 = vpop.f32.mrf.mxu1 }
 0x154   : > { %v1360_v45 = vadd.f32 %v2255_v62, %v1271_v35  ;;  %v1450_v0 = vpop.f32.mrf.mxu1 }
 0x155   : > { %v2277_v63 = vpop.f32.mrf.mxu0  ;;  %v1451_v4 = vadd.f32 %v1450_v0, %v1350_v51 }
 0x156   : > { %v1457_v44 = vadd.f32 %v2266_v59, %v1360_v45 }
 0x157   : > { %v1536_v9 = vpop.f32.mrf.mxu0 }
 0x158   : > { %v1544_v5 = vadd.f32 %v2277_v63, %v1457_v44  ;;  %v1537_v10 = vadd.f32 %v1536_v9, %v1451_v4 }
 0x15c   : > { %v2288_v18 = vpop.f32.mrf.mxu1 }
 0x15d   : > { %v1629_v20 = vadd.f32 %v2288_v18, %v1544_v5 }
 0x15e   : > { %v1620_v41 = vpop.f32.mrf.mxu1 }
 0x15f   : > { %v2299_v8 = vpop.f32.mrf.mxu0  ;;  %v1621_v24 = vadd.f32 %v1620_v41, %v1537_v10 }
 0x160   : > { %v1718_v11 = vadd.f32 %v2299_v8, %v1629_v20 }
 0x161   : > { %v1711_v52 = vpop.f32.mrf.mxu0 }
 0x162   : > { %v1712_v16 = vadd.f32 %v1711_v52, %v1621_v24 }
 0x165   : > { %v2310_v55 = vpop.f32.mrf.mxu1 }
 0x166   : > { %v1799_v17 = vadd.f32 %v2310_v55, %v1718_v11 }
 0x167   : > { %v1792_v42 = vpop.f32.mrf.mxu1 }
 0x168   : > { %v1803_v60 = vadd.f32 %v1799_v17, %v306_v15  ;;  %v1793_v48 = vadd.f32 %v1792_v42, %v1712_v16 }
 0x16a   : > { %1805 = vst.msk [vmem:[#allocation2 + $0x8] sm:$0xff] %vm302_vm0, %v1803_v60  ;;  %v1802_v21 = vadd.f32 %v1793_v48, %v305_v22 }
 0x16c   : > { %1804 = vst.msk [vmem:[#allocation2] sm:$0xff] %vm302_vm0, %v1802_v21 }
 0x171   : > { %v1810_v6 = vld [vmem:[#allocation2 + $0x8] sm:$0xff] }
 0x172   : > { %v1819_v28 = vadd.f32 %v1977_v54, %v1810_v6 }
 0x173   : > { %v1809_v46 = vld [vmem:[#allocation2] sm:$0xff] }
 0x174   : > { %vm1821_vm1 = vcmp.ge.f32.partialorder %v1819_v28, 0.0  ;;  %v1823_v43 = vmul.f32 0.2, %v1819_v28  ;;  %v1818_v7 = vadd.f32 %v1977_v54, %v1809_v46 }
 0x176   : > { %v1825_v12 = vsel %vm1821_vm1, %v1819_v28, %v1823_v43  ;;  %vm1820_vm2 = vcmp.ge.f32.partialorder %v1818_v7, 0.0  ;;  %v1822_v32 = vmul.f32 0.2, %v1818_v7 }
 0x177   : > { %1827 = vst.msk [vmem:[%s296_s28 + $0x8] sm:$0xff] %vm302_vm0, %v1825_v12 }
 0x178   : > { %v1824_v49 = vsel %vm1820_vm2, %v1818_v7, %v1822_v32 }
 0x179   : > { %1826 = vst.msk [vmem:[%s296_s28] sm:$0xff] %vm302_vm0, %v1824_v49 }
 0x17a PF: > { %s13_s14 = sadd.s32 1, %s2359_s14   ;;  %s3446_s12 = smov %s2355_s13 }
 0x17b   : > { %p10_p5 = scmp.ge.s32.totalorder %s13_s14, 4   ;;  %s3447_s13 = smov %s3449_s15 }
 0x17d   :  { %12 = sbr.rel (!%p10_p5) target bundleno = 2 (0x2), region = 76 }

// kernel: style_encoder_forward.18
= control target key start
LH: loop header
LB: loop body
LE: loop exit
PB: predicated region body
PF: predicated region fallthrough
CT: control target
= control target key end

     0   :  { %s2485_s15 = smov 0   ;;  %s2487_s16 = smov 0   ;;  %s3372_s0 = inlined_call_operand.vmem [shape: f32[2,16,288], index: 0, kind: input, shape index: {}]   ;;  %s3373_s1 = inlined_call_operand.vmem [shape: f32[288,32], index: 1, kind: input, shape index: {}]   ;;  %s3374_s2 = inlined_call_operand.vmem [shape: f32[1,32], index: 2, kind: input, shape index: {}]   ;;  %s3375_s3 = inlined_call_operand.vmem [shape: f32[2,16,32], index: 3, kind: input, shape index: {}]   ;;  %s3376_s4 = inlined_call_operand.vmem [shape: f32[2,16,32], index: 4, kind: output, shape index: {}]  }
   0x1   :  { %s2489_s17 = smov 0  }
   0x2 LB: > { %s40_s18 = sadd.s32 1, %s2453_s16  ;;  %p2068_p0 = scmp.ge.s32.totalorder %s2457_s17, 1  ;;  %s2457_s17 = sphi %s2489_s17, %s14_s17   ;;  %s2453_s16 = sphi %s2487_s16, %s3554_s16   ;;  %s2449_s15 = sphi %s2485_s15, %s3553_s15  }
   0x3   : > { %p42_p1 = scmp.ge.s32.totalorder %s40_s18, 2  ;;  %p253_p2 = scmp.lt.s32.totalorder %s2457_s17, 3 }
   0x5   : > { %s3556_s18 = smov (%p42_p1, %s40_s18), 0  ;;  %p254_p3 = pnand %p2068_p0, %p253_p2 }
   0x7   : > { %257 = sbr.rel (%p254_p3) target bundleno = 379 (0x17b), region = 36 }
   0xc   : > { %v418_v0 = vld [vmem:[%s3373_s1 + $0xf8] sm:$0xff]  ;;  %v417_v2 = vld [vmem:[%s3373_s1 + $0xf0] sm:$0xff]  ;;  %v416_v7 = vld [vmem:[%s3373_s1 + $0xe8] sm:$0xff]  ;;  %p320_p4 = scmp.lt.s32.totalorder %s2449_s15, 1  ;;  %vm376_vm0 = vcmask 261120  }
   0xd   : > { %v402_v1 = vld [vmem:[%s3373_s1 + $0x78] sm:$0xff]  ;;  %v2514_v3 = vand.u32 4294901760, %v418_v0  ;;  %v2518_v5 = vand.u32 4294901760, %v417_v2  ;;  %v401_v6 = vld [vmem:[%s3373_s1 + $0x70] sm:$0xff]  ;;  %v400_v8 = vld [vmem:[%s3373_s1 + $0x68] sm:$0xff]  ;;  %v2531_v10 = vand.u32 4294901760, %v416_v7 }
   0xe   : > { %v2516_v4 = vand.u32 4294901760, %v402_v1  ;;  %v2529_v9 = vand.u32 4294901760, %v401_v6  ;;  %v2533_v11 = vand.u32 4294901760, %v400_v8  ;;  %v415_v12 = vld [vmem:[%s3373_s1 + $0xe0] sm:$0xff]  ;;  %v414_v14 = vld [vmem:[%s3373_s1 + $0xd8] sm:$0xff]  ;;  %v2562_v20 = vld [vmem:[%s3373_s1 + $0xd0] sm:$0xff] }
   0xf   : > { %v399_v13 = vld [vmem:[%s3373_s1 + $0x60] sm:$0xff]  ;;  %2079 = vmatprep.subr.mxu0 %v2514_v3  ;;  %v2545_v15 = vand.u32 4294901760, %v415_v12  ;;  %v2549_v17 = vand.u32 4294901760, %v414_v14  ;;  %v2552_v18 = vsub.f32 %v418_v0, %v2514_v3  ;;  %v2557_v19 = vld [vmem:[%s3373_s1 + $0x58] sm:$0xff]  ;;  %v2567_v21 = vld [vmem:[%s3373_s1 + $0x50] sm:$0xff]  ;;  %v2577_v24 = vand.u32 4294901760, %v2562_v20 }
  0x10   : > { %v2547_v16 = vand.u32 4294901760, %v399_v13  ;;  %2080 = vmatpush3.msra.mxu0 %v2516_v4  ;;  %v2571_v22 = vand.u32 4294901760, %v2557_v19  ;;  %v2574_v23 = vsub.f32 %v402_v1, %v2516_v4  ;;  %v2580_v25 = vsub.f32 %v417_v2, %v2518_v5  ;;  %v2585_v26 = vld [vmem:[%s3373_s1 + $0xc8] sm:$0xff]  ;;  %v2595_v28 = vld [vmem:[%s3373_s1 + $0xc0] sm:$0xff]  ;;  %v2647_v46 = vld [vmem:[%s3373_s1 + $0xb8] sm:$0xff]  ;;  %s3558_s15 = smov (!%p320_p4, %s2449_s15), 1 }
  0x11   : > { %3452 = vst [vmem:[#allocation3_spill] sm:$0xff] %v2577_v24  ;;  %v2590_v27 = vld [vmem:[%s3373_s1 + $0x48] sm:$0xff]  ;;  %2081 = vmatprep.subr.mxu0 %v2518_v5  ;;  %v3390_v29 = vand.u32 4294901760, %v2552_v18  ;;  %v2600_v30 = vand.u32 4294901760, %v2567_v21  ;;  %v2603_v31 = vsub.f32 %v401_v6, %v2529_v9  ;;  %v2606_v32 = vand.u32 4294901760, %v2585_v26  ;;  %v2620_v37 = vld [vmem:[%s3373_s1 + $0x40] sm:$0xff] }
  0x12   : > { %2082 = vmatpush3.msra.mxu0 %v2529_v9  ;;  %v3389_v33 = vand.u32 4294901760, %v2574_v23  ;;  %v3388_v34 = vand.u32 4294901760, %v2580_v25  ;;  %v2612_v35 = vsub.f32 %v416_v7, %v2531_v10  ;;  %v2615_v36 = vand.u32 4294901760, %v2590_v27  ;;  %v2660_v51 = vld [vmem:[%s3373_s1 + $0x38] sm:$0xff]  ;;  %v2670_v56 = vld [vmem:[%s3373_s1 + $0xb0] sm:$0xff]  ;;  %v2700_v2 = vld [vmem:[%s3373_s1 + $0xa8] sm:$0xff] }
  0x13   : > { %3453 = vst [vmem:[#allocation4_spill] sm:$0xff] %v2600_v30  ;;  %3454 = vst [vmem:[#allocation5_spill] sm:$0xff] %v2606_v32  ;;  %2083 = vmatprep.subr.mxu0 %v2531_v10  ;;  %v673_v38 = vsub.f32 %v2552_v18, %v3390_v29  ;;  %v3386_v39 = vand.u32 4294901760, %v2603_v31  ;;  %v2628_v40 = vsub.f32 %v400_v8, %v2533_v11  ;;  %v2631_v41 = vand.u32 4294901760, %v2595_v28  ;;  %v2685_v61 = vld [vmem:[%s3373_s1 + $0x30] sm:$0xff]  ;;  %s2409_s5 = smul.u32 48, %s3558_s15 }
  0x14   : > { %3455 = vst [vmem:[#allocation6_spill] sm:$0xff] %v2615_v36  ;;  %2084 = vmatpush3.msra.mxu0 %v2533_v11  ;;  %v561_v42 = vsub.f32 %v2574_v23, %v3389_v33  ;;  %v680_v43 = vsub.f32 %v2580_v25, %v3388_v34  ;;  %v3384_v44 = vand.u32 4294901760, %v2612_v35  ;;  %v2642_v45 = vsub.f32 %v415_v12, %v2545_v15  ;;  %v2843_v33 = vld [vmem:[%s3373_s1 + $0x88] sm:$0xff]  ;;  %s2077_s29 = sshll.u32 %s3558_s15, 4 }
  0x15   : > { %3456 = vst [vmem:[#allocation7_spill] sm:$0xff] %v2631_v41  ;;  %2085 = vmatprep.subr.mxu0 %v2545_v15  ;;  %v674_v47 = vand.u32 4294901760, %v673_v38  ;;  %v568_v48 = vsub.f32 %v2603_v31, %v3386_v39  ;;  %v3382_v49 = vand.u32 4294901760, %v2628_v40  ;;  %v2655_v50 = vand.u32 4294901760, %v2620_v37  ;;  %s2890_s14 = scalar_lea.vmem %s3372_s0, %s2409_s5  ;;  %s357_s6 = scalar_lea.vmem %s3375_s3, %s2077_s29 }
  0x16   : > { %2086 = vmatpush3.msra.mxu0 %v2547_v16  ;;  %v562_v52 = vand.u32 4294901760, %v561_v42  ;;  %v681_v53 = vand.u32 4294901760, %v680_v43  ;;  %v687_v54 = vsub.f32 %v2612_v35, %v3384_v44  ;;  %v3381_v55 = vand.u32 4294901760, %v2642_v45  ;;  %v2815_v44 = vld [vmem:[%s3373_s1 + $0x90] sm:$0xff]  ;;  %s370_s15 = scalar_lea.vmem %s3376_s4, %s2077_s29 }
  0x17   : > { %3457 = vst [vmem:[#allocation8_spill] sm:$0xff] %v2655_v50  ;;  %2087 = vmatprep.subr.mxu0 %v2549_v17  ;;  %2117 = vmatprep.subr.mxu1 %v674_v47  ;;  %v569_v57 = vand.u32 4294901760, %v568_v48  ;;  %v575_v58 = vsub.f32 %v2628_v40, %v3382_v49  ;;  %v2677_v59 = vsub.f32 %v399_v13, %v2547_v16  ;;  %v2680_v60 = vand.u32 4294901760, %v2647_v46  ;;  %v2714_v13 = vld [vmem:[%s3373_s1 + $0x28] sm:$0xff]  ;;  %v2799_v49 = vld [vmem:[%s3373_s1 + $0x18] sm:$0xff] }
  0x18   : > { %2088 = vmatpush3.msra.mxu0 %v2571_v22  ;;  %2118 = vmatpush3.msra.mxu1 %v562_v52  ;;  %v688_v62 = vand.u32 4294901760, %v687_v54  ;;  %v694_v63 = vsub.f32 %v2642_v45, %v3381_v55  ;;  %v2692_v0 = vsub.f32 %v414_v14, %v2549_v17  ;;  %v2695_v1 = vand.u32 4294901760, %v2660_v51  ;;  %v2741_v52 = vld [vmem:[%s3373_s1 + $0xa0] sm:$0xff] }
  0x19   : > { %3458 = vst [vmem:[#allocation9_spill] sm:$0xff] %v2680_v60  ;;  %2089 = vmatprep.subr.mxu0 %v2577_v24  ;;  %2119 = vmatprep.subr.mxu1 %v681_v53  ;;  %v576_v6 = vand.u32 4294901760, %v575_v58  ;;  %v3379_v7 = vand.u32 4294901760, %v2677_v59  ;;  %v2706_v8 = vsub.f32 %v2557_v19, %v2571_v22  ;;  %v2709_v12 = vand.u32 4294901760, %v2670_v56 }
  0x1a   : > { %3459 = vst [vmem:[#allocation10_spill] sm:$0xff] %v2695_v1  ;;  %2090 = vmatpush3.msra.mxu0 %v2600_v30  ;;  %2120 = vmatpush3.msra.mxu1 %v569_v57  ;;  %v695_v14 = vand.u32 4294901760, %v694_v63  ;;  %v3378_v38 = vand.u32 4294901760, %v2692_v0  ;;  %v2721_v42 = vsub.f32 %v2562_v20, %v2577_v24  ;;  %v2724_v19 = vand.u32 4294901760, %v2685_v61 }
  0x1b   : > { %3460 = vst [vmem:[#allocation11_spill] sm:$0xff] %v2709_v12  ;;  %2091 = vmatprep.subr.mxu0 %v2606_v32  ;;  %2121 = vmatprep.subr.mxu1 %v688_v62  ;;  %v582_v43 = vsub.f32 %v2677_v59, %v3379_v7  ;;  %v3377_v47 = vand.u32 4294901760, %v2706_v8  ;;  %v2733_v48 = vsub.f32 %v2567_v21, %v2600_v30  ;;  %v2736_v20 = vand.u32 4294901760, %v2700_v2 }
  0x1c   : > { %3461 = vst [vmem:[#allocation12_spill] sm:$0xff] %v2724_v19  ;;  %2092 = vmatpush3.msra.mxu0 %v2615_v36  ;;  %2122 = vmatpush3.msra.mxu1 %v576_v6  ;;  %v701_v53 = vsub.f32 %v2692_v0, %v3378_v38  ;;  %v3380_v21 = vand.u32 4294901760, %v2721_v42  ;;  %v2750_v54 = vsub.f32 %v2585_v26, %v2606_v32  ;;  %v2753_v57 = vand.u32 4294901760, %v2714_v13  ;;  %v2767_v26 = vld [vmem:[%s3373_s1 + $0x20] sm:$0xff]  ;;  %v2785_v38 = vld [vmem:[%s3373_s1 + $0x98] sm:$0xff] }
  0x1d   : > { %3462 = vst [vmem:[#allocation13_spill] sm:$0xff] %v2736_v20  ;;  %2093 = vmatprep.subr.mxu0 %v2631_v41  ;;  %2123 = vmatprep.subr.mxu1 %v695_v14  ;;  %v583_v58 = vand.u32 4294901760, %v582_v43  ;;  %v589_v62 = vsub.f32 %v2706_v8, %v3377_v47  ;;  %v3383_v63 = vand.u32 4294901760, %v2733_v48  ;;  %v2762_v6 = vsub.f32 %v2590_v27, %v2615_v36 }
  0x1e   : > { %3463 = vst [vmem:[#allocation14_spill] sm:$0xff] %v2753_v57  ;;  %2094 = vmatpush3.msra.mxu0 %v2655_v50  ;;  %v702_v14 = vand.u32 4294901760, %v701_v53  ;;  %v708_v43 = vsub.f32 %v2721_v42, %v3380_v21  ;;  %v3385_v47 = vand.u32 4294901760, %v2750_v54  ;;  %v2780_v27 = vand.u32 4294901760, %v2741_v52 }
  0x1f   : > { %2124 = vmatpush3.msra.mxu1 %v583_v58  ;;  %2095 = vmatprep.subr.mxu0 %v2680_v60  ;;  %v590_v7 = vand.u32 4294901760, %v589_v62  ;;  %v596_v53 = vsub.f32 %v2733_v48, %v3383_v63  ;;  %v3387_v21 = vand.u32 4294901760, %v2762_v6  ;;  %v2794_v55 = vsub.f32 %v2595_v28, %v2631_v41 }
  0x20   : > { %3464 = vst [vmem:[#allocation15_spill] sm:$0xff] %v2780_v27  ;;  %2125 = vmatprep.subr.mxu1 %v702_v14  ;;  %2096 = vmatpush3.msra.mxu0 %v2695_v1  ;;  %v709_v58 = vand.u32 4294901760, %v708_v43  ;;  %v715_v62 = vsub.f32 %v2750_v54, %v3385_v47  ;;  %v2806_v63 = vand.u32 4294901760, %v2767_v26  ;;  %v2810_v28 = vsub.f32 %v2620_v37, %v2655_v50  ;;  %v2828_v37 = vld [vmem:[%s3373_s1 + $0x10] sm:$0xff] }
  0x21   : > { %2126 = vmatpush3.msra.mxu1 %v590_v7  ;;  %2097 = vmatprep.subr.mxu0 %v2709_v12  ;;  %v597_v14 = vand.u32 4294901760, %v596_v53  ;;  %v603_v43 = vsub.f32 %v2762_v6, %v3387_v21  ;;  %v3393_v47 = vand.u32 4294901760, %v2794_v55  ;;  %v2823_v39 = vand.u32 4294901760, %v2785_v38 }
  0x22   : > { %3465 = vst [vmem:[#allocation16_spill] sm:$0xff] %v2806_v63  ;;  %2127 = vmatprep.subr.mxu1 %v709_v58  ;;  %2098 = vmatpush3.msra.mxu0 %v2724_v19  ;;  %v716_v7 = vand.u32 4294901760, %v715_v62  ;;  %v3394_v53 = vand.u32 4294901760, %v2810_v28  ;;  %v2835_v21 = vsub.f32 %v2647_v46, %v2680_v60  ;;  %v2838_v34 = vand.u32 4294901760, %v2799_v49 }
  0x23   : > { %3466 = vst [vmem:[#allocation17_spill] sm:$0xff] %v2823_v39  ;;  %2128 = vmatpush3.msra.mxu1 %v597_v14  ;;  %2099 = vmatprep.subr.mxu0 %v2736_v20  ;;  %v604_v58 = vand.u32 4294901760, %v603_v43  ;;  %v722_v62 = vsub.f32 %v2794_v55, %v3393_v47  ;;  %v2851_v46 = vsub.f32 %v2660_v51, %v2695_v1  ;;  %v2854_v29 = vand.u32 4294901760, %v2815_v44  ;;  %v2871_v51 = vld [vmem:[%s3373_s1 + $0x8] sm:$0xff] }
  0x24   : > { %3467 = vst [vmem:[#allocation18_spill] sm:$0xff] %v2838_v34  ;;  %2129 = vmatprep.subr.mxu1 %v716_v7  ;;  %2100 = vmatpush3.msra.mxu0 %v2753_v57  ;;  %v610_v14 = vsub.f32 %v2810_v28, %v3394_v53  ;;  %v2863_v60 = vsub.f32 %v2670_v56, %v2709_v12  ;;  %v2866_v47 = vand.u32 4294901760, %v2828_v37  ;;  %v2880_v56 = vand.u32 4294901760, %v2843_v33  ;;  %v2885_v12 = vld [vmem:[%s3373_s1 + $0x80] sm:$0xff] }
  0x25   : > { %3468 = vst [vmem:[#allocation19_spill] sm:$0xff] %v2854_v29  ;;  %2130 = vmatpush3.msra.mxu1 %v604_v58  ;;  %2101 = vmatprep.subr.mxu0 %v2780_v27  ;;  %v723_v7 = vand.u32 4294901760, %v722_v62  ;;  %v2877_v43 = vsub.f32 %v2685_v61, %v2724_v19  ;;  %v3471_v62 = vand.u32 4294901760, %v2835_v21  ;;  %v2899_v19 = vsub.f32 %v2700_v2, %v2736_v20  ;;  %v2916_v2 = vld [vmem:[%s3373_s1] sm:$0xff] }
  0x26   : > { %3469 = vst [vmem:[#allocation20_spill] sm:$0xff] %v2866_v47  ;;  %3470 = vst [vmem:[#allocation21_spill] sm:$0xff] %v2880_v56  ;;  %2102 = vmatpush3.msra.mxu0 %v2806_v63  ;;  %v611_v58 = vand.u32 4294901760, %v610_v14  ;;  %v3413_v53 = vand.u32 4294901760, %v2863_v60  ;;  %v3473_v1 = vand.u32 4294901760, %v2851_v46  ;;  %v2907_v41 = vand.u32 4294901760, %v2871_v51 }
  0x27   : > { %v729_v61 = vsub.f32 %v2835_v21, %v3471_v62  ;;  %3472 = vst [vmem:[#allocation22_spill] sm:$0xff] %v2899_v19  ;;  %2131 = vmatprep.subr.mxu1 %v723_v7  ;;  %2103 = vmatprep.subr.mxu0 %v2823_v39  ;;  %v2911_v62 = vsub.f32 %v2714_v13, %v2753_v57  ;;  %v2924_v20 = vand.u32 4294901760, %v2885_v12  ;;  %v382_v13 = vld [vmem:[%s2890_s14 + $0x8] sm:$0xff]  ;;  %v3475_v36 = vand.u32 4294901760, %v2877_v43 }
  0x28   : > { %v617_v50 = vsub.f32 %v2851_v46, %v3473_v1  ;;  %2132 = vmatpush3.msra.mxu1 %v611_v58  ;;  %2104 = vmatpush3.msra.mxu0 %v2838_v34  ;;  %v736_v1 = vsub.f32 %v2863_v60, %v3413_v53  ;;  %v2934_v32 = vsub.f32 %v2741_v52, %v2780_v27  ;;  %v381_v53 = vld [vmem:[%s2890_s14] sm:$0xff]  ;;  %v3476_v30 = vand.u32 4294901760, %v2899_v19 }
  0x29   : > { %3474 = vst [vmem:[#allocation23_spill] sm:$0xff] %v2911_v62  ;;  %v730_v7 = vand.u32 4294901760, %v729_v61  ;;  %2105 = vmatprep.subr.mxu0 %v2854_v29  ;;  %v624_v58 = vsub.f32 %v2877_v43, %v3475_v36  ;;  %v2942_v24 = vand.u32 4294901760, %v2916_v2  ;;  %v2946_v36 = vsub.f32 %v2767_v26, %v2806_v63 }
  0x2a   : > { %v618_v57 = vand.u32 4294901760, %v617_v50  ;;  %v737_v14 = vand.u32 4294901760, %v736_v1  ;;  %2106 = vmatpush3.msra.mxu0 %v2866_v47  ;;  %v743_v50 = vsub.f32 %v2899_v19, %v3476_v30  ;;  %v3478_v52 = vand.u32 4294901760, %v2911_v62 }
  0x2b   : > { %2133 = vmatprep.subr.mxu1 %v730_v7  ;;  %3477 = vst [vmem:[#allocation24_spill] sm:$0xff] %v2946_v36  ;;  %v625_v61 = vand.u32 4294901760, %v624_v58  ;;  %2107 = vmatprep.subr.mxu0 %v2880_v56  ;;  %v3422_v1 = vand.u32 4294901760, %v2934_v32  ;;  %v2953_v27 = vand.u32 4294901760, %v382_v13  ;;  %v3423_v19 = vand.u32 4294901760, %v2946_v36 }
  0x2c   : > { %2134 = vmatpush3.msra.mxu1 %v618_v57  ;;  %v631_v7 = vsub.f32 %v2911_v62, %v3478_v52  ;;  %v744_v30 = vand.u32 4294901760, %v743_v50  ;;  %2108 = vmatpush3.msra.mxu0 %v2907_v41  ;;  %v2959_v57 = vsub.f32 %v2785_v38, %v2823_v39  ;;  %v2961_v26 = vand.u32 4294901760, %v381_v53 }
  0x2d   : > { %3479 = vst [vmem:[#allocation25_spill] sm:$0xff] %v2953_v27  ;;  %2135 = vmatprep.subr.mxu1 %v737_v14  ;;  %2109 = vmatprep.subr.mxu0 %v2924_v20  ;;  %v750_v52 = vsub.f32 %v2934_v32, %v3422_v1  ;;  %v2968_v14 = vsub.f32 %v382_v13, %v2953_v27 }
  0x2e   : > { %3480 = vst [vmem:[#allocation26_spill] sm:$0xff] %v2961_v26  ;;  %2136 = vmatpush3.msra.mxu1 %v625_v61  ;;  %v632_v58 = vand.u32 4294901760, %v631_v7  ;;  %v2972_v50 = vsub.f32 %v2799_v49, %v2838_v34  ;;  %2110 = vmatpush3.msra.mxu0 %v2942_v24  ;;  %v638_v38 = vsub.f32 %v2946_v36, %v3423_v19 }
  0x2f   : > { %2137 = vmatprep.subr.mxu1 %v744_v30  ;;  %v2980_v7 = vsub.f32 %v381_v53, %v2961_v26  ;;  %v2984_v13 = vsub.f32 %v2815_v44, %v2854_v29  ;;  %v751_v1 = vand.u32 4294901760, %v750_v52  ;;  %v3428_v49 = vand.u32 4294901760, %v2968_v14  ;;  %2155 = vmatprep.subr.mxu0 %v2552_v18 }
  0x30   : > { %3481 = vst [vmem:[#allocation27_spill] sm:$0xff] %v2972_v50  ;;  %2138 = vmatpush3.msra.mxu1 %v632_v58  ;;  %v3431_v30 = vand.u32 4294901760, %v2972_v50  ;;  %v2991_v19 = vsub.f32 %v2828_v37, %v2866_v47  ;;  %v639_v61 = vand.u32 4294901760, %v638_v38  ;;  %v3482_v53 = vand.u32 4294901760, %v2959_v57  ;;  %782 = vmatprep.mubr.f32.mxu1 %v2953_v27 }
  0x31   : > { %2139 = vmatprep.subr.mxu1 %v751_v1  ;;  %v529_v52 = vsub.f32 %v2968_v14, %v3428_v49  ;;  %v3483_v58 = vand.u32 4294901760, %v2980_v7  ;;  %v3484_v27 = vand.u32 4294901760, %v2984_v13  ;;  %v3018_v47 = vsub.f32 %v2871_v51, %v2907_v41 }
  0x32   : > { %v757_v34 = vsub.f32 %v2959_v57, %v3482_v53  ;;  %v645_v37 = vsub.f32 %v2972_v50, %v3431_v30  ;;  %v3008_v53 = vsub.f32 %v2843_v33, %v2880_v56  ;;  %2140 = vmatpush3.msra.mxu1 %v639_v61  ;;  %v3485_v29 = vand.u32 4294901760, %v2991_v19 }
  0x33   : > { %v535_v1 = vsub.f32 %v2980_v7, %v3483_v58  ;;  %v764_v49 = vsub.f32 %v2984_v13, %v3484_v27  ;;  %v530_v30 = vand.u32 4294901760, %v529_v52  ;;  %v3438_v58 = vand.u32 4294901760, %v3018_v47 }
  0x34   : > { %v758_v44 = vand.u32 4294901760, %v757_v34  ;;  %v646_v38 = vand.u32 4294901760, %v645_v37  ;;  %v652_v33 = vsub.f32 %v2991_v19, %v3485_v29  ;;  %v3439_v34 = vand.u32 4294901760, %v3008_v53 }
  0x35   : > { %v536_v61 = vand.u32 4294901760, %v535_v1  ;;  %v765_v56 = vand.u32 4294901760, %v764_v49  ;;  %v3027_v27 = vsub.f32 %v2885_v12, %v2924_v20  ;;  %531 = vmatprep.mubr.f32.mxu0 %v530_v30  ;;  %v3034_v29 = vsub.f32 %v2916_v2, %v2942_v24  ;;  %v385_v1 = vld [vmem:[%s2890_s14 + $0x20] sm:$0xff] }
  0x36   : > { %2141 = vmatprep.subr.mxu1 %v758_v44  ;;  %v653_v51 = vand.u32 4294901760, %v652_v33  ;;  %v771_v52 = vsub.f32 %v3008_v53, %v3439_v34  ;;  %v659_v49 = vsub.f32 %v3018_v47, %v3438_v58  ;;  %v3493_v58 = vld [vmem:[#allocation7_spill] sm:$0xff] }
  0x37   : > { %2142 = vmatpush3.msra.mxu1 %v646_v38  ;;  %3486 = vst [vmem:[#allocation28_spill] sm:$0xff] %v3034_v29  ;;  %537 = vmatmul.mubr.f32.vlgmr.msra.gmra.mxu0 %v536_v61  ;;  %v3437_v12 = vand.u32 4294901760, %v3027_v27  ;;  %v3436_v44 = vand.u32 4294901760, %v3034_v29  ;;  %v384_v61 = vld [vmem:[%s2890_s14 + $0x18] sm:$0xff] }
  0x38   : > { %2143 = vmatprep.subr.mxu1 %v765_v56  ;;  %2156 = vmatpush3.msra.mxu0 %v2574_v23  ;;  %v772_v30 = vand.u32 4294901760, %v771_v52  ;;  %v660_v2 = vand.u32 4294901760, %v659_v49  ;;  %v3062_v52 = vand.u32 4294901760, %v384_v61 }
  0x39   : > { %2144 = vmatpush3.msra.mxu1 %v653_v51  ;;  %2157 = vmatprep.subr.mxu0 %v2580_v25  ;;  %v778_v56 = vsub.f32 %v3027_v27, %v3437_v12  ;;  %v666_v37 = vsub.f32 %v3034_v29, %v3436_v44  ;;  %v3056_v51 = vand.u32 4294901760, %v385_v1  ;;  %v3492_v12 = vld [vmem:[#allocation6_spill] sm:$0xff] }
  0x3a   : > { %2158 = vmatpush3.msra.mxu0 %v2603_v31  ;;  %2145 = vmatprep.subr.mxu1 %v772_v30  ;;  %v3076_v30 = vsub.f32 %v384_v61, %v3062_v52  ;;  %v3491_v61 = vld [vmem:[#allocation5_spill] sm:$0xff] }
  0x3b   : > { %2159 = vmatprep.subr.mxu0 %v2612_v35  ;;  %2146 = vmatpush3.msra.mxu1 %v660_v2  ;;  %v779_v38 = vand.u32 4294901760, %v778_v56  ;;  %v667_v33 = vand.u32 4294901760, %v666_v37  ;;  %3487 = vst [vmem:[#allocation29_spill] sm:$0xff] %v3056_v51  ;;  %v3069_v49 = vsub.f32 %v385_v1, %v3056_v51  ;;  %v3488_v37 = vld [vmem:[#allocation3_spill] sm:$0xff]  ;;  %v3489_v1 = vld [vmem:[#allocation4_spill] sm:$0xff] }
  0x3c   : > { %2160 = vmatpush3.msra.mxu0 %v2628_v40  ;;  %v3444_v56 = vand.u32 4294901760, %v3076_v30 }
  0x3d   : > { %2147 = vmatprep.subr.mxu1 %v779_v38  ;;  %2161 = vmatprep.subr.mxu0 %v2642_v45  ;;  %v3440_v2 = vand.u32 4294901760, %v3069_v49 }
  0x3e   : > { %2148 = vmatpush3.msra.mxu1 %v667_v33  ;;  %2162 = vmatpush3.msra.mxu0 %v2677_v59  ;;  %v3490_v33 = vld [vmem:[#allocation22_spill] sm:$0xff]  ;;  %v550_v44 = vsub.f32 %v3076_v30, %v3444_v56  ;;  %v3497_v56 = vld [vmem:[#allocation11_spill] sm:$0xff] }
  0x3f   : > { %784 = vmatmul.mubr.f32.vlgmr.msra.gmra.mxu1 %v2961_v26  ;;  %2163 = vmatprep.subr.mxu0 %v2692_v0  ;;  %v544_v38 = vsub.f32 %v3069_v49, %v3440_v2  ;;  %v3494_v2 = vld [vmem:[#allocation8_spill] sm:$0xff]  ;;  %v3495_v26 = vld [vmem:[#allocation9_spill] sm:$0xff] }
  0x40   : > { %2193 = vmatprep.subr.mxu1 %v2514_v3  ;;  %2164 = vmatpush3.msra.mxu0 %v2706_v8 }
  0x41   : > { %2194 = vmatpush3.msra.mxu1 %v2516_v4  ;;  %2165 = vmatprep.subr.mxu0 %v2721_v42  ;;  %v545_v34 = vand.u32 4294901760, %v544_v38  ;;  %v3499_v38 = vld [vmem:[#allocation13_spill] sm:$0xff] }
  0x42   : > { %2195 = vmatprep.subr.mxu1 %v2518_v5  ;;  %2166 = vmatpush3.msra.mxu0 %v2733_v48 }
  0x43   : > { %2196 = vmatpush3.msra.mxu1 %v2529_v9  ;;  %2167 = vmatprep.subr.mxu0 %v2750_v54 }
  0x44   : > { %2197 = vmatprep.subr.mxu1 %v2531_v10  ;;  %2168 = vmatpush3.msra.mxu0 %v2762_v6 }
  0x45   : > { %2198 = vmatpush3.msra.mxu1 %v2533_v11  ;;  %2169 = vmatprep.subr.mxu0 %v2794_v55 }
  0x46   : > { %2199 = vmatprep.subr.mxu1 %v2545_v15  ;;  %2170 = vmatpush3.msra.mxu0 %v2810_v28 }
  0x47   : > { %2200 = vmatpush3.msra.mxu1 %v2547_v16  ;;  %2171 = vmatprep.subr.mxu0 %v2835_v21 }
  0x48   : > { %2201 = vmatprep.subr.mxu1 %v2549_v17  ;;  %2172 = vmatpush3.msra.mxu0 %v2851_v46 }
  0x49   : > { %2202 = vmatpush3.msra.mxu1 %v2571_v22  ;;  %2173 = vmatprep.subr.mxu0 %v2863_v60 }
  0x4a   : > { %2203 = vmatprep.subr.mxu1 %v3488_v37  ;;  %2174 = vmatpush3.msra.mxu0 %v2877_v43 }
  0x4b   : > { %2204 = vmatpush3.msra.mxu1 %v3489_v1  ;;  %2175 = vmatprep.subr.mxu0 %v3490_v33 }
  0x4c   : > { %2205 = vmatprep.subr.mxu1 %v3491_v61  ;;  %2176 = vmatpush3.msra.mxu0 %v2911_v62  ;;  %v551_v62 = vand.u32 4294901760, %v550_v44  ;;  %v3496_v61 = vld [vmem:[#allocation10_spill] sm:$0xff]  ;;  %v3501_v44 = vld [vmem:[#allocation15_spill] sm:$0xff] }
  0x4d   : > { %2206 = vmatpush3.msra.mxu1 %v3492_v12  ;;  %2177 = vmatprep.subr.mxu0 %v2934_v32 }
  0x4e   : > { %2207 = vmatprep.subr.mxu1 %v3493_v58  ;;  %2178 = vmatpush3.msra.mxu0 %v2946_v36  ;;  %v3498_v36 = vld [vmem:[#allocation12_spill] sm:$0xff] }
  0x4f   : > { %2208 = vmatpush3.msra.mxu1 %v3494_v2  ;;  %2179 = vmatprep.subr.mxu0 %v2959_v57 }
  0x50   : > { %2209 = vmatprep.subr.mxu1 %v3495_v26  ;;  %2180 = vmatpush3.msra.mxu0 %v2972_v50  ;;  %v3500_v50 = vld [vmem:[#allocation14_spill] sm:$0xff] }
  0x51   : > { %2210 = vmatpush3.msra.mxu1 %v3496_v61  ;;  %2181 = vmatprep.subr.mxu0 %v2984_v13 }
  0x52   : > { %2211 = vmatprep.subr.mxu1 %v3497_v56  ;;  %546 = vmatprep.mubr.f32.mxu0 %v545_v34  ;;  %v3503_v34 = vand.u32 4294901760, %v2574_v23  ;;  %v3510_v23 = vand.u32 4294901760, %v2612_v35  ;;  %v3515_v35 = vand.u32 4294901760, %v2980_v7 }
  0x53   : > { %2182 = vmatpush3.msra.mxu0 %v2991_v19  ;;  %2212 = vmatpush3.msra.mxu1 %v3498_v36 }
  0x54   : > { %552 = vmatmul.mubr.f32.gmra.mxu0 %v551_v62  ;;  %2183 = vmatprep.subr.mxu0 %v3008_v53  ;;  %v3502_v62 = vand.u32 4294901760, %v2552_v18  ;;  %v3509_v18 = vld [vmem:[#allocation21_spill] sm:$0xff] }
  0x55   : > { %2213 = vmatprep.subr.mxu1 %v3499_v38  ;;  %2184 = vmatpush3.msra.mxu0 %v3018_v47 }
  0x56   : > { %2214 = vmatpush3.msra.mxu1 %v3500_v50  ;;  %2185 = vmatprep.subr.mxu0 %v3027_v27 }
  0x57   : > { %2215 = vmatprep.subr.mxu1 %v3501_v44  ;;  %2186 = vmatpush3.msra.mxu0 %v3034_v29  ;;  %v3504_v44 = vld [vmem:[#allocation18_spill] sm:$0xff]  ;;  %v3505_v29 = vand.u32 4294901760, %v2580_v25  ;;  %v3511_v25 = vand.u32 4294901760, %v2628_v40  ;;  %v3517_v40 = vand.u32 4294901760, %v2706_v8  ;;  %v3526_v8 = vand.u32 4294901760, %v2835_v21 }
  0x58   : > { %926 = vmatprep.mubr.f32.mxu0 %v2968_v14  ;;  %2216 = vmatpush3.msra.mxu1 %v2806_v63  ;;  %v3506_v63 = vld [vmem:[#allocation19_spill] sm:$0xff] }
  0x59   : > { %789 = vmatprep.mubr.f32.mxu1 %v3056_v51  ;;  %929 = vmatmul.mubr.f32.vlgmr.msra.gmra.mxu0 %v2980_v7  ;;  %v3507_v51 = vld [vmem:[#allocation20_spill] sm:$0xff] }
  0x5a   : > { %2217 = vmatprep.subr.mxu1 %v2823_v39  ;;  %2231 = vmatprep.subr.mxu0 %v3502_v62  ;;  %v3508_v39 = vand.u32 4294901760, %v2603_v31  ;;  %v3513_v31 = vand.u32 4294901760, %v2968_v14  ;;  %v3516_v62 = vand.u32 4294901760, %v2692_v0  ;;  %v3520_v14 = vand.u32 4294901760, %v2733_v48 }
  0x5b   : > { %791 = vmatmul.mubr.f32.gmra.mxu1 %v3062_v52  ;;  %2232 = vmatpush3.msra.mxu0 %v3503_v34  ;;  %v3522_v0 = vand.u32 4294901760, %v2750_v54  ;;  %v3534_v54 = vand.u32 4294901760, %v2934_v32 }
  0x5c   : > { %2218 = vmatpush3.msra.mxu1 %v3504_v44  ;;  %2233 = vmatprep.subr.mxu0 %v3505_v29  ;;  %v3512_v29 = vand.u32 4294901760, %v2642_v45  ;;  %v3518_v45 = vand.u32 4294901760, %v2721_v42  ;;  %v3531_v42 = vld [vmem:[#allocation5_spill] sm:$0xff] }
  0x5d   : > { %2219 = vmatprep.subr.mxu1 %v3506_v63  ;;  %935 = vmatprep.mubr.f32.mxu0 %v3069_v49 }
  0x5e   : > { %2220 = vmatpush3.msra.mxu1 %v3507_v51  ;;  %2234 = vmatpush3.msra.mxu0 %v3508_v39  ;;  %v3514_v39 = vand.u32 4294901760, %v2677_v59  ;;  %v3519_v59 = vand.u32 4294901760, %v3069_v49  ;;  %v3538_v49 = vld [vmem:[#allocation27_spill] sm:$0xff] }
  0x5f   : > { %938 = vmatmul.mubr.f32.gmra.mxu0 %v3076_v30  ;;  %2221 = vmatprep.subr.mxu1 %v3509_v18 }
  0x60   : > { %2235 = vmatprep.subr.mxu0 %v3510_v23  ;;  %2222 = vmatpush3.msra.mxu1 %v2907_v41  ;;  %v3544_v23 = vand.u32 4294901760, %v3027_v27 }
  0x61   : > { %2236 = vmatpush3.msra.mxu0 %v3511_v25  ;;  %2223 = vmatprep.subr.mxu1 %v2924_v20  ;;  %v3545_v25 = vld [vmem:[#allocation15_spill] sm:$0xff] }
  0x62   : > { %2237 = vmatprep.subr.mxu0 %v3512_v29  ;;  %2224 = vmatpush3.msra.mxu1 %v2942_v24  ;;  %v3546_v29 = vld [vmem:[#allocation28_spill] sm:$0xff] }
  0x63   : > { %1042 = vmatprep.mubr.f32.mxu1 %v3513_v31  ;;  %2238 = vmatpush3.msra.mxu0 %v3514_v39  ;;  %v3547_v31 = vand.u32 4294901760, %v3546_v29  ;;  %v3549_v39 = vld [vmem:[#allocation16_spill] sm:$0xff] }
  0x64   : > { %1046 = vmatmul.mubr.f32.vlgmr.msra.gmra.mxu1 %v3515_v35  ;;  %2239 = vmatprep.subr.mxu0 %v3516_v62  ;;  %v3550_v35 = vld [vmem:[#allocation26_spill] sm:$0xff]  ;;  %v3551_v62 = vld [vmem:[#allocation17_spill] sm:$0xff] }
  0x65   : > { %2269 = vmatprep.subr.mxu1 %v2514_v3  ;;  %2240 = vmatpush3.msra.mxu0 %v3517_v40  ;;  %v3521_v3 = vand.u32 4294901760, %v3076_v30  ;;  %v3539_v30 = vand.u32 4294901760, %v3538_v49 }
  0x66   : > { %2270 = vmatpush3.msra.mxu1 %v2516_v4  ;;  %2241 = vmatprep.subr.mxu0 %v3518_v45  ;;  %v3523_v4 = vand.u32 4294901760, %v2762_v6  ;;  %v421_v6 = vld [vmem:[%s3373_s1 + $0x110] sm:$0xff] }
  0x67   : > { %2271 = vmatprep.subr.mxu1 %v2518_v5  ;;  %1053 = vmatprep.mubr.f32.mxu1 %v3519_v59  ;;  %v3524_v5 = vand.u32 4294901760, %v2794_v55  ;;  %v3529_v55 = vand.u32 4294901760, %v2877_v43 }
  0x68   : > { %2242 = vmatpush3.msra.mxu0 %v3520_v14  ;;  %2272 = vmatpush3.msra.mxu1 %v2529_v9  ;;  %v3525_v9 = vand.u32 4294901760, %v2810_v28  ;;  %v3535_v28 = vld [vmem:[#allocation24_spill] sm:$0xff]  ;;  %v3552_v14 = vld [vmem:[#allocation29_spill] sm:$0xff] }
  0x69   : > { %1057 = vmatmul.mubr.f32.gmra.mxu1 %v3521_v3  ;;  %2243 = vmatprep.subr.mxu0 %v3522_v0 }
  0x6a   : > { %2273 = vmatprep.subr.mxu1 %v2531_v10  ;;  %2244 = vmatpush3.msra.mxu0 %v3523_v4  ;;  %v3527_v10 = vand.u32 4294901760, %v2851_v46  ;;  %v3536_v46 = vand.u32 4294901760, %v3535_v28 }
  0x6b   : > { %2274 = vmatpush3.msra.mxu1 %v2533_v11  ;;  %2245 = vmatprep.subr.mxu0 %v3524_v5  ;;  %v3528_v11 = vand.u32 4294901760, %v2863_v60  ;;  %v3532_v60 = vld [vmem:[#allocation23_spill] sm:$0xff] }
  0x6c   : > { %2275 = vmatprep.subr.mxu1 %v2545_v15  ;;  %2246 = vmatpush3.msra.mxu0 %v3525_v9  ;;  %v383_v15 = vld [vmem:[%s2890_s14 + $0x10] sm:$0xff]  ;;  %v3533_v48 = vand.u32 4294901760, %v3532_v60 }
  0x6d   : > { %2276 = vmatpush3.msra.mxu1 %v2547_v16  ;;  %2247 = vmatprep.subr.mxu0 %v3526_v8  ;;  %v3530_v16 = vand.u32 4294901760, %v3490_v33  ;;  %v425_v21 = vsel %vm376_vm0, %v383_v15, 0 }
  0x6e   : > { %2277 = vmatprep.subr.mxu1 %v2549_v17  ;;  %2248 = vmatpush3.msra.mxu0 %v3527_v10  ;;  %v422_v17 = vld [vmem:[%s3373_s1 + $0x118] sm:$0xff]  ;;  %v3223_v32 = vand.u32 4294901760, %v425_v21 }
  0x6f   : > { %2278 = vmatpush3.msra.mxu1 %v2571_v22  ;;  %2249 = vmatprep.subr.mxu0 %v3528_v11  ;;  %v386_v22 = vld [vmem:[%s2890_s14 + $0x28] sm:$0xff]  ;;  %v3217_v43 = vand.u32 4294901760, %v422_v17 }
  0x70   : > { %2279 = vmatprep.subr.mxu1 %v3488_v37  ;;  %2250 = vmatpush3.msra.mxu0 %v3529_v55  ;;  %v428_v7 = vsel %vm376_vm0, %v386_v22, 0  ;;  %v420_v37 = vld [vmem:[%s3373_s1 + $0x108] sm:$0xff]  ;;  %v3253_v34 = vsub.f32 %v425_v21, %v3223_v32 }
  0x71   : > { %2280 = vmatpush3.msra.mxu1 %v3489_v1  ;;  %2251 = vmatprep.subr.mxu0 %v3530_v16  ;;  %v419_v1 = vld [vmem:[%s3373_s1 + $0x100] sm:$0xff]  ;;  %v3245_v33 = vsub.f32 %v422_v17, %v3217_v43 }
  0x72   : > { %2281 = vmatprep.subr.mxu1 %v3531_v42  ;;  %2252 = vmatpush3.msra.mxu0 %v3533_v48 }
  0x73   : > { %2282 = vmatpush3.msra.mxu1 %v3492_v12  ;;  %2253 = vmatprep.subr.mxu0 %v3534_v54  ;;  %v3537_v12 = vand.u32 4294901760, %v2959_v57  ;;  %v3236_v57 = vand.u32 4294901760, %v428_v7 }
  0x74   : > { %2283 = vmatprep.subr.mxu1 %v3493_v58  ;;  %2254 = vmatpush3.msra.mxu0 %v3536_v46  ;;  %v3228_v58 = vand.u32 4294901760, %v421_v6 }
  0x75   : > { %2284 = vmatpush3.msra.mxu1 %v3494_v2  ;;  %2255 = vmatprep.subr.mxu0 %v3537_v12  ;;  %v3540_v2 = vand.u32 4294901760, %v2984_v13  ;;  %v3250_v13 = vand.u32 4294901760, %v420_v37 }
  0x76   : > { %2285 = vmatprep.subr.mxu1 %v3495_v26  ;;  %2256 = vmatpush3.msra.mxu0 %v3539_v30  ;;  %v3541_v26 = vand.u32 4294901760, %v2991_v19  ;;  %v3543_v19 = vand.u32 4294901760, %v3018_v47  ;;  %v3271_v47 = vand.u32 4294901760, %v3245_v33 }
  0x77   : > { %2286 = vmatpush3.msra.mxu1 %v3496_v61  ;;  %2257 = vmatprep.subr.mxu0 %v3540_v2  ;;  %v3542_v61 = vand.u32 4294901760, %v3008_v53  ;;  %v3265_v53 = vsub.f32 %v428_v7, %v3236_v57  ;;  %v1477_v27 = vsub.f32 %v420_v37, %v3250_v13 }
  0x78   : > { %2287 = vmatprep.subr.mxu1 %v3497_v56  ;;  %2258 = vmatpush3.msra.mxu0 %v3541_v26  ;;  %v1470_v56 = vsub.f32 %v421_v6, %v3228_v58  ;;  %v1465_v3 = vsub.f32 %v3245_v33, %v3271_v47 }
  0x79   : > { %2288 = vmatpush3.msra.mxu1 %v3498_v36  ;;  %2259 = vmatprep.subr.mxu0 %v3542_v61  ;;  %v3262_v36 = vand.u32 4294901760, %v419_v1  ;;  %v1429_v45 = vand.u32 4294901760, %v3265_v53  ;;  %v1478_v0 = vand.u32 4294901760, %v1477_v27 }
  0x7a   : > { %2289 = vmatprep.subr.mxu1 %v3499_v38  ;;  %2260 = vmatpush3.msra.mxu0 %v3543_v19  ;;  %v3548_v38 = vld [vmem:[#allocation25_spill] sm:$0xff]  ;;  %v3279_v40 = vand.u32 4294901760, %v1470_v56  ;;  %v1466_v5 = vand.u32 4294901760, %v1465_v3 }
  0x7b   : > { %2290 = vmatpush3.msra.mxu1 %v3500_v50  ;;  %2261 = vmatprep.subr.mxu0 %v3544_v23  ;;  %v1419_v50 = vand.u32 4294901760, %v3253_v34  ;;  %v1484_v59 = vsub.f32 %v419_v1, %v3262_v36  ;;  %v1479_v9 = vsub.f32 %v1477_v27, %v1478_v0 }
  0x7c   : > { %2291 = vmatprep.subr.mxu1 %v3545_v25  ;;  %2262 = vmatpush3.msra.mxu0 %v3547_v31 }
  0x7d   : > { %1223 = vmatprep.mubr.f32.mxu0 %v3548_v38  ;;  %2292 = vmatpush3.msra.mxu1 %v3549_v39  ;;  %v1485_v4 = vand.u32 4294901760, %v1484_v59 }
  0x7e   : > { %1225 = vmatmul.mubr.f32.vlgmr.msra.gmra.mxu0 %v3550_v35  ;;  %2293 = vmatprep.subr.mxu1 %v3551_v62 }
  0x7f   : > { %2294 = vmatpush3.msra.mxu1 %v3504_v44  ;;  %2343 = vmatprep.subr.mxu0 %v3217_v43  ;;  %v1420_v44 = vsub.f32 %v3253_v34, %v1419_v50  ;;  %v1486_v10 = vsub.f32 %v1484_v59, %v1485_v4 }
  0x80   : > { %2295 = vmatprep.subr.mxu1 %v3506_v63  ;;  %1230 = vmatprep.mubr.f32.mxu0 %v3552_v14  ;;  %v1472_v63 = vsub.f32 %v1470_v56, %v3279_v40 }
  0x81   : > { %2296 = vmatpush3.msra.mxu1 %v3507_v51  ;;  %2344 = vmatpush3.msra.mxu0 %v3217_v43  ;;  %v1430_v51 = vsub.f32 %v3265_v53, %v1429_v45 }
  0x82   : > { %1232 = vmatmul.mubr.f32.gmra.mxu0 %v3062_v52  ;;  %2297 = vmatprep.subr.mxu1 %v3509_v18  ;;  %v1421_v18 = vand.u32 4294901760, %v1420_v44 }
  0x83   : > { %2345 = vmatprep.subr.mxu0 %v3228_v58  ;;  %2298 = vmatpush3.msra.mxu1 %v2907_v41  ;;  %v1473_v41 = vand.u32 4294901760, %v1472_v63  ;;  %v1431_v8 = vand.u32 4294901760, %v1430_v51 }
  0x84   : > { %2346 = vmatpush3.msra.mxu0 %v3228_v58  ;;  %2299 = vmatprep.subr.mxu1 %v2924_v20  ;;  %v1480_v20 = vand.u32 4294901760, %v1479_v9 }
  0x85   : > { %2347 = vmatprep.subr.mxu0 %v3250_v13  ;;  %2300 = vmatpush3.msra.mxu1 %v2942_v24  ;;  %v1487_v24 = vand.u32 4294901760, %v1486_v10 }
  0x86   : > { %1334 = vmatprep.mubr.f32.mxu1 %v3548_v38  ;;  %2348 = vmatpush3.msra.mxu0 %v3250_v13 }
  0x87   : > { %1336 = vmatmul.mubr.f32.vlgmr.msra.gmra.mxu1 %v3550_v35  ;;  %2349 = vmatprep.subr.mxu0 %v3262_v36 }
  0x88   : > { %2354 = vmatprep.subr.mxu1 %v1466_v5  ;;  %2350 = vmatpush3.msra.mxu0 %v3262_v36 }
  0x89   : > { %2355 = vmatpush3.msra.mxu1 %v1466_v5  ;;  %2351 = vmatprep.mubr.f32.mxu0 %v1421_v18 }
  0x8a   : > { %2356 = vmatprep.subr.mxu1 %v1473_v41  ;;  %2365 = vmatprep.subr.mxu0 %v3245_v33 }
  0x8b   : > { %1341 = vmatprep.mubr.f32.mxu1 %v3552_v14  ;;  %2352 = vmatmul.mubr.f32.vlgmr.msra.gmra.mxu0 %v1431_v8 }
  0x8c   : > { %2357 = vmatpush3.msra.mxu1 %v1473_v41  ;;  %2366 = vmatpush3.msra.mxu0 %v3245_v33 }
  0x8d   : > { %1343 = vmatmul.mubr.f32.gmra.mxu1 %v3062_v52  ;;  %2358 = vmatprep.subr.mxu1 %v1480_v20  ;;  %v2459_v52 = vmov 0.0  }
  0x8e   : > { %2367 = vmatprep.subr.mxu0 %v1470_v56  ;;  %2359 = vmatpush3.msra.mxu1 %v1480_v20  ;;  %378 = vst.msk [vmem:[#allocation2 + $0x8] sm:$0xff] %vm376_vm0, %v2459_v52  ;;  %377 = vst.msk [vmem:[#allocation2] sm:$0xff] %vm376_vm0, %v2459_v52 }
  0x8f   : > { %2368 = vmatpush3.msra.mxu0 %v1470_v56  ;;  %2360 = vmatprep.subr.mxu1 %v1487_v24 }
  0x90   : > { %2369 = vmatprep.subr.mxu0 %v1477_v27  ;;  %2361 = vmatpush3.msra.mxu1 %v1487_v24 }
  0x91   : > { %2362 = vmatprep.mubr.f32.mxu1 %v3223_v32  ;;  %2370 = vmatpush3.msra.mxu0 %v1477_v27 }
  0x92   : > { %2363 = vmatmul.mubr.f32.vlgmr.msra.gmra.mxu1 %v3236_v57  ;;  %2371 = vmatprep.subr.mxu0 %v1484_v59 }
  0x93   : > { %2376 = vmatprep.subr.mxu1 %v3217_v43  ;;  %2372 = vmatpush3.msra.mxu0 %v1484_v59 }
  0x94   : > { %2373 = vmatprep.mubr.f32.mxu0 %v3253_v34  ;;  %2377 = vmatpush3.msra.mxu1 %v3217_v43 }
  0x95   : > { %2374 = vmatmul.mubr.f32.vlgmr.msra.gmra.mxu0 %v3265_v53  ;;  %2378 = vmatprep.subr.mxu1 %v3228_v58 }
  0x96   : > { %2387 = vmatprep.subr.mxu0 %v3271_v47  ;;  %2379 = vmatpush3.msra.mxu1 %v3228_v58 }
  0x97   : > { %2388 = vmatpush3.msra.mxu0 %v3271_v47  ;;  %2380 = vmatprep.subr.mxu1 %v3250_v13 }
  0x98   : > { %2389 = vmatprep.subr.mxu0 %v3279_v40  ;;  %2381 = vmatpush3.msra.mxu1 %v3250_v13 }
  0x99   : > { %2390 = vmatpush3.msra.mxu0 %v3279_v40  ;;  %2382 = vmatprep.subr.mxu1 %v3262_v36 }
  0x9a   : > { %2391 = vmatprep.subr.mxu0 %v1478_v0  ;;  %2383 = vmatpush3.msra.mxu1 %v3262_v36 }
  0x9b   : > { %2384 = vmatprep.mubr.f32.mxu1 %v1419_v50  ;;  %2392 = vmatpush3.msra.mxu0 %v1478_v0 }
  0x9c   : > { %2385 = vmatmul.mubr.f32.vlgmr.msra.gmra.mxu1 %v1429_v45  ;;  %2393 = vmatprep.subr.mxu0 %v1485_v4 }
  0x9d   : > { %2398 = vmatprep.subr.mxu1 %v3217_v43  ;;  %2394 = vmatpush3.msra.mxu0 %v1485_v4 }
  0x9e   : > { %2395 = vmatprep.mubr.f32.mxu0 %v3223_v32  ;;  %2399 = vmatpush3.msra.mxu1 %v3217_v43 }
  0x9f   : > { %2396 = vmatmul.mubr.f32.vlgmr.msra.gmra.mxu0 %v3236_v57  ;;  %2400 = vmatprep.subr.mxu1 %v3228_v58 }
  0xa0   : > { %2401 = vmatpush3.msra.mxu1 %v3228_v58  ;;  %2406 = vmatprep.mubr.f32.mxu1 %v3223_v32 }
  0xa1   : > { %2402 = vmatprep.subr.mxu1 %v3250_v13 }
  0xa2   : > { %2403 = vmatpush3.msra.mxu1 %v3250_v13 }
  0xa3   : > { %2404 = vmatprep.subr.mxu1 %v3262_v36 }
  0xa4   : > { %2405 = vmatpush3.msra.mxu1 %v3262_v36 }
  0xa5   : > { %2407 = vmatmul.mubr.f32.vlgmr.msra.gmra.mxu1 %v3236_v57 }
  0xf7   : > { %v2111_v11 = vpop.f32.mrf.mxu0 }
  0xf9   : > { %v2112_v15 = vpop.f32.mrf.mxu0 }
  0xfa   : > { %v2113_v13 = vadd.f32 %v2112_v15, %v2111_v11  ;;  %v380_v15 = vld [vmem:[#allocation2 + $0x8] sm:$0xff] }
  0xff   : > { %v2149_v17 = vpop.f32.mrf.mxu1 }
 0x101   : > { %v2150_v42 = vpop.f32.mrf.mxu1 }
 0x102   : > { %v2151_v33 = vadd.f32 %v2150_v42, %v2149_v17 }
 0x104   : > { %v786_v36 = vadd.f32 %v2151_v33, %v2113_v13 }
 0x114   : > { %v2114_v55 = vpop.f32.mrf.mxu0 }
 0x116   : > { %v2115_v16 = vpop.f32.mrf.mxu0 }
 0x117   : > { %v2116_v32 = vadd.f32 %v2115_v16, %v2114_v55 }
 0x119   : > { %v2187_v22 = vpop.f32.mrf.mxu0 }
 0x11b   : > { %v2152_v60 = vpop.f32.mrf.mxu1  ;;  %v2188_v48 = vpop.f32.mrf.mxu0 }
 0x11c   : > { %v2189_v34 = vadd.f32 %v2188_v48, %v2187_v22  ;;  %v379_v22 = vld [vmem:[#allocation2] sm:$0xff] }
 0x11d   : > { %v2153_v21 = vpop.f32.mrf.mxu1 }
 0x11e   : > { %v2154_v49 = vadd.f32 %v2153_v21, %v2152_v60  ;;  %v931_v31 = vadd.f32 %v2189_v34, %v786_v36 }
 0x11f   : > { %v2190_v54 = vpop.f32.mrf.mxu0 }
 0x120   : > { %v793_v2 = vadd.f32 %v2154_v49, %v2116_v32 }
 0x121   : > { %v2191_v28 = vpop.f32.mrf.mxu0 }
 0x122   : > { %v2192_v57 = vadd.f32 %v2191_v28, %v2190_v54  ;;  %v2074_v54 = vld [vmem:[%s3374_s2] ss:$0 sm:$0xff] }
 0x124   : > { %v2225_v6 = vpop.f32.mrf.mxu1  ;;  %v940_v19 = vadd.f32 %v2192_v57, %v793_v2 }
 0x126   : > { %v2226_v46 = vpop.f32.mrf.mxu1 }
 0x127   : > { %v2227_v53 = vadd.f32 %v2226_v46, %v2225_v6  ;;  %v1895_v6 = vld [vmem:[%s357_s6 + $0x8] sm:$0xff] }
 0x129   : > { %v2228_v7 = vpop.f32.mrf.mxu1  ;;  %v1048_v50 = vadd.f32 %v2227_v53, %v931_v31 }
 0x12b   : > { %v2229_v30 = vpop.f32.mrf.mxu1 }
 0x12c   : > { %v2230_v61 = vadd.f32 %v2229_v30, %v2228_v7 }
 0x12e   : > { %v1059_v25 = vadd.f32 %v2230_v61, %v940_v19 }
 0x13e   : > { %v2263_v43 = vpop.f32.mrf.mxu0 }
 0x140   : > { %v2264_v12 = vpop.f32.mrf.mxu0 }
 0x141   : > { %v2265_v47 = vadd.f32 %v2264_v12, %v2263_v43  ;;  %v1894_v43 = vld [vmem:[%s357_s6] sm:$0xff] }
 0x142   : > { %v2266_v58 = vpop.f32.mrf.mxu0 }
 0x143   : > { %v1227_v40 = vadd.f32 %v2265_v47, %v1048_v50 }
 0x144   : > { %v2267_v26 = vpop.f32.mrf.mxu0 }
 0x145   : > { %v2268_v56 = vadd.f32 %v2267_v26, %v2266_v58 }
 0x147   : > { %v2301_v37 = vpop.f32.mrf.mxu1  ;;  %v1234_v38 = vadd.f32 %v2268_v56, %v1059_v25 }
 0x149   : > { %v2302_v1 = vpop.f32.mrf.mxu1 }
 0x14a   : > { %v2303_v27 = vadd.f32 %v2302_v1, %v2301_v37 }
 0x14b   : > { %v2353_v62 = vpop.f32.mrf.mxu0 }
 0x14c   : > { %v1338_v14 = vadd.f32 %v2303_v27, %v1227_v40 }
 0x14d   : > { %v2304_v23 = vpop.f32.mrf.mxu1  ;;  %v1423_v3 = vpop.f32.mrf.mxu0 }
 0x14e   : > { %v1424_v51 = vadd.f32 %v1423_v3, %v1338_v14 }
 0x14f   : > { %v2305_v29 = vpop.f32.mrf.mxu1 }
 0x150   : > { %v2306_v39 = vadd.f32 %v2305_v29, %v2304_v23 }
 0x152   : > { %v1345_v35 = vadd.f32 %v2306_v39, %v1234_v38  ;;  %v2364_v59 = vpop.f32.mrf.mxu1 }
 0x154   : > { %v1434_v45 = vadd.f32 %v2353_v62, %v1345_v35  ;;  %v1524_v0 = vpop.f32.mrf.mxu1 }
 0x155   : > { %v2375_v63 = vpop.f32.mrf.mxu0  ;;  %v1525_v4 = vadd.f32 %v1524_v0, %v1424_v51 }
 0x156   : > { %v1531_v44 = vadd.f32 %v2364_v59, %v1434_v45 }
 0x157   : > { %v1610_v9 = vpop.f32.mrf.mxu0 }
 0x158   : > { %v1618_v5 = vadd.f32 %v2375_v63, %v1531_v44  ;;  %v1611_v10 = vadd.f32 %v1610_v9, %v1525_v4 }
 0x15c   : > { %v2386_v18 = vpop.f32.mrf.mxu1 }
 0x15d   : > { %v1703_v20 = vadd.f32 %v2386_v18, %v1618_v5 }
 0x15e   : > { %v1694_v41 = vpop.f32.mrf.mxu1 }
 0x15f   : > { %v2397_v8 = vpop.f32.mrf.mxu0  ;;  %v1695_v24 = vadd.f32 %v1694_v41, %v1611_v10 }
 0x160   : > { %v1792_v11 = vadd.f32 %v2397_v8, %v1703_v20 }
 0x161   : > { %v1785_v52 = vpop.f32.mrf.mxu0 }
 0x162   : > { %v1786_v16 = vadd.f32 %v1785_v52, %v1695_v24 }
 0x165   : > { %v2408_v55 = vpop.f32.mrf.mxu1 }
 0x166   : > { %v1873_v17 = vadd.f32 %v2408_v55, %v1792_v11 }
 0x167   : > { %v1866_v42 = vpop.f32.mrf.mxu1 }
 0x168   : > { %v1877_v60 = vadd.f32 %v1873_v17, %v380_v15  ;;  %v1867_v48 = vadd.f32 %v1866_v42, %v1786_v16 }
 0x16a   : > { %1879 = vst.msk [vmem:[#allocation2 + $0x8] sm:$0xff] %vm376_vm0, %v1877_v60  ;;  %v1876_v21 = vadd.f32 %v1867_v48, %v379_v22 }
 0x16c   : > { %1878 = vst.msk [vmem:[#allocation2] sm:$0xff] %vm376_vm0, %v1876_v21 }
 0x171   : > { %v1884_v28 = vld [vmem:[#allocation2 + $0x8] sm:$0xff] }
 0x172   : > { %v1893_v46 = vadd.f32 %v2074_v54, %v1884_v28 }
 0x173   : > { %v1883_v7 = vld [vmem:[#allocation2] sm:$0xff] }
 0x174   : > { %v1897_v12 = vadd.f32 %v1895_v6, %v1893_v46  ;;  %v1892_v32 = vadd.f32 %v2074_v54, %v1883_v7 }
 0x176   : > { %v1899_v49 = vmul.f32 0.70710677, %v1897_v12  ;;  %v1896_v30 = vadd.f32 %v1894_v43, %v1892_v32 }
 0x178   : > { %1901 = vst.msk [vmem:[%s370_s15 + $0x8] sm:$0xff] %vm376_vm0, %v1899_v49  ;;  %v1898_v58 = vmul.f32 0.70710677, %v1896_v30 }
 0x17a   : > { %1900 = vst.msk [vmem:[%s370_s15] sm:$0xff] %vm376_vm0, %v1898_v58 }
 0x17b PF: > { %s14_s17 = sadd.s32 1, %s2457_s17   ;;  %s3553_s15 = smov %s2453_s16 }
 0x17c   : > { %p11_p5 = scmp.ge.s32.totalorder %s14_s17, 4   ;;  %s3554_s16 = smov %s3556_s18 }
 0x17e   :  { %13 = sbr.rel (!%p11_p5) target bundleno = 2 (0x2), region = 83 }

// kernel: style_encoder_forward.19
= control target key start
LH: loop header
LB: loop body
LE: loop exit
PB: predicated region body
PF: predicated region fallthrough
CT: control target
= control target key end

     0   :  { %v2871_v3 = vmov 1983009808   ;;  %vm2873_vm1 = vmmov 0   ;;  %vm1855_vm3 = vcmask 261120   ;;  %vm2344_vm4 = vcmask 254976   ;;  %s4421_s1 = inlined_call_operand.vmem [shape: f32[512,32], index: 1, kind: input, shape index: {}]   ;;  %s4422_s0 = inlined_call_operand.vmem [shape: f32[2,512], index: 0, kind: input, shape index: {}]   ;;  %s4423_s3 = inlined_call_operand.vmem [shape: f32[32,32], index: 3, kind: input, shape index: {}]   ;;  %s4424_s2 = inlined_call_operand.vmem [shape: f32[1,32], index: 2, kind: input, shape index: {}]   ;;  %s4425_s4 = inlined_call_operand.vmem [shape: f32[1,32], index: 4, kind: input, shape index: {}]   ;;  %s4426_s5 = inlined_call_operand.vmem [shape: f32[2,32], index: 5, kind: output, shape index: {}]  }
   0x1   :  { %v55_v0 = vld [vmem:[%s4421_s1 + $0xf8] sm:$0xff]  ;;  %v54_v2 = vld [vmem:[%s4421_s1 + $0xf0] sm:$0xff]  ;;  %v2913_v4 = vunpack.c.l.s4 %v2871_v3  ;;  %v53_v9 = vld [vmem:[%s4421_s1 + $0xe8] sm:$0xff] }
   0x2   :  { %v39_v1 = vld [vmem:[%s4421_s1 + $0x78] sm:$0xff]  ;;  %v2915_v5 = vand.u32 4294901760, %v55_v0  ;;  %v2919_v7 = vand.u32 4294901760, %v54_v2  ;;  %v38_v8 = vld [vmem:[%s4421_s1 + $0x70] sm:$0xff]  ;;  %v37_v10 = vld [vmem:[%s4421_s1 + $0x68] sm:$0xff]  ;;  %v2932_v13 = vand.u32 4294901760, %v53_v9 }
   0x3   :  { %v2917_v6 = vand.u32 4294901760, %v39_v1  ;;  %v2930_v12 = vand.u32 4294901760, %v38_v8  ;;  %v2934_v14 = vand.u32 4294901760, %v37_v10  ;;  %v52_v15 = vld [vmem:[%s4421_s1 + $0xe0] sm:$0xff]  ;;  %v2945_v17 = vld [vmem:[%s4421_s1 + $0xd8] sm:$0xff]  ;;  %v2967_v24 = vld [vmem:[%s4421_s1 + $0xd0] sm:$0xff] }
   0x4   :  { %v36_v16 = vld [vmem:[%s4421_s1 + $0x60] sm:$0xff]  ;;  %2352 = vmatprep.subr.mxu0 %v2915_v5  ;;  %v2949_v19 = vand.u32 4294901760, %v52_v15  ;;  %v2954_v21 = vand.u32 4294901760, %v2945_v17  ;;  %v2957_v22 = vsub.f32 %v55_v0, %v2915_v5  ;;  %v2962_v23 = vld [vmem:[%s4421_s1 + $0x58] sm:$0xff]  ;;  %v2972_v25 = vld [vmem:[%s4421_s1 + $0x50] sm:$0xff]  ;;  %v2982_v28 = vand.u32 4294901760, %v2967_v24 }
   0x5   :  { %v2951_v20 = vand.u32 4294901760, %v36_v16  ;;  %2353 = vmatpush3.msra.mxu0 %v2917_v6  ;;  %v2976_v26 = vand.u32 4294901760, %v2962_v23  ;;  %v2979_v27 = vsub.f32 %v39_v1, %v2917_v6  ;;  %v2985_v29 = vsub.f32 %v54_v2, %v2919_v7  ;;  %v2990_v30 = vld [vmem:[%s4421_s1 + $0xc8] sm:$0xff]  ;;  %v3000_v32 = vld [vmem:[%s4421_s1 + $0xc0] sm:$0xff]  ;;  %v3052_v50 = vld [vmem:[%s4421_s1 + $0xb8] sm:$0xff] }
   0x6   :  { %4573 = vst [vmem:[#allocation2_spill] sm:$0xff] %v2957_v22  ;;  %v2995_v31 = vld [vmem:[%s4421_s1 + $0x48] sm:$0xff]  ;;  %2354 = vmatprep.subr.mxu0 %v2919_v7  ;;  %v4439_v33 = vand.u32 4294901760, %v2957_v22  ;;  %v3005_v34 = vand.u32 4294901760, %v2972_v25  ;;  %v3008_v35 = vsub.f32 %v38_v8, %v2930_v12  ;;  %v3011_v36 = vand.u32 4294901760, %v2990_v30  ;;  %v3025_v41 = vld [vmem:[%s4421_s1 + $0x40] sm:$0xff] }
   0x7   :  { %2355 = vmatpush3.msra.mxu0 %v2930_v12  ;;  %v4437_v37 = vand.u32 4294901760, %v2979_v27  ;;  %v4435_v38 = vand.u32 4294901760, %v2985_v29  ;;  %v3017_v39 = vsub.f32 %v53_v9, %v2932_v13  ;;  %v3020_v40 = vand.u32 4294901760, %v2995_v31  ;;  %v3065_v55 = vld [vmem:[%s4421_s1 + $0x38] sm:$0xff]  ;;  %v3075_v60 = vld [vmem:[%s4421_s1 + $0xb0] sm:$0xff]  ;;  %v3242_v11 = vld [vmem:[%s4421_s1 + $0x88] sm:$0xff] }
   0x8   :  { %2356 = vmatprep.subr.mxu0 %v2932_v13  ;;  %v345_v42 = vsub.f32 %v2957_v22, %v4439_v33  ;;  %v4434_v43 = vand.u32 4294901760, %v3008_v35  ;;  %v3033_v44 = vsub.f32 %v37_v10, %v2934_v14  ;;  %v3036_v45 = vand.u32 4294901760, %v3000_v32  ;;  %v3090_v1 = vld [vmem:[%s4421_s1 + $0x30] sm:$0xff]  ;;  %v3106_v10 = vld [vmem:[%s4421_s1 + $0xa8] sm:$0xff] }
   0x9   :  { %2357 = vmatpush3.msra.mxu0 %v2934_v14  ;;  %v233_v46 = vsub.f32 %v2979_v27, %v4437_v37  ;;  %v352_v47 = vsub.f32 %v2985_v29, %v4435_v38  ;;  %v4432_v48 = vand.u32 4294901760, %v3017_v39  ;;  %v3047_v49 = vsub.f32 %v52_v15, %v2949_v19  ;;  %v3199_v38 = vld [vmem:[%s4421_s1 + $0x18] sm:$0xff]  ;;  %v3215_v37 = vld [vmem:[%s4421_s1 + $0x90] sm:$0xff] }
   0xa   :  { %4574 = vst [vmem:[#allocation3_spill] sm:$0xff] %v3036_v45  ;;  %2358 = vmatprep.subr.mxu0 %v2949_v19  ;;  %v346_v51 = vand.u32 4294901760, %v345_v42  ;;  %v240_v52 = vsub.f32 %v3008_v35, %v4434_v43  ;;  %v4430_v53 = vand.u32 4294901760, %v3033_v44  ;;  %v3060_v54 = vand.u32 4294901760, %v3025_v41 }
   0xb   :  { %2359 = vmatpush3.msra.mxu0 %v2951_v20  ;;  %v234_v56 = vand.u32 4294901760, %v233_v46  ;;  %v353_v57 = vand.u32 4294901760, %v352_v47  ;;  %v359_v58 = vsub.f32 %v3017_v39, %v4432_v48  ;;  %v4428_v59 = vand.u32 4294901760, %v3047_v49  ;;  %v3120_v46 = vld [vmem:[%s4421_s1 + $0x28] sm:$0xff] }
   0xc   :  { %4575 = vst [vmem:[#allocation4_spill] sm:$0xff] %v3060_v54  ;;  %2360 = vmatprep.subr.mxu0 %v2954_v21  ;;  %2387 = vmatprep.subr.mxu1 %v346_v51  ;;  %v241_v61 = vand.u32 4294901760, %v240_v52  ;;  %v247_v62 = vsub.f32 %v3033_v44, %v4430_v53  ;;  %v3082_v63 = vsub.f32 %v36_v16, %v2951_v20  ;;  %v3085_v0 = vand.u32 4294901760, %v3052_v50 }
   0xd   :  { %2361 = vmatpush3.msra.mxu0 %v2976_v26  ;;  %2388 = vmatpush3.msra.mxu1 %v234_v56  ;;  %v360_v2 = vand.u32 4294901760, %v359_v58  ;;  %v366_v3 = vsub.f32 %v3047_v49, %v4428_v59  ;;  %v3098_v8 = vsub.f32 %v2945_v17, %v2954_v21  ;;  %v3101_v9 = vand.u32 4294901760, %v3065_v55 }
   0xe   :  { %4576 = vst [vmem:[#allocation5_spill] sm:$0xff] %v3085_v0  ;;  %2362 = vmatprep.subr.mxu0 %v2982_v28  ;;  %2389 = vmatprep.subr.mxu1 %v353_v57  ;;  %v248_v15 = vand.u32 4294901760, %v247_v62  ;;  %v4427_v16 = vand.u32 4294901760, %v3082_v63  ;;  %v3112_v42 = vsub.f32 %v2962_v23, %v2976_v26  ;;  %v3115_v17 = vand.u32 4294901760, %v3075_v60 }
   0xf   :  { %4577 = vst [vmem:[#allocation6_spill] sm:$0xff] %v3101_v9  ;;  %2363 = vmatpush3.msra.mxu0 %v3005_v34  ;;  %2390 = vmatpush3.msra.mxu1 %v241_v61  ;;  %v367_v47 = vand.u32 4294901760, %v366_v3  ;;  %v4429_v51 = vand.u32 4294901760, %v3098_v8  ;;  %v3126_v52 = vsub.f32 %v2967_v24, %v2982_v28  ;;  %v3129_v23 = vand.u32 4294901760, %v3090_v1  ;;  %v3146_v24 = vld [vmem:[%s4421_s1 + $0xa0] sm:$0xff] }
  0x10   :  { %4578 = vst [vmem:[#allocation7_spill] sm:$0xff] %v3115_v17  ;;  %2364 = vmatprep.subr.mxu0 %v3011_v36  ;;  %2391 = vmatprep.subr.mxu1 %v360_v2  ;;  %v254_v56 = vsub.f32 %v3082_v63, %v4427_v16  ;;  %v4431_v57 = vand.u32 4294901760, %v3112_v42  ;;  %v3138_v58 = vsub.f32 %v2972_v25, %v3005_v34  ;;  %v3141_v61 = vand.u32 4294901760, %v3106_v10 }
  0x11   :  { %4579 = vst [vmem:[#allocation8_spill] sm:$0xff] %v3129_v23  ;;  %2365 = vmatpush3.msra.mxu0 %v3020_v40  ;;  %2392 = vmatpush3.msra.mxu1 %v248_v15  ;;  %v373_v62 = vsub.f32 %v3098_v8, %v4429_v51  ;;  %v4433_v2 = vand.u32 4294901760, %v3126_v52  ;;  %v3155_v25 = vsub.f32 %v2990_v30, %v3011_v36  ;;  %v3158_v3 = vand.u32 4294901760, %v3120_v46  ;;  %v3172_v30 = vld [vmem:[%s4421_s1 + $0x20] sm:$0xff] }
  0x12   :  { %4580 = vst [vmem:[#allocation9_spill] sm:$0xff] %v3141_v61  ;;  %2366 = vmatprep.subr.mxu0 %v3036_v45  ;;  %2393 = vmatprep.subr.mxu1 %v367_v47  ;;  %v255_v16 = vand.u32 4294901760, %v254_v56  ;;  %v261_v15 = vsub.f32 %v3112_v42, %v4431_v57  ;;  %v4436_v59 = vand.u32 4294901760, %v3138_v58  ;;  %v3167_v51 = vsub.f32 %v2995_v31, %v3020_v40  ;;  %v3185_v31 = vld [vmem:[%s4421_s1 + $0x98] sm:$0xff] }
  0x13   :  { %4581 = vst [vmem:[#allocation10_spill] sm:$0xff] %v3158_v3  ;;  %2367 = vmatpush3.msra.mxu0 %v3060_v54  ;;  %v374_v53 = vand.u32 4294901760, %v373_v62  ;;  %v380_v47 = vsub.f32 %v3126_v52, %v4433_v2  ;;  %v4438_v56 = vand.u32 4294901760, %v3155_v25  ;;  %v3180_v57 = vand.u32 4294901760, %v3146_v24 }
  0x14   :  { %2394 = vmatpush3.msra.mxu1 %v255_v16  ;;  %2368 = vmatprep.subr.mxu0 %v3085_v0  ;;  %v262_v48 = vand.u32 4294901760, %v261_v15  ;;  %v268_v62 = vsub.f32 %v3138_v58, %v4436_v59  ;;  %v4440_v2 = vand.u32 4294901760, %v3167_v51  ;;  %v3194_v43 = vsub.f32 %v3000_v32, %v3036_v45 }
  0x15   :  { %4582 = vst [vmem:[#allocation11_spill] sm:$0xff] %v3180_v57  ;;  %2395 = vmatprep.subr.mxu1 %v374_v53  ;;  %2369 = vmatpush3.msra.mxu0 %v3101_v9  ;;  %v381_v16 = vand.u32 4294901760, %v380_v47  ;;  %v387_v15 = vsub.f32 %v3155_v25, %v4438_v56  ;;  %v3206_v59 = vand.u32 4294901760, %v3172_v30  ;;  %v3210_v32 = vsub.f32 %v3025_v41, %v3060_v54  ;;  %v3228_v41 = vld [vmem:[%s4421_s1 + $0x10] sm:$0xff] }
  0x16   :  { %2396 = vmatpush3.msra.mxu1 %v262_v48  ;;  %2370 = vmatprep.subr.mxu0 %v3115_v17  ;;  %v269_v53 = vand.u32 4294901760, %v268_v62  ;;  %v275_v47 = vsub.f32 %v3167_v51, %v4440_v2  ;;  %v4445_v56 = vand.u32 4294901760, %v3194_v43  ;;  %v3223_v33 = vand.u32 4294901760, %v3185_v31 }
  0x17   :  { %4583 = vst [vmem:[#allocation12_spill] sm:$0xff] %v3206_v59  ;;  %4584 = vst [vmem:[#allocation13_spill] sm:$0xff] %v3210_v32  ;;  %2397 = vmatprep.subr.mxu1 %v381_v16  ;;  %2371 = vmatpush3.msra.mxu0 %v3129_v23  ;;  %v388_v48 = vand.u32 4294901760, %v387_v15  ;;  %v3234_v18 = vsub.f32 %v3052_v50, %v3085_v0  ;;  %v3237_v2 = vand.u32 4294901760, %v3199_v38  ;;  %v3253_v62 = vand.u32 4294901760, %v3215_v37 }
  0x18   :  { %4585 = vst [vmem:[#allocation14_spill] sm:$0xff] %v3223_v33  ;;  %2398 = vmatpush3.msra.mxu1 %v269_v53  ;;  %2372 = vmatprep.subr.mxu0 %v3141_v61  ;;  %v276_v16 = vand.u32 4294901760, %v275_v47  ;;  %v394_v15 = vsub.f32 %v3194_v43, %v4445_v56  ;;  %v3250_v50 = vsub.f32 %v3065_v55, %v3101_v9  ;;  %v4590_v0 = vand.u32 4294901760, %v3210_v32  ;;  %v3270_v55 = vld [vmem:[%s4421_s1 + $0x8] sm:$0xff] }
  0x19   :  { %4586 = vst [vmem:[#allocation15_spill] sm:$0xff] %v3234_v18  ;;  %4587 = vst [vmem:[#allocation16_spill] sm:$0xff] %v3237_v2  ;;  %2399 = vmatprep.subr.mxu1 %v388_v48  ;;  %2373 = vmatpush3.msra.mxu0 %v3158_v3  ;;  %v3262_v54 = vsub.f32 %v3075_v60, %v3115_v17  ;;  %v3265_v56 = vand.u32 4294901760, %v3228_v41  ;;  %v3276_v47 = vsub.f32 %v3090_v1, %v3129_v23  ;;  %v3284_v17 = vld [vmem:[%s4421_s1 + $0x80] sm:$0xff] }
  0x1a   :  { %4588 = vst [vmem:[#allocation17_spill] sm:$0xff] %v3250_v50  ;;  %4589 = vst [vmem:[#allocation18_spill] sm:$0xff] %v3253_v62  ;;  %v282_v53 = vsub.f32 %v3210_v32, %v4590_v0  ;;  %2400 = vmatpush3.msra.mxu1 %v276_v16  ;;  %2374 = vmatprep.subr.mxu0 %v3180_v57  ;;  %v395_v48 = vand.u32 4294901760, %v394_v15  ;;  %v3279_v60 = vand.u32 4294901760, %v3242_v11  ;;  %v4594_v9 = vand.u32 4294901760, %v3234_v18 }
  0x1b   :  { %4591 = vst [vmem:[#allocation19_spill] sm:$0xff] %v3262_v54  ;;  %4592 = vst [vmem:[#allocation20_spill] sm:$0xff] %v3265_v56  ;;  %2375 = vmatpush3.msra.mxu0 %v3206_v59  ;;  %v4462_v0 = vand.u32 4294901760, %v3262_v54  ;;  %v3293_v1 = vsub.f32 %v3106_v10, %v3141_v61  ;;  %v4596_v23 = vand.u32 4294901760, %v3250_v50  ;;  %v3310_v10 = vld [vmem:[%s4421_s1] sm:$0xff]  ;;  %v3318_v61 = vand.u32 4294901760, %v3284_v17 }
  0x1c   :  { %4593 = vst [vmem:[#allocation21_spill] sm:$0xff] %v3279_v60  ;;  %v283_v16 = vand.u32 4294901760, %v282_v53  ;;  %v401_v15 = vsub.f32 %v3234_v18, %v4594_v9  ;;  %2401 = vmatprep.subr.mxu1 %v395_v48  ;;  %2376 = vmatprep.subr.mxu0 %v3223_v33  ;;  %v3301_v53 = vand.u32 4294901760, %v3270_v55  ;;  %v3305_v9 = vsub.f32 %v3120_v46, %v3158_v3  ;;  %v20_v46 = vld [vmem:[%s4422_s0] sm:$0xff] }
  0x1d   :  { %4595 = vst [vmem:[#allocation22_spill] sm:$0xff] %v3293_v1  ;;  %v289_v45 = vsub.f32 %v3250_v50, %v4596_v23  ;;  %2377 = vmatpush3.msra.mxu0 %v3237_v2  ;;  %v408_v23 = vsub.f32 %v3262_v54, %v4462_v0  ;;  %4598 = vst [vmem:[#allocation24_spill] sm:$0xff] %v3318_v61  ;;  %v3330_v0 = vsub.f32 %v3146_v24, %v3180_v57 }
  0x1e   :  { %4597 = vst [vmem:[#allocation23_spill] sm:$0xff] %v3301_v53  ;;  %2402 = vmatpush3.msra.mxu1 %v283_v16  ;;  %v402_v48 = vand.u32 4294901760, %v401_v15  ;;  %2378 = vmatprep.subr.mxu0 %v3253_v62  ;;  %v4599_v16 = vand.u32 4294901760, %v3276_v47  ;;  %v4600_v54 = vand.u32 4294901760, %v3293_v1  ;;  %v3337_v18 = vand.u32 4294901760, %v3310_v10 }
  0x1f   :  { %v290_v3 = vand.u32 4294901760, %v289_v45  ;;  %v409_v32 = vand.u32 4294901760, %v408_v23  ;;  %2379 = vmatpush3.msra.mxu0 %v3265_v56  ;;  %v4601_v24 = vand.u32 4294901760, %v3305_v9  ;;  %v4473_v23 = vand.u32 4294901760, %v3330_v0 }
  0x20   :  { %v296_v15 = vsub.f32 %v3276_v47, %v4599_v16  ;;  %2403 = vmatprep.subr.mxu1 %v402_v48  ;;  %v415_v45 = vsub.f32 %v3293_v1, %v4600_v54  ;;  %v3341_v16 = vsub.f32 %v3172_v30, %v3206_v59  ;;  %2380 = vmatprep.subr.mxu0 %v3279_v60  ;;  %vm21_vm0 = vcmp.ge.f32.partialorder %v20_v46, 0.0 }
  0x21   :  { %2404 = vmatpush3.msra.mxu1 %v290_v3  ;;  %v303_v48 = vsub.f32 %v3305_v9, %v4601_v24  ;;  %2381 = vmatpush3.msra.mxu0 %v3301_v53  ;;  %v22_v1 = vmul.f32 0.2, %v20_v46  ;;  %v4602_v30 = vlaneseq  ;;  %v3357_v24 = vsub.f32 %v3185_v31, %v3223_v33 }
  0x22   :  { %v297_v50 = vand.u32 4294901760, %v296_v15  ;;  %2405 = vmatprep.subr.mxu1 %v409_v32  ;;  %v416_v54 = vand.u32 4294901760, %v415_v45  ;;  %v4478_v57 = vand.u32 4294901760, %v3341_v16  ;;  %2382 = vmatprep.subr.mxu0 %v3318_v61  ;;  %v422_v15 = vsub.f32 %v3330_v0, %v4473_v23 }
  0x23   :  { %v101_v59 = vshrl.u32 %v4602_v30, 7  ;;  %v304_v3 = vand.u32 4294901760, %v303_v48  ;;  %v3361_v32 = vsub.f32 %v3199_v38, %v3237_v2  ;;  %2383 = vmatpush3.msra.mxu0 %v3337_v18  ;;  %v3368_v45 = vsel %vm21_vm0, %v20_v46, %v22_v1 }
  0x24   :  { %2406 = vmatpush3.msra.mxu1 %v297_v50  ;;  %v310_v50 = vsub.f32 %v3341_v16, %v4478_v57  ;;  %v4603_v48 = vunpack.c.0.s8 %v2913_v4  ;;  %v423_v31 = vand.u32 4294901760, %v422_v15  ;;  %v4476_v23 = vand.u32 4294901760, %v3357_v24  ;;  %2422 = vmatprep.subr.mxu0 %v2957_v22 }
  0x25   :  { %2407 = vmatprep.subr.mxu1 %v416_v54  ;;  %v4477_v38 = vand.u32 4294901760, %v3361_v32  ;;  %v3381_v1 = vsub.f32 %v3215_v37, %v3253_v62  ;;  %v3385_v4 = vsub.f32 %v3228_v41, %v3265_v56  ;;  %v3399_v37 = vsub.f32 %v3270_v55, %v3301_v53 }
  0x26   :  { %v3372_v30 = vsub.s32 %v4603_v48, %v101_v59  ;;  %2408 = vmatpush3.msra.mxu1 %v304_v3  ;;  %v311_v54 = vand.u32 4294901760, %v310_v50  ;;  %v429_v59 = vsub.f32 %v3357_v24, %v4476_v23  ;;  %v3395_v3 = vsub.f32 %v3242_v11, %v3279_v60 }
  0x27   :  { %2409 = vmatprep.subr.mxu1 %v423_v31  ;;  %v317_v46 = vsub.f32 %v3361_v32, %v4477_v38  ;;  %v4480_v50 = vand.u32 4294901760, %v3381_v1  ;;  %v4483_v48 = vand.u32 4294901760, %v3385_v4  ;;  %v4487_v57 = vand.u32 4294901760, %v3399_v37 }
  0x28   :  { %v103_v2 = vrot.slane %v3368_v45, %v3372_v30  ;;  %2410 = vmatpush3.msra.mxu1 %v311_v54  ;;  %v430_v31 = vand.u32 4294901760, %v429_v59  ;;  %v4484_v38 = vand.u32 4294901760, %v3395_v3 }
  0x29   :  { %v318_v23 = vand.u32 4294901760, %v317_v46  ;;  %v436_v55 = vsub.f32 %v3381_v1, %v4480_v50  ;;  %v324_v54 = vsub.f32 %v3385_v4, %v4483_v48  ;;  %v331_v46 = vsub.f32 %v3399_v37, %v4487_v57 }
  0x2a   :  { %v111_v41 = vcombine.high %v103_v2, %v103_v2  ;;  %v3401_v15 = vand.u32 4294901760, %v103_v2  ;;  %2411 = vmatprep.subr.mxu1 %v430_v31  ;;  %v443_v59 = vsub.f32 %v3395_v3, %v4484_v38  ;;  %v3430_v50 = vsub.f32 %v3310_v10, %v3337_v18 }
  0x2b   :  { %2412 = vmatpush3.msra.mxu1 %v318_v23  ;;  %v437_v48 = vand.u32 4294901760, %v436_v55  ;;  %v325_v38 = vand.u32 4294901760, %v324_v54  ;;  %v332_v57 = vand.u32 4294901760, %v331_v46 }
  0x2c   :  { %4604 = vst [vmem:[#allocation25_spill] sm:$0xff] %v3401_v15  ;;  %v3407_v11 = vand.u32 4294901760, %v111_v41  ;;  %v3410_v22 = vsub.f32 %v103_v2, %v3401_v15  ;;  %v3426_v2 = vsub.f32 %v3284_v17, %v3318_v61  ;;  %4606 = vst [vmem:[#allocation27_spill] sm:$0xff] %v3430_v50  ;;  %v444_v60 = vand.u32 4294901760, %v443_v59 }
  0x2d   :  { %v4493_v17 = vand.u32 4294901760, %v3430_v50  ;;  %2413 = vmatprep.subr.mxu1 %v437_v48  ;;  %v4610_v48 = vld [vmem:[#allocation4_spill] sm:$0xff] }
  0x2e   :  { %4605 = vst [vmem:[#allocation26_spill] sm:$0xff] %v3407_v11  ;;  %v3433_v53 = vsub.f32 %v111_v41, %v3407_v11  ;;  %v4492_v31 = vand.u32 4294901760, %v3410_v22  ;;  %454 = vmatprep.mubr.f32.mxu1 %v3407_v11  ;;  %v4494_v56 = vand.u32 4294901760, %v3426_v2  ;;  %2414 = vmatpush3.msra.mxu1 %v325_v38  ;;  %v4609_v38 = vld [vmem:[#allocation15_spill] sm:$0xff]  ;;  %v4623_v11 = vld [vmem:[#allocation16_spill] sm:$0xff] }
  0x2f   :  { %v338_v41 = vsub.f32 %v3430_v50, %v4493_v17  ;;  %2415 = vmatprep.subr.mxu1 %v444_v60  ;;  %v4608_v60 = vld [vmem:[#allocation3_spill] sm:$0xff]  ;;  %v4618_v17 = vld [vmem:[#allocation9_spill] sm:$0xff] }
  0x30   :  { %v4495_v61 = vand.u32 4294901760, %v3433_v53  ;;  %v222_v10 = vsub.f32 %v3410_v22, %v4492_v31  ;;  %v450_v23 = vsub.f32 %v3426_v2, %v4494_v56  ;;  %2416 = vmatpush3.msra.mxu1 %v332_v57  ;;  %v4607_v57 = vld [vmem:[#allocation13_spill] sm:$0xff]  ;;  %v4619_v56 = vld [vmem:[#allocation10_spill] sm:$0xff] }
  0x31   :  { %v339_v46 = vand.u32 4294901760, %v338_v41  ;;  %v4614_v41 = vld [vmem:[#allocation6_spill] sm:$0xff] }
  0x32   :  { %v216_v55 = vsub.f32 %v3433_v53, %v4495_v61  ;;  %v223_v54 = vand.u32 4294901760, %v222_v10  ;;  %v451_v59 = vand.u32 4294901760, %v450_v23  ;;  %v4612_v10 = vld [vmem:[#allocation5_spill] sm:$0xff]  ;;  %v4613_v23 = vld [vmem:[#allocation19_spill] sm:$0xff] }
  0x33   :  { %v4620_v61 = vld [vmem:[#allocation11_spill] sm:$0xff] }
  0x34   :  { %v217_v31 = vand.u32 4294901760, %v216_v55  ;;  %2417 = vmatprep.subr.mxu1 %v451_v59  ;;  %v4615_v55 = vld [vmem:[#allocation7_spill] sm:$0xff]  ;;  %v4617_v59 = vld [vmem:[#allocation8_spill] sm:$0xff] }
  0x35   :  { %2418 = vmatpush3.msra.mxu1 %v339_v46  ;;  %v96_v46 = vcombine.high %v3368_v45, %v3368_v45 }
  0x36   :  { %218 = vmatprep.mubr.f32.mxu0 %v217_v31  ;;  %456 = vmatmul.mubr.f32.vlgmr.msra.gmra.mxu1 %v3401_v15  ;;  %v4611_v31 = vld [vmem:[#allocation17_spill] sm:$0xff]  ;;  %v4621_v15 = vld [vmem:[#allocation12_spill] sm:$0xff] }
  0x37   :  { %224 = vmatmul.mubr.f32.vlgmr.msra.gmra.mxu0 %v223_v54  ;;  %2457 = vmatprep.subr.mxu1 %v2915_v5  ;;  %v4616_v54 = vld [vmem:[#allocation22_spill] sm:$0xff]  ;;  %v3506_v45 = vrot.slane %v96_v46, %v3372_v30  ;;  %v4625_v30 = vld [vmem:[#allocation21_spill] sm:$0xff]  ;;  %v4626_v46 = vld [vmem:[#allocation23_spill] sm:$0xff] }
  0x38   :  { %2423 = vmatpush3.msra.mxu0 %v2979_v27  ;;  %2458 = vmatpush3.msra.mxu1 %v2917_v6 }
  0x39   :  { %2424 = vmatprep.subr.mxu0 %v2985_v29  ;;  %2459 = vmatprep.subr.mxu1 %v2919_v7  ;;  %4622 = vst [vmem:[#allocation13_spill] sm:$0xff] %v3506_v45  ;;  %v4627_v45 = vld [vmem:[#allocation2_spill] sm:$0xff] }
  0x3a   :  { %2425 = vmatpush3.msra.mxu0 %v3008_v35  ;;  %2460 = vmatpush3.msra.mxu1 %v2930_v12 }
  0x3b   :  { %2426 = vmatprep.subr.mxu0 %v3017_v39  ;;  %2461 = vmatprep.subr.mxu1 %v2932_v13 }
  0x3c   :  { %2427 = vmatpush3.msra.mxu0 %v3033_v44  ;;  %2462 = vmatpush3.msra.mxu1 %v2934_v14 }
  0x3d   :  { %2428 = vmatprep.subr.mxu0 %v3047_v49  ;;  %2463 = vmatprep.subr.mxu1 %v2949_v19 }
  0x3e   :  { %2429 = vmatpush3.msra.mxu0 %v3082_v63  ;;  %2464 = vmatpush3.msra.mxu1 %v2951_v20 }
  0x3f   :  { %2430 = vmatprep.subr.mxu0 %v3098_v8  ;;  %2465 = vmatprep.subr.mxu1 %v2954_v21 }
  0x40   :  { %2431 = vmatpush3.msra.mxu0 %v3112_v42  ;;  %2466 = vmatpush3.msra.mxu1 %v2976_v26 }
  0x41   :  { %2432 = vmatprep.subr.mxu0 %v3126_v52  ;;  %2467 = vmatprep.subr.mxu1 %v2982_v28 }
  0x42   :  { %2433 = vmatpush3.msra.mxu0 %v3138_v58  ;;  %2468 = vmatpush3.msra.mxu1 %v3005_v34 }
  0x43   :  { %2434 = vmatprep.subr.mxu0 %v3155_v25  ;;  %2469 = vmatprep.subr.mxu1 %v3011_v36 }
  0x44   :  { %2435 = vmatpush3.msra.mxu0 %v3167_v51  ;;  %2470 = vmatpush3.msra.mxu1 %v3020_v40 }
  0x45   :  { %2436 = vmatprep.subr.mxu0 %v3194_v43  ;;  %2471 = vmatprep.subr.mxu1 %v4608_v60 }
  0x46   :  { %2437 = vmatpush3.msra.mxu0 %v4607_v57  ;;  %2472 = vmatpush3.msra.mxu1 %v4610_v48 }
  0x47   :  { %2438 = vmatprep.subr.mxu0 %v4609_v38  ;;  %2473 = vmatprep.subr.mxu1 %v4612_v10 }
  0x48   :  { %2439 = vmatpush3.msra.mxu0 %v4611_v31  ;;  %2474 = vmatpush3.msra.mxu1 %v4614_v41 }
  0x49   :  { %2440 = vmatprep.subr.mxu0 %v4613_v23  ;;  %2475 = vmatprep.subr.mxu1 %v4615_v55 }
  0x4a   :  { %2441 = vmatpush3.msra.mxu0 %v3276_v47  ;;  %2476 = vmatpush3.msra.mxu1 %v4617_v59 }
  0x4b   :  { %2442 = vmatprep.subr.mxu0 %v4616_v54  ;;  %2477 = vmatprep.subr.mxu1 %v4618_v17 }
  0x4c   :  { %2443 = vmatpush3.msra.mxu0 %v3305_v9  ;;  %2478 = vmatpush3.msra.mxu1 %v4619_v56 }
  0x4d   :  { %2444 = vmatprep.subr.mxu0 %v3330_v0  ;;  %2479 = vmatprep.subr.mxu1 %v4620_v61  ;;  %v4624_v61 = vld [vmem:[#allocation20_spill] sm:$0xff] }
  0x4e   :  { %2445 = vmatpush3.msra.mxu0 %v3341_v16  ;;  %591 = vmatprep.mubr.f32.mxu0 %v3433_v53 }
  0x4f   :  { %2446 = vmatprep.subr.mxu0 %v3357_v24  ;;  %2480 = vmatpush3.msra.mxu1 %v4621_v15 }
  0x50   :  { %2447 = vmatpush3.msra.mxu0 %v3361_v32  ;;  %2481 = vmatprep.subr.mxu1 %v3223_v33  ;;  %v4629_v33 = vand.u32 4294901760, %v2979_v27  ;;  %v4636_v27 = vand.u32 4294901760, %v3033_v44 }
  0x51   :  { %2448 = vmatprep.subr.mxu0 %v3381_v1  ;;  %2482 = vmatpush3.msra.mxu1 %v4623_v11  ;;  %v4628_v11 = vand.u32 4294901760, %v4627_v45  ;;  %v82_v45 = vld [vmem:[%s4421_s1 + $0x1d0] sm:$0xff] }
  0x52   :  { %2449 = vmatpush3.msra.mxu0 %v3385_v4  ;;  %2483 = vmatprep.subr.mxu1 %v3253_v62  ;;  %v4630_v62 = vld [vmem:[#allocation24_spill] sm:$0xff] }
  0x53   :  { %2450 = vmatprep.subr.mxu0 %v3395_v3  ;;  %2484 = vmatpush3.msra.mxu1 %v4624_v61  ;;  %v4631_v61 = vand.u32 4294901760, %v2985_v29  ;;  %v4637_v29 = vand.u32 4294901760, %v3047_v49 }
  0x54   :  { %2451 = vmatpush3.msra.mxu0 %v3399_v37  ;;  %2485 = vmatprep.subr.mxu1 %v4625_v30  ;;  %v4632_v30 = vand.u32 4294901760, %v3008_v35  ;;  %v4639_v35 = vand.u32 4294901760, %v3098_v8  ;;  %v85_v8 = vld [vmem:[%s4421_s1 + $0x1e8] sm:$0xff] }
  0x55   :  { %2452 = vmatprep.subr.mxu0 %v3426_v2  ;;  %2486 = vmatpush3.msra.mxu1 %v4626_v46  ;;  %v4633_v46 = vand.u32 4294901760, %v3433_v53  ;;  %v4653_v53 = vand.u32 4294901760, %v4616_v54 }
  0x56   :  { %2453 = vmatpush3.msra.mxu0 %v3430_v50  ;;  %2487 = vmatprep.subr.mxu1 %v4630_v62  ;;  %v4634_v50 = vand.u32 4294901760, %v3017_v39  ;;  %v87_v39 = vld [vmem:[%s4421_s1 + $0x1f8] sm:$0xff] }
  0x57   :  { %594 = vmatmul.mubr.f32.vlgmr.msra.gmra.mxu0 %v3410_v22  ;;  %2492 = vmatprep.subr.mxu0 %v4628_v11  ;;  %v4635_v11 = vand.u32 4294901760, %v3410_v22  ;;  %v4640_v22 = vand.u32 4294901760, %v3112_v42 }
  0x58   :  { %2493 = vmatpush3.msra.mxu0 %v4629_v33  ;;  %2488 = vmatpush3.msra.mxu1 %v3337_v18  ;;  %v4638_v33 = vand.u32 4294901760, %v3082_v63  ;;  %v69_v63 = vld [vmem:[%s4421_s1 + $0x168] sm:$0xff] }
  0x59   :  { %2494 = vmatprep.subr.mxu0 %v4631_v61  ;;  %698 = vmatprep.mubr.f32.mxu1 %v4633_v46  ;;  %v3614_v61 = vand.u32 4294901760, %v69_v63  ;;  %v4659_v46 = vand.u32 4294901760, %v3357_v24 }
  0x5a   :  { %2495 = vmatpush3.msra.mxu0 %v4632_v30  ;;  %702 = vmatmul.mubr.f32.vlgmr.msra.gmra.mxu1 %v4635_v11 }
  0x5b   :  { %2496 = vmatprep.subr.mxu0 %v4634_v50  ;;  %2527 = vmatprep.subr.mxu1 %v2915_v5  ;;  %v4641_v5 = vand.u32 4294901760, %v3126_v52  ;;  %4650 = vst [vmem:[#allocation3_spill] sm:$0xff] %v3614_v61 }
  0x5c   :  { %2497 = vmatpush3.msra.mxu0 %v4636_v27  ;;  %2528 = vmatpush3.msra.mxu1 %v2917_v6  ;;  %v71_v6 = vld [vmem:[%s4421_s1 + $0x178] sm:$0xff]  ;;  %v4661_v27 = vand.u32 4294901760, %v3361_v32  ;;  %v3693_v32 = vand.u32 4294901760, %v82_v45 }
  0x5d   :  { %2498 = vmatprep.subr.mxu0 %v4637_v29  ;;  %2529 = vmatprep.subr.mxu1 %v2919_v7  ;;  %v4642_v7 = vand.u32 4294901760, %v3138_v58  ;;  %v3573_v44 = vand.u32 4294901760, %v71_v6 }
  0x5e   :  { %2499 = vmatpush3.msra.mxu0 %v4638_v33  ;;  %2530 = vmatpush3.msra.mxu1 %v2930_v12  ;;  %v70_v12 = vld [vmem:[%s4421_s1 + $0x170] sm:$0xff]  ;;  %v65_v33 = vld [vmem:[%s4421_s1 + $0x148] sm:$0xff]  ;;  %4665 = vst [vmem:[#allocation7_spill] sm:$0xff] %v3693_v32 }
  0x5f   :  { %2500 = vmatprep.subr.mxu0 %v4639_v35  ;;  %2531 = vmatprep.subr.mxu1 %v2932_v13  ;;  %v4643_v13 = vand.u32 4294901760, %v3155_v25  ;;  %v3578_v49 = vand.u32 4294901760, %v70_v12  ;;  %v3601_v42 = vsub.f32 %v71_v6, %v3573_v44  ;;  %v3619_v25 = vand.u32 4294901760, %v85_v8 }
  0x60   :  { %2501 = vmatpush3.msra.mxu0 %v4640_v22  ;;  %2532 = vmatpush3.msra.mxu1 %v2934_v14  ;;  %v4644_v14 = vand.u32 4294901760, %v3167_v51  ;;  %v68_v51 = vld [vmem:[%s4421_s1 + $0x160] sm:$0xff]  ;;  %v4664_v35 = vand.u32 4294901760, %v3381_v1  ;;  %v4666_v1 = vand.u32 4294901760, %v3385_v4 }
  0x61   :  { %2502 = vmatprep.subr.mxu0 %v4641_v5  ;;  %2533 = vmatprep.subr.mxu1 %v2949_v19  ;;  %v4645_v19 = vand.u32 4294901760, %v3194_v43  ;;  %v4647_v43 = vand.u32 4294901760, %v4609_v38  ;;  %v3612_v58 = vsub.f32 %v70_v12, %v3578_v49  ;;  %4652 = vst [vmem:[#allocation15_spill] sm:$0xff] %v3619_v25  ;;  %v3627_v50 = vand.u32 4294901760, %v68_v51  ;;  %v81_v5 = vld [vmem:[%s4421_s1 + $0x1c8] sm:$0xff]  ;;  %v80_v4 = vld [vmem:[%s4421_s1 + $0x1c0] sm:$0xff] }
  0x62   :  { %2503 = vmatpush3.msra.mxu0 %v4642_v7  ;;  %2534 = vmatpush3.msra.mxu1 %v2951_v20  ;;  %v4646_v20 = vand.u32 4294901760, %v4607_v57  ;;  %v4509_v38 = vand.u32 4294901760, %v3601_v42  ;;  %v3664_v30 = vsub.f32 %v85_v8, %v3619_v25  ;;  %v4667_v7 = vld [vmem:[#allocation11_spill] sm:$0xff] }
  0x63   :  { %2504 = vmatprep.subr.mxu0 %v4643_v13  ;;  %2535 = vmatprep.subr.mxu1 %v2954_v21  ;;  %v86_v21 = vld [vmem:[%s4421_s1 + $0x1f0] sm:$0xff]  ;;  %4654 = vst [vmem:[#allocation4_spill] sm:$0xff] %v3627_v50  ;;  %v4507_v54 = vand.u32 4294901760, %v3612_v58  ;;  %v3670_v11 = vsub.f32 %v68_v51, %v3627_v50  ;;  %v4668_v13 = vand.u32 4294901760, %v3395_v3  ;;  %v3742_v51 = vand.u32 4294901760, %v81_v5 }
  0x64   :  { %2505 = vmatpush3.msra.mxu0 %v4644_v14  ;;  %2536 = vmatpush3.msra.mxu1 %v2976_v26  ;;  %v3592_v26 = vand.u32 4294901760, %v87_v39  ;;  %v3609_v52 = vand.u32 4294901760, %v86_v21  ;;  %v3683_v24 = vsub.f32 %v3601_v42, %v4509_v38  ;;  %v4669_v14 = vld [vmem:[#allocation26_spill] sm:$0xff]  ;;  %v61_v38 = vld [vmem:[%s4421_s1 + $0x128] sm:$0xff] }
  0x65   :  { %2506 = vmatprep.subr.mxu0 %v4645_v19  ;;  %2537 = vmatprep.subr.mxu1 %v2982_v28  ;;  %v4648_v28 = vand.u32 4294901760, %v4611_v31  ;;  %v3643_v31 = vsub.f32 %v69_v63, %v3614_v61  ;;  %v3699_v22 = vsub.f32 %v3612_v58, %v4507_v54  ;;  %v3720_v19 = vand.u32 4294901760, %v65_v33  ;;  %4672 = vst [vmem:[#allocation8_spill] sm:$0xff] %v3742_v51  ;;  %v4687_v54 = vld [vmem:[#allocation21_spill] sm:$0xff] }
  0x66   :  { %2507 = vmatpush3.msra.mxu0 %v4646_v20  ;;  %2538 = vmatpush3.msra.mxu1 %v3005_v34  ;;  %v4649_v34 = vand.u32 4294901760, %v4613_v23  ;;  %v3630_v57 = vsub.f32 %v87_v39, %v3592_v26  ;;  %v66_v23 = vld [vmem:[%s4421_s1 + $0x150] sm:$0xff]  ;;  %v64_v20 = vld [vmem:[%s4421_s1 + $0x140] sm:$0xff]  ;;  %v4504_v3 = vand.u32 4294901760, %v3670_v11  ;;  %v4671_v63 = vand.u32 4294901760, %v3399_v37 }
  0x67   :  { %2508 = vmatprep.subr.mxu0 %v4647_v43  ;;  %2539 = vmatprep.subr.mxu1 %v3011_v36  ;;  %v4651_v36 = vand.u32 4294901760, %v3276_v47  ;;  %v4655_v47 = vand.u32 4294901760, %v3305_v9  ;;  %v67_v9 = vld [vmem:[%s4421_s1 + $0x158] sm:$0xff]  ;;  %v4505_v6 = vand.u32 4294901760, %v3643_v31  ;;  %4670 = vst [vmem:[#allocation22_spill] sm:$0xff] %v3720_v19 }
  0x68   :  { %2509 = vmatpush3.msra.mxu0 %v4648_v28  ;;  %2540 = vmatpush3.msra.mxu1 %v3020_v40  ;;  %v84_v40 = vld [vmem:[%s4421_s1 + $0x1e0] sm:$0xff]  ;;  %v3678_v29 = vand.u32 4294901760, %v67_v9 }
  0x69   :  { %2510 = vmatprep.subr.mxu0 %v4649_v34  ;;  %2541 = vmatprep.subr.mxu1 %v4608_v60  ;;  %v83_v60 = vld [vmem:[%s4421_s1 + $0x1d8] sm:$0xff]  ;;  %v4673_v34 = vand.u32 4294901760, %v3426_v2  ;;  %v3762_v2 = vsub.f32 %v82_v45, %v3693_v32 }
  0x6a   :  { %2511 = vmatpush3.msra.mxu0 %v4651_v36  ;;  %2542 = vmatpush3.msra.mxu1 %v4610_v48  ;;  %v4656_v48 = vand.u32 4294901760, %v3330_v0  ;;  %v4657_v0 = vand.u32 4294901760, %v3341_v16  ;;  %v3672_v16 = vand.u32 4294901760, %v83_v60  ;;  %4662 = vst [vmem:[#allocation19_spill] sm:$0xff] %v3678_v29  ;;  %v3736_v43 = vsub.f32 %v67_v9, %v3678_v29  ;;  %v4674_v36 = vld [vmem:[#allocation14_spill] sm:$0xff]  ;;  %v79_v45 = vld [vmem:[%s4421_s1 + $0x1b8] sm:$0xff] }
  0x6b   :  { %2512 = vmatprep.subr.mxu0 %v4653_v53  ;;  %2543 = vmatprep.subr.mxu1 %v4612_v10  ;;  %v3649_v10 = vsub.f32 %v86_v21, %v3609_v52  ;;  %v3756_v53 = vsub.f32 %v3643_v31, %v4505_v6  ;;  %v3813_v6 = vand.u32 4294901760, %v79_v45 }
  0x6c   :  { %2513 = vmatpush3.msra.mxu0 %v4655_v47  ;;  %2544 = vmatpush3.msra.mxu1 %v4614_v41  ;;  %v3658_v41 = vand.u32 4294901760, %v84_v40  ;;  %4660 = vst [vmem:[#allocation5_spill] sm:$0xff] %v3672_v16  ;;  %v3730_v21 = vsub.f32 %v83_v60, %v3672_v16  ;;  %v4675_v47 = vld [vmem:[#allocation27_spill] sm:$0xff] }
  0x6d   :  { %2514 = vmatprep.subr.mxu0 %v4656_v48  ;;  %2545 = vmatprep.subr.mxu1 %v4615_v55  ;;  %v4510_v55 = vand.u32 4294901760, %v3630_v57  ;;  %v4676_v60 = vand.u32 4294901760, %v4675_v47  ;;  %v4677_v48 = vld [vmem:[#allocation16_spill] sm:$0xff]  ;;  %4686 = vst [vmem:[#allocation11_spill] sm:$0xff] %v3813_v6  ;;  %v3882_v8 = vsub.f32 %v79_v45, %v3813_v6 }
  0x6e   :  { %2515 = vmatpush3.msra.mxu0 %v4657_v0  ;;  %4658 = vst [vmem:[#allocation17_spill] sm:$0xff] %v3658_v41  ;;  %2546 = vmatpush3.msra.mxu1 %v4617_v59  ;;  %v3685_v59 = vand.u32 4294901760, %v66_v23  ;;  %v3710_v12 = vsub.f32 %v84_v40, %v3658_v41  ;;  %v63_v40 = vld [vmem:[%s4421_s1 + $0x138] sm:$0xff] }
  0x6f   :  { %2516 = vmatprep.subr.mxu0 %v4659_v46  ;;  %2547 = vmatprep.subr.mxu1 %v4618_v17  ;;  %v4508_v17 = vand.u32 4294901760, %v3649_v10  ;;  %v3718_v39 = vsub.f32 %v3630_v57, %v4510_v55  ;;  %v3775_v46 = vand.u32 4294901760, %v64_v20  ;;  %v4690_v55 = vld [vmem:[#allocation23_spill] sm:$0xff] }
  0x70   :  { %2517 = vmatpush3.msra.mxu0 %v4661_v27  ;;  %4663 = vst [vmem:[#allocation6_spill] sm:$0xff] %v3685_v59  ;;  %2548 = vmatpush3.msra.mxu1 %v4619_v56  ;;  %v4506_v56 = vand.u32 4294901760, %v3664_v30  ;;  %v3740_v28 = vsub.f32 %v66_v23, %v3685_v59  ;;  %v3772_v23 = vand.u32 4294901760, %v80_v4  ;;  %v4511_v0 = vand.u32 4294901760, %v3710_v12  ;;  %v4680_v27 = vld [vmem:[#allocation25_spill] sm:$0xff] }
  0x71   :  { %2518 = vmatprep.subr.mxu0 %v4664_v35  ;;  %2549 = vmatprep.subr.mxu1 %v4667_v7  ;;  %v3750_v37 = vsub.f32 %v3649_v10, %v4508_v17  ;;  %4679 = vst [vmem:[#allocation10_spill] sm:$0xff] %v3775_v46  ;;  %v1208_v35 = vand.u32 4294901760, %v3718_v39  ;;  %v3789_v7 = vsub.f32 %v3670_v11, %v4504_v3  ;;  %v3803_v39 = vld [vmem:[%s4421_s1 + $0x1b0] sm:$0xff]  ;;  %v60_v17 = vld [vmem:[%s4421_s1 + $0x120] sm:$0xff] }
  0x72   :  { %2519 = vmatpush3.msra.mxu0 %v4666_v1  ;;  %868 = vmatprep.mubr.f32.mxu0 %v4669_v14  ;;  %v3770_v9 = vsub.f32 %v3664_v30, %v4506_v56  ;;  %4678 = vst [vmem:[#allocation9_spill] sm:$0xff] %v3772_v23  ;;  %v3784_v1 = vsub.f32 %v65_v33, %v3720_v19  ;;  %v4514_v33 = vand.u32 4294901760, %v3736_v43  ;;  %v4513_v47 = vand.u32 4294901760, %v3740_v28 }
  0x73   :  { %2520 = vmatprep.subr.mxu0 %v4668_v13  ;;  %2550 = vmatpush3.msra.mxu1 %v4621_v15  ;;  %v4512_v13 = vand.u32 4294901760, %v3730_v21  ;;  %v4515_v56 = vand.u32 4294901760, %v3762_v2  ;;  %v3844_v3 = vsub.f32 %v80_v4, %v3772_v23  ;;  %v3890_v15 = vand.u32 4294901760, %v60_v17 }
  0x74   :  { %2521 = vmatpush3.msra.mxu0 %v4671_v63  ;;  %2551 = vmatprep.subr.mxu1 %v4674_v36  ;;  %4681 = vst [vmem:[#allocation12_spill] sm:$0xff] %v3784_v1  ;;  %v62_v63 = vld [vmem:[%s4421_s1 + $0x130] sm:$0xff]  ;;  %v3797_v36 = vand.u32 4294901760, %v63_v40  ;;  %v3862_v4 = vsub.f32 %v3740_v28, %v4513_v47  ;;  %v4699_v47 = vand.u32 4294901760, %v3784_v1 }
  0x75   :  { %2522 = vmatprep.subr.mxu0 %v4673_v34  ;;  %2552 = vmatpush3.msra.mxu1 %v4677_v48  ;;  %v4682_v34 = vld [vmem:[#allocation18_spill] sm:$0xff]  ;;  %v4685_v48 = vld [vmem:[#allocation20_spill] sm:$0xff] }
  0x76   :  { %2523 = vmatpush3.msra.mxu0 %v4676_v60  ;;  %2553 = vmatprep.subr.mxu1 %v4682_v34  ;;  %4683 = vst [vmem:[#allocation2_spill] sm:$0xff] %v3797_v36  ;;  %v3807_v60 = vsub.f32 %v81_v5, %v3742_v51  ;;  %v1215_v34 = vand.u32 4294901760, %v3750_v37  ;;  %v3822_v5 = vsub.f32 %v3710_v12, %v4511_v0  ;;  %v3827_v37 = vand.u32 4294901760, %v62_v63 }
  0x77   :  { %870 = vmatmul.mubr.f32.vlgmr.msra.gmra.mxu0 %v4680_v27  ;;  %2562 = vmatprep.subr.mxu0 %v3592_v26  ;;  %v3838_v0 = vsub.f32 %v3730_v21, %v4512_v13  ;;  %v3857_v13 = vsub.f32 %v3736_v43, %v4514_v33  ;;  %v76_v33 = vld [vmem:[%s4421_s1 + $0x1a0] sm:$0xff]  ;;  %4694 = vst [vmem:[#allocation18_spill] sm:$0xff] %v3890_v15 }
  0x78   :  { %2563 = vmatpush3.msra.mxu0 %v3573_v44  ;;  %4684 = vst [vmem:[#allocation24_spill] sm:$0xff] %v3807_v60  ;;  %2554 = vmatpush3.msra.mxu1 %v4685_v48  ;;  %v3825_v48 = vsub.f32 %v64_v20, %v3775_v46  ;;  %4689 = vst [vmem:[#allocation14_spill] sm:$0xff] %v3827_v37  ;;  %v3841_v20 = vand.u32 4294901760, %v3803_v39 }
  0x79   :  { %2564 = vmatprep.subr.mxu0 %v3609_v52  ;;  %2555 = vmatprep.subr.mxu1 %v4687_v54  ;;  %v77_v54 = vld [vmem:[%s4421_s1 + $0x1a8] sm:$0xff]  ;;  %v1236_v45 = vand.u32 4294901760, %v3838_v0  ;;  %v4697_v0 = vand.u32 4294901760, %v3807_v60 }
  0x7a   :  { %2565 = vmatpush3.msra.mxu0 %v3578_v49  ;;  %4688 = vst [vmem:[#allocation26_spill] sm:$0xff] %v3825_v48  ;;  %2556 = vmatpush3.msra.mxu1 %v4690_v55  ;;  %4691 = vst [vmem:[#allocation27_spill] sm:$0xff] %v3841_v20  ;;  %v3852_v55 = vsub.f32 %v63_v40, %v3797_v36  ;;  %v3875_v40 = vand.u32 4294901760, %v61_v38 }
  0x7b   :  { %2566 = vmatprep.subr.mxu0 %v3619_v25  ;;  %2557 = vmatprep.subr.mxu1 %v4630_v62  ;;  %v3873_v62 = vsub.f32 %v3762_v2, %v4515_v56  ;;  %v3888_v56 = vsub.f32 %v62_v63, %v3827_v37  ;;  %v4696_v63 = vld [vmem:[#allocation13_spill] sm:$0xff]  ;;  %v4698_v25 = vand.u32 4294901760, %v3683_v24 }
  0x7c   :  { %2567 = vmatpush3.msra.mxu0 %v3614_v61  ;;  %2558 = vmatpush3.msra.mxu1 %v3337_v18  ;;  %4692 = vst [vmem:[#allocation16_spill] sm:$0xff] %v3875_v40  ;;  %v1229_v18 = vand.u32 4294901760, %v3822_v5  ;;  %v59_v5 = vld [vmem:[%s4421_s1 + $0x118] sm:$0xff]  ;;  %v58_v61 = vld [vmem:[%s4421_s1 + $0x110] sm:$0xff] }
  0x7d   :  { %2568 = vmatprep.subr.mxu0 %v3658_v41  ;;  %972 = vmatprep.mubr.f32.mxu1 %v4669_v14  ;;  %4693 = vst [vmem:[#allocation25_spill] sm:$0xff] %v3888_v56  ;;  %v3896_v41 = vand.u32 4294901760, %v77_v54  ;;  %v3912_v14 = vand.u32 4294901760, %v76_v33 }
  0x7e   :  { %2569 = vmatpush3.msra.mxu0 %v3627_v50  ;;  %974 = vmatmul.mubr.f32.vlgmr.msra.gmra.mxu1 %v4680_v27  ;;  %v112_v50 = vcombine.high %v4696_v63, %v4696_v63  ;;  %v1124_v27 = vand.u32 4294901760, %v3857_v13  ;;  %v3922_v13 = vsub.f32 %v61_v38, %v3875_v40  ;;  %v4700_v38 = vand.u32 4294901760, %v3825_v48 }
  0x7f   :  { %2570 = vmatprep.subr.mxu0 %v3672_v16  ;;  %4695 = vst [vmem:[#allocation20_spill] sm:$0xff] %v3896_v41  ;;  %2597 = vmatprep.subr.mxu1 %v1208_v35  ;;  %v3910_v16 = vsub.f32 %v3807_v60, %v4697_v0  ;;  %v1243_v35 = vand.u32 4294901760, %v3873_v62  ;;  %v3927_v0 = vsub.f32 %v3784_v1, %v4699_v47  ;;  %v3942_v62 = vand.u32 4294901760, %v59_v5  ;;  %v74_v47 = vld [vmem:[%s4421_s1 + $0x190] sm:$0xff] }
  0x80   :  { %2571 = vmatpush3.msra.mxu0 %v3678_v29  ;;  %2598 = vmatpush3.msra.mxu1 %v4698_v25  ;;  %v75_v29 = vld [vmem:[%s4421_s1 + $0x198] sm:$0xff]  ;;  %v3935_v25 = vsub.f32 %v60_v17, %v3890_v15  ;;  %v3940_v24 = vsub.f32 %v3825_v48, %v4700_v38  ;;  %v3949_v60 = vsub.f32 %v3803_v39, %v3841_v20  ;;  %v4703_v17 = vand.u32 4294901760, %v3844_v3 }
  0x81   :  { %2572 = vmatprep.subr.mxu0 %v3693_v32  ;;  %2599 = vmatprep.subr.mxu1 %v1215_v34  ;;  %4701 = vst [vmem:[#allocation21_spill] sm:$0xff] %v3942_v62  ;;  %v4702_v34 = vand.u32 4294901760, %v3699_v22  ;;  %v3960_v32 = vand.u32 4294901760, %v58_v61  ;;  %v3962_v48 = vand.u32 4294901760, %v112_v50  ;;  %v4705_v1 = vand.u32 4294901760, %v3770_v9 }
  0x82   :  { %2573 = vmatpush3.msra.mxu0 %v3685_v59  ;;  %v3957_v38 = vsub.f32 %v3844_v3, %v4703_v17  ;;  %v1250_v22 = vand.u32 4294901760, %v3910_v16  ;;  %v3968_v39 = vand.u32 4294901760, %v75_v29  ;;  %v3974_v17 = vand.u32 4294901760, %v4696_v63 }
  0x83   :  { %2600 = vmatpush3.msra.mxu1 %v4702_v34  ;;  %2574 = vmatprep.subr.mxu0 %v3742_v51  ;;  %4704 = vst [vmem:[#allocation23_spill] sm:$0xff] %v3962_v48  ;;  %v3971_v34 = vsub.f32 %v77_v54, %v3896_v41  ;;  %v4708_v59 = vand.u32 4294901760, %v3756_v53  ;;  %v1138_v9 = vand.u32 4294901760, %v3927_v0  ;;  %v3985_v16 = vand.u32 4294901760, %v74_v47  ;;  %v73_v51 = vld [vmem:[%s4421_s1 + $0x188] sm:$0xff] }
  0x84   :  { %2601 = vmatprep.subr.mxu1 %v4705_v1  ;;  %2575 = vmatpush3.msra.mxu0 %v3720_v19  ;;  %4706 = vst [vmem:[#allocation13_spill] sm:$0xff] %v3968_v39  ;;  %4707 = vst [vmem:[#allocation28_spill] sm:$0xff] %v3974_v17  ;;  %v4709_v1 = vand.u32 4294901760, %v3882_v8  ;;  %v3994_v53 = vsub.f32 %v59_v5, %v3942_v62  ;;  %v4001_v54 = vsub.f32 %v76_v33, %v3912_v14 }
  0x85   :  { %2602 = vmatpush3.msra.mxu1 %v4708_v59  ;;  %2576 = vmatprep.subr.mxu0 %v3772_v23  ;;  %4710 = vst [vmem:[#allocation29_spill] sm:$0xff] %v3985_v16  ;;  %v1145_v59 = vand.u32 4294901760, %v3940_v24  ;;  %v4711_v23 = vand.u32 4294901760, %v3789_v7  ;;  %v4712_v24 = vand.u32 4294901760, %v3852_v55  ;;  %v4011_v0 = vsub.f32 %v58_v61, %v3960_v32 }
  0x86   :  { %v3983_v19 = vsub.f32 %v3882_v8, %v4709_v1  ;;  %2603 = vmatprep.subr.mxu1 %v1229_v18  ;;  %2577 = vmatpush3.msra.mxu0 %v3775_v46  ;;  %v57_v1 = vld [vmem:[%s4421_s1 + $0x108] sm:$0xff]  ;;  %v1257_v18 = vand.u32 4294901760, %v3957_v38  ;;  %v72_v46 = vld [vmem:[%s4421_s1 + $0x180] sm:$0xff]  ;;  %v4017_v33 = vsub.f32 %v112_v50, %v3962_v48  ;;  %v4028_v61 = vsub.f32 %v4696_v63, %v3974_v17 }
  0x87   :  { %2604 = vmatpush3.msra.mxu1 %v4711_v23  ;;  %2578 = vmatprep.subr.mxu0 %v3813_v6  ;;  %v1151_v5 = vsub.f32 %v3852_v55, %v4712_v24  ;;  %v4020_v23 = vand.u32 4294901760, %v73_v51  ;;  %v56_v38 = vld [vmem:[%s4421_s1 + $0x100] sm:$0xff]  ;;  %v4031_v24 = vsub.f32 %v75_v29, %v3968_v39  ;;  %v4714_v63 = vand.u32 4294901760, %v3949_v60 }
  0x88   :  { %2605 = vmatprep.subr.mxu1 %v1236_v45  ;;  %2579 = vmatpush3.msra.mxu0 %v3797_v36  ;;  %v1264_v50 = vand.u32 4294901760, %v3983_v19  ;;  %v4713_v45 = vand.u32 4294901760, %v3888_v56  ;;  %v4038_v36 = vand.u32 4294901760, %v57_v1  ;;  %v4049_v19 = vsub.f32 %v74_v47, %v3985_v16 }
  0x89   :  { %2606 = vmatpush3.msra.mxu1 %v1124_v27  ;;  %2580 = vmatprep.subr.mxu0 %v3841_v20  ;;  %v1270_v29 = vsub.f32 %v3949_v60, %v4714_v63  ;;  %v4045_v27 = vand.u32 4294901760, %v72_v46  ;;  %v1152_v6 = vand.u32 4294901760, %v1151_v5  ;;  %v4716_v63 = vand.u32 4294901760, %v3971_v34 }
  0x8a   :  { %v1158_v7 = vsub.f32 %v3888_v56, %v4713_v45  ;;  %2607 = vmatprep.subr.mxu1 %v1243_v35  ;;  %2581 = vmatpush3.msra.mxu0 %v3827_v37  ;;  %v4715_v45 = vand.u32 4294901760, %v3862_v4  ;;  %v4054_v35 = vand.u32 4294901760, %v56_v38  ;;  %v4069_v56 = vsub.f32 %v57_v1, %v4038_v36 }
  0x8b   :  { %2582 = vmatprep.subr.mxu0 %v3896_v41  ;;  %v1277_v47 = vsub.f32 %v3971_v34, %v4716_v63  ;;  %v1271_v4 = vand.u32 4294901760, %v1270_v29  ;;  %v4723_v29 = vand.u32 4294901760, %v3935_v25  ;;  %1316 = vmatprep.mubr.f32.mxu1 %v3962_v48  ;;  %v4752_v48 = vld [vmem:[#allocation13_spill] sm:$0xff] }
  0x8c   :  { %2608 = vmatpush3.msra.mxu1 %v4715_v45  ;;  %2583 = vmatpush3.msra.mxu0 %v3875_v40  ;;  %v4065_v45 = vsub.f32 %v73_v51, %v4020_v23  ;;  %v1159_v5 = vand.u32 4294901760, %v1158_v7  ;;  %4717 = vst [vmem:[#allocation30_spill] sm:$0xff] %v4069_v56  ;;  %v4719_v51 = vand.u32 4294901760, %v4001_v54  ;;  %v4081_v7 = vsub.f32 %v72_v46, %v4045_v27 }
  0x8d   :  { %2609 = vmatprep.subr.mxu1 %v1250_v22  ;;  %2584 = vmatprep.subr.mxu0 %v3912_v14  ;;  %v4718_v22 = vand.u32 4294901760, %v3922_v13  ;;  %v4085_v1 = vsub.f32 %v56_v38, %v4054_v35  ;;  %v1172_v63 = vsub.f32 %v3935_v25, %v4723_v29  ;;  %v1278_v46 = vand.u32 4294901760, %v1277_v47 }
  0x8e   :  { %2610 = vmatpush3.msra.mxu1 %v1138_v9  ;;  %2585 = vmatpush3.msra.mxu0 %v3890_v15  ;;  %v1284_v9 = vsub.f32 %v4001_v54, %v4719_v51  ;;  %4720 = vst [vmem:[#allocation31_spill] sm:$0xff] %v4081_v7  ;;  %v4725_v38 = vand.u32 4294901760, %v4031_v24  ;;  %v4726_v51 = vand.u32 4294901760, %v3994_v53 }
  0x8f   :  { %v1165_v37 = vsub.f32 %v3922_v13, %v4718_v22  ;;  %2611 = vmatprep.subr.mxu1 %v1257_v18  ;;  %2586 = vmatprep.subr.mxu0 %v3968_v39  ;;  %4721 = vst [vmem:[#allocation32_spill] sm:$0xff] %v4085_v1  ;;  %v4722_v18 = vand.u32 4294901760, %v4017_v33 }
  0x90   :  { %2612 = vmatpush3.msra.mxu1 %v1145_v59  ;;  %2587 = vmatpush3.msra.mxu0 %v3942_v62  ;;  %v4724_v59 = vand.u32 4294901760, %v4028_v61  ;;  %v1291_v39 = vsub.f32 %v4031_v24, %v4725_v38  ;;  %v4727_v62 = vand.u32 4294901760, %v4049_v19 }
  0x91   :  { %v1078_v22 = vsub.f32 %v4017_v33, %v4722_v18  ;;  %2613 = vmatprep.subr.mxu1 %v1264_v50  ;;  %2588 = vmatprep.subr.mxu0 %v3985_v16  ;;  %v1166_v29 = vand.u32 4294901760, %v1165_v37  ;;  %v1179_v50 = vsub.f32 %v3994_v53, %v4726_v51  ;;  %v1173_v37 = vand.u32 4294901760, %v1172_v63 }
  0x92   :  { %v1084_v20 = vsub.f32 %v4028_v61, %v4724_v59  ;;  %2614 = vmatpush3.msra.mxu1 %v1152_v6  ;;  %2589 = vmatpush3.msra.mxu0 %v3960_v32  ;;  %v1285_v59 = vand.u32 4294901760, %v1284_v9  ;;  %v1298_v38 = vsub.f32 %v4049_v19, %v4727_v62  ;;  %v4728_v16 = vand.u32 4294901760, %v4011_v0 }
  0x93   :  { %2615 = vmatprep.subr.mxu1 %v1271_v4  ;;  %2590 = vmatprep.subr.mxu0 %v4020_v23  ;;  %v1079_v6 = vand.u32 4294901760, %v1078_v22  ;;  %v4562_v4 = vand.u32 4294901760, %v4085_v1  ;;  %v1292_v47 = vand.u32 4294901760, %v1291_v39  ;;  %v4729_v62 = vand.u32 4294901760, %v4065_v45 }
  0x94   :  { %2616 = vmatpush3.msra.mxu1 %v1159_v5  ;;  %v1186_v51 = vsub.f32 %v4011_v0, %v4728_v16  ;;  %2591 = vmatpush3.msra.mxu0 %v4038_v36  ;;  %v1085_v9 = vand.u32 4294901760, %v1084_v20  ;;  %v1180_v5 = vand.u32 4294901760, %v1179_v50  ;;  %v4730_v63 = vand.u32 4294901760, %v4069_v56 }
  0x95   :  { %2617 = vmatprep.subr.mxu1 %v1278_v46  ;;  %v1305_v18 = vsub.f32 %v4065_v45, %v4729_v62  ;;  %2592 = vmatprep.subr.mxu0 %v4045_v27  ;;  %v1299_v16 = vand.u32 4294901760, %v1298_v38  ;;  %v4731_v46 = vand.u32 4294901760, %v4081_v7  ;;  %v4737_v62 = vld [vmem:[#allocation26_spill] sm:$0xff] }
  0x96   :  { %2618 = vmatpush3.msra.mxu1 %v1166_v29  ;;  %v1193_v22 = vsub.f32 %v4069_v56, %v4730_v63  ;;  %2593 = vmatpush3.msra.mxu0 %v4054_v35  ;;  %v1187_v39 = vand.u32 4294901760, %v1186_v51  ;;  %v1200_v29 = vsub.f32 %v4085_v1, %v4562_v4  ;;  %v4735_v51 = vld [vmem:[#allocation3_spill] sm:$0xff]  ;;  %v4739_v63 = vld [vmem:[#allocation5_spill] sm:$0xff] }
  0x97   :  { %2619 = vmatprep.subr.mxu1 %v1285_v59  ;;  %v1312_v20 = vsub.f32 %v4081_v7, %v4731_v46  ;;  %1080 = vmatprep.mubr.f32.mxu0 %v1079_v6  ;;  %v1306_v50 = vand.u32 4294901760, %v1305_v18  ;;  %v4732_v18 = vld [vmem:[#allocation24_spill] sm:$0xff]  ;;  %v4742_v46 = vld [vmem:[#allocation25_spill] sm:$0xff]  ;;  %v4750_v4 = vld [vmem:[#allocation27_spill] sm:$0xff] }
  0x98   :  { %2620 = vmatpush3.msra.mxu1 %v1173_v37  ;;  %1086 = vmatmul.mubr.f32.vlgmr.msra.gmra.mxu0 %v1085_v9  ;;  %v1194_v59 = vand.u32 4294901760, %v1193_v22  ;;  %v1201_v6 = vand.u32 4294901760, %v1200_v29  ;;  %v4734_v37 = vld [vmem:[#allocation12_spill] sm:$0xff]  ;;  %v4736_v9 = vld [vmem:[#allocation17_spill] sm:$0xff]  ;;  %v4740_v22 = vld [vmem:[#allocation19_spill] sm:$0xff] }
  0x99   :  { %2621 = vmatprep.subr.mxu1 %v1292_v47  ;;  %2632 = vmatprep.subr.mxu0 %v3630_v57  ;;  %v1313_v38 = vand.u32 4294901760, %v1312_v20  ;;  %v4733_v47 = vld [vmem:[#allocation15_spill] sm:$0xff]  ;;  %v4743_v20 = vld [vmem:[#allocation6_spill] sm:$0xff] }
  0x9a   :  { %2622 = vmatpush3.msra.mxu1 %v1180_v5  ;;  %2633 = vmatpush3.msra.mxu0 %v3601_v42  ;;  %v4738_v5 = vld [vmem:[#allocation4_spill] sm:$0xff]  ;;  %v4745_v29 = vld [vmem:[#allocation22_spill] sm:$0xff] }
  0x9b   :  { %2623 = vmatprep.subr.mxu1 %v1299_v16  ;;  %2634 = vmatprep.subr.mxu0 %v3649_v10  ;;  %v4741_v16 = vld [vmem:[#allocation7_spill] sm:$0xff] }
  0x9c   :  { %2624 = vmatpush3.msra.mxu1 %v1187_v39  ;;  %2635 = vmatpush3.msra.mxu0 %v3612_v58  ;;  %v4744_v39 = vld [vmem:[#allocation8_spill] sm:$0xff] }
  0x9d   :  { %2625 = vmatprep.subr.mxu1 %v1306_v50  ;;  %2636 = vmatprep.subr.mxu0 %v3664_v30  ;;  %v4746_v50 = vld [vmem:[#allocation9_spill] sm:$0xff] }
  0x9e   :  { %2626 = vmatpush3.msra.mxu1 %v1194_v59  ;;  %2637 = vmatpush3.msra.mxu0 %v3643_v31  ;;  %v4747_v59 = vld [vmem:[#allocation10_spill] sm:$0xff] }
  0x9f   :  { %2627 = vmatprep.subr.mxu1 %v1313_v38  ;;  %2638 = vmatprep.subr.mxu0 %v3710_v12  ;;  %v4748_v38 = vld [vmem:[#allocation11_spill] sm:$0xff] }
  0xa0   :  { %2628 = vmatpush3.msra.mxu1 %v1201_v6  ;;  %2639 = vmatpush3.msra.mxu0 %v3670_v11  ;;  %v4749_v6 = vld [vmem:[#allocation2_spill] sm:$0xff] }
  0xa1   :  { %1318 = vmatmul.mubr.f32.vlgmr.msra.gmra.mxu1 %v3974_v17  ;;  %2640 = vmatprep.subr.mxu0 %v3730_v21  ;;  %v4751_v17 = vld [vmem:[#allocation14_spill] sm:$0xff] }
  0xa2   :  { %2667 = vmatprep.subr.mxu1 %v3592_v26  ;;  %2641 = vmatpush3.msra.mxu0 %v3736_v43 }
  0xa3   :  { %2668 = vmatpush3.msra.mxu1 %v3573_v44  ;;  %2642 = vmatprep.subr.mxu0 %v3762_v2 }
  0xa4   :  { %2669 = vmatprep.subr.mxu1 %v3609_v52  ;;  %2643 = vmatpush3.msra.mxu0 %v3740_v28 }
  0xa5   :  { %2670 = vmatpush3.msra.mxu1 %v3578_v49  ;;  %2644 = vmatprep.subr.mxu0 %v4732_v18 }
  0xa6   :  { %2671 = vmatprep.subr.mxu1 %v4733_v47  ;;  %2645 = vmatpush3.msra.mxu0 %v4734_v37 }
  0xa7   :  { %2672 = vmatpush3.msra.mxu1 %v4735_v51  ;;  %2646 = vmatprep.subr.mxu0 %v3844_v3 }
  0xa8   :  { %2673 = vmatprep.subr.mxu1 %v4736_v9  ;;  %2647 = vmatpush3.msra.mxu0 %v4737_v62 }
  0xa9   :  { %2674 = vmatpush3.msra.mxu1 %v4738_v5  ;;  %2648 = vmatprep.subr.mxu0 %v3882_v8 }
  0xaa   :  { %2675 = vmatprep.subr.mxu1 %v4739_v63  ;;  %2649 = vmatpush3.msra.mxu0 %v3852_v55 }
  0xab   :  { %2676 = vmatpush3.msra.mxu1 %v4740_v22  ;;  %2650 = vmatprep.subr.mxu0 %v3949_v60 }
  0xac   :  { %2677 = vmatprep.subr.mxu1 %v4741_v16  ;;  %2651 = vmatpush3.msra.mxu0 %v4742_v46 }
  0xad   :  { %2678 = vmatpush3.msra.mxu1 %v4743_v20  ;;  %2652 = vmatprep.subr.mxu0 %v3971_v34 }
  0xae   :  { %2679 = vmatprep.subr.mxu1 %v4744_v39  ;;  %2653 = vmatpush3.msra.mxu0 %v3922_v13 }
  0xaf   :  { %2680 = vmatpush3.msra.mxu1 %v4745_v29  ;;  %2654 = vmatprep.subr.mxu0 %v4001_v54 }
  0xb0   :  { %2681 = vmatprep.subr.mxu1 %v4746_v50  ;;  %2655 = vmatpush3.msra.mxu0 %v3935_v25 }
  0xb1   :  { %2682 = vmatpush3.msra.mxu1 %v4747_v59  ;;  %2656 = vmatprep.subr.mxu0 %v4031_v24 }
  0xb2   :  { %2683 = vmatprep.subr.mxu1 %v4748_v38  ;;  %2657 = vmatpush3.msra.mxu0 %v3994_v53 }
  0xb3   :  { %2684 = vmatpush3.msra.mxu1 %v4749_v6  ;;  %2658 = vmatprep.subr.mxu0 %v4049_v19 }
  0xb4   :  { %2685 = vmatprep.subr.mxu1 %v4750_v4  ;;  %2659 = vmatpush3.msra.mxu0 %v4011_v0 }
  0xb5   :  { %2686 = vmatpush3.msra.mxu1 %v4751_v17  ;;  %2660 = vmatprep.subr.mxu0 %v4065_v45 }
  0xb6   :  { %2687 = vmatprep.subr.mxu1 %v3896_v41  ;;  %2661 = vmatpush3.msra.mxu0 %v4069_v56  ;;  %v4753_v41 = vand.u32 4294901760, %v3630_v57  ;;  %v4754_v56 = vld [vmem:[#allocation21_spill] sm:$0xff]  ;;  %v4759_v57 = vand.u32 4294901760, %v3664_v30  ;;  %v4764_v30 = vand.u32 4294901760, %v4028_v61 }
  0xb7   :  { %2688 = vmatpush3.msra.mxu1 %v3875_v40  ;;  %2662 = vmatprep.subr.mxu0 %v4081_v7  ;;  %v4755_v40 = vand.u32 4294901760, %v3601_v42  ;;  %v4756_v7 = vld [vmem:[#allocation29_spill] sm:$0xff]  ;;  %v4760_v42 = vand.u32 4294901760, %v3643_v31  ;;  %v4766_v31 = vand.u32 4294901760, %v3736_v43  ;;  %v4774_v43 = vand.u32 4294901760, %v3852_v55 }
  0xb8   :  { %2689 = vmatprep.subr.mxu1 %v3912_v14  ;;  %2663 = vmatpush3.msra.mxu0 %v4085_v1  ;;  %v4757_v1 = vand.u32 4294901760, %v3649_v10  ;;  %v4761_v10 = vand.u32 4294901760, %v3710_v12  ;;  %v4767_v12 = vand.u32 4294901760, %v3762_v2  ;;  %v4778_v2 = vand.u32 4294901760, %v3922_v13 }
  0xb9   :  { %1453 = vmatprep.mubr.f32.mxu0 %v4017_v33  ;;  %2690 = vmatpush3.msra.mxu1 %v3890_v15  ;;  %v4758_v15 = vand.u32 4294901760, %v3612_v58  ;;  %v4762_v58 = vand.u32 4294901760, %v4017_v33  ;;  %v4780_v55 = vand.u32 4294901760, %v3935_v25  ;;  %v4782_v13 = vand.u32 4294901760, %v3994_v53  ;;  %v4786_v33 = vld [vmem:[#allocation20_spill] sm:$0xff] }
  0xba   :  { %1456 = vmatmul.mubr.f32.vlgmr.msra.gmra.mxu0 %v4028_v61  ;;  %2691 = vmatprep.subr.mxu1 %v4752_v48  ;;  %v4784_v25 = vand.u32 4294901760, %v4011_v0  ;;  %v4787_v61 = vld [vmem:[#allocation30_spill] sm:$0xff] }
  0xbb   :  { %2702 = vmatprep.subr.mxu0 %v4753_v41  ;;  %2692 = vmatpush3.msra.mxu1 %v4754_v56  ;;  %v4763_v41 = vand.u32 4294901760, %v3670_v11  ;;  %v4768_v11 = vand.u32 4294901760, %v3740_v28  ;;  %v4776_v28 = vand.u32 4294901760, %v4742_v46  ;;  %v4788_v53 = vand.u32 4294901760, %v4787_v61 }
  0xbc   :  { %2703 = vmatpush3.msra.mxu0 %v4755_v40  ;;  %2693 = vmatprep.subr.mxu1 %v4756_v7  ;;  %v4781_v40 = vand.u32 4294901760, %v4031_v24  ;;  %v4789_v24 = vld [vmem:[#allocation16_spill] sm:$0xff] }
  0xbd   :  { %2704 = vmatprep.subr.mxu0 %v4757_v1  ;;  %2694 = vmatpush3.msra.mxu1 %v3960_v32  ;;  %v4790_v1 = vld [vmem:[#allocation31_spill] sm:$0xff] }
  0xbe   :  { %2705 = vmatpush3.msra.mxu0 %v4758_v15  ;;  %2695 = vmatprep.subr.mxu1 %v4020_v23  ;;  %v4765_v15 = vand.u32 4294901760, %v3730_v21  ;;  %v4769_v21 = vand.u32 4294901760, %v4732_v18  ;;  %v4794_v18 = vld [vmem:[#allocation23_spill] sm:$0xff] }
  0xbf   :  { %2706 = vmatprep.subr.mxu0 %v4759_v57  ;;  %2696 = vmatpush3.msra.mxu1 %v4038_v36 }
  0xc0   :  { %2707 = vmatpush3.msra.mxu0 %v4760_v42  ;;  %2697 = vmatprep.subr.mxu1 %v4045_v27 }
  0xc1   :  { %2708 = vmatprep.subr.mxu0 %v4761_v10  ;;  %2698 = vmatpush3.msra.mxu1 %v4054_v35 }
  0xc2   :  { %1560 = vmatprep.mubr.f32.mxu1 %v4762_v58  ;;  %2709 = vmatpush3.msra.mxu0 %v4763_v41 }
  0xc3   :  { %1564 = vmatmul.mubr.f32.vlgmr.msra.gmra.mxu1 %v4764_v30  ;;  %2710 = vmatprep.subr.mxu0 %v4765_v15 }
  0xc4   :  { %2737 = vmatprep.subr.mxu1 %v3592_v26  ;;  %2711 = vmatpush3.msra.mxu0 %v4766_v31  ;;  %v4770_v26 = vand.u32 4294901760, %v4734_v37 }
  0xc5   :  { %2738 = vmatpush3.msra.mxu1 %v3573_v44  ;;  %2712 = vmatprep.subr.mxu0 %v4767_v12  ;;  %v4771_v44 = vand.u32 4294901760, %v3844_v3  ;;  %v4775_v3 = vand.u32 4294901760, %v3949_v60  ;;  %v4779_v60 = vand.u32 4294901760, %v4001_v54  ;;  %v4785_v54 = vand.u32 4294901760, %v4065_v45  ;;  %v4796_v45 = vld [vmem:[#allocation28_spill] sm:$0xff] }
  0xc6   :  { %2739 = vmatprep.subr.mxu1 %v3609_v52  ;;  %2713 = vmatpush3.msra.mxu0 %v4768_v11  ;;  %v4772_v52 = vand.u32 4294901760, %v4737_v62  ;;  %v2350_v11 = vld [vmem:[%s4424_s2] ss:$0 sm:$0xff] }
  0xc7   :  { %2740 = vmatpush3.msra.mxu1 %v3578_v49  ;;  %2714 = vmatprep.subr.mxu0 %v4769_v21  ;;  %v4773_v49 = vand.u32 4294901760, %v3882_v8  ;;  %v4777_v8 = vand.u32 4294901760, %v3971_v34  ;;  %v4783_v34 = vand.u32 4294901760, %v4049_v19  ;;  %v4791_v19 = vand.u32 4294901760, %v4790_v1 }
  0xc8   :  { %2741 = vmatprep.subr.mxu1 %v4733_v47  ;;  %2715 = vmatpush3.msra.mxu0 %v4770_v26  ;;  %v1844_v47 = vld [vmem:[%s4423_s3] sm:$0xff] }
  0xc9   :  { %2742 = vmatpush3.msra.mxu1 %v4735_v51  ;;  %2716 = vmatprep.subr.mxu0 %v4771_v44  ;;  %v4336_v62 = vand.u32 4294901760, %v1844_v47 }
  0xca   :  { %2743 = vmatprep.subr.mxu1 %v4736_v9  ;;  %2717 = vmatpush3.msra.mxu0 %v4772_v52 }
  0xcb   :  { %2744 = vmatpush3.msra.mxu1 %v4738_v5  ;;  %2718 = vmatprep.subr.mxu0 %v4773_v49  ;;  %v4344_v46 = vsub.f32 %v1844_v47, %v4336_v62 }
  0xcc   :  { %2745 = vmatprep.subr.mxu1 %v4739_v63  ;;  %2719 = vmatpush3.msra.mxu0 %v4774_v43 }
  0xcd   :  { %2746 = vmatpush3.msra.mxu1 %v4740_v22  ;;  %2720 = vmatprep.subr.mxu0 %v4775_v3 }
  0xce   :  { %2747 = vmatprep.subr.mxu1 %v4741_v16  ;;  %2721 = vmatpush3.msra.mxu0 %v4776_v28  ;;  %v2872_v16 = vmov 0.0  }
  0xcf   :  { %2748 = vmatpush3.msra.mxu1 %v4743_v20  ;;  %2722 = vmatprep.subr.mxu0 %v4777_v8 }
  0xd0   :  { %2749 = vmatprep.subr.mxu1 %v4744_v39  ;;  %2723 = vmatpush3.msra.mxu0 %v4778_v2 }
  0xd1   :  { %2750 = vmatpush3.msra.mxu1 %v4745_v29  ;;  %2724 = vmatprep.subr.mxu0 %v4779_v60  ;;  %v1986_v29 = vand.u32 4294901760, %v4344_v46 }
  0xd2   :  { %2751 = vmatprep.subr.mxu1 %v4746_v50  ;;  %2725 = vmatpush3.msra.mxu0 %v4780_v55 }
  0xd3   :  { %2752 = vmatpush3.msra.mxu1 %v4747_v59  ;;  %2726 = vmatprep.subr.mxu0 %v4781_v40  ;;  %v1987_v59 = vsub.f32 %v4344_v46, %v1986_v29 }
  0xd4   :  { %2753 = vmatprep.subr.mxu1 %v4748_v38  ;;  %2727 = vmatpush3.msra.mxu0 %v4782_v13 }
  0xd5   :  { %2754 = vmatpush3.msra.mxu1 %v4749_v6  ;;  %2728 = vmatprep.subr.mxu0 %v4783_v34  ;;  %v1988_v38 = vand.u32 4294901760, %v1987_v59 }
  0xd6   :  { %2755 = vmatprep.subr.mxu1 %v4750_v4  ;;  %2729 = vmatpush3.msra.mxu0 %v4784_v25  ;;  %v4792_v4 = vld [vmem:[#allocation32_spill] sm:$0xff] }
  0xd7   :  { %2756 = vmatpush3.msra.mxu1 %v4751_v17  ;;  %2730 = vmatprep.subr.mxu0 %v4785_v54  ;;  %v4793_v0 = vand.u32 4294901760, %v4792_v4  ;;  %v4795_v17 = vld [vmem:[#allocation18_spill] sm:$0xff] }
  0xd8   :  { %2757 = vmatprep.subr.mxu1 %v4786_v33  ;;  %2731 = vmatpush3.msra.mxu0 %v4788_v53 }
  0xd9   :  { %2758 = vmatpush3.msra.mxu1 %v4789_v24  ;;  %2732 = vmatprep.subr.mxu0 %v4791_v19 }
  0xda   :  { %2759 = vmatprep.subr.mxu1 %v3912_v14  ;;  %2733 = vmatpush3.msra.mxu0 %v4793_v0 }
  0xdb   :  { %1730 = vmatprep.mubr.f32.mxu0 %v4794_v18  ;;  %2760 = vmatpush3.msra.mxu1 %v4795_v17 }
  0xdc   :  { %1732 = vmatmul.mubr.f32.vlgmr.msra.gmra.mxu0 %v4796_v45  ;;  %2761 = vmatprep.subr.mxu1 %v4752_v48 }
  0xdd   :  { %2762 = vmatpush3.msra.mxu1 %v4754_v56  ;;  %1834 = vmatprep.mubr.f32.mxu1 %v4794_v18  ;;  %v1847_v56 = vld [vmem:[%s4423_s3 + $0x18] sm:$0xff] }
  0xde   :  { %2763 = vmatprep.subr.mxu1 %v4756_v7  ;;  %v4307_v48 = vand.u32 4294901760, %v1847_v56  ;;  %2802 = vmatprep.subr.mxu0 %v2872_v16 }
  0xdf   :  { %2764 = vmatpush3.msra.mxu1 %v3960_v32  ;;  %v1846_v32 = vld [vmem:[%s4423_s3 + $0x10] sm:$0xff]  ;;  %2810 = vmatprep.mubr.msk.f32.mxu0 %vm2873_vm1, %v2872_v16 }
  0xe0   :  { %2765 = vmatprep.subr.mxu1 %v4020_v23  ;;  %v4313_v14 = vsub.f32 %v1847_v56, %v4307_v48  ;;  %v1845_v23 = vld [vmem:[%s4423_s3 + $0x8] sm:$0xff]  ;;  %2803 = vmatpush3.msra.mxu0 %v4307_v48 }
  0xe1   :  { %2766 = vmatpush3.msra.mxu1 %v4038_v36  ;;  %v4315_v36 = vand.u32 4294901760, %v1846_v32  ;;  %v4324_v7 = vand.u32 4294901760, %v1845_v23  ;;  %2804 = vmatprep.subr.mxu0 %v2872_v16 }
  0xe2   :  { %2767 = vmatprep.subr.mxu1 %v4045_v27  ;;  %v1965_v27 = vand.u32 4294901760, %v4313_v14 }
  0xe3   :  { %2768 = vmatpush3.msra.mxu1 %v4054_v35  ;;  %v4322_v35 = vsub.f32 %v1846_v32, %v4315_v36  ;;  %v4334_v9 = vsub.f32 %v1845_v23, %v4324_v7  ;;  %2805 = vmatpush3.msra.mxu0 %v4315_v36 }
  0xe4   :  { %1836 = vmatmul.mubr.f32.vlgmr.msra.gmra.mxu1 %v4796_v45  ;;  %v1966_v37 = vsub.f32 %v4313_v14, %v1965_v27  ;;  %2813 = vmatprep.subr.mxu1 %v2872_v16 }
  0xe5   :  { %v1972_v51 = vand.u32 4294901760, %v4322_v35  ;;  %v1979_v22 = vand.u32 4294901760, %v4334_v9  ;;  %2806 = vmatprep.subr.mxu0 %v2872_v16  ;;  %2821 = vmatprep.mubr.msk.f32.mxu1 %vm2873_vm1, %v2872_v16 }
  0xe6   :  { %v1967_v5 = vand.u32 4294901760, %v1966_v37  ;;  %2807 = vmatpush3.msra.mxu0 %v4324_v7 }
  0xe7   :  { %v1973_v63 = vsub.f32 %v4322_v35, %v1972_v51  ;;  %v1980_v39 = vsub.f32 %v4334_v9, %v1979_v22  ;;  %2808 = vmatprep.subr.mxu0 %v2872_v16 }
  0xe8   :  { %2814 = vmatpush3.msra.mxu1 %v1967_v5  ;;  %2809 = vmatpush3.msra.mxu0 %v4336_v62 }
  0xe9   :  { %v1974_v20 = vand.u32 4294901760, %v1973_v63  ;;  %2815 = vmatprep.subr.mxu1 %v2872_v16  ;;  %v1981_v50 = vand.u32 4294901760, %v1980_v39  ;;  %2824 = vmatprep.subr.mxu0 %v2872_v16 }
  0xeb   :  { %2816 = vmatpush3.msra.mxu1 %v1974_v20 }
  0xec   :  { %2817 = vmatprep.subr.mxu1 %v2872_v16 }
  0xed   :  { %2818 = vmatpush3.msra.mxu1 %v1981_v50 }
  0xee   :  { %2819 = vmatprep.subr.mxu1 %v2872_v16 }
  0xef   :  { %2820 = vmatpush3.msra.mxu1 %v1988_v38 }
  0xf0   :  { %2835 = vmatprep.subr.mxu1 %v2872_v16 }
  0xf6   :  { %v2419_v42 = vpop.f32.mrf.mxu1 }
  0xf7   :  { %v2384_v6 = vpop.f32.mrf.mxu0 }
  0xf8   :  { %v2420_v58 = vpop.f32.mrf.mxu1 }
  0xf9   :  { %v2385_v57 = vpop.f32.mrf.mxu0  ;;  %v2421_v49 = vadd.f32 %v2420_v58, %v2419_v42 }
  0xfa   :  { %v2386_v12 = vadd.f32 %v2385_v57, %v2384_v6 }
  0xfc   :  { %v226_v52 = vadd.f32 %v2386_v12, %v2350_v11 }
  0xfe   :  { %v458_v2 = vadd.f32 %v2421_v49, %v226_v52 }
 0x117   :  { %v2454_v10 = vpop.f32.mrf.mxu0 }
 0x119   :  { %v2455_v41 = vpop.f32.mrf.mxu0 }
 0x11a   :  { %v2489_v30 = vpop.f32.mrf.mxu1  ;;  %v2456_v3 = vadd.f32 %v2455_v41, %v2454_v10 }
 0x11c   :  { %v2490_v31 = vpop.f32.mrf.mxu1  ;;  %v596_v40 = vadd.f32 %v2456_v3, %v458_v2 }
 0x11d   :  { %v2491_v60 = vadd.f32 %v2490_v31, %v2489_v30 }
 0x11f   :  { %v704_v25 = vadd.f32 %v2491_v60, %v596_v40 }
 0x137   :  { %v2524_v15 = vpop.f32.mrf.mxu0 }
 0x139   :  { %v2525_v21 = vpop.f32.mrf.mxu0 }
 0x13a   :  { %v2526_v13 = vadd.f32 %v2525_v21, %v2524_v15 }
 0x13c   :  { %v872_v53 = vadd.f32 %v2526_v13, %v704_v25 }
 0x13e   :  { %v2559_v26 = vpop.f32.mrf.mxu1 }
 0x140   :  { %v2560_v43 = vpop.f32.mrf.mxu1 }
 0x141   :  { %v2561_v54 = vadd.f32 %v2560_v43, %v2559_v26 }
 0x143   :  { %v976_v19 = vadd.f32 %v2561_v54, %v872_v53 }
 0x158   :  { %v2594_v44 = vpop.f32.mrf.mxu0 }
 0x15a   :  { %v2595_v28 = vpop.f32.mrf.mxu0 }
 0x15b   :  { %v2596_v24 = vadd.f32 %v2595_v28, %v2594_v44 }
 0x15d   :  { %v1088_v18 = vadd.f32 %v2596_v24, %v976_v19 }
 0x161   :  { %v2629_v8 = vpop.f32.mrf.mxu1 }
 0x163   :  { %v2630_v34 = vpop.f32.mrf.mxu1 }
 0x164   :  { %v2631_v4 = vadd.f32 %v2630_v34, %v2629_v8 }
 0x166   :  { %v1320_v56 = vadd.f32 %v2631_v4, %v1088_v18 }
 0x17a   :  { %v2664_v55 = vpop.f32.mrf.mxu0 }
 0x17c   :  { %v2665_v33 = vpop.f32.mrf.mxu0 }
 0x17d   :  { %v2666_v17 = vadd.f32 %v2665_v33, %v2664_v55 }
 0x17f   :  { %v1458_v23 = vadd.f32 %v2666_v17, %v1320_v56 }
 0x183   :  { %v2699_v61 = vpop.f32.mrf.mxu1 }
 0x185   :  { %v2700_v0 = vpop.f32.mrf.mxu1 }
 0x186   :  { %v2701_v32 = vadd.f32 %v2700_v0, %v2699_v61 }
 0x188   :  { %v1566_v5 = vadd.f32 %v2701_v32, %v1458_v23 }
 0x19c   :  { %v2734_v1 = vpop.f32.mrf.mxu0 }
 0x19e   :  { %v2735_v45 = vpop.f32.mrf.mxu0 }
 0x19f   :  { %v2736_v47 = vadd.f32 %v2735_v45, %v2734_v1 }
 0x1a1   :  { %v1734_v20 = vadd.f32 %v2736_v47, %v1566_v5 }
 0x1a4   :  { %v2769_v37 = vpop.f32.mrf.mxu1 }
 0x1a6   :  { %v2770_v63 = vpop.f32.mrf.mxu1 }
 0x1a7   :  { %v2771_v39 = vadd.f32 %v2770_v63, %v2769_v37 }
 0x1a9   :  { %v1838_v50 = vadd.f32 %v2771_v39, %v1734_v20 }
 0x1ab   :  { %vm1841_vm2 = vcmp.ge.f32.partialorder %v1838_v50, 0.0  ;;  %v1842_v59 = vmul.f32 0.2, %v1838_v50 }
 0x1ad   :  { %v1843_v38 = vsel %vm1841_vm2, %v1838_v50, %v1842_v59 }
 0x1ae   :  { %v1857_v6 = vsel %vm1855_vm3, %v1843_v38, 0 }
 0x1af   :  { %v1928_v57 = vand.u32 4294901760, %v1857_v6 }
 0x1b1   :  { %2822 = vmatmul.mubr.f32.vlgmr.msra.gmra.mxu1 %v1928_v57  ;;  %v1929_v42 = vsub.f32 %v1857_v6, %v1928_v57 }
 0x1b2   :  { %2836 = vmatpush3.msra.mxu1 %v4307_v48  ;;  %2843 = vmatprep.mubr.msk.f32.mxu1 %vm2873_vm1, %v2872_v16 }
 0x1b3   :  { %2837 = vmatprep.subr.mxu1 %v2872_v16  ;;  %v1930_v10 = vand.u32 4294901760, %v1929_v42 }
 0x1b4   :  { %2838 = vmatpush3.msra.mxu1 %v4315_v36 }
 0x1b5   :  { %2839 = vmatprep.subr.mxu1 %v2872_v16  ;;  %v1931_v58 = vsub.f32 %v1929_v42, %v1930_v10 }
 0x1b6   :  { %2840 = vmatpush3.msra.mxu1 %v4324_v7 }
 0x1b7   :  { %2841 = vmatprep.subr.mxu1 %v2872_v16  ;;  %v1932_v41 = vand.u32 4294901760, %v1931_v58 }
 0x1b8   :  { %2842 = vmatpush3.msra.mxu1 %v4336_v62 }
 0x1b9   :  { %2844 = vmatmul.mubr.f32.vlgmr.msra.gmra.mxu1 %v1930_v10  ;;  %2857 = vmatprep.subr.mxu1 %v2872_v16 }
 0x1ba   :  { %2811 = vmatmul.mubr.f32.vlgmr.msra.gmra.mxu0 %v1932_v41  ;;  %2858 = vmatpush3.msra.mxu1 %v4307_v48 }
 0x1bb   :  { %2825 = vmatpush3.msra.mxu0 %v4313_v14  ;;  %2859 = vmatprep.subr.mxu1 %v2872_v16 }
 0x1bc   :  { %2826 = vmatprep.subr.mxu0 %v2872_v16  ;;  %2860 = vmatpush3.msra.mxu1 %v4315_v36 }
 0x1bd   :  { %2827 = vmatpush3.msra.mxu0 %v4322_v35  ;;  %2861 = vmatprep.subr.mxu1 %v2872_v16  ;;  %v2351_v35 = vld [vmem:[%s4425_s4] ss:$0 sm:$0xff] }
 0x1be   :  { %2828 = vmatprep.subr.mxu0 %v2872_v16  ;;  %2862 = vmatpush3.msra.mxu1 %v4324_v7 }
 0x1bf   :  { %2829 = vmatpush3.msra.mxu0 %v4334_v9  ;;  %2863 = vmatprep.subr.mxu1 %v2872_v16 }
 0x1c0   :  { %2830 = vmatprep.subr.mxu0 %v2872_v16  ;;  %2832 = vmatprep.mubr.msk.f32.mxu0 %vm2873_vm1, %v2872_v16 }
 0x1c1   :  { %2831 = vmatpush3.msra.mxu0 %v4344_v46  ;;  %2864 = vmatpush3.msra.mxu1 %v4336_v62 }
 0x1c2   :  { %2865 = vmatprep.mubr.msk.f32.mxu1 %vm2873_vm1, %v2872_v16  ;;  %2833 = vmatmul.mubr.f32.vlgmr.msra.gmra.mxu0 %v1929_v42 }
 0x1c3   :  { %2846 = vmatprep.subr.mxu0 %v2872_v16  ;;  %2866 = vmatmul.mubr.f32.vlgmr.msra.gmra.mxu1 %v1928_v57 }
 0x1c4   :  { %2847 = vmatpush3.msra.mxu0 %v1965_v27  ;;  %2854 = vmatprep.mubr.msk.f32.mxu0 %vm2873_vm1, %v2872_v16 }
 0x1c5   :  { %2848 = vmatprep.subr.mxu0 %v2872_v16 }
 0x1c6   :  { %2849 = vmatpush3.msra.mxu0 %v1972_v51 }
 0x1c7   :  { %2850 = vmatprep.subr.mxu0 %v2872_v16 }
 0x1c8   :  { %2851 = vmatpush3.msra.mxu0 %v1979_v22 }
 0x1c9   :  { %2852 = vmatprep.subr.mxu0 %v2872_v16 }
 0x1ca   :  { %2853 = vmatpush3.msra.mxu0 %v1986_v29 }
 0x1cb   :  { %2855 = vmatmul.mubr.f32.vlgmr.msra.gmra.mxu0 %v1928_v57 }
 0x271   :  { %v2025_v48 = vpop.f32.mrf.mxu1 }
 0x273   :  { %v2823_v14 = vpop.f32.mrf.mxu1 }
 0x279   :  { %v2182_v36 = vpop.f32.mrf.mxu1 }
 0x27a   :  { %v1934_v27 = vpop.f32.mrf.mxu0 }
 0x27b   :  { %v2845_v7 = vpop.f32.mrf.mxu1  ;;  %v1935_v51 = vadd.f32 %v2351_v35, %v1934_v27 }
 0x27c   :  { %v2812_v62 = vpop.f32.mrf.mxu0 }
 0x27d   :  { %v2026_v22 = vadd.f32 %v2025_v48, %v1935_v51 }
 0x282   :  { %v2105_v30 = vpop.f32.mrf.mxu0 }
 0x283   :  { %v2340_v9 = vpop.f32.mrf.mxu1  ;;  %v2106_v31 = vadd.f32 %v2105_v30, %v2026_v22 }
 0x284   :  { %v2834_v15 = vpop.f32.mrf.mxu0 }
 0x285   :  { %v2867_v16 = vpop.f32.mrf.mxu1  ;;  %v2183_v46 = vadd.f32 %v2182_v36, %v2106_v31 }
 0x28b   :  { %v2265_v29 = vpop.f32.mrf.mxu0 }
 0x28c   :  { %v2266_v12 = vadd.f32 %v2265_v29, %v2183_v46 }
 0x28d   :  { %v2856_v11 = vpop.f32.mrf.mxu0 }
 0x28e   :  { %v2341_v21 = vadd.f32 %v2340_v9, %v2266_v12 }
 0x290   :  { %2345 = vst.msk [vmem:[%s4426_s5] sm:$0x3] %vm2344_vm4, %v2341_v21 }

</bundles_post_ra>
